<compile_context>
chip_gen: v5e
topology: v5e:2x2
jax: 0.10.0
libtpu: 0.0.40
codegen_flags: <defaults>
</compile_context>

<pallas_src>
import jax
import jax.numpy as jnp
from jax.experimental import pallas as pl
from jax.experimental.pallas import tpu as pltpu

_EPS = 1e-5  # PyTorch BatchNorm2d default


def _round_up(x, m):
    return (x + m - 1) // m * m


def _lrelu(x, slope=0.2):
    return jnp.maximum(x, slope * x)


# ---------------------------------------------------------------------------
# Pallas kernel: single-pass matmul (bf16 feeds, f32 accumulate) with an
# optional fused LeakyReLU and optional per-channel partial sums for BN.
# ---------------------------------------------------------------------------
def _make_matmul_kernel(act, emit_stats, tn):
    """act in {None, 'lrelu'}.  If emit_stats, writes an (8, tn) block whose
    row 0 is Σx over the tile's rows and row 1 is Σx² (raw conv output, f32)."""

    def kernel(a_ref, b_ref, out_ref, *stats_refs):
        # Whole K fits in one block -> single dot, no accumulation loop.
        r = jnp.dot(a_ref[...], b_ref[...], preferred_element_type=jnp.float32)

        if emit_stats:
            s = jnp.sum(r, axis=0, keepdims=True)        # (1, tn), XLU reduce
            ss = jnp.sum(r * r, axis=0, keepdims=True)   # (1, tn)
            rows = jax.lax.broadcasted_iota(jnp.int32, (8, tn), 0)
            stats_refs[0][...] = (jnp.where(rows == 0, s, 0.0)
                                  + jnp.where(rows == 1, ss, 0.0))

        if act == "lrelu":
            r = _lrelu(r)
        out_ref[...] = r.astype(out_ref.dtype)

    return kernel


def matmul_fused(A, Bm, act, emit_stats):
    """act(A @ B) with bf16 MXU feeds.  Returns (y[M,C] bf16, stats or None),
    where stats = (Σy, Σy²) per output channel of the *raw* (pre-act) product."""
    M, K = A.shape
    K2, C = Bm.shape
    assert K == K2

    tm = min(256, _round_up(M, 8))
    tn = 128                             # gn>=2 on 256-ch layers (v7x 2nd TC); full v5e MXU
    tk = _round_up(K, 128)               # whole K in one block -> reduction grid collapses
    M_pad = _round_up(M, tm)
    C_pad = _round_up(C, tn)

    Ab = A.astype(jnp.bfloat16)
    Bb = Bm.astype(jnp.bfloat16)
    if (M_pad, tk) != (M, K):            # only layer 1 actually pads (tiny)
        Ab = jnp.pad(Ab, ((0, M_pad - M), (0, tk - K)))
    if (tk, C_pad) != (K, C):
        Bb = jnp.pad(Bb, ((0, tk - K), (0, C_pad - C)))

    gm, gn = M_pad // tm, C_pad // tn

    out_shapes = [jax.ShapeDtypeStruct((M_pad, C_pad), jnp.bfloat16)]
    out_specs = [pl.BlockSpec((tm, tn), lambda i, j: (i, j))]
    if emit_stats:
        out_shapes.append(jax.ShapeDtypeStruct((gm * 8, C_pad), jnp.float32))
        out_specs.append(pl.BlockSpec((8, tn), lambda i, j: (i, j)))

    outs = pl.pallas_call(
        _make_matmul_kernel(act, emit_stats, tn),
        out_shape=tuple(out_shapes),
        grid_spec=pltpu.PrefetchScalarGridSpec(
            num_scalar_prefetch=0,
            grid=(gm, gn),
            in_specs=[
                pl.BlockSpec((tm, tk), lambda i, j: (i, 0)),
                pl.BlockSpec((tk, tn), lambda i, j: (0, j)),
            ],
            out_specs=tuple(out_specs),
        ),
        compiler_params=pltpu.CompilerParams(
            dimension_semantics=("parallel", "parallel"),
        ),
    )(Ab, Bb)

    y = outs[0][:M, :C]
    if emit_stats:
        stats = outs[1].reshape(gm, 8, C_pad)
        sums = stats[:, 0, :C].sum(axis=0)
        sumsq = stats[:, 1, :C].sum(axis=0)
        return y, (sums, sumsq)
    return y, None


# ---------------------------------------------------------------------------
# Plain-JAX glue: NHWC im2col, conv layer, BN affine from partial sums.
# ---------------------------------------------------------------------------
def _im2col(x_nhwc, k, stride, pad):
    N, H, W, C = x_nhwc.shape
    if pad > 0:
        x_nhwc = jnp.pad(x_nhwc, ((0, 0), (pad, pad), (pad, pad), (0, 0)))
    Ho = (H + 2 * pad - k) // stride + 1
    Wo = (W + 2 * pad - k) // stride + 1
    cols = [x_nhwc[:, ky:ky + stride * (Ho - 1) + 1:stride,
                   kx:kx + stride * (Wo - 1) + 1:stride, :]
            for ky in range(k) for kx in range(k)]
    # rows: (N, Ho, Wo); cols: (ky, kx, Cin) -- matches the weight layout below.
    A = jnp.stack(cols, axis=3).reshape(N * Ho * Wo, k * k * C)
    return A, Ho, Wo


def conv_layer(x_nhwc, w, stride, pad, act, emit_stats):
    cout, _, k, _ = w.shape
    A, Ho, Wo = _im2col(x_nhwc, k, stride, pad)
    # PyTorch conv weight (Cout, Cin, k, k) -> (k*k*Cin, Cout), no flip.
    Bm = jnp.transpose(w, (2, 3, 1, 0)).reshape(-1, cout)
    y, stats = matmul_fused(A, Bm, act=act, emit_stats=emit_stats)
    return y, (Ho, Wo), stats


def _bn_affine(gamma, beta, sums, sumsq, m_rows):
    # Training-mode (batch-stat) BN finished from in-kernel partial sums.
    mean = sums / m_rows
    var = jnp.maximum(sumsq / m_rows - mean * mean, 0.0)
    scale = gamma.astype(jnp.float32) * jax.lax.rsqrt(var + _EPS)
    shift = beta.astype(jnp.float32) - mean * scale
    return scale, shift


@jax.jit
def discriminator_forward(x_nchw, params):
    (w1, _, _), (w2, g2, b2), (w3, g3, b3), (w4, _, _), (w5, _, _) = params
    N = x_nchw.shape[0]
    x = jnp.transpose(x_nchw, (0, 2, 3, 1))               # NHWC, once

    # Layer 1: conv(3->64, s2, p1) + LeakyReLU fused in the kernel.
    y1, hw1, _ = conv_layer(x, w1, 2, 1, act="lrelu", emit_stats=False)
    x = y1.reshape(N, *hw1, w1.shape[0])

    # Layer 2: conv(64->128) -> BN -> LeakyReLU.  Stats from kernel epilogue;
    # scale/shift + LeakyReLU fuse (XLA) into the next layer's im2col/bf16 cast.
    y2, hw2, (s2, ss2) = conv_layer(x, w2, 2, 1, act=None, emit_stats=True)
    sc2, sh2 = _bn_affine(g2, b2, s2, ss2, y2.shape[0])
    x = _lrelu(y2.astype(jnp.float32) * sc2 + sh2).astype(jnp.bfloat16)
    x = x.reshape(N, *hw2, w2.shape[0])

    # Layer 3: conv(128->256) -> BN -> LeakyReLU.
    y3, hw3, (s3, ss3) = conv_layer(x, w3, 2, 1, act=None, emit_stats=True)
    sc3, sh3 = _bn_affine(g3, b3, s3, ss3, y3.shape[0])
    x = _lrelu(y3.astype(jnp.float32) * sc3 + sh3).astype(jnp.bfloat16)
    x = x.reshape(N, *hw3, w3.shape[0])

    # Layer 4: conv(256->256) + LeakyReLU fused in the kernel.
    y4, hw4, _ = conv_layer(x, w4, 2, 1, act="lrelu", emit_stats=False)
    x = y4.reshape(N, *hw4, w4.shape[0])

    # Layer 5: conv(256->1, k4, s1, p0) + Sigmoid.  Cout=1, M=N: a padded MXU
    # matmul would be pure overhead, so this is a plain VPU dot (per review).
    A5, _, _ = _im2col(x, 4, 1, 0)                          # (N, 4096)
    B5 = jnp.transpose(w5, (2, 3, 1, 0)).reshape(-1, 1)
    logits = jnp.dot(A5.astype(jnp.float32), B5)
    out = jax.nn.sigmoid(logits)                            # stable, stays in (0,1)
    return out.reshape(N, 1, 1, 1)


# ---------------------------------------------------------------------------
# Pure-JAX f32 reference (lax.conv) for a tolerance check.
# ---------------------------------------------------------------------------
def _reference_forward(x, params):
    (w1, _, _), (w2, g2, b2), (w3, g3, b3), (w4, _, _), (w5, _, _) = params

    def conv(x, w, stride, pad):
        return jax.lax.conv_general_dilated(
            x, w, (stride, stride), [(pad, pad), (pad, pad)],
            dimension_numbers=("NCHW", "OIHW", "NCHW"))

    def bn(x, g, b):
        mean = x.mean(axis=(0, 2, 3), keepdims=True)
        var = ((x - mean) ** 2).mean(axis=(0, 2, 3), keepdims=True)
        return ((x - mean) * jax.lax.rsqrt(var + _EPS)
                * g.reshape(1, -1, 1, 1) + b.reshape(1, -1, 1, 1))

    x = _lrelu(conv(x, w1, 2, 1))
    x = _lrelu(bn(conv(x, w2, 2, 1), g2, b2))
    x = _lrelu(bn(conv(x, w3, 2, 1), g3, b3))
    x = _lrelu(conv(x, w4, 2, 1))
    return jax.nn.sigmoid(conv(x, w5, 1, 0))


def init_params(key):
    # Deterministic synthetic weights (DCGAN-style N(0, 0.02) init).  BatchNorm
    # uses PyTorch defaults (gamma=1, beta=0) in training mode (batch stats).
    channels = [(3, 64), (64, 128), (128, 256), (256, 256), (256, 1)]
    keys = jax.random.split(key, len(channels))
    params = []
    for kk, (ci, co) in zip(keys, channels):
        w = 0.02 * jax.random.normal(kk, (co, ci, 4, 4), jnp.float32)
        params.append((w, jnp.ones((co,), jnp.float32), jnp.zeros((co,), jnp.float32)))
    return params


if __name__ == "__main__":
    key = jax.random.PRNGKey(0)
    kx, kp = jax.random.split(key)
    # Spatial size 64 is required by the architecture (final 4x4 valid conv).
    x = jax.random.normal(kx, (2, 3, 64, 64), jnp.float32)   # small batch
    params = init_params(kp)

    out = discriminator_forward(x, params)
    out = jax.block_until_ready(out)

    assert out.shape == (2, 1, 1, 1), out.shape
    assert out.dtype == jnp.float32
    assert bool(jnp.all(jnp.isfinite(out)))
    assert bool(jnp.all((out > 0.0) & (out < 1.0)))           # sigmoid range

    # Tolerance check vs. f32 reference (bf16 MXU feeds => ~1e-2 rel on logits).
    ref = jax.jit(_reference_forward)(x, params)
    ref = jax.block_until_ready(ref)
    assert bool(jnp.all(jnp.abs(out - ref) < 5e-2)), (out, ref)

    print("KERNEL_OK")
</pallas_src>

<mosaic_0001>
module attributes {stable_mosaic.version = 11 : i64} {
  func.func @kernel(%arg0: i32, %arg1: i32, %arg2: memref<256x128xbf16, #tpu.memory_space<vmem>>, %arg3: memref<128x128xbf16, #tpu.memory_space<vmem>>, %arg4: memref<256x128xbf16, #tpu.memory_space<vmem>>) attributes {dimension_semantics = [#tpu.dimension_semantics<parallel>, #tpu.dimension_semantics<parallel>], iteration_bounds = array<i64: 8, 1>, scalar_prefetch = 0 : i64, scratch_operands = 0 : i64, tpu.core_type = #tpu.core_type<tc>, window_params = [{transform_indices = @transform_0, window_bounds = array<i64: 256, 128>}, {transform_indices = @transform_1, window_bounds = array<i64: 128, 128>}, {transform_indices = @transform_2, window_bounds = array<i64: 256, 128>}]} {
    %c0 = arith.constant 0 : index
    %c0_0 = arith.constant 0 : index
    %0 = vector.load %arg2[%c0, %c0_0] : memref<256x128xbf16, #tpu.memory_space<vmem>>, vector<256x128xbf16>
    %c0_1 = arith.constant 0 : index
    %c0_2 = arith.constant 0 : index
    %1 = vector.load %arg3[%c0_1, %c0_2] : memref<128x128xbf16, #tpu.memory_space<vmem>>, vector<128x128xbf16>
    %cst = arith.constant dense<0.000000e+00> : vector<256x128xf32>
    %2 = tpu.matmul %0, %1, %cst {dimension_numbers = #tpu.dot_dimension_numbers<[1], [0], [0], [1], [0, 0, 1, 1], [], []>} : vector<256x128xbf16>, vector<128x128xbf16>, vector<256x128xf32> -> vector<256x128xf32>
    %cst_3 = arith.constant 2.000000e-01 : f32
    %3 = vector.broadcast %cst_3 : f32 to vector<256x128xf32>
    %4 = arith.mulf %3, %2 : vector<256x128xf32>
    %5 = arith.maximumf %2, %4 : vector<256x128xf32>
    %6 = arith.truncf %5 : vector<256x128xf32> to vector<256x128xbf16>
    %c0_4 = arith.constant 0 : index
    %c0_5 = arith.constant 0 : index
    %7 = vector.load %arg4[%c0_4, %c0_5] : memref<256x128xbf16, #tpu.memory_space<vmem>>, vector<256x128xbf16>
    tpu.vector_store %arg4[%c0_4, %c0_5], %6 {strides = array<i32>} : memref<256x128xbf16, #tpu.memory_space<vmem>>, vector<256x128xbf16>,
    return
  }
  func.func @transform_0(%arg0: i32, %arg1: i32) -> (i32, i32) {
    %c0_i32 = arith.constant 0 : i32
    %c0_i32_0 = arith.constant 0 : i32
    return %arg0, %c0_i32 : i32, i32
  }
  func.func @transform_1(%arg0: i32, %arg1: i32) -> (i32, i32) {
    %c0_i32 = arith.constant 0 : i32
    %c0_i32_0 = arith.constant 0 : i32
    return %c0_i32, %arg1 : i32, i32
  }
  func.func @transform_2(%arg0: i32, %arg1: i32) -> (i32, i32) {
    %c0_i32 = arith.constant 0 : i32
    return %arg0, %arg1 : i32, i32
  }
}

module attributes {stable_mosaic.version = 11 : i64} {
  func.func @kernel(%arg0: i32, %arg1: i32, %arg2: memref<256x1024xbf16, #tpu.memory_space<vmem>>, %arg3: memref<1024x128xbf16, #tpu.memory_space<vmem>>, %arg4: memref<256x128xbf16, #tpu.memory_space<vmem>>, %arg5: memref<8x128xf32, #tpu.memory_space<vmem>>) attributes {dimension_semantics = [#tpu.dimension_semantics<parallel>, #tpu.dimension_semantics<parallel>], iteration_bounds = array<i64: 2, 1>, scalar_prefetch = 0 : i64, scratch_operands = 0 : i64, tpu.core_type = #tpu.core_type<tc>, window_params = [{transform_indices = @transform_0, window_bounds = array<i64: 256, 1024>}, {transform_indices = @transform_1, window_bounds = array<i64: 1024, 128>}, {transform_indices = @transform_2, window_bounds = array<i64: 256, 128>}, {transform_indices = @transform_3, window_bounds = array<i64: 8, 128>}]} {
    %c0 = arith.constant 0 : index
    %c0_0 = arith.constant 0 : index
    %0 = vector.load %arg2[%c0, %c0_0] : memref<256x1024xbf16, #tpu.memory_space<vmem>>, vector<256x1024xbf16>
    %c0_1 = arith.constant 0 : index
    %c0_2 = arith.constant 0 : index
    %1 = vector.load %arg3[%c0_1, %c0_2] : memref<1024x128xbf16, #tpu.memory_space<vmem>>, vector<1024x128xbf16>
    %cst = arith.constant dense<0.000000e+00> : vector<256x128xf32>
    %2 = tpu.matmul %0, %1, %cst {dimension_numbers = #tpu.dot_dimension_numbers<[1], [0], [0], [1], [0, 0, 1, 1], [], []>} : vector<256x1024xbf16>, vector<1024x128xbf16>, vector<256x128xf32> -> vector<256x128xf32>
    %cst_3 = arith.constant dense<0.000000e+00> : vector<128xf32>
    %3 = vector.multi_reduction <add>, %2, %cst_3 [0] : vector<256x128xf32> to vector<128xf32>
    %4 = vector.shape_cast %3 : vector<128xf32> to vector<1x128xf32>
    %5 = arith.mulf %2, %2 : vector<256x128xf32>
    %cst_4 = arith.constant dense<0.000000e+00> : vector<128xf32>
    %6 = vector.multi_reduction <add>, %5, %cst_4 [0] : vector<256x128xf32> to vector<128xf32>
    %7 = vector.shape_cast %6 : vector<128xf32> to vector<1x128xf32>
    %8 = tpu.iota {dimensions = array<i32: 0>} : vector<8x128xi32>
    %c0_i32 = arith.constant 0 : i32
    %9 = vector.broadcast %c0_i32 : i32 to vector<8x128xi32>
    %10 = arith.cmpi eq, %8, %9 : vector<8x128xi32>
    %cst_5 = arith.constant 0.000000e+00 : f32
    %11 = vector.shape_cast %4 : vector<1x128xf32> to vector<1x128xf32>
    %12 = vector.broadcast %11 : vector<1x128xf32> to vector<8x128xf32>
    %13 = vector.broadcast %cst_5 : f32 to vector<8x128xf32>
    %14 = arith.select %10, %12, %13 : vector<8x128xi1>, vector<8x128xf32>
    %c1_i32 = arith.constant 1 : i32
    %15 = vector.broadcast %c1_i32 : i32 to vector<8x128xi32>
    %16 = arith.cmpi eq, %8, %15 : vector<8x128xi32>
    %cst_6 = arith.constant 0.000000e+00 : f32
    %17 = vector.shape_cast %7 : vector<1x128xf32> to vector<1x128xf32>
    %18 = vector.broadcast %17 : vector<1x128xf32> to vector<8x128xf32>
    %19 = vector.broadcast %cst_6 : f32 to vector<8x128xf32>
    %20 = arith.select %16, %18, %19 : vector<8x128xi1>, vector<8x128xf32>
    %21 = arith.addf %14, %20 : vector<8x128xf32>
    %c0_7 = arith.constant 0 : index
    %c0_8 = arith.constant 0 : index
    %22 = vector.load %arg5[%c0_7, %c0_8] : memref<8x128xf32, #tpu.memory_space<vmem>>, vector<8x128xf32>
    tpu.vector_store %arg5[%c0_7, %c0_8], %21 {strides = array<i32>} : memref<8x128xf32, #tpu.memory_space<vmem>>, vector<8x128xf32>,
    %23 = arith.truncf %2 : vector<256x128xf32> to vector<256x128xbf16>
    %c0_9 = arith.constant 0 : index
    %c0_10 = arith.constant 0 : index
    %24 = vector.load %arg4[%c0_9, %c0_10] : memref<256x128xbf16, #tpu.memory_space<vmem>>, vector<256x128xbf16>
    tpu.vector_store %arg4[%c0_9, %c0_10], %23 {strides = array<i32>} : memref<256x128xbf16, #tpu.memory_space<vmem>>, vector<256x128xbf16>,
    return
  }
  func.func @transform_0(%arg0: i32, %arg1: i32) -> (i32, i32) {
    %c0_i32 = arith.constant 0 : i32
    %c0_i32_0 = arith.constant 0 : i32
    return %arg0, %c0_i32 : i32, i32
  }
  func.func @transform_1(%arg0: i32, %arg1: i32) -> (i32, i32) {
    %c0_i32 = arith.constant 0 : i32
    %c0_i32_0 = arith.constant 0 : i32
    return %c0_i32, %arg1 : i32, i32
  }
  func.func @transform_2(%arg0: i32, %arg1: i32) -> (i32, i32) {
    %c0_i32 = arith.constant 0 : i32
    return %arg0, %arg1 : i32, i32
  }
  func.func @transform_3(%arg0: i32, %arg1: i32) -> (i32, i32) {
    %c0_i32 = arith.constant 0 : i32
    return %arg0, %arg1 : i32, i32
  }
}

module attributes {stable_mosaic.version = 11 : i64} {
  func.func @kernel(%arg0: i32, %arg1: i32, %arg2: memref<128x2048xbf16, #tpu.memory_space<vmem>>, %arg3: memref<2048x128xbf16, #tpu.memory_space<vmem>>, %arg4: memref<128x128xbf16, #tpu.memory_space<vmem>>, %arg5: memref<8x128xf32, #tpu.memory_space<vmem>>) attributes {dimension_semantics = [#tpu.dimension_semantics<parallel>, #tpu.dimension_semantics<parallel>], iteration_bounds = array<i64: 1, 2>, scalar_prefetch = 0 : i64, scratch_operands = 0 : i64, tpu.core_type = #tpu.core_type<tc>, window_params = [{transform_indices = @transform_0, window_bounds = array<i64: 128, 2048>}, {transform_indices = @transform_1, window_bounds = array<i64: 2048, 128>}, {transform_indices = @transform_2, window_bounds = array<i64: 128, 128>}, {transform_indices = @transform_3, window_bounds = array<i64: 8, 128>}]} {
    %c0 = arith.constant 0 : index
    %c0_0 = arith.constant 0 : index
    %0 = vector.load %arg2[%c0, %c0_0] : memref<128x2048xbf16, #tpu.memory_space<vmem>>, vector<128x2048xbf16>
    %c0_1 = arith.constant 0 : index
    %c0_2 = arith.constant 0 : index
    %1 = vector.load %arg3[%c0_1, %c0_2] : memref<2048x128xbf16, #tpu.memory_space<vmem>>, vector<2048x128xbf16>
    %cst = arith.constant dense<0.000000e+00> : vector<128x128xf32>
    %2 = tpu.matmul %0, %1, %cst {dimension_numbers = #tpu.dot_dimension_numbers<[1], [0], [0], [1], [0, 0, 1, 1], [], []>} : vector<128x2048xbf16>, vector<2048x128xbf16>, vector<128x128xf32> -> vector<128x128xf32>
    %cst_3 = arith.constant dense<0.000000e+00> : vector<128xf32>
    %3 = vector.multi_reduction <add>, %2, %cst_3 [0] : vector<128x128xf32> to vector<128xf32>
    %4 = vector.shape_cast %3 : vector<128xf32> to vector<1x128xf32>
    %5 = arith.mulf %2, %2 : vector<128x128xf32>
    %cst_4 = arith.constant dense<0.000000e+00> : vector<128xf32>
    %6 = vector.multi_reduction <add>, %5, %cst_4 [0] : vector<128x128xf32> to vector<128xf32>
    %7 = vector.shape_cast %6 : vector<128xf32> to vector<1x128xf32>
    %8 = tpu.iota {dimensions = array<i32: 0>} : vector<8x128xi32>
    %c0_i32 = arith.constant 0 : i32
    %9 = vector.broadcast %c0_i32 : i32 to vector<8x128xi32>
    %10 = arith.cmpi eq, %8, %9 : vector<8x128xi32>
    %cst_5 = arith.constant 0.000000e+00 : f32
    %11 = vector.shape_cast %4 : vector<1x128xf32> to vector<1x128xf32>
    %12 = vector.broadcast %11 : vector<1x128xf32> to vector<8x128xf32>
    %13 = vector.broadcast %cst_5 : f32 to vector<8x128xf32>
    %14 = arith.select %10, %12, %13 : vector<8x128xi1>, vector<8x128xf32>
    %c1_i32 = arith.constant 1 : i32
    %15 = vector.broadcast %c1_i32 : i32 to vector<8x128xi32>
    %16 = arith.cmpi eq, %8, %15 : vector<8x128xi32>
    %cst_6 = arith.constant 0.000000e+00 : f32
    %17 = vector.shape_cast %7 : vector<1x128xf32> to vector<1x128xf32>
    %18 = vector.broadcast %17 : vector<1x128xf32> to vector<8x128xf32>
    %19 = vector.broadcast %cst_6 : f32 to vector<8x128xf32>
    %20 = arith.select %16, %18, %19 : vector<8x128xi1>, vector<8x128xf32>
    %21 = arith.addf %14, %20 : vector<8x128xf32>
    %c0_7 = arith.constant 0 : index
    %c0_8 = arith.constant 0 : index
    %22 = vector.load %arg5[%c0_7, %c0_8] : memref<8x128xf32, #tpu.memory_space<vmem>>, vector<8x128xf32>
    tpu.vector_store %arg5[%c0_7, %c0_8], %21 {strides = array<i32>} : memref<8x128xf32, #tpu.memory_space<vmem>>, vector<8x128xf32>,
    %23 = arith.truncf %2 : vector<128x128xf32> to vector<128x128xbf16>
    %c0_9 = arith.constant 0 : index
    %c0_10 = arith.constant 0 : index
    %24 = vector.load %arg4[%c0_9, %c0_10] : memref<128x128xbf16, #tpu.memory_space<vmem>>, vector<128x128xbf16>
    tpu.vector_store %arg4[%c0_9, %c0_10], %23 {strides = array<i32>} : memref<128x128xbf16, #tpu.memory_space<vmem>>, vector<128x128xbf16>,
    return
  }
  func.func @transform_0(%arg0: i32, %arg1: i32) -> (i32, i32) {
    %c0_i32 = arith.constant 0 : i32
    %c0_i32_0 = arith.constant 0 : i32
    return %arg0, %c0_i32 : i32, i32
  }
  func.func @transform_1(%arg0: i32, %arg1: i32) -> (i32, i32) {
    %c0_i32 = arith.constant 0 : i32
    %c0_i32_0 = arith.constant 0 : i32
    return %c0_i32, %arg1 : i32, i32
  }
  func.func @transform_2(%arg0: i32, %arg1: i32) -> (i32, i32) {
    %c0_i32 = arith.constant 0 : i32
    return %arg0, %arg1 : i32, i32
  }
  func.func @transform_3(%arg0: i32, %arg1: i32) -> (i32, i32) {
    %c0_i32 = arith.constant 0 : i32
    return %arg0, %arg1 : i32, i32
  }
}

module attributes {stable_mosaic.version = 11 : i64} {
  func.func @kernel(%arg0: i32, %arg1: i32, %arg2: memref<32x4096xbf16, #tpu.memory_space<vmem>>, %arg3: memref<4096x128xbf16, #tpu.memory_space<vmem>>, %arg4: memref<32x128xbf16, #tpu.memory_space<vmem>>) attributes {dimension_semantics = [#tpu.dimension_semantics<parallel>, #tpu.dimension_semantics<parallel>], iteration_bounds = array<i64: 1, 2>, scalar_prefetch = 0 : i64, scratch_operands = 0 : i64, tpu.core_type = #tpu.core_type<tc>, window_params = [{transform_indices = @transform_0, window_bounds = array<i64: 32, 4096>}, {transform_indices = @transform_1, window_bounds = array<i64: 4096, 128>}, {transform_indices = @transform_2, window_bounds = array<i64: 32, 128>}]} {
    %c0 = arith.constant 0 : index
    %c0_0 = arith.constant 0 : index
    %0 = vector.load %arg2[%c0, %c0_0] : memref<32x4096xbf16, #tpu.memory_space<vmem>>, vector<32x4096xbf16>
    %c0_1 = arith.constant 0 : index
    %c0_2 = arith.constant 0 : index
    %1 = vector.load %arg3[%c0_1, %c0_2] : memref<4096x128xbf16, #tpu.memory_space<vmem>>, vector<4096x128xbf16>
    %cst = arith.constant dense<0.000000e+00> : vector<32x128xf32>
    %2 = tpu.matmul %0, %1, %cst {dimension_numbers = #tpu.dot_dimension_numbers<[1], [0], [0], [1], [0, 0, 1, 1], [], []>} : vector<32x4096xbf16>, vector<4096x128xbf16>, vector<32x128xf32> -> vector<32x128xf32>
    %cst_3 = arith.constant 2.000000e-01 : f32
    %3 = vector.broadcast %cst_3 : f32 to vector<32x128xf32>
    %4 = arith.mulf %3, %2 : vector<32x128xf32>
    %5 = arith.maximumf %2, %4 : vector<32x128xf32>
    %6 = arith.truncf %5 : vector<32x128xf32> to vector<32x128xbf16>
    %c0_4 = arith.constant 0 : index
    %c0_5 = arith.constant 0 : index
    %7 = vector.load %arg4[%c0_4, %c0_5] : memref<32x128xbf16, #tpu.memory_space<vmem>>, vector<32x128xbf16>
    tpu.vector_store %arg4[%c0_4, %c0_5], %6 {strides = array<i32>} : memref<32x128xbf16, #tpu.memory_space<vmem>>, vector<32x128xbf16>,
    return
  }
  func.func @transform_0(%arg0: i32, %arg1: i32) -> (i32, i32) {
    %c0_i32 = arith.constant 0 : i32
    %c0_i32_0 = arith.constant 0 : i32
    return %arg0, %c0_i32 : i32, i32
  }
  func.func @transform_1(%arg0: i32, %arg1: i32) -> (i32, i32) {
    %c0_i32 = arith.constant 0 : i32
    %c0_i32_0 = arith.constant 0 : i32
    return %c0_i32, %arg1 : i32, i32
  }
  func.func @transform_2(%arg0: i32, %arg1: i32) -> (i32, i32) {
    %c0_i32 = arith.constant 0 : i32
    return %arg0, %arg1 : i32, i32
  }
}

</mosaic_0001>

<bundles_post_ra>
// kernel: discriminator_forward.4
= control target key start
LH: loop header
LB: loop body
LE: loop exit
PB: predicated region body
PF: predicated region fallthrough
CT: control target
= control target key end

     0   :  { %s997_s9 = smov 0   ;;  %s999_s10 = smov 0   ;;  %s1100_s0 = inlined_call_operand.vmem [shape: bf16[2048,128], index: 0, kind: input, shape index: {}]   ;;  %s1101_s1 = inlined_call_operand.vmem [shape: bf16[128,128], index: 1, kind: input, shape index: {}]   ;;  %s1102_s2 = inlined_call_operand.vmem [shape: bf16[2048,128], index: 2, kind: output, shape index: {}]  }
   0x1   :  { %s1001_s11 = smov 0  }
   0x2 LB: > { %s24_s12 = sadd.s32 1, %s976_s10  ;;  %p688_p0 = scmp.ge.s32.totalorder %s980_s11, 1  ;;  %s980_s11 = sphi %s1001_s11, %s12_s11   ;;  %s976_s10 = sphi %s999_s10, %s1104_s10   ;;  %s972_s9 = sphi %s997_s9, %s1103_s9  }
   0x3   : > { %p26_p1 = scmp.ge.s32.totalorder %s24_s12, 8  ;;  %p136_p2 = scmp.lt.s32.totalorder %s980_s11, 9 }
   0x5   : > { %s1106_s12 = smov (%p26_p1, %s24_s12), 0  ;;  %p137_p3 = pnand %p688_p0, %p136_p2 }
   0x6   : > { %s689_s21 = sshll.u32 (!%p137_p3), %s972_s9, 5 }
   0x7   : > { %140 = sbr.rel (%p137_p3) target bundleno = 241 (0xf1), region = 28  ;;  %p166_p4 = scmp.lt.s32.totalorder (!%p137_p3), %s689_s21, 255 }
   0xc   : > { %v814_v0 = vld [vmem:[%s1101_s1 + $0x38] sm:$0xff]  ;;  %v813_v1 = vld [vmem:[%s1101_s1 + $0x30] sm:$0xff]  ;;  %v812_v2 = vld [vmem:[%s1101_s1 + $0x28] sm:$0xff]  ;;  %s1108_s21 = smov (!%p166_p4, %s689_s21), 255 }
   0xd   : > { %376 = vmatpush.bf16.msra.mxu0 %v814_v0  ;;  %910 = vmatpush.bf16.msra.mxu1 %v814_v0  ;;  %v811_v3 = vld [vmem:[%s1101_s1 + $0x20] sm:$0xff]  ;;  %v810_v4 = vld [vmem:[%s1101_s1 + $0x18] sm:$0xff]  ;;  %v809_v5 = vld [vmem:[%s1101_s1 + $0x10] sm:$0xff]  ;;  %s690_s28 = sshll.u32 %s1108_s21, 2 }
   0xe   : > { %911 = vmatpush.bf16.msra.mxu2 %v814_v0  ;;  %912 = vmatpush.bf16.msra.mxu3 %v814_v0  ;;  %v808_v6 = vld [vmem:[%s1101_s1 + $0x8] sm:$0xff]  ;;  %v807_v7 = vld [vmem:[%s1101_s1] sm:$0xff]  ;;  %s1050_s5 = scalar_lea.vmem %s1100_s0, %s690_s28  ;;  %s1073_s8 = scalar_lea.vmem %s1102_s2, %s690_s28 }
   0xf   : > { %v791_v8 = vld [vmem:[%s1050_s5] sm:$0xff]  ;;  %v792_v12 = vld [vmem:[%s1050_s5 + $0x8] sm:$0xff]  ;;  %v793_v16 = vld [vmem:[%s1050_s5 + $0x10] sm:$0xff] }
  0x10   : > { %v795_v9 = vld [vmem:[%s1050_s5 + $0x20] sm:$0xff]  ;;  %v796_v13 = vld [vmem:[%s1050_s5 + $0x28] sm:$0xff]  ;;  %v797_v17 = vld [vmem:[%s1050_s5 + $0x30] sm:$0xff] }
  0x11   : > { %377 = vmatpush.bf16.msra.mxu0 %v813_v1  ;;  %913 = vmatpush.bf16.msra.mxu1 %v813_v1  ;;  %v799_v10 = vld [vmem:[%s1050_s5 + $0x40] sm:$0xff]  ;;  %v800_v14 = vld [vmem:[%s1050_s5 + $0x48] sm:$0xff]  ;;  %v801_v18 = vld [vmem:[%s1050_s5 + $0x50] sm:$0xff] }
  0x12   : > { %914 = vmatpush.bf16.msra.mxu2 %v813_v1  ;;  %915 = vmatpush.bf16.msra.mxu3 %v813_v1  ;;  %v803_v11 = vld [vmem:[%s1050_s5 + $0x60] sm:$0xff]  ;;  %v804_v15 = vld [vmem:[%s1050_s5 + $0x68] sm:$0xff]  ;;  %v805_v19 = vld [vmem:[%s1050_s5 + $0x70] sm:$0xff] }
  0x13   : > { %v794_v20 = vld [vmem:[%s1050_s5 + $0x18] sm:$0xff] }
  0x14   : > { %v798_v21 = vld [vmem:[%s1050_s5 + $0x38] sm:$0xff] }
  0x15   : > { %378 = vmatpush.bf16.msra.mxu0 %v812_v2  ;;  %916 = vmatpush.bf16.msra.mxu1 %v812_v2  ;;  %v802_v22 = vld [vmem:[%s1050_s5 + $0x58] sm:$0xff] }
  0x16   : > { %917 = vmatpush.bf16.msra.mxu2 %v812_v2  ;;  %918 = vmatpush.bf16.msra.mxu3 %v812_v2  ;;  %v806_v23 = vld [vmem:[%s1050_s5 + $0x78] sm:$0xff] }
  0x19   : > { %379 = vmatpush.bf16.msra.mxu0 %v811_v3  ;;  %919 = vmatpush.bf16.msra.mxu1 %v811_v3 }
  0x1a   : > { %920 = vmatpush.bf16.msra.mxu2 %v811_v3  ;;  %921 = vmatpush.bf16.msra.mxu3 %v811_v3 }
  0x1d   : > { %380 = vmatpush.bf16.msra.mxu0 %v810_v4  ;;  %922 = vmatpush.bf16.msra.mxu1 %v810_v4 }
  0x1e   : > { %923 = vmatpush.bf16.msra.mxu2 %v810_v4  ;;  %924 = vmatpush.bf16.msra.mxu3 %v810_v4 }
  0x21   : > { %381 = vmatpush.bf16.msra.mxu0 %v809_v5  ;;  %925 = vmatpush.bf16.msra.mxu1 %v809_v5 }
  0x22   : > { %926 = vmatpush.bf16.msra.mxu2 %v809_v5  ;;  %927 = vmatpush.bf16.msra.mxu3 %v809_v5 }
  0x25   : > { %382 = vmatpush.bf16.msra.mxu0 %v808_v6  ;;  %928 = vmatpush.bf16.msra.mxu1 %v808_v6 }
  0x26   : > { %929 = vmatpush.bf16.msra.mxu2 %v808_v6  ;;  %930 = vmatpush.bf16.msra.mxu3 %v808_v6 }
  0x29   : > { %383 = vmatpush.bf16.msra.mxu0 %v807_v7  ;;  %931 = vmatpush.bf16.msra.mxu1 %v807_v7 }
  0x2a   : > { %932 = vmatpush.bf16.msra.mxu2 %v807_v7  ;;  %933 = vmatpush.bf16.msra.mxu3 %v807_v7 }
  0x2c   : > { %384 = vmatmul.bf16.vlgmr.msra.gmra.mxu0 %v791_v8  ;;  %404 = vmatmul.bf16.vlgmr.msra.gmra.mxu1 %v795_v9 }
  0x2d   : > { %424 = vmatmul.bf16.vlgmr.msra.gmra.mxu2 %v799_v10  ;;  %444 = vmatmul.bf16.vlgmr.msra.gmra.mxu3 %v803_v11 }
  0x3c   : > { %389 = vmatmul.bf16.gmra.mxu0 %v792_v12  ;;  %409 = vmatmul.bf16.gmra.mxu1 %v796_v13 }
  0x3d   : > { %429 = vmatmul.bf16.gmra.mxu2 %v800_v14  ;;  %449 = vmatmul.bf16.gmra.mxu3 %v804_v15 }
  0x4c   : > { %394 = vmatmul.bf16.gmra.mxu0 %v793_v16  ;;  %414 = vmatmul.bf16.gmra.mxu1 %v797_v17 }
  0x4d   : > { %434 = vmatmul.bf16.gmra.mxu2 %v801_v18  ;;  %454 = vmatmul.bf16.gmra.mxu3 %v805_v19 }
  0x5c   : > { %399 = vmatmul.bf16.gmra.mxu0 %v794_v20  ;;  %419 = vmatmul.bf16.gmra.mxu1 %v798_v21 }
  0x5d   : > { %439 = vmatmul.bf16.gmra.mxu2 %v802_v22  ;;  %459 = vmatmul.bf16.gmra.mxu3 %v806_v23 }
  0xa9   : > { %v385_v24 = vpop.f32.mrf.mxu0  ;;  %v405_v25 = vpop.f32.mrf.mxu1 }
  0xaa   : > { %v465_v26 = vmul.f32 0.2, %v385_v24  ;;  %v473_v27 = vmul.f32 0.2, %v405_v25 }
  0xac   : > { %v497_v34 = vmax.f32 %v385_v24, %v465_v26  ;;  %v505_v35 = vmax.f32 %v405_v25, %v473_v27 }
  0xb0   : > { %v425_v28 = vpop.f32.mrf.mxu2  ;;  %v445_v29 = vpop.f32.mrf.mxu3 }
  0xb1   : > { %v387_v30 = vpop.f32.mrf.mxu0  ;;  %v407_v31 = vpop.f32.mrf.mxu1  ;;  %v481_v40 = vmul.f32 0.2, %v425_v28  ;;  %v489_v41 = vmul.f32 0.2, %v445_v29 }
  0xb2   : > { %v466_v32 = vmul.f32 0.2, %v387_v30  ;;  %v474_v33 = vmul.f32 0.2, %v407_v31 }
  0xb3   : > { %v513_v48 = vmax.f32 %v425_v28, %v481_v40  ;;  %v521_v49 = vmax.f32 %v445_v29, %v489_v41 }
  0xb4   : > { %v498_v36 = vmax.f32 %v387_v30, %v466_v32  ;;  %v506_v37 = vmax.f32 %v407_v31, %v474_v33 }
  0xb6   : > { %v818_v38 = vpack.c.bf16 %v498_v36, %v497_v34  ;;  %v838_v39 = vpack.c.bf16 %v506_v37, %v505_v35 }
  0xb8   : > { %819 = vst [vmem:[%s1073_s8] sm:$0xff] %v818_v38   ;;  %v427_v42 = vpop.f32.mrf.mxu2  ;;  %v447_v43 = vpop.f32.mrf.mxu3 }
  0xb9   : > { %898 = vst [vmem:[%s1073_s8 + $0x20] sm:$0xff] %v838_v39   ;;  %v482_v44 = vmul.f32 0.2, %v427_v42  ;;  %v490_v45 = vmul.f32 0.2, %v447_v43  ;;  %v390_v46 = vpop.f32.mrf.mxu0  ;;  %v410_v47 = vpop.f32.mrf.mxu1 }
  0xba   : > { %v467_v54 = vmul.f32 0.2, %v390_v46  ;;  %v475_v55 = vmul.f32 0.2, %v410_v47 }
  0xbb   : > { %v514_v50 = vmax.f32 %v427_v42, %v482_v44  ;;  %v522_v51 = vmax.f32 %v447_v43, %v490_v45 }
  0xbc   : > { %v499_v62 = vmax.f32 %v390_v46, %v467_v54  ;;  %v507_v63 = vmax.f32 %v410_v47, %v475_v55 }
  0xbd   : > { %v858_v52 = vpack.c.bf16 %v514_v50, %v513_v48  ;;  %v878_v53 = vpack.c.bf16 %v522_v51, %v521_v49 }
  0xbf   : > { %902 = vst [vmem:[%s1073_s8 + $0x40] sm:$0xff] %v858_v52  }
  0xc0   : > { %906 = vst [vmem:[%s1073_s8 + $0x60] sm:$0xff] %v878_v53   ;;  %v430_v56 = vpop.f32.mrf.mxu2  ;;  %v450_v57 = vpop.f32.mrf.mxu3 }
  0xc1   : > { %v392_v58 = vpop.f32.mrf.mxu0  ;;  %v412_v59 = vpop.f32.mrf.mxu1  ;;  %v483_v4 = vmul.f32 0.2, %v430_v56  ;;  %v491_v5 = vmul.f32 0.2, %v450_v57 }
  0xc2   : > { %v468_v60 = vmul.f32 0.2, %v392_v58  ;;  %v476_v61 = vmul.f32 0.2, %v412_v59 }
  0xc3   : > { %v515_v12 = vmax.f32 %v430_v56, %v483_v4  ;;  %v523_v13 = vmax.f32 %v450_v57, %v491_v5 }
  0xc4   : > { %v500_v0 = vmax.f32 %v392_v58, %v468_v60  ;;  %v508_v1 = vmax.f32 %v412_v59, %v476_v61 }
  0xc6   : > { %v823_v2 = vpack.c.bf16 %v500_v0, %v499_v62  ;;  %v843_v3 = vpack.c.bf16 %v508_v1, %v507_v63 }
  0xc8   : > { %895 = vst [vmem:[%s1073_s8 + $0x8] sm:$0xff] %v823_v2   ;;  %v432_v6 = vpop.f32.mrf.mxu2  ;;  %v452_v7 = vpop.f32.mrf.mxu3 }
  0xc9   : > { %899 = vst [vmem:[%s1073_s8 + $0x28] sm:$0xff] %v843_v3   ;;  %v484_v8 = vmul.f32 0.2, %v432_v6  ;;  %v492_v9 = vmul.f32 0.2, %v452_v7  ;;  %v395_v10 = vpop.f32.mrf.mxu0  ;;  %v415_v11 = vpop.f32.mrf.mxu1 }
  0xca   : > { %v469_v18 = vmul.f32 0.2, %v395_v10  ;;  %v477_v19 = vmul.f32 0.2, %v415_v11 }
  0xcb   : > { %v516_v14 = vmax.f32 %v432_v6, %v484_v8  ;;  %v524_v15 = vmax.f32 %v452_v7, %v492_v9 }
  0xcc   : > { %v501_v26 = vmax.f32 %v395_v10, %v469_v18  ;;  %v509_v27 = vmax.f32 %v415_v11, %v477_v19 }
  0xcd   : > { %v863_v16 = vpack.c.bf16 %v516_v14, %v515_v12  ;;  %v883_v17 = vpack.c.bf16 %v524_v15, %v523_v13 }
  0xcf   : > { %903 = vst [vmem:[%s1073_s8 + $0x48] sm:$0xff] %v863_v16  }
  0xd0   : > { %907 = vst [vmem:[%s1073_s8 + $0x68] sm:$0xff] %v883_v17   ;;  %v435_v20 = vpop.f32.mrf.mxu2  ;;  %v455_v21 = vpop.f32.mrf.mxu3 }
  0xd1   : > { %v397_v22 = vpop.f32.mrf.mxu0  ;;  %v417_v23 = vpop.f32.mrf.mxu1  ;;  %v485_v32 = vmul.f32 0.2, %v435_v20  ;;  %v493_v33 = vmul.f32 0.2, %v455_v21 }
  0xd2   : > { %v470_v24 = vmul.f32 0.2, %v397_v22  ;;  %v478_v25 = vmul.f32 0.2, %v417_v23 }
  0xd3   : > { %v517_v40 = vmax.f32 %v435_v20, %v485_v32  ;;  %v525_v41 = vmax.f32 %v455_v21, %v493_v33 }
  0xd4   : > { %v502_v28 = vmax.f32 %v397_v22, %v470_v24  ;;  %v510_v29 = vmax.f32 %v417_v23, %v478_v25 }
  0xd6   : > { %v828_v30 = vpack.c.bf16 %v502_v28, %v501_v26  ;;  %v848_v31 = vpack.c.bf16 %v510_v29, %v509_v27 }
  0xd8   : > { %896 = vst [vmem:[%s1073_s8 + $0x10] sm:$0xff] %v828_v30   ;;  %v437_v34 = vpop.f32.mrf.mxu2  ;;  %v457_v35 = vpop.f32.mrf.mxu3 }
  0xd9   : > { %900 = vst [vmem:[%s1073_s8 + $0x30] sm:$0xff] %v848_v31   ;;  %v486_v36 = vmul.f32 0.2, %v437_v34  ;;  %v494_v37 = vmul.f32 0.2, %v457_v35  ;;  %v400_v38 = vpop.f32.mrf.mxu0  ;;  %v420_v39 = vpop.f32.mrf.mxu1 }
  0xda   : > { %v471_v46 = vmul.f32 0.2, %v400_v38  ;;  %v479_v47 = vmul.f32 0.2, %v420_v39 }
  0xdb   : > { %v518_v42 = vmax.f32 %v437_v34, %v486_v36  ;;  %v526_v43 = vmax.f32 %v457_v35, %v494_v37 }
  0xdc   : > { %v503_v54 = vmax.f32 %v400_v38, %v471_v46  ;;  %v511_v55 = vmax.f32 %v420_v39, %v479_v47 }
  0xdd   : > { %v868_v44 = vpack.c.bf16 %v518_v42, %v517_v40  ;;  %v888_v45 = vpack.c.bf16 %v526_v43, %v525_v41 }
  0xdf   : > { %904 = vst [vmem:[%s1073_s8 + $0x50] sm:$0xff] %v868_v44  }
  0xe0   : > { %908 = vst [vmem:[%s1073_s8 + $0x70] sm:$0xff] %v888_v45   ;;  %v440_v48 = vpop.f32.mrf.mxu2  ;;  %v460_v49 = vpop.f32.mrf.mxu3 }
  0xe1   : > { %v402_v50 = vpop.f32.mrf.mxu0  ;;  %v422_v51 = vpop.f32.mrf.mxu1  ;;  %v487_v60 = vmul.f32 0.2, %v440_v48  ;;  %v495_v61 = vmul.f32 0.2, %v460_v49 }
  0xe2   : > { %v472_v52 = vmul.f32 0.2, %v402_v50  ;;  %v480_v53 = vmul.f32 0.2, %v422_v51 }
  0xe3   : > { %v519_v2 = vmax.f32 %v440_v48, %v487_v60  ;;  %v527_v3 = vmax.f32 %v460_v49, %v495_v61 }
  0xe4   : > { %v504_v56 = vmax.f32 %v402_v50, %v472_v52  ;;  %v512_v57 = vmax.f32 %v422_v51, %v480_v53 }
  0xe6   : > { %v833_v58 = vpack.c.bf16 %v504_v56, %v503_v54  ;;  %v853_v59 = vpack.c.bf16 %v512_v57, %v511_v55 }
  0xe8   : > { %897 = vst [vmem:[%s1073_s8 + $0x18] sm:$0xff] %v833_v58   ;;  %v442_v62 = vpop.f32.mrf.mxu2  ;;  %v462_v63 = vpop.f32.mrf.mxu3 }
  0xe9   : > { %901 = vst [vmem:[%s1073_s8 + $0x38] sm:$0xff] %v853_v59   ;;  %v488_v0 = vmul.f32 0.2, %v442_v62  ;;  %v496_v1 = vmul.f32 0.2, %v462_v63 }
  0xeb   : > { %v520_v4 = vmax.f32 %v442_v62, %v488_v0  ;;  %v528_v5 = vmax.f32 %v462_v63, %v496_v1 }
  0xed   : > { %v873_v6 = vpack.c.bf16 %v520_v4, %v519_v2  ;;  %v893_v7 = vpack.c.bf16 %v528_v5, %v527_v3 }
  0xef   : > { %905 = vst [vmem:[%s1073_s8 + $0x58] sm:$0xff] %v873_v6  }
  0xf0   : > { %909 = vst [vmem:[%s1073_s8 + $0x78] sm:$0xff] %v893_v7  }
  0xf1 PF: > { %s12_s11 = sadd.s32 1, %s980_s11   ;;  %s1103_s9 = smov %s976_s10 }
  0xf2   : > { %p9_p5 = scmp.ge.s32.totalorder %s12_s11, 10   ;;  %s1104_s10 = smov %s1106_s12 }
  0xf4   :  { %11 = sbr.rel (!%p9_p5) target bundleno = 2 (0x2), region = 61 }

// kernel: discriminator_forward.5
= control target key start
LH: loop header
LB: loop body
LE: loop exit
PB: predicated region body
PF: predicated region fallthrough
CT: control target
= control target key end

     0   :  { %s3672_s12 = smov 0   ;;  %s3674_s13 = smov 0   ;;  %s4281_s0 = inlined_call_operand.vmem [shape: bf16[512,1024], index: 0, kind: input, shape index: {}]   ;;  %s4282_s1 = inlined_call_operand.vmem [shape: bf16[1024,128], index: 1, kind: input, shape index: {}]   ;;  %s4283_s2 = inlined_call_operand.vmem [shape: bf16[512,128], index: 2, kind: output, shape index: {0}]   ;;  %s4284_s3 = inlined_call_operand.vmem [shape: f32[16,128], index: 3, kind: output, shape index: {1}]  }
   0x1   :  { %s3676_s14 = smov 0  }
   0x2 LB: > { %s26_s15 = sadd.s32 1, %s3646_s13  ;;  %p2539_p0 = scmp.ge.s32.totalorder %s3650_s14, 1  ;;  %s3650_s14 = sphi %s3676_s14, %s14_s14   ;;  %s3646_s13 = sphi %s3674_s13, %s4286_s13   ;;  %s3642_s12 = sphi %s3672_s12, %s4285_s12  }
   0x3   : > { %p28_p1 = scmp.ge.s32.totalorder %s26_s15, 2  ;;  %p167_p2 = scmp.lt.s32.totalorder %s3650_s14, 3 }
   0x5   : > { %s4288_s15 = smov (%p28_p1, %s26_s15), 0  ;;  %p168_p3 = pnand %p2539_p0, %p167_p2 }
   0x6   : > { %s2540_s17 = sshll.u32 (!%p168_p3), %s3642_s12, 5  ;;  %p226_p5 = scmp.lt.s32.totalorder (!%p168_p3), %s3642_s12, 1 }
   0x7   : > { %171 = sbr.rel (%p168_p3) target bundleno = 706 (0x2c2), region = 28  ;;  %p207_p4 = scmp.lt.s32.totalorder (!%p168_p3), %s2540_s17, 63 }
   0xc   : > { %v3452_v0 = vld [vmem:[%s4282_s1 + $0x38] sm:$0xff]  ;;  %v3451_v4 = vld [vmem:[%s4282_s1 + $0x30] sm:$0xff]  ;;  %v3450_v8 = vld [vmem:[%s4282_s1 + $0x28] sm:$0xff]  ;;  %s4290_s17 = smov (!%p207_p4, %s2540_s17), 63  ;;  %s4292_s12 = smov (!%p226_p5, %s3642_s12), 1 }
   0xd   : > { %v3460_v1 = vld [vmem:[%s4282_s1 + $0x78] sm:$0xff]  ;;  %1513 = vmatpush.bf16.msra.mxu0 %v3452_v0  ;;  %v3459_v5 = vld [vmem:[%s4282_s1 + $0x70] sm:$0xff]  ;;  %v3458_v9 = vld [vmem:[%s4282_s1 + $0x68] sm:$0xff]  ;;  %s3316_s20 = sshll.u32 %s4290_s17, 5  ;;  %s2544_s19 = sshll.u32 %s4290_s17, 2 }
   0xe   : > { %v3468_v2 = vld [vmem:[%s4282_s1 + $0xb8] sm:$0xff]  ;;  %1602 = vmatpush.bf16.msra.mxu1 %v3460_v1  ;;  %v3467_v6 = vld [vmem:[%s4282_s1 + $0xb0] sm:$0xff]  ;;  %v3466_v10 = vld [vmem:[%s4282_s1 + $0xa8] sm:$0xff]  ;;  %s3777_s27 = scalar_lea.vmem %s4281_s0, %s3316_s20  ;;  %s4172_s22 = scalar_lea.vmem %s4283_s2, %s2544_s19 }
   0xf   : > { %v3476_v3 = vld [vmem:[%s4282_s1 + $0xf8] sm:$0xff]  ;;  %1691 = vmatpush.bf16.msra.mxu2 %v3468_v2  ;;  %v3475_v7 = vld [vmem:[%s4282_s1 + $0xf0] sm:$0xff]  ;;  %v3474_v11 = vld [vmem:[%s4282_s1 + $0xe8] sm:$0xff]  ;;  %s2545_s17 = sshll.u32 %s4292_s12, 3 }
  0x10   : > { %1780 = vmatpush.bf16.msra.mxu3 %v3476_v3  ;;  %v3449_v12 = vld [vmem:[%s4282_s1 + $0x20] sm:$0xff]  ;;  %v3448_v16 = vld [vmem:[%s4282_s1 + $0x18] sm:$0xff]  ;;  %v3447_v20 = vld [vmem:[%s4282_s1 + $0x10] sm:$0xff]  ;;  %s232_s24 = scalar_lea.vmem %s4284_s3, %s2545_s17 }
  0x11   : > { %1514 = vmatpush.bf16.msra.mxu0 %v3451_v4  ;;  %v3457_v13 = vld [vmem:[%s4282_s1 + $0x60] sm:$0xff]  ;;  %v3456_v17 = vld [vmem:[%s4282_s1 + $0x58] sm:$0xff]  ;;  %v3455_v21 = vld [vmem:[%s4282_s1 + $0x50] sm:$0xff] }
  0x12   : > { %1603 = vmatpush.bf16.msra.mxu1 %v3459_v5  ;;  %v3465_v14 = vld [vmem:[%s4282_s1 + $0xa0] sm:$0xff]  ;;  %v3464_v18 = vld [vmem:[%s4282_s1 + $0x98] sm:$0xff]  ;;  %v3463_v22 = vld [vmem:[%s4282_s1 + $0x90] sm:$0xff] }
  0x13   : > { %1692 = vmatpush.bf16.msra.mxu2 %v3467_v6  ;;  %v3473_v15 = vld [vmem:[%s4282_s1 + $0xe0] sm:$0xff]  ;;  %v3472_v19 = vld [vmem:[%s4282_s1 + $0xd8] sm:$0xff]  ;;  %v3471_v23 = vld [vmem:[%s4282_s1 + $0xd0] sm:$0xff] }
  0x14   : > { %1781 = vmatpush.bf16.msra.mxu3 %v3475_v7  ;;  %v3446_v24 = vld [vmem:[%s4282_s1 + $0x8] sm:$0xff]  ;;  %v3445_v28 = vld [vmem:[%s4282_s1] sm:$0xff]  ;;  %v3500_v40 = vld [vmem:[%s4282_s1 + $0x1b8] sm:$0xff] }
  0x15   : > { %1515 = vmatpush.bf16.msra.mxu0 %v3450_v8  ;;  %v3454_v25 = vld [vmem:[%s4282_s1 + $0x48] sm:$0xff]  ;;  %v3453_v29 = vld [vmem:[%s4282_s1 + $0x40] sm:$0xff]  ;;  %v3484_v41 = vld [vmem:[%s4282_s1 + $0x138] sm:$0xff] }
  0x16   : > { %1604 = vmatpush.bf16.msra.mxu1 %v3458_v9  ;;  %v3462_v26 = vld [vmem:[%s4282_s1 + $0x88] sm:$0xff]  ;;  %v3461_v30 = vld [vmem:[%s4282_s1 + $0x80] sm:$0xff]  ;;  %v3508_v46 = vld [vmem:[%s4282_s1 + $0x1f8] sm:$0xff] }
  0x17   : > { %1693 = vmatpush.bf16.msra.mxu2 %v3466_v10  ;;  %v3470_v27 = vld [vmem:[%s4282_s1 + $0xc8] sm:$0xff]  ;;  %v3469_v31 = vld [vmem:[%s4282_s1 + $0xc0] sm:$0xff]  ;;  %v3492_v47 = vld [vmem:[%s4282_s1 + $0x178] sm:$0xff] }
  0x18   : > { %1782 = vmatpush.bf16.msra.mxu3 %v3474_v11  ;;  %v2548_v32 = vld [vmem:[%s3777_s27] sm:$0xf]  ;;  %v3317_v34 = vld [vmem:[%s3777_s27 + $0x4] sm:$0xf]  ;;  %v2556_v36 = vld [vmem:[%s3777_s27 + $0x8] sm:$0xf] }
  0x19   : > { %1516 = vmatpush.bf16.msra.mxu0 %v3449_v12  ;;  %v3321_v33 = vld [vmem:[%s3777_s27 + $0x1c] sm:$0xf0]  ;;  %v2550_v35 = vld [vmem:[%s3777_s27 + $0x20] sm:$0xf0]  ;;  %v3322_v37 = vld [vmem:[%s3777_s27 + $0x24] sm:$0xf0] }
  0x1a   : > { %1605 = vmatpush.bf16.msra.mxu1 %v3457_v13  ;;  %v3318_v38 = vld [vmem:[%s3777_s27 + $0xc] sm:$0xf]  ;;  %v2549_v42 = vor.u32 %v3321_v33, %v2548_v32  ;;  %v2553_v43 = vor.u32 %v3317_v34, %v2550_v35  ;;  %v2557_v44 = vor.u32 %v3322_v37, %v2556_v36  ;;  %v3499_v48 = vld [vmem:[%s4282_s1 + $0x1b0] sm:$0xff]  ;;  %v2580_v52 = vld [vmem:[%s3777_s27 + $0x40] sm:$0xf] }
  0x1b   : > { %1694 = vmatpush.bf16.msra.mxu2 %v3465_v14  ;;  %v2558_v39 = vld [vmem:[%s3777_s27 + $0x28] sm:$0xf0]  ;;  %v3483_v49 = vld [vmem:[%s4282_s1 + $0x130] sm:$0xff]  ;;  %v3329_v53 = vld [vmem:[%s3777_s27 + $0x5c] sm:$0xf0] }
  0x1c   : > { %1783 = vmatpush.bf16.msra.mxu3 %v3473_v15  ;;  %v2561_v45 = vor.u32 %v3318_v38, %v2558_v39  ;;  %v3507_v50 = vld [vmem:[%s4282_s1 + $0x1f0] sm:$0xff]  ;;  %v3325_v54 = vld [vmem:[%s3777_s27 + $0x44] sm:$0xf]  ;;  %v2588_v56 = vld [vmem:[%s3777_s27 + $0x48] sm:$0xf]  ;;  %v2581_v60 = vor.u32 %v3329_v53, %v2580_v52 }
  0x1d   : > { %1517 = vmatpush.bf16.msra.mxu0 %v3448_v16  ;;  %v3491_v51 = vld [vmem:[%s4282_s1 + $0x170] sm:$0xff]  ;;  %v2582_v55 = vld [vmem:[%s3777_s27 + $0x60] sm:$0xf0]  ;;  %v3330_v57 = vld [vmem:[%s3777_s27 + $0x64] sm:$0xf0] }
  0x1e   : > { %1606 = vmatpush.bf16.msra.mxu1 %v3456_v17  ;;  %v3326_v58 = vld [vmem:[%s3777_s27 + $0x4c] sm:$0xf]  ;;  %v2585_v61 = vor.u32 %v3325_v54, %v2582_v55  ;;  %v2589_v62 = vor.u32 %v3330_v57, %v2588_v56  ;;  %v2612_v0 = vld [vmem:[%s3777_s27 + $0x80] sm:$0xf]  ;;  %v3333_v2 = vld [vmem:[%s3777_s27 + $0x84] sm:$0xf] }
  0x1f   : > { %1695 = vmatpush.bf16.msra.mxu2 %v3464_v18  ;;  %v2590_v59 = vld [vmem:[%s3777_s27 + $0x68] sm:$0xf0]  ;;  %v3337_v1 = vld [vmem:[%s3777_s27 + $0x9c] sm:$0xf0]  ;;  %v2614_v3 = vld [vmem:[%s3777_s27 + $0xa0] sm:$0xf0] }
  0x20   : > { %1784 = vmatpush.bf16.msra.mxu3 %v3472_v19  ;;  %v2593_v63 = vor.u32 %v3326_v58, %v2590_v59  ;;  %v2620_v4 = vld [vmem:[%s3777_s27 + $0x88] sm:$0xf]  ;;  %v3334_v6 = vld [vmem:[%s3777_s27 + $0x8c] sm:$0xf]  ;;  %v2613_v8 = vor.u32 %v3337_v1, %v2612_v0  ;;  %v2617_v9 = vor.u32 %v3333_v2, %v2614_v3  ;;  %v2644_v16 = vld [vmem:[%s3777_s27 + $0xc0] sm:$0xf] }
  0x21   : > { %1518 = vmatpush.bf16.msra.mxu0 %v3447_v20  ;;  %v3338_v5 = vld [vmem:[%s3777_s27 + $0xa4] sm:$0xf0]  ;;  %v2622_v7 = vld [vmem:[%s3777_s27 + $0xa8] sm:$0xf0]  ;;  %v3345_v17 = vld [vmem:[%s3777_s27 + $0xdc] sm:$0xf0] }
  0x22   : > { %1607 = vmatpush.bf16.msra.mxu1 %v3455_v21  ;;  %v2621_v10 = vor.u32 %v3338_v5, %v2620_v4  ;;  %v2625_v11 = vor.u32 %v3334_v6, %v2622_v7  ;;  %v3498_v12 = vld [vmem:[%s4282_s1 + $0x1a8] sm:$0xff]  ;;  %v3341_v18 = vld [vmem:[%s3777_s27 + $0xc4] sm:$0xf]  ;;  %v2740_v56 = vld [vmem:[%s3777_s27 + $0x180] sm:$0xf] }
  0x23   : > { %1696 = vmatpush.bf16.msra.mxu2 %v3463_v22  ;;  %v3482_v13 = vld [vmem:[%s4282_s1 + $0x128] sm:$0xff]  ;;  %v2646_v19 = vld [vmem:[%s3777_s27 + $0xe0] sm:$0xf0]  ;;  %v3369_v57 = vld [vmem:[%s3777_s27 + $0x19c] sm:$0xf0] }
  0x24   : > { %1785 = vmatpush.bf16.msra.mxu3 %v3471_v23  ;;  %v3506_v14 = vld [vmem:[%s4282_s1 + $0x1e8] sm:$0xff]  ;;  %v3365_v58 = vld [vmem:[%s3777_s27 + $0x184] sm:$0xf]  ;;  %v2741_v0 = vor.u32 %v3369_v57, %v2740_v56  ;;  %v3496_v4 = vld [vmem:[%s4282_s1 + $0x198] sm:$0xff] }
  0x25   : > { %1519 = vmatpush.bf16.msra.mxu0 %v3446_v24  ;;  %v3490_v15 = vld [vmem:[%s4282_s1 + $0x168] sm:$0xff]  ;;  %v2645_v24 = vor.u32 %v3345_v17, %v2644_v16  ;;  %v2742_v59 = vld [vmem:[%s3777_s27 + $0x1a0] sm:$0xf0]  ;;  %v3480_v5 = vld [vmem:[%s4282_s1 + $0x118] sm:$0xff] }
  0x26   : > { %1608 = vmatpush.bf16.msra.mxu1 %v3454_v25  ;;  %v2652_v20 = vld [vmem:[%s3777_s27 + $0xc8] sm:$0xf]  ;;  %v3342_v22 = vld [vmem:[%s3777_s27 + $0xcc] sm:$0xf]  ;;  %v2649_v25 = vor.u32 %v3341_v18, %v2646_v19  ;;  %v2745_v1 = vor.u32 %v3365_v58, %v2742_v59  ;;  %v3504_v6 = vld [vmem:[%s4282_s1 + $0x1d8] sm:$0xff] }
  0x27   : > { %1697 = vmatpush.bf16.msra.mxu2 %v3462_v26  ;;  %v3346_v21 = vld [vmem:[%s3777_s27 + $0xe4] sm:$0xf0]  ;;  %v2654_v23 = vld [vmem:[%s3777_s27 + $0xe8] sm:$0xf0]  ;;  %v3488_v7 = vld [vmem:[%s4282_s1 + $0x158] sm:$0xff] }
  0x28   : > { %1786 = vmatpush.bf16.msra.mxu3 %v3470_v27  ;;  %v2653_v26 = vor.u32 %v3346_v21, %v2652_v20  ;;  %v2657_v27 = vor.u32 %v3342_v22, %v2654_v23  ;;  %v2684_v32 = vld [vmem:[%s3777_s27 + $0x108] sm:$0xf]  ;;  %v3350_v34 = vld [vmem:[%s3777_s27 + $0x10c] sm:$0xf]  ;;  %v2804_v20 = vld [vmem:[%s3777_s27 + $0x200] sm:$0xf] }
  0x29   : > { %1520 = vmatpush.bf16.msra.mxu0 %v3445_v28  ;;  %v2676_v28 = vld [vmem:[%s3777_s27 + $0x100] sm:$0xf]  ;;  %v3354_v33 = vld [vmem:[%s3777_s27 + $0x124] sm:$0xf0]  ;;  %v2686_v35 = vld [vmem:[%s3777_s27 + $0x128] sm:$0xf0] }
  0x2a   : > { %1609 = vmatpush.bf16.msra.mxu1 %v3453_v29  ;;  %v3353_v29 = vld [vmem:[%s3777_s27 + $0x11c] sm:$0xf0]  ;;  %v2685_v38 = vor.u32 %v3354_v33, %v2684_v32  ;;  %v2689_v39 = vor.u32 %v3350_v34, %v2686_v35  ;;  %v3381_v22 = vld [vmem:[%s3777_s27 + $0x204] sm:$0xf]  ;;  %v3495_v35 = vld [vmem:[%s4282_s1 + $0x190] sm:$0xff] }
  0x2b   : > { %1698 = vmatpush.bf16.msra.mxu2 %v3461_v30  ;;  %v3349_v30 = vld [vmem:[%s3777_s27 + $0x104] sm:$0xf]  ;;  %v2677_v36 = vor.u32 %v3353_v29, %v2676_v28  ;;  %v3385_v21 = vld [vmem:[%s3777_s27 + $0x21c] sm:$0xf0] }
  0x2c   : > { %1787 = vmatpush.bf16.msra.mxu3 %v3469_v31  ;;  %1521 = vmatmul.bf16.vlgmr.msra.gmra.mxu0 %v2549_v42  ;;  %v2678_v31 = vld [vmem:[%s3777_s27 + $0x120] sm:$0xf0]  ;;  %v2805_v28 = vor.u32 %v3385_v21, %v2804_v20 }
  0x2d   : > { %1869 = vmatpush.bf16.msrb.mxu0 %v3484_v41  ;;  %1610 = vmatmul.bf16.vlgmr.msra.gmra.mxu1 %v2553_v43  ;;  %v2681_v37 = vor.u32 %v3349_v30, %v2678_v31  ;;  %v3481_v41 = vld [vmem:[%s4282_s1 + $0x120] sm:$0xff] }
  0x2e   : > { %1699 = vmatmul.bf16.vlgmr.msra.gmra.mxu2 %v2557_v44  ;;  %1958 = vmatpush.bf16.msrb.mxu1 %v3492_v47  ;;  %v3505_v42 = vld [vmem:[%s4282_s1 + $0x1e0] sm:$0xff] }
  0x2f   : > { %2047 = vmatpush.bf16.msrb.mxu2 %v3500_v40  ;;  %1788 = vmatmul.bf16.vlgmr.msra.gmra.mxu3 %v2561_v45  ;;  %v3497_v40 = vld [vmem:[%s4282_s1 + $0x1a0] sm:$0xff] }
  0x30   : > { %2136 = vmatpush.bf16.msrb.mxu3 %v3508_v46  ;;  %v3489_v43 = vld [vmem:[%s4282_s1 + $0x160] sm:$0xff] }
  0x31   : > { %1870 = vmatpush.bf16.msrb.mxu0 %v3483_v49  ;;  %v2708_v44 = vld [vmem:[%s3777_s27 + $0x140] sm:$0xf]  ;;  %v3357_v46 = vld [vmem:[%s3777_s27 + $0x144] sm:$0xf]  ;;  %v3362_v49 = vld [vmem:[%s3777_s27 + $0x164] sm:$0xf0] }
  0x32   : > { %1959 = vmatpush.bf16.msrb.mxu1 %v3491_v51  ;;  %v3361_v45 = vld [vmem:[%s3777_s27 + $0x15c] sm:$0xf0]  ;;  %v2710_v47 = vld [vmem:[%s3777_s27 + $0x160] sm:$0xf0]  ;;  %v2718_v51 = vld [vmem:[%s3777_s27 + $0x168] sm:$0xf0] }
  0x33   : > { %2048 = vmatpush.bf16.msrb.mxu2 %v3499_v48  ;;  %v2716_v48 = vld [vmem:[%s3777_s27 + $0x148] sm:$0xf]  ;;  %v2709_v52 = vor.u32 %v3361_v45, %v2708_v44  ;;  %v2713_v53 = vor.u32 %v3357_v46, %v2710_v47  ;;  %v2806_v23 = vld [vmem:[%s3777_s27 + $0x220] sm:$0xf0]  ;;  %v3487_v45 = vld [vmem:[%s4282_s1 + $0x150] sm:$0xff] }
  0x34   : > { %2137 = vmatpush.bf16.msrb.mxu3 %v3507_v50  ;;  %v3358_v50 = vld [vmem:[%s3777_s27 + $0x14c] sm:$0xf]  ;;  %v2717_v54 = vor.u32 %v3362_v49, %v2716_v48  ;;  %v2809_v29 = vor.u32 %v3381_v22, %v2806_v23  ;;  %v2836_v46 = vld [vmem:[%s3777_s27 + $0x240] sm:$0xf]  ;;  %v3389_v48 = vld [vmem:[%s3777_s27 + $0x244] sm:$0xf] }
  0x35   : > { %1871 = vmatpush.bf16.msrb.mxu0 %v3482_v13  ;;  %v2721_v55 = vor.u32 %v3358_v50, %v2718_v51  ;;  %v3378_v13 = vld [vmem:[%s3777_s27 + $0x1e4] sm:$0xf0]  ;;  %v3393_v47 = vld [vmem:[%s3777_s27 + $0x25c] sm:$0xf0]  ;;  %v2838_v49 = vld [vmem:[%s3777_s27 + $0x260] sm:$0xf0] }
  0x36   : > { %1960 = vmatpush.bf16.msrb.mxu1 %v3490_v15  ;;  %v2782_v15 = vld [vmem:[%s3777_s27 + $0x1e8] sm:$0xf0]  ;;  %v2844_v50 = vld [vmem:[%s3777_s27 + $0x248] sm:$0xf]  ;;  %v2837_v56 = vor.u32 %v3393_v47, %v2836_v46  ;;  %v2841_v57 = vor.u32 %v3389_v48, %v2838_v49 }
  0x37   : > { %2049 = vmatpush.bf16.msrb.mxu2 %v3498_v12  ;;  %v2780_v12 = vld [vmem:[%s3777_s27 + $0x1c8] sm:$0xf]  ;;  %v2910_v46 = vld [vmem:[%s3777_s27 + $0x2e8] sm:$0xf0] }
  0x38   : > { %2138 = vmatpush.bf16.msrb.mxu3 %v3506_v14  ;;  %v3374_v14 = vld [vmem:[%s3777_s27 + $0x1cc] sm:$0xf]  ;;  %v2781_v18 = vor.u32 %v3378_v13, %v2780_v12  ;;  %v3394_v51 = vld [vmem:[%s3777_s27 + $0x264] sm:$0xf0] }
  0x39   : > { %1872 = vmatpush.bf16.msrb.mxu0 %v3481_v41  ;;  %v2785_v19 = vor.u32 %v3374_v14, %v2782_v15  ;;  %v2876_v12 = vld [vmem:[%s3777_s27 + $0x288] sm:$0xf]  ;;  %v3398_v14 = vld [vmem:[%s3777_s27 + $0x28c] sm:$0xf] }
  0x3a   : > { %1961 = vmatpush.bf16.msrb.mxu1 %v3489_v43  ;;  %v3402_v13 = vld [vmem:[%s3777_s27 + $0x2a4] sm:$0xf0]  ;;  %v2878_v15 = vld [vmem:[%s3777_s27 + $0x2a8] sm:$0xf0] }
  0x3b   : > { %2050 = vmatpush.bf16.msrb.mxu2 %v3497_v40  ;;  %v2877_v23 = vor.u32 %v3402_v13, %v2876_v12 }
  0x3c   : > { %1526 = vmatmul.bf16.gmra.mxu0 %v2581_v60  ;;  %2139 = vmatpush.bf16.msrb.mxu3 %v3505_v42  ;;  %v2748_v60 = vld [vmem:[%s3777_s27 + $0x188] sm:$0xf] }
  0x3d   : > { %1615 = vmatmul.bf16.gmra.mxu1 %v2585_v61  ;;  %v3370_v61 = vld [vmem:[%s3777_s27 + $0x1a4] sm:$0xf0]  ;;  %1873 = vmatpush.bf16.msrb.mxu0 %v3480_v5 }
  0x3e   : > { %1704 = vmatmul.bf16.gmra.mxu2 %v2589_v62  ;;  %v3366_v62 = vld [vmem:[%s3777_s27 + $0x18c] sm:$0xf]  ;;  %v2749_v2 = vor.u32 %v3370_v61, %v2748_v60  ;;  %1962 = vmatpush.bf16.msrb.mxu1 %v3488_v7  ;;  %v2845_v61 = vor.u32 %v3394_v51, %v2844_v50 }
  0x3f   : > { %1793 = vmatmul.bf16.gmra.mxu3 %v2593_v63  ;;  %v2750_v63 = vld [vmem:[%s3777_s27 + $0x1a8] sm:$0xf0]  ;;  %2051 = vmatpush.bf16.msrb.mxu2 %v3496_v4 }
  0x40   : > { %v2753_v3 = vor.u32 %v3366_v62, %v2750_v63  ;;  %2140 = vmatpush.bf16.msrb.mxu3 %v3504_v6 }
  0x42   : > { %1963 = vmatpush.bf16.msrb.mxu1 %v3487_v45  ;;  %v3406_v45 = vld [vmem:[%s3777_s27 + $0x2cc] sm:$0xf] }
  0x43   : > { %2052 = vmatpush.bf16.msrb.mxu2 %v3495_v35 }
  0x4c   : > { %1531 = vmatmul.bf16.gmra.mxu0 %v2613_v8  ;;  %v2772_v8 = vld [vmem:[%s3777_s27 + $0x1c0] sm:$0xf] }
  0x4d   : > { %1620 = vmatmul.bf16.gmra.mxu1 %v2617_v9  ;;  %v3377_v9 = vld [vmem:[%s3777_s27 + $0x1dc] sm:$0xf0] }
  0x4e   : > { %1709 = vmatmul.bf16.gmra.mxu2 %v2621_v10  ;;  %v3373_v10 = vld [vmem:[%s3777_s27 + $0x1c4] sm:$0xf]  ;;  %v2773_v16 = vor.u32 %v3377_v9, %v2772_v8  ;;  %v2868_v8 = vld [vmem:[%s3777_s27 + $0x280] sm:$0xf] }
  0x4f   : > { %1798 = vmatmul.bf16.gmra.mxu3 %v2625_v11  ;;  %v2774_v11 = vld [vmem:[%s3777_s27 + $0x1e0] sm:$0xf0]  ;;  %v3401_v9 = vld [vmem:[%s3777_s27 + $0x29c] sm:$0xf0] }
  0x50   : > { %v2777_v17 = vor.u32 %v3373_v10, %v2774_v11  ;;  %v3397_v10 = vld [vmem:[%s3777_s27 + $0x284] sm:$0xf] }
  0x51   : > { %v2870_v11 = vld [vmem:[%s3777_s27 + $0x2a0] sm:$0xf0] }
  0x5c   : > { %1536 = vmatmul.bf16.gmra.mxu0 %v2645_v24  ;;  %v2812_v24 = vld [vmem:[%s3777_s27 + $0x208] sm:$0xf] }
  0x5d   : > { %1625 = vmatmul.bf16.gmra.mxu1 %v2649_v25  ;;  %v3386_v25 = vld [vmem:[%s3777_s27 + $0x224] sm:$0xf0] }
  0x5e   : > { %1714 = vmatmul.bf16.gmra.mxu2 %v2653_v26  ;;  %v3382_v26 = vld [vmem:[%s3777_s27 + $0x20c] sm:$0xf]  ;;  %v2813_v32 = vor.u32 %v3386_v25, %v2812_v24  ;;  %v2881_v24 = vor.u32 %v3398_v14, %v2878_v15 }
  0x5f   : > { %1803 = vmatmul.bf16.gmra.mxu3 %v2657_v27  ;;  %v2814_v27 = vld [vmem:[%s3777_s27 + $0x228] sm:$0xf0] }
  0x60   : > { %v2817_v33 = vor.u32 %v3382_v26, %v2814_v27  ;;  %v3494_v27 = vld [vmem:[%s4282_s1 + $0x188] sm:$0xff] }
  0x61   : > { %2053 = vmatpush.bf16.msrb.mxu2 %v3494_v27 }
  0x6c   : > { %1541 = vmatmul.bf16.gmra.mxu0 %v2677_v36  ;;  %v3479_v36 = vld [vmem:[%s4282_s1 + $0x110] sm:$0xff] }
  0x6d   : > { %1630 = vmatmul.bf16.gmra.mxu1 %v2681_v37  ;;  %v3503_v37 = vld [vmem:[%s4282_s1 + $0x1d0] sm:$0xff]  ;;  %1874 = vmatpush.bf16.msrb.mxu0 %v3479_v36 }
  0x6e   : > { %1719 = vmatmul.bf16.gmra.mxu2 %v2685_v38  ;;  %2141 = vmatpush.bf16.msrb.mxu3 %v3503_v37  ;;  %v3486_v37 = vld [vmem:[%s4282_s1 + $0x148] sm:$0xff] }
  0x6f   : > { %1808 = vmatmul.bf16.gmra.mxu3 %v2689_v39  ;;  %1964 = vmatpush.bf16.msrb.mxu1 %v3486_v37  ;;  %v3421_v37 = vld [vmem:[%s3777_s27 + $0x344] sm:$0xf] }
  0x7c   : > { %1546 = vmatmul.bf16.gmra.mxu0 %v2709_v52  ;;  %v3390_v52 = vld [vmem:[%s3777_s27 + $0x24c] sm:$0xf] }
  0x7d   : > { %1635 = vmatmul.bf16.gmra.mxu1 %v2713_v53  ;;  %v2846_v53 = vld [vmem:[%s3777_s27 + $0x268] sm:$0xf0] }
  0x7e   : > { %1724 = vmatmul.bf16.gmra.mxu2 %v2717_v54  ;;  %v2849_v62 = vor.u32 %v3390_v52, %v2846_v53 }
  0x7f   : > { %1813 = vmatmul.bf16.gmra.mxu3 %v2721_v55 }
  0x8c   : > { %1551 = vmatmul.bf16.gmra.mxu0 %v2741_v0 }
  0x8d   : > { %1640 = vmatmul.bf16.gmra.mxu1 %v2745_v1 }
  0x8e   : > { %1729 = vmatmul.bf16.gmra.mxu2 %v2749_v2 }
  0x8f   : > { %1818 = vmatmul.bf16.gmra.mxu3 %v2753_v3 }
  0x9c   : > { %1556 = vmatmul.bf16.gmra.mxu0 %v2773_v16 }
  0x9d   : > { %1645 = vmatmul.bf16.gmra.mxu1 %v2777_v17 }
  0x9e   : > { %1734 = vmatmul.bf16.gmra.mxu2 %v2781_v18  ;;  %v2869_v18 = vor.u32 %v3401_v9, %v2868_v8  ;;  %v3418_v8 = vld [vmem:[%s3777_s27 + $0x324] sm:$0xf0]  ;;  %v3414_v9 = vld [vmem:[%s3777_s27 + $0x30c] sm:$0xf] }
  0x9f   : > { %1823 = vmatmul.bf16.gmra.mxu3 %v2785_v19  ;;  %v2873_v19 = vor.u32 %v3397_v10, %v2870_v11  ;;  %v2942_v10 = vld [vmem:[%s3777_s27 + $0x328] sm:$0xf0] }
  0xa9   : > { %v1522_v30 = vpop.f32.mrf.mxu0 }
  0xaa   : > { %v1611_v31 = vpop.f32.mrf.mxu1 }
  0xab   : > { %v1612_v34 = vadd.f32 %v1611_v31, %v1522_v30 }
  0xac   : > { %1561 = vmatmul.bf16.gmra.mxu0 %v2805_v28  ;;  %v3478_v28 = vld [vmem:[%s4282_s1 + $0x108] sm:$0xff] }
  0xad   : > { %1650 = vmatmul.bf16.gmra.mxu1 %v2809_v29  ;;  %v3502_v29 = vld [vmem:[%s4282_s1 + $0x1c8] sm:$0xff]  ;;  %1875 = vmatpush.bf16.msrb.mxu0 %v3478_v28 }
  0xae   : > { %1739 = vmatmul.bf16.gmra.mxu2 %v2813_v32  ;;  %2142 = vmatpush.bf16.msrb.mxu3 %v3502_v29 }
  0xaf   : > { %1828 = vmatmul.bf16.gmra.mxu3 %v2817_v33 }
  0xb1   : > { %v1700_v38 = vpop.f32.mrf.mxu2  ;;  %v1524_v41 = vpop.f32.mrf.mxu0 }
  0xb2   : > { %v1789_v39 = vpop.f32.mrf.mxu3  ;;  %v1701_v40 = vadd.f32 %v1700_v38, %v1612_v34  ;;  %v1613_v42 = vpop.f32.mrf.mxu1  ;;  %v2900_v38 = vld [vmem:[%s3777_s27 + $0x2c0] sm:$0xf] }
  0xb3   : > { %v1614_v43 = vadd.f32 %v1613_v42, %v1524_v41  ;;  %v2902_v41 = vld [vmem:[%s3777_s27 + $0x2e0] sm:$0xf0]  ;;  %v2908_v42 = vld [vmem:[%s3777_s27 + $0x2c8] sm:$0xf] }
  0xb4   : > { %v3938_v44 = vadd.f32 %v1789_v39, %v1701_v40  ;;  %v3409_v39 = vld [vmem:[%s3777_s27 + $0x2dc] sm:$0xf0]  ;;  %v3405_v40 = vld [vmem:[%s3777_s27 + $0x2c4] sm:$0xf] }
  0xb5   : > { %v2901_v49 = vor.u32 %v3409_v39, %v2900_v38  ;;  %v2905_v50 = vor.u32 %v3405_v40, %v2902_v41  ;;  %v2966_v38 = vld [vmem:[%s3777_s27 + $0x360] sm:$0xf0]  ;;  %v2972_v39 = vld [vmem:[%s3777_s27 + $0x348] sm:$0xf]  ;;  %v3422_v41 = vld [vmem:[%s3777_s27 + $0x34c] sm:$0xf] }
  0xb6   : > { %v3426_v40 = vld [vmem:[%s3777_s27 + $0x364] sm:$0xf0] }
  0xb9   : > { %v1702_v54 = vpop.f32.mrf.mxu2  ;;  %v1527_v59 = vpop.f32.mrf.mxu0 }
  0xba   : > { %v1791_v55 = vpop.f32.mrf.mxu3  ;;  %v1703_v58 = vadd.f32 %v1702_v54, %v1614_v43  ;;  %v1616_v60 = vpop.f32.mrf.mxu1  ;;  %v3410_v43 = vld [vmem:[%s3777_s27 + $0x2e4] sm:$0xf0] }
  0xbb   : > { %v1617_v63 = vadd.f32 %v1616_v60, %v1527_v59  ;;  %v2909_v54 = vor.u32 %v3410_v43, %v2908_v42  ;;  %v2974_v42 = vld [vmem:[%s3777_s27 + $0x368] sm:$0xf0] }
  0xbc   : > { %v3951_v0 = vadd.f32 %v1791_v55, %v1703_v58  ;;  %1566 = vmatmul.bf16.gmra.mxu0 %v2837_v56  ;;  %v2913_v55 = vor.u32 %v3406_v45, %v2910_v46 }
  0xbd   : > { %1655 = vmatmul.bf16.gmra.mxu1 %v2841_v57 }
  0xbe   : > { %1744 = vmatmul.bf16.gmra.mxu2 %v2845_v61 }
  0xbf   : > { %1833 = vmatmul.bf16.gmra.mxu3 %v2849_v62 }
  0xc1   : > { %v1705_v1 = vpop.f32.mrf.mxu2  ;;  %v1529_v4 = vpop.f32.mrf.mxu0 }
  0xc2   : > { %v1794_v2 = vpop.f32.mrf.mxu3  ;;  %v1706_v3 = vadd.f32 %v1705_v1, %v1617_v63  ;;  %v1618_v5 = vpop.f32.mrf.mxu1 }
  0xc3   : > { %v1619_v6 = vadd.f32 %v1618_v5, %v1529_v4  ;;  %v3413_v4 = vld [vmem:[%s3777_s27 + $0x304] sm:$0xf] }
  0xc4   : > { %v3953_v7 = vadd.f32 %v1794_v2, %v1706_v3  ;;  %v2932_v2 = vld [vmem:[%s3777_s27 + $0x300] sm:$0xf]  ;;  %v2934_v5 = vld [vmem:[%s3777_s27 + $0x320] sm:$0xf0] }
  0xc5   : > { %v3417_v3 = vld [vmem:[%s3777_s27 + $0x31c] sm:$0xf0]  ;;  %v2937_v14 = vor.u32 %v3413_v4, %v2934_v5  ;;  %v2998_v4 = vld [vmem:[%s3777_s27 + $0x3a0] sm:$0xf0]  ;;  %v3004_v5 = vld [vmem:[%s3777_s27 + $0x388] sm:$0xf] }
  0xc6   : > { %v2933_v13 = vor.u32 %v3417_v3, %v2932_v2  ;;  %v3433_v2 = vld [vmem:[%s3777_s27 + $0x39c] sm:$0xf0]  ;;  %v3429_v3 = vld [vmem:[%s3777_s27 + $0x384] sm:$0xf] }
  0xc9   : > { %v1707_v16 = vpop.f32.mrf.mxu2  ;;  %v1532_v21 = vpop.f32.mrf.mxu0 }
  0xca   : > { %v1796_v17 = vpop.f32.mrf.mxu3  ;;  %v1708_v20 = vadd.f32 %v1707_v16, %v1619_v6  ;;  %v1621_v22 = vpop.f32.mrf.mxu1  ;;  %v2940_v6 = vld [vmem:[%s3777_s27 + $0x308] sm:$0xf] }
  0xcb   : > { %v1622_v25 = vadd.f32 %v1621_v22, %v1532_v21  ;;  %v3493_v22 = vld [vmem:[%s4282_s1 + $0x180] sm:$0xff] }
  0xcc   : > { %v3963_v26 = vadd.f32 %v1796_v17, %v1708_v20  ;;  %1571 = vmatmul.bf16.gmra.mxu0 %v2869_v18  ;;  %v2941_v18 = vor.u32 %v3418_v8, %v2940_v6  ;;  %2054 = vmatpush.bf16.msrb.mxu2 %v3493_v22  ;;  %v3434_v6 = vld [vmem:[%s3777_s27 + $0x3a4] sm:$0xf0]  ;;  %v3430_v8 = vld [vmem:[%s3777_s27 + $0x38c] sm:$0xf] }
  0xcd   : > { %1660 = vmatmul.bf16.gmra.mxu1 %v2873_v19  ;;  %v2945_v19 = vor.u32 %v3414_v9, %v2942_v10  ;;  %v3006_v9 = vld [vmem:[%s3777_s27 + $0x3a8] sm:$0xf0] }
  0xce   : > { %1749 = vmatmul.bf16.gmra.mxu2 %v2877_v23  ;;  %v3477_v23 = vld [vmem:[%s4282_s1 + $0x100] sm:$0xff] }
  0xcf   : > { %1838 = vmatmul.bf16.gmra.mxu3 %v2881_v24  ;;  %v3501_v24 = vld [vmem:[%s4282_s1 + $0x1c0] sm:$0xff]  ;;  %1876 = vmatpush.bf16.msrb.mxu0 %v3477_v23 }
  0xd0   : > { %2143 = vmatpush.bf16.msrb.mxu3 %v3501_v24 }
  0xd1   : > { %v1710_v30 = vpop.f32.mrf.mxu2  ;;  %v1534_v33 = vpop.f32.mrf.mxu0 }
  0xd2   : > { %v1799_v31 = vpop.f32.mrf.mxu3  ;;  %v1711_v32 = vadd.f32 %v1710_v30, %v1622_v25  ;;  %v1623_v34 = vpop.f32.mrf.mxu1 }
  0xd3   : > { %v1624_v35 = vadd.f32 %v1623_v34, %v1534_v33  ;;  %v3485_v33 = vld [vmem:[%s4282_s1 + $0x140] sm:$0xff] }
  0xd4   : > { %v3974_v36 = vadd.f32 %v1799_v31, %v1711_v32  ;;  %v2964_v34 = vld [vmem:[%s3777_s27 + $0x340] sm:$0xf]  ;;  %1965 = vmatpush.bf16.msrb.mxu1 %v3485_v33  ;;  %v3437_v33 = vld [vmem:[%s3777_s27 + $0x3c4] sm:$0xf] }
  0xd9   : > { %v1712_v47 = vpop.f32.mrf.mxu2  ;;  %v1537_v52 = vpop.f32.mrf.mxu0 }
  0xda   : > { %v1801_v48 = vpop.f32.mrf.mxu3  ;;  %v1713_v51 = vadd.f32 %v1712_v47, %v1624_v35  ;;  %v1626_v53 = vpop.f32.mrf.mxu1  ;;  %v3425_v35 = vld [vmem:[%s3777_s27 + $0x35c] sm:$0xf0]  ;;  %v2969_v47 = vor.u32 %v3421_v37, %v2966_v38  ;;  %v3442_v37 = vld [vmem:[%s3777_s27 + $0x3e4] sm:$0xf0]  ;;  %v3438_v38 = vld [vmem:[%s3777_s27 + $0x3cc] sm:$0xf] }
  0xdb   : > { %v1627_v56 = vadd.f32 %v1626_v53, %v1537_v52  ;;  %v2965_v46 = vor.u32 %v3425_v35, %v2964_v34  ;;  %v2977_v52 = vor.u32 %v3422_v41, %v2974_v42  ;;  %v3030_v34 = vld [vmem:[%s3777_s27 + $0x3e0] sm:$0xf0]  ;;  %v3036_v35 = vld [vmem:[%s3777_s27 + $0x3c8] sm:$0xf] }
  0xdc   : > { %v3987_v57 = vadd.f32 %v1801_v48, %v1713_v51  ;;  %1576 = vmatmul.bf16.gmra.mxu0 %v2901_v49  ;;  %v2973_v51 = vor.u32 %v3426_v40, %v2972_v39  ;;  %v3038_v39 = vld [vmem:[%s3777_s27 + $0x3e8] sm:$0xf0] }
  0xdd   : > { %1665 = vmatmul.bf16.gmra.mxu1 %v2905_v50 }
  0xde   : > { %1754 = vmatmul.bf16.gmra.mxu2 %v2909_v54 }
  0xdf   : > { %1843 = vmatmul.bf16.gmra.mxu3 %v2913_v55 }
  0xe1   : > { %v1715_v58 = vpop.f32.mrf.mxu2  ;;  %v1539_v61 = vpop.f32.mrf.mxu0 }
  0xe2   : > { %v1804_v59 = vpop.f32.mrf.mxu3  ;;  %v1716_v60 = vadd.f32 %v1715_v58, %v1627_v56  ;;  %v1628_v62 = vpop.f32.mrf.mxu1 }
  0xe3   : > { %v1629_v63 = vadd.f32 %v1628_v62, %v1539_v61 }
  0xe4   : > { %v3989_v1 = vadd.f32 %v1804_v59, %v1716_v60 }
  0xe9   : > { %v1717_v11 = vpop.f32.mrf.mxu2  ;;  %v1542_v16 = vpop.f32.mrf.mxu0 }
  0xea   : > { %v1806_v12 = vpop.f32.mrf.mxu3  ;;  %v1718_v15 = vadd.f32 %v1717_v11, %v1629_v63  ;;  %v1631_v17 = vpop.f32.mrf.mxu1  ;;  %v2996_v63 = vld [vmem:[%s3777_s27 + $0x380] sm:$0xf] }
  0xeb   : > { %v1632_v20 = vadd.f32 %v1631_v17, %v1542_v16  ;;  %v3005_v17 = vor.u32 %v3434_v6, %v3004_v5  ;;  %v3324_v5 = vld [vmem:[%s3777_s27 + $0x34] sm:$0xf0]  ;;  %v3320_v6 = vld [vmem:[%s3777_s27 + $0x1c] sm:$0xf] }
  0xec   : > { %v3999_v21 = vadd.f32 %v1806_v12, %v1718_v15  ;;  %1581 = vmatmul.bf16.gmra.mxu0 %v2933_v13  ;;  %v2997_v12 = vor.u32 %v3433_v2, %v2996_v63  ;;  %v3001_v13 = vor.u32 %v3429_v3, %v2998_v4  ;;  %v3323_v63 = vld [vmem:[%s3777_s27 + $0x2c] sm:$0xf0]  ;;  %v3319_v2 = vld [vmem:[%s3777_s27 + $0x14] sm:$0xf]  ;;  %v2572_v4 = vld [vmem:[%s3777_s27 + $0x18] sm:$0xf] }
  0xed   : > { %1670 = vmatmul.bf16.gmra.mxu1 %v2937_v14  ;;  %v2566_v3 = vld [vmem:[%s3777_s27 + $0x30] sm:$0xf0] }
  0xee   : > { %1759 = vmatmul.bf16.gmra.mxu2 %v2941_v18  ;;  %v3009_v18 = vor.u32 %v3430_v8, %v3006_v9  ;;  %v2574_v8 = vld [vmem:[%s3777_s27 + $0x38] sm:$0xf0] }
  0xef   : > { %1848 = vmatmul.bf16.gmra.mxu3 %v2945_v19 }
  0xf1   : > { %v1720_v25 = vpop.f32.mrf.mxu2  ;;  %v1544_v29 = vpop.f32.mrf.mxu0 }
  0xf2   : > { %v1809_v27 = vpop.f32.mrf.mxu3  ;;  %v1721_v28 = vadd.f32 %v1720_v25, %v1632_v20  ;;  %v1633_v30 = vpop.f32.mrf.mxu1 }
  0xf3   : > { %v1634_v31 = vadd.f32 %v1633_v30, %v1544_v29  ;;  %v3028_v30 = vld [vmem:[%s3777_s27 + $0x3c0] sm:$0xf] }
  0xf4   : > { %v4010_v32 = vadd.f32 %v1809_v27, %v1721_v28 }
  0xf9   : > { %v1722_v43 = vpop.f32.mrf.mxu2  ;;  %v1547_v49 = vpop.f32.mrf.mxu0 }
  0xfa   : > { %v1811_v45 = vpop.f32.mrf.mxu3  ;;  %v1723_v48 = vadd.f32 %v1722_v43, %v1634_v31  ;;  %v1636_v50 = vpop.f32.mrf.mxu1  ;;  %v3441_v31 = vld [vmem:[%s3777_s27 + $0x3dc] sm:$0xf0]  ;;  %v3033_v43 = vor.u32 %v3437_v33, %v3030_v34  ;;  %v3331_v33 = vld [vmem:[%s3777_s27 + $0x6c] sm:$0xf0]  ;;  %v3327_v34 = vld [vmem:[%s3777_s27 + $0x54] sm:$0xf] }
  0xfb   : > { %v1637_v53 = vadd.f32 %v1636_v50, %v1547_v49  ;;  %v3029_v42 = vor.u32 %v3441_v31, %v3028_v30  ;;  %v3041_v49 = vor.u32 %v3438_v38, %v3038_v39  ;;  %v2596_v31 = vld [vmem:[%s3777_s27 + $0x50] sm:$0xf]  ;;  %v3332_v38 = vld [vmem:[%s3777_s27 + $0x74] sm:$0xf0]  ;;  %v3328_v39 = vld [vmem:[%s3777_s27 + $0x5c] sm:$0xf] }
  0xfc   : > { %v4023_v54 = vadd.f32 %v1811_v45, %v1723_v48  ;;  %1586 = vmatmul.bf16.gmra.mxu0 %v2965_v46  ;;  %v3037_v48 = vor.u32 %v3442_v37, %v3036_v35  ;;  %v2598_v35 = vld [vmem:[%s3777_s27 + $0x70] sm:$0xf0]  ;;  %v2604_v37 = vld [vmem:[%s3777_s27 + $0x58] sm:$0xf] }
  0xfd   : > { %1675 = vmatmul.bf16.gmra.mxu1 %v2969_v47 }
  0xfe   : > { %1764 = vmatmul.bf16.gmra.mxu2 %v2973_v51 }
  0xff   : > { %1853 = vmatmul.bf16.gmra.mxu3 %v2977_v52 }
 0x101   : > { %v1725_v55 = vpop.f32.mrf.mxu2  ;;  %v1549_v59 = vpop.f32.mrf.mxu0 }
 0x102   : > { %v1814_v56 = vpop.f32.mrf.mxu3  ;;  %v1726_v58 = vadd.f32 %v1725_v55, %v1637_v53  ;;  %v1638_v60 = vpop.f32.mrf.mxu1 }
 0x103   : > { %v1639_v61 = vadd.f32 %v1638_v60, %v1549_v59 }
 0x104   : > { %v4025_v62 = vadd.f32 %v1814_v56, %v1726_v58 }
 0x109   : > { %v1727_v10 = vpop.f32.mrf.mxu2  ;;  %v1552_v15 = vpop.f32.mrf.mxu0 }
 0x10a   : > { %v1816_v11 = vpop.f32.mrf.mxu3  ;;  %v1728_v14 = vadd.f32 %v1727_v10, %v1639_v61  ;;  %v1641_v16 = vpop.f32.mrf.mxu1  ;;  %v2564_v61 = vld [vmem:[%s3777_s27 + $0x10] sm:$0xf] }
 0x10b   : > { %v1642_v19 = vadd.f32 %v1641_v16, %v1552_v15  ;;  %v2573_v16 = vor.u32 %v3324_v5, %v2572_v4  ;;  %v3339_v4 = vld [vmem:[%s3777_s27 + $0xac] sm:$0xf0]  ;;  %v3335_v5 = vld [vmem:[%s3777_s27 + $0x94] sm:$0xf] }
 0x10c   : > { %v4035_v20 = vadd.f32 %v1816_v11, %v1728_v14  ;;  %1591 = vmatmul.bf16.gmra.mxu0 %v2997_v12  ;;  %v2565_v11 = vor.u32 %v3323_v63, %v2564_v61  ;;  %v2569_v12 = vor.u32 %v3319_v2, %v2566_v3  ;;  %v2628_v3 = vld [vmem:[%s3777_s27 + $0x90] sm:$0xf] }
 0x10d   : > { %1680 = vmatmul.bf16.gmra.mxu1 %v3001_v13 }
 0x10e   : > { %1769 = vmatmul.bf16.gmra.mxu2 %v3005_v17  ;;  %v2577_v17 = vor.u32 %v3320_v6, %v2574_v8  ;;  %v2630_v6 = vld [vmem:[%s3777_s27 + $0xb0] sm:$0xf0]  ;;  %v2636_v8 = vld [vmem:[%s3777_s27 + $0x98] sm:$0xf] }
 0x10f   : > { %1858 = vmatmul.bf16.gmra.mxu3 %v3009_v18 }
 0x111   : > { %v1730_v22 = vpop.f32.mrf.mxu2  ;;  %v1554_v25 = vpop.f32.mrf.mxu0 }
 0x112   : > { %v1819_v23 = vpop.f32.mrf.mxu3  ;;  %v1731_v24 = vadd.f32 %v1730_v22, %v1642_v19  ;;  %v1643_v27 = vpop.f32.mrf.mxu1 }
 0x113   : > { %v1644_v28 = vadd.f32 %v1643_v27, %v1554_v25 }
 0x114   : > { %v4037_v29 = vadd.f32 %v1819_v23, %v1731_v24 }
 0x119   : > { %v1732_v40 = vpop.f32.mrf.mxu2  ;;  %v1557_v46 = vpop.f32.mrf.mxu0 }
 0x11a   : > { %v1821_v41 = vpop.f32.mrf.mxu3  ;;  %v1733_v45 = vadd.f32 %v1732_v40, %v1644_v28  ;;  %v1646_v47 = vpop.f32.mrf.mxu1  ;;  %v2606_v40 = vld [vmem:[%s3777_s27 + $0x78] sm:$0xf0] }
 0x11b   : > { %v1647_v50 = vadd.f32 %v1646_v47, %v1557_v46 }
 0x11c   : > { %v4047_v51 = vadd.f32 %v1821_v41, %v1733_v45  ;;  %1596 = vmatmul.bf16.gmra.mxu0 %v3029_v42  ;;  %v2601_v45 = vor.u32 %v3327_v34, %v2598_v35 }
 0x11d   : > { %1685 = vmatmul.bf16.gmra.mxu1 %v3033_v43  ;;  %v2597_v43 = vor.u32 %v3331_v33, %v2596_v31 }
 0x11e   : > { %1774 = vmatmul.bf16.gmra.mxu2 %v3037_v48 }
 0x11f   : > { %1863 = vmatmul.bf16.gmra.mxu3 %v3041_v49  ;;  %v2605_v49 = vor.u32 %v3332_v38, %v2604_v37  ;;  %v2660_v38 = vld [vmem:[%s3777_s27 + $0xd0] sm:$0xf] }
 0x121   : > { %v1735_v52 = vpop.f32.mrf.mxu2  ;;  %v1559_v56 = vpop.f32.mrf.mxu0 }
 0x122   : > { %v1824_v53 = vpop.f32.mrf.mxu3  ;;  %v1736_v55 = vadd.f32 %v1735_v52, %v1647_v50  ;;  %v1648_v58 = vpop.f32.mrf.mxu1  ;;  %v2609_v50 = vor.u32 %v3328_v39, %v2606_v40  ;;  %v3347_v39 = vld [vmem:[%s3777_s27 + $0xec] sm:$0xf0]  ;;  %v3343_v40 = vld [vmem:[%s3777_s27 + $0xd4] sm:$0xf] }
 0x123   : > { %v1649_v59 = vadd.f32 %v1648_v58, %v1559_v56 }
 0x124   : > { %v4049_v60 = vadd.f32 %v1824_v53, %v1736_v55 }
 0x129   : > { %v1737_v9 = vpop.f32.mrf.mxu2  ;;  %v1562_v14 = vpop.f32.mrf.mxu0 }
 0x12a   : > { %v1826_v10 = vpop.f32.mrf.mxu3  ;;  %v1738_v13 = vadd.f32 %v1737_v9, %v1649_v59  ;;  %v1651_v15 = vpop.f32.mrf.mxu1  ;;  %v3340_v9 = vld [vmem:[%s3777_s27 + $0xb4] sm:$0xf0] }
 0x12b   : > { %v1652_v18 = vadd.f32 %v1651_v15, %v1562_v14  ;;  %v2629_v14 = vor.u32 %v3339_v4, %v2628_v3  ;;  %v2633_v15 = vor.u32 %v3335_v5, %v2630_v6 }
 0x12c   : > { %v4059_v19 = vadd.f32 %v1826_v10, %v1738_v13  ;;  %1877 = vmatmul.bf16.vlgmr.msrb.gmra.mxu0 %v2565_v11  ;;  %v3336_v10 = vld [vmem:[%s3777_s27 + $0x9c] sm:$0xf] }
 0x12d   : > { %1966 = vmatmul.bf16.vlgmr.msrb.gmra.mxu1 %v2569_v12  ;;  %v2638_v11 = vld [vmem:[%s3777_s27 + $0xb8] sm:$0xf0] }
 0x12e   : > { %2055 = vmatmul.bf16.vlgmr.msrb.gmra.mxu2 %v2573_v16 }
 0x12f   : > { %2144 = vmatmul.bf16.vlgmr.msrb.gmra.mxu3 %v2577_v17 }
 0x131   : > { %v1740_v22 = vpop.f32.mrf.mxu2  ;;  %v1564_v25 = vpop.f32.mrf.mxu0 }
 0x132   : > { %v1829_v23 = vpop.f32.mrf.mxu3  ;;  %v1741_v24 = vadd.f32 %v1740_v22, %v1652_v18  ;;  %v1653_v27 = vpop.f32.mrf.mxu1  ;;  %v2637_v22 = vor.u32 %v3340_v9, %v2636_v8 }
 0x133   : > { %v1654_v28 = vadd.f32 %v1653_v27, %v1564_v25 }
 0x134   : > { %v4061_v30 = vadd.f32 %v1829_v23, %v1741_v24  ;;  %v2641_v23 = vor.u32 %v3336_v10, %v2638_v11  ;;  %v2692_v11 = vld [vmem:[%s3777_s27 + $0x110] sm:$0xf] }
 0x139   : > { %v1742_v41 = vpop.f32.mrf.mxu2  ;;  %v1567_v47 = vpop.f32.mrf.mxu0 }
 0x13a   : > { %v1831_v42 = vpop.f32.mrf.mxu3  ;;  %v1743_v46 = vadd.f32 %v1742_v41, %v1654_v28  ;;  %v1656_v48 = vpop.f32.mrf.mxu1  ;;  %v2662_v41 = vld [vmem:[%s3777_s27 + $0xf0] sm:$0xf0] }
 0x13b   : > { %v1657_v52 = vadd.f32 %v1656_v48, %v1567_v47 }
 0x13c   : > { %v4071_v53 = vadd.f32 %v1831_v42, %v1743_v46  ;;  %1882 = vmatmul.bf16.gmra.mxu0 %v2597_v43  ;;  %v2668_v42 = vld [vmem:[%s3777_s27 + $0xd8] sm:$0xf]  ;;  %v2670_v46 = vld [vmem:[%s3777_s27 + $0xf8] sm:$0xf0] }
 0x13d   : > { %1971 = vmatmul.bf16.gmra.mxu1 %v2601_v45  ;;  %v3348_v43 = vld [vmem:[%s3777_s27 + $0xf4] sm:$0xf0]  ;;  %v3344_v45 = vld [vmem:[%s3777_s27 + $0xdc] sm:$0xf] }
 0x13e   : > { %2060 = vmatmul.bf16.gmra.mxu2 %v2605_v49  ;;  %v2661_v49 = vor.u32 %v3347_v39, %v2660_v38 }
 0x13f   : > { %2149 = vmatmul.bf16.gmra.mxu3 %v2609_v50  ;;  %v2665_v50 = vor.u32 %v3343_v40, %v2662_v41 }
 0x141   : > { %v1745_v55 = vpop.f32.mrf.mxu2  ;;  %v1569_v59 = vpop.f32.mrf.mxu0 }
 0x142   : > { %v1834_v56 = vpop.f32.mrf.mxu3  ;;  %v1746_v58 = vadd.f32 %v1745_v55, %v1657_v52  ;;  %v1658_v61 = vpop.f32.mrf.mxu1 }
 0x143   : > { %v1659_v63 = vadd.f32 %v1658_v61, %v1569_v59  ;;  %v2673_v59 = vor.u32 %v3344_v45, %v2670_v46 }
 0x144   : > { %v4073_v2 = vadd.f32 %v1834_v56, %v1746_v58  ;;  %v2669_v58 = vor.u32 %v3348_v43, %v2668_v42 }
 0x149   : > { %v1747_v12 = vpop.f32.mrf.mxu2  ;;  %v1572_v17 = vpop.f32.mrf.mxu0 }
 0x14a   : > { %v1836_v13 = vpop.f32.mrf.mxu3  ;;  %v1748_v16 = vadd.f32 %v1747_v12, %v1659_v63  ;;  %v1661_v18 = vpop.f32.mrf.mxu1  ;;  %v3355_v12 = vld [vmem:[%s3777_s27 + $0x12c] sm:$0xf0] }
 0x14b   : > { %v1662_v24 = vadd.f32 %v1661_v18, %v1572_v17  ;;  %v3352_v17 = vld [vmem:[%s3777_s27 + $0x11c] sm:$0xf] }
 0x14c   : > { %v4083_v25 = vadd.f32 %v1836_v13, %v1748_v16  ;;  %1887 = vmatmul.bf16.gmra.mxu0 %v2629_v14  ;;  %v3351_v13 = vld [vmem:[%s3777_s27 + $0x114] sm:$0xf]  ;;  %v3356_v16 = vld [vmem:[%s3777_s27 + $0x134] sm:$0xf0]  ;;  %v2702_v18 = vld [vmem:[%s3777_s27 + $0x138] sm:$0xf0] }
 0x14d   : > { %1976 = vmatmul.bf16.gmra.mxu1 %v2633_v15  ;;  %v2694_v14 = vld [vmem:[%s3777_s27 + $0x130] sm:$0xf0]  ;;  %v2700_v15 = vld [vmem:[%s3777_s27 + $0x118] sm:$0xf] }
 0x14e   : > { %2065 = vmatmul.bf16.gmra.mxu2 %v2637_v22 }
 0x14f   : > { %2154 = vmatmul.bf16.gmra.mxu3 %v2641_v23 }
 0x151   : > { %v1750_v27 = vpop.f32.mrf.mxu2  ;;  %v1574_v33 = vpop.f32.mrf.mxu0 }
 0x152   : > { %v1839_v28 = vpop.f32.mrf.mxu3  ;;  %v1751_v31 = vadd.f32 %v1750_v27, %v1662_v24  ;;  %v1663_v34 = vpop.f32.mrf.mxu1  ;;  %v2693_v24 = vor.u32 %v3355_v12, %v2692_v11  ;;  %v2697_v27 = vor.u32 %v3351_v13, %v2694_v14 }
 0x153   : > { %v1664_v35 = vadd.f32 %v1663_v34, %v1574_v33  ;;  %v2701_v34 = vor.u32 %v3356_v16, %v2700_v15 }
 0x154   : > { %v4085_v37 = vadd.f32 %v1839_v28, %v1751_v31 }
 0x159   : > { %v1752_v47 = vpop.f32.mrf.mxu2  ;;  %v1577_v55 = vpop.f32.mrf.mxu0 }
 0x15a   : > { %v1841_v48 = vpop.f32.mrf.mxu3  ;;  %v1753_v52 = vadd.f32 %v1752_v47, %v1664_v35  ;;  %v1666_v56 = vpop.f32.mrf.mxu1  ;;  %v2705_v35 = vor.u32 %v3352_v17, %v2702_v18 }
 0x15b   : > { %v1667_v61 = vadd.f32 %v1666_v56, %v1577_v55  ;;  %v2732_v55 = vld [vmem:[%s3777_s27 + $0x158] sm:$0xf] }
 0x15c   : > { %v4095_v63 = vadd.f32 %v1841_v48, %v1753_v52  ;;  %1892 = vmatmul.bf16.gmra.mxu0 %v2661_v49  ;;  %v2724_v48 = vld [vmem:[%s3777_s27 + $0x150] sm:$0xf]  ;;  %v2726_v52 = vld [vmem:[%s3777_s27 + $0x170] sm:$0xf0]  ;;  %v3364_v56 = vld [vmem:[%s3777_s27 + $0x174] sm:$0xf0] }
 0x15d   : > { %1981 = vmatmul.bf16.gmra.mxu1 %v2665_v50  ;;  %v3363_v49 = vld [vmem:[%s3777_s27 + $0x16c] sm:$0xf0]  ;;  %v3359_v50 = vld [vmem:[%s3777_s27 + $0x154] sm:$0xf]  ;;  %v2733_v11 = vor.u32 %v3364_v56, %v2732_v55 }
 0x15e   : > { %2070 = vmatmul.bf16.gmra.mxu2 %v2669_v58  ;;  %v3360_v58 = vld [vmem:[%s3777_s27 + $0x15c] sm:$0xf] }
 0x15f   : > { %2159 = vmatmul.bf16.gmra.mxu3 %v2673_v59  ;;  %v2734_v59 = vld [vmem:[%s3777_s27 + $0x178] sm:$0xf0] }
 0x160   : > { %v2737_v12 = vor.u32 %v3360_v58, %v2734_v59 }
 0x161   : > { %v1755_v3 = vpop.f32.mrf.mxu2  ;;  %v1579_v6 = vpop.f32.mrf.mxu0 }
 0x162   : > { %v1844_v4 = vpop.f32.mrf.mxu3  ;;  %v1756_v5 = vadd.f32 %v1755_v3, %v1667_v61  ;;  %v1668_v8 = vpop.f32.mrf.mxu1 }
 0x163   : > { %v1669_v9 = vadd.f32 %v1668_v8, %v1579_v6 }
 0x164   : > { %v4097_v10 = vadd.f32 %v1844_v4, %v1756_v5  ;;  %v2725_v4 = vor.u32 %v3363_v49, %v2724_v48  ;;  %v2729_v5 = vor.u32 %v3359_v50, %v2726_v52 }
 0x169   : > { %v1757_v22 = vpop.f32.mrf.mxu2  ;;  %v1582_v31 = vpop.f32.mrf.mxu0 }
 0x16a   : > { %v1846_v23 = vpop.f32.mrf.mxu3  ;;  %v1758_v28 = vadd.f32 %v1757_v22, %v1669_v9  ;;  %v1671_v33 = vpop.f32.mrf.mxu1 }
 0x16b   : > { %v1672_v38 = vadd.f32 %v1671_v33, %v1582_v31  ;;  %v3367_v31 = vld [vmem:[%s3777_s27 + $0x194] sm:$0xf] }
 0x16c   : > { %v4107_v39 = vadd.f32 %v1846_v23, %v1758_v28  ;;  %1897 = vmatmul.bf16.gmra.mxu0 %v2693_v24  ;;  %v3371_v28 = vld [vmem:[%s3777_s27 + $0x1ac] sm:$0xf0]  ;;  %v2758_v33 = vld [vmem:[%s3777_s27 + $0x1b0] sm:$0xf0] }
 0x16d   : > { %1986 = vmatmul.bf16.gmra.mxu1 %v2697_v27  ;;  %v2756_v27 = vld [vmem:[%s3777_s27 + $0x190] sm:$0xf] }
 0x16e   : > { %2075 = vmatmul.bf16.gmra.mxu2 %v2701_v34  ;;  %v2764_v34 = vld [vmem:[%s3777_s27 + $0x198] sm:$0xf] }
 0x16f   : > { %2164 = vmatmul.bf16.gmra.mxu3 %v2705_v35  ;;  %v3372_v35 = vld [vmem:[%s3777_s27 + $0x1b4] sm:$0xf0] }
 0x170   : > { %v2765_v50 = vor.u32 %v3372_v35, %v2764_v34 }
 0x171   : > { %v1760_v40 = vpop.f32.mrf.mxu2  ;;  %v1584_v43 = vpop.f32.mrf.mxu0 }
 0x172   : > { %v1849_v41 = vpop.f32.mrf.mxu3  ;;  %v1761_v42 = vadd.f32 %v1760_v40, %v1672_v38  ;;  %v1673_v45 = vpop.f32.mrf.mxu1  ;;  %v3368_v38 = vld [vmem:[%s3777_s27 + $0x19c] sm:$0xf] }
 0x173   : > { %v1674_v46 = vadd.f32 %v1673_v45, %v1584_v43  ;;  %v2766_v40 = vld [vmem:[%s3777_s27 + $0x1b8] sm:$0xf0]  ;;  %v2757_v43 = vor.u32 %v3371_v28, %v2756_v27  ;;  %v2761_v45 = vor.u32 %v3367_v31, %v2758_v33 }
 0x174   : > { %v4109_v47 = vadd.f32 %v1849_v41, %v1761_v42  ;;  %v2769_v52 = vor.u32 %v3368_v38, %v2766_v40 }
 0x179   : > { %v1762_v61 = vpop.f32.mrf.mxu2  ;;  %v1587_v8 = vpop.f32.mrf.mxu0 }
 0x17a   : > { %v1851_v3 = vpop.f32.mrf.mxu3  ;;  %v1763_v6 = vadd.f32 %v1762_v61, %v1674_v46  ;;  %v1676_v9 = vpop.f32.mrf.mxu1 }
 0x17b   : > { %v1677_v13 = vadd.f32 %v1676_v9, %v1587_v8  ;;  %v2788_v8 = vld [vmem:[%s3777_s27 + $0x1d0] sm:$0xf] }
 0x17c   : > { %v4119_v14 = vadd.f32 %v1851_v3, %v1763_v6  ;;  %1902 = vmatmul.bf16.gmra.mxu0 %v2725_v4  ;;  %v3379_v9 = vld [vmem:[%s3777_s27 + $0x1ec] sm:$0xf0] }
 0x17d   : > { %1991 = vmatmul.bf16.gmra.mxu1 %v2729_v5 }
 0x17e   : > { %2080 = vmatmul.bf16.gmra.mxu2 %v2733_v11  ;;  %v3375_v11 = vld [vmem:[%s3777_s27 + $0x1d4] sm:$0xf] }
 0x17f   : > { %2169 = vmatmul.bf16.gmra.mxu3 %v2737_v12  ;;  %v2790_v12 = vld [vmem:[%s3777_s27 + $0x1f0] sm:$0xf0] }
 0x180   : > { %v2793_v27 = vor.u32 %v3375_v11, %v2790_v12 }
 0x181   : > { %v1765_v15 = vpop.f32.mrf.mxu2  ;;  %v1589_v18 = vpop.f32.mrf.mxu0 }
 0x182   : > { %v1854_v16 = vpop.f32.mrf.mxu3  ;;  %v1766_v17 = vadd.f32 %v1765_v15, %v1677_v13  ;;  %v1678_v22 = vpop.f32.mrf.mxu1  ;;  %v2796_v13 = vld [vmem:[%s3777_s27 + $0x1d8] sm:$0xf] }
 0x183   : > { %v1679_v23 = vadd.f32 %v1678_v22, %v1589_v18  ;;  %v3380_v15 = vld [vmem:[%s3777_s27 + $0x1f4] sm:$0xf0] }
 0x184   : > { %v4121_v24 = vadd.f32 %v1854_v16, %v1766_v17  ;;  %v3376_v16 = vld [vmem:[%s3777_s27 + $0x1dc] sm:$0xf]  ;;  %v2797_v34 = vor.u32 %v3380_v15, %v2796_v13 }
 0x185   : > { %v2798_v17 = vld [vmem:[%s3777_s27 + $0x1f8] sm:$0xf0] }
 0x186   : > { %v2801_v35 = vor.u32 %v3376_v16, %v2798_v17 }
 0x189   : > { %v1767_v41 = vpop.f32.mrf.mxu2  ;;  %v1592_v48 = vpop.f32.mrf.mxu0 }
 0x18a   : > { %v1856_v42 = vpop.f32.mrf.mxu3  ;;  %v1768_v46 = vadd.f32 %v1767_v41, %v1679_v23  ;;  %v1681_v49 = vpop.f32.mrf.mxu1  ;;  %v2789_v23 = vor.u32 %v3379_v9, %v2788_v8 }
 0x18b   : > { %v1682_v55 = vadd.f32 %v1681_v49, %v1592_v48 }
 0x18c   : > { %v4131_v56 = vadd.f32 %v1856_v42, %v1768_v46  ;;  %1907 = vmatmul.bf16.gmra.mxu0 %v2757_v43 }
 0x18d   : > { %1996 = vmatmul.bf16.gmra.mxu1 %v2761_v45 }
 0x18e   : > { %2085 = vmatmul.bf16.gmra.mxu2 %v2765_v50  ;;  %v2820_v50 = vld [vmem:[%s3777_s27 + $0x210] sm:$0xf] }
 0x18f   : > { %2174 = vmatmul.bf16.gmra.mxu3 %v2769_v52  ;;  %v3387_v52 = vld [vmem:[%s3777_s27 + $0x22c] sm:$0xf0] }
 0x190   : > { %v2821_v9 = vor.u32 %v3387_v52, %v2820_v50  ;;  %v2862_v50 = vld [vmem:[%s3777_s27 + $0x278] sm:$0xf0] }
 0x191   : > { %v1770_v58 = vpop.f32.mrf.mxu2  ;;  %v1594_v3 = vpop.f32.mrf.mxu0 }
 0x192   : > { %v1859_v59 = vpop.f32.mrf.mxu3  ;;  %v1771_v61 = vadd.f32 %v1770_v58, %v1682_v55  ;;  %v1683_v4 = vpop.f32.mrf.mxu1  ;;  %v3383_v55 = vld [vmem:[%s3777_s27 + $0x214] sm:$0xf] }
 0x193   : > { %v1684_v5 = vadd.f32 %v1683_v4, %v1594_v3  ;;  %v2822_v58 = vld [vmem:[%s3777_s27 + $0x230] sm:$0xf0]  ;;  %v3384_v3 = vld [vmem:[%s3777_s27 + $0x21c] sm:$0xf] }
 0x194   : > { %v4133_v6 = vadd.f32 %v1859_v59, %v1771_v61  ;;  %v2828_v59 = vld [vmem:[%s3777_s27 + $0x218] sm:$0xf]  ;;  %v2830_v4 = vld [vmem:[%s3777_s27 + $0x238] sm:$0xf0]  ;;  %v2825_v11 = vor.u32 %v3383_v55, %v2822_v58 }
 0x195   : > { %v3388_v61 = vld [vmem:[%s3777_s27 + $0x234] sm:$0xf0]  ;;  %v2833_v17 = vor.u32 %v3384_v3, %v2830_v4 }
 0x196   : > { %v2829_v16 = vor.u32 %v3388_v61, %v2828_v59 }
 0x199   : > { %v1772_v18 = vpop.f32.mrf.mxu2  ;;  %v1597_v31 = vpop.f32.mrf.mxu0 }
 0x19a   : > { %v1861_v22 = vpop.f32.mrf.mxu3  ;;  %v1773_v28 = vadd.f32 %v1772_v18, %v1684_v5  ;;  %v1686_v33 = vpop.f32.mrf.mxu1 }
 0x19b   : > { %v1687_v38 = vadd.f32 %v1686_v33, %v1597_v31 }
 0x19c   : > { %v4143_v40 = vadd.f32 %v1861_v22, %v1773_v28  ;;  %1912 = vmatmul.bf16.gmra.mxu0 %v2789_v23 }
 0x19d   : > { %2001 = vmatmul.bf16.gmra.mxu1 %v2793_v27 }
 0x19e   : > { %2090 = vmatmul.bf16.gmra.mxu2 %v2797_v34 }
 0x19f   : > { %2179 = vmatmul.bf16.gmra.mxu3 %v2801_v35 }
 0x1a1   : > { %v1775_v41 = vpop.f32.mrf.mxu2  ;;  %v1599_v45 = vpop.f32.mrf.mxu0 }
 0x1a2   : > { %v1864_v42 = vpop.f32.mrf.mxu3  ;;  %v1776_v43 = vadd.f32 %v1775_v41, %v1687_v38  ;;  %v1688_v46 = vpop.f32.mrf.mxu1  ;;  %v2852_v38 = vld [vmem:[%s3777_s27 + $0x250] sm:$0xf] }
 0x1a3   : > { %v1689_v48 = vadd.f32 %v1688_v46, %v1599_v45  ;;  %v3395_v41 = vld [vmem:[%s3777_s27 + $0x26c] sm:$0xf0]  ;;  %v2860_v45 = vld [vmem:[%s3777_s27 + $0x258] sm:$0xf] }
 0x1a4   : > { %v4145_v49 = vadd.f32 %v1864_v42, %v1776_v43  ;;  %v3391_v42 = vld [vmem:[%s3777_s27 + $0x254] sm:$0xf]  ;;  %v3396_v46 = vld [vmem:[%s3777_s27 + $0x274] sm:$0xf0]  ;;  %v2853_v59 = vor.u32 %v3395_v41, %v2852_v38  ;;  %v3403_v38 = vld [vmem:[%s3777_s27 + $0x2ac] sm:$0xf0] }
 0x1a5   : > { %v2854_v43 = vld [vmem:[%s3777_s27 + $0x270] sm:$0xf0] }
 0x1a6   : > { %v2857_v61 = vor.u32 %v3391_v42, %v2854_v43  ;;  %v3399_v43 = vld [vmem:[%s3777_s27 + $0x294] sm:$0xf] }
 0x1a9   : > { %v1777_v5 = vpop.f32.mrf.mxu2  ;;  %v1878_v13 = vpop.f32.mrf.mxu0 }
 0x1aa   : > { %v1866_v8 = vpop.f32.mrf.mxu3  ;;  %v1778_v12 = vadd.f32 %v1777_v5, %v1689_v48  ;;  %v1967_v15 = vpop.f32.mrf.mxu1  ;;  %v1879_v22 = vadd.f32 %v1878_v13, %v3938_v44  ;;  %v3392_v48 = vld [vmem:[%s3777_s27 + $0x25c] sm:$0xf]  ;;  %v2861_v5 = vor.u32 %v3396_v46, %v2860_v45  ;;  %v2886_v45 = vld [vmem:[%s3777_s27 + $0x2b0] sm:$0xf0]  ;;  %v2892_v46 = vld [vmem:[%s3777_s27 + $0x298] sm:$0xf] }
 0x1ac   : > { %v4155_v18 = vadd.f32 %v1866_v8, %v1778_v12  ;;  %1917 = vmatmul.bf16.gmra.mxu0 %v2821_v9  ;;  %v1968_v33 = vadd.f32 %v1967_v15, %v1879_v22  ;;  %v2865_v8 = vor.u32 %v3392_v48, %v2862_v50  ;;  %v3404_v48 = vld [vmem:[%s3777_s27 + $0x2b4] sm:$0xf0]  ;;  %v3400_v50 = vld [vmem:[%s3777_s27 + $0x29c] sm:$0xf] }
 0x1ad   : > { %2006 = vmatmul.bf16.gmra.mxu1 %v2825_v11 }
 0x1ae   : > { %2095 = vmatmul.bf16.gmra.mxu2 %v2829_v16 }
 0x1af   : > { %2184 = vmatmul.bf16.gmra.mxu3 %v2833_v17 }
 0x1b1   : > { %v2056_v23 = vpop.f32.mrf.mxu2  ;;  %v1880_v28 = vpop.f32.mrf.mxu0 }
 0x1b2   : > { %v2145_v27 = vpop.f32.mrf.mxu3  ;;  %v1969_v31 = vpop.f32.mrf.mxu1  ;;  %v1881_v34 = vadd.f32 %v1880_v28, %v3951_v0  ;;  %v2057_v35 = vadd.f32 %v2056_v23, %v1968_v33 }
 0x1b4   : > { %v1970_v52 = vadd.f32 %v1969_v31, %v1881_v34  ;;  %v2146_v55 = vadd.f32 %v2145_v27, %v2057_v35  ;;  %v2884_v35 = vld [vmem:[%s3777_s27 + $0x290] sm:$0xf] }
 0x1b6   : > { %v2262_v12 = vmul.f32 %v2146_v55, %v2146_v55 }
 0x1b9   : > { %v2058_v44 = vpop.f32.mrf.mxu2  ;;  %v1883_v4 = vpop.f32.mrf.mxu0 }
 0x1ba   : > { %v2147_v58 = vpop.f32.mrf.mxu3  ;;  %v2059_v3 = vadd.f32 %v2058_v44, %v1970_v52  ;;  %v1972_v0 = vpop.f32.mrf.mxu1  ;;  %v1884_v11 = vadd.f32 %v1883_v4, %v3953_v7  ;;  %v2894_v52 = vld [vmem:[%s3777_s27 + $0x2b8] sm:$0xf0] }
 0x1bc   : > { %v2148_v9 = vadd.f32 %v2147_v58, %v2059_v3  ;;  %1922 = vmatmul.bf16.gmra.mxu0 %v2853_v59  ;;  %v1973_v7 = vadd.f32 %v1972_v0, %v1884_v11  ;;  %v2889_v3 = vor.u32 %v3399_v43, %v2886_v45  ;;  %v2924_v43 = vld [vmem:[%s3777_s27 + $0x2d8] sm:$0xf] }
 0x1bd   : > { %2011 = vmatmul.bf16.gmra.mxu1 %v2857_v61  ;;  %v2885_v61 = vor.u32 %v3403_v38, %v2884_v35  ;;  %v3412_v45 = vld [vmem:[%s3777_s27 + $0x2f4] sm:$0xf0] }
 0x1be   : > { %v2225_v13 = vadd.f32 %v2148_v9, %v2146_v55  ;;  %v2263_v15 = vmul.f32 %v2148_v9, %v2148_v9  ;;  %v3512_v16 = vpack.c.bf16 %v2148_v9, %v2146_v55  ;;  %2100 = vmatmul.bf16.gmra.mxu2 %v2861_v5  ;;  %v2893_v5 = vor.u32 %v3404_v48, %v2892_v46  ;;  %v3408_v46 = vld [vmem:[%s3777_s27 + $0x2dc] sm:$0xf] }
 0x1bf   : > { %2189 = vmatmul.bf16.gmra.mxu3 %v2865_v8  ;;  %v2897_v8 = vor.u32 %v3400_v50, %v2894_v52  ;;  %v2926_v48 = vld [vmem:[%s3777_s27 + $0x2f8] sm:$0xf0] }
 0x1c0   : > { %v2294_v17 = vadd.f32 %v2263_v15, %v2262_v12  ;;  %3513 = vst [vmem:[%s4172_s22] sm:$0xff] %v3512_v16  }
 0x1c1   : > { %v2061_v22 = vpop.f32.mrf.mxu2  ;;  %v1885_v28 = vpop.f32.mrf.mxu0 }
 0x1c2   : > { %v2150_v23 = vpop.f32.mrf.mxu3  ;;  %v2062_v27 = vadd.f32 %v2061_v22, %v1973_v7  ;;  %v1974_v31 = vpop.f32.mrf.mxu1  ;;  %v1886_v34 = vadd.f32 %v1885_v28, %v3963_v26 }
 0x1c4   : > { %v2151_v33 = vadd.f32 %v2150_v23, %v2062_v27  ;;  %v1975_v44 = vadd.f32 %v1974_v31, %v1886_v34  ;;  %v3411_v34 = vld [vmem:[%s3777_s27 + $0x2ec] sm:$0xf0] }
 0x1c6   : > { %v2226_v41 = vadd.f32 %v2225_v13, %v2151_v33  ;;  %v2264_v42 = vmul.f32 %v2151_v33, %v2151_v33 }
 0x1c8   : > { %v2295_v55 = vadd.f32 %v2294_v17, %v2264_v42  ;;  %v2918_v42 = vld [vmem:[%s3777_s27 + $0x2f0] sm:$0xf0] }
 0x1c9   : > { %v2063_v58 = vpop.f32.mrf.mxu2  ;;  %v1888_v0 = vpop.f32.mrf.mxu0 }
 0x1ca   : > { %v2152_v59 = vpop.f32.mrf.mxu3  ;;  %v2064_v4 = vadd.f32 %v2063_v58, %v1975_v44  ;;  %v1977_v26 = vpop.f32.mrf.mxu1  ;;  %v1889_v11 = vadd.f32 %v1888_v0, %v3974_v36  ;;  %v2929_v0 = vor.u32 %v3408_v46, %v2926_v48 }
 0x1cc   : > { %v2153_v9 = vadd.f32 %v2152_v59, %v2064_v4  ;;  %1927 = vmatmul.bf16.gmra.mxu0 %v2885_v61  ;;  %v1978_v17 = vadd.f32 %v1977_v26, %v1889_v11  ;;  %v2925_v4 = vor.u32 %v3412_v45, %v2924_v43 }
 0x1cd   : > { %2016 = vmatmul.bf16.gmra.mxu1 %v2889_v3 }
 0x1ce   : > { %v2227_v12 = vadd.f32 %v2226_v41, %v2153_v9  ;;  %v2265_v13 = vmul.f32 %v2153_v9, %v2153_v9  ;;  %v3517_v15 = vpack.c.bf16 %v2153_v9, %v2151_v33  ;;  %2105 = vmatmul.bf16.gmra.mxu2 %v2893_v5  ;;  %v2916_v33 = vld [vmem:[%s3777_s27 + $0x2d0] sm:$0xf]  ;;  %v3407_v41 = vld [vmem:[%s3777_s27 + $0x2d4] sm:$0xf] }
 0x1cf   : > { %2194 = vmatmul.bf16.gmra.mxu3 %v2897_v8  ;;  %v2917_v58 = vor.u32 %v3411_v34, %v2916_v33  ;;  %v2921_v59 = vor.u32 %v3407_v41, %v2918_v42  ;;  %v3415_v33 = vld [vmem:[%s3777_s27 + $0x314] sm:$0xf]  ;;  %v3416_v41 = vld [vmem:[%s3777_s27 + $0x31c] sm:$0xf] }
 0x1d0   : > { %v2296_v16 = vadd.f32 %v2295_v55, %v2265_v13  ;;  %3589 = vst [vmem:[%s4172_s22 + $0x8] sm:$0xff] %v3517_v15   ;;  %v2950_v34 = vld [vmem:[%s3777_s27 + $0x330] sm:$0xf0]  ;;  %v2958_v42 = vld [vmem:[%s3777_s27 + $0x338] sm:$0xf0] }
 0x1d1   : > { %v2066_v7 = vpop.f32.mrf.mxu2  ;;  %v1890_v23 = vpop.f32.mrf.mxu0 }
 0x1d2   : > { %v2155_v36 = vpop.f32.mrf.mxu3  ;;  %v2067_v22 = vadd.f32 %v2066_v7, %v1978_v17  ;;  %v1979_v27 = vpop.f32.mrf.mxu1  ;;  %v1891_v31 = vadd.f32 %v1890_v23, %v3987_v57  ;;  %v2948_v23 = vld [vmem:[%s3777_s27 + $0x310] sm:$0xf] }
 0x1d4   : > { %v2156_v28 = vadd.f32 %v2155_v36, %v2067_v22  ;;  %v1980_v52 = vadd.f32 %v1979_v27, %v1891_v31  ;;  %v3419_v27 = vld [vmem:[%s3777_s27 + $0x32c] sm:$0xf0] }
 0x1d6   : > { %v2228_v35 = vadd.f32 %v2227_v12, %v2156_v28  ;;  %v2266_v38 = vmul.f32 %v2156_v28, %v2156_v28 }
 0x1d8   : > { %v2297_v50 = vadd.f32 %v2296_v16, %v2266_v38  ;;  %v3420_v38 = vld [vmem:[%s3777_s27 + $0x334] sm:$0xf0] }
 0x1d9   : > { %v2068_v55 = vpop.f32.mrf.mxu2  ;;  %v1893_v3 = vpop.f32.mrf.mxu0 }
 0x1da   : > { %v2157_v44 = vpop.f32.mrf.mxu3  ;;  %v2069_v61 = vadd.f32 %v2068_v55, %v1980_v52  ;;  %v1982_v57 = vpop.f32.mrf.mxu1  ;;  %v1894_v5 = vadd.f32 %v1893_v3, %v3989_v1  ;;  %v2953_v52 = vor.u32 %v3415_v33, %v2950_v34 }
 0x1dc   : > { %v2158_v26 = vadd.f32 %v2157_v44, %v2069_v61  ;;  %1932 = vmatmul.bf16.gmra.mxu0 %v2917_v58  ;;  %v1983_v13 = vadd.f32 %v1982_v57, %v1894_v5 }
 0x1dd   : > { %2021 = vmatmul.bf16.gmra.mxu1 %v2921_v59  ;;  %v2961_v59 = vor.u32 %v3416_v41, %v2958_v42 }
 0x1de   : > { %v2229_v8 = vadd.f32 %v2228_v35, %v2158_v26  ;;  %v2267_v9 = vmul.f32 %v2158_v26, %v2158_v26  ;;  %v3522_v11 = vpack.c.bf16 %v2158_v26, %v2156_v28  ;;  %2110 = vmatmul.bf16.gmra.mxu2 %v2925_v4  ;;  %v2956_v35 = vld [vmem:[%s3777_s27 + $0x318] sm:$0xf] }
 0x1df   : > { %2199 = vmatmul.bf16.gmra.mxu3 %v2929_v0  ;;  %v2957_v58 = vor.u32 %v3420_v38, %v2956_v35 }
 0x1e0   : > { %v2298_v12 = vadd.f32 %v2297_v50, %v2267_v9  ;;  %3590 = vst [vmem:[%s4172_s22 + $0x10] sm:$0xff] %v3522_v11   ;;  %v2949_v50 = vor.u32 %v3419_v27, %v2948_v23  ;;  %v2988_v23 = vld [vmem:[%s3777_s27 + $0x358] sm:$0xf] }
 0x1e1   : > { %v2071_v15 = vpop.f32.mrf.mxu2  ;;  %v1895_v17 = vpop.f32.mrf.mxu0  ;;  %v3428_v27 = vld [vmem:[%s3777_s27 + $0x374] sm:$0xf0] }
 0x1e2   : > { %v2160_v1 = vpop.f32.mrf.mxu3  ;;  %v2072_v16 = vadd.f32 %v2071_v15, %v1983_v13  ;;  %v1984_v7 = vpop.f32.mrf.mxu1  ;;  %v1896_v22 = vadd.f32 %v1895_v17, %v3999_v21 }
 0x1e4   : > { %v2161_v36 = vadd.f32 %v2160_v1, %v2072_v16  ;;  %v1985_v45 = vadd.f32 %v1984_v7, %v1896_v22  ;;  %v2980_v1 = vld [vmem:[%s3777_s27 + $0x350] sm:$0xf]  ;;  %v2982_v22 = vld [vmem:[%s3777_s27 + $0x370] sm:$0xf0] }
 0x1e5   : > { %v3427_v16 = vld [vmem:[%s3777_s27 + $0x36c] sm:$0xf0] }
 0x1e6   : > { %v2230_v28 = vadd.f32 %v2229_v8, %v2161_v36  ;;  %v2268_v31 = vmul.f32 %v2161_v36, %v2161_v36  ;;  %v2981_v41 = vor.u32 %v3427_v16, %v2980_v1  ;;  %v3432_v1 = vld [vmem:[%s3777_s27 + $0x39c] sm:$0xf] }
 0x1e7   : > { %v3022_v16 = vld [vmem:[%s3777_s27 + $0x3b8] sm:$0xf0] }
 0x1e8   : > { %v2299_v43 = vadd.f32 %v2298_v12, %v2268_v31  ;;  %v2990_v31 = vld [vmem:[%s3777_s27 + $0x378] sm:$0xf0] }
 0x1e9   : > { %v2073_v46 = vpop.f32.mrf.mxu2  ;;  %v1898_v44 = vpop.f32.mrf.mxu0 }
 0x1ea   : > { %v2162_v48 = vpop.f32.mrf.mxu3  ;;  %v2074_v55 = vadd.f32 %v2073_v46, %v1985_v45  ;;  %v1987_v21 = vpop.f32.mrf.mxu1  ;;  %v1899_v3 = vadd.f32 %v1898_v44, %v4010_v32  ;;  %v2989_v46 = vor.u32 %v3428_v27, %v2988_v23 }
 0x1ec   : > { %v2163_v61 = vadd.f32 %v2162_v48, %v2074_v55  ;;  %1937 = vmatmul.bf16.gmra.mxu0 %v2949_v50  ;;  %v1988_v5 = vadd.f32 %v1987_v21, %v1899_v3 }
 0x1ed   : > { %2026 = vmatmul.bf16.gmra.mxu1 %v2953_v52 }
 0x1ee   : > { %v2231_v57 = vadd.f32 %v2230_v28, %v2163_v61  ;;  %v2269_v4 = vmul.f32 %v2163_v61, %v2163_v61  ;;  %v3527_v0 = vpack.c.bf16 %v2163_v61, %v2161_v36  ;;  %2115 = vmatmul.bf16.gmra.mxu2 %v2957_v58  ;;  %v3423_v36 = vld [vmem:[%s3777_s27 + $0x354] sm:$0xf]  ;;  %v3424_v28 = vld [vmem:[%s3777_s27 + $0x35c] sm:$0xf] }
 0x1ef   : > { %2204 = vmatmul.bf16.gmra.mxu3 %v2961_v59  ;;  %v2985_v42 = vor.u32 %v3423_v36, %v2982_v22  ;;  %v2993_v48 = vor.u32 %v3424_v28, %v2990_v31 }
 0x1f0   : > { %v2300_v26 = vadd.f32 %v2299_v43, %v2269_v4  ;;  %3591 = vst [vmem:[%s4172_s22 + $0x18] sm:$0xff] %v3527_v0  }
 0x1f1   : > { %v2076_v8 = vpop.f32.mrf.mxu2  ;;  %v1900_v11 = vpop.f32.mrf.mxu0 }
 0x1f2   : > { %v2165_v32 = vpop.f32.mrf.mxu3  ;;  %v2077_v9 = vadd.f32 %v2076_v8, %v1988_v5  ;;  %v1989_v12 = vpop.f32.mrf.mxu1  ;;  %v1901_v15 = vadd.f32 %v1900_v11, %v4023_v54  ;;  %v3012_v5 = vld [vmem:[%s3777_s27 + $0x390] sm:$0xf]  ;;  %v3431_v11 = vld [vmem:[%s3777_s27 + $0x394] sm:$0xf] }
 0x1f3   : > { %v3435_v8 = vld [vmem:[%s3777_s27 + $0x3ac] sm:$0xf0] }
 0x1f4   : > { %v2166_v13 = vadd.f32 %v2165_v32, %v2077_v9  ;;  %v1990_v34 = vadd.f32 %v1989_v12, %v1901_v15  ;;  %v3014_v12 = vld [vmem:[%s3777_s27 + $0x3b0] sm:$0xf0]  ;;  %v3436_v15 = vld [vmem:[%s3777_s27 + $0x3b4] sm:$0xf0]  ;;  %v3013_v23 = vor.u32 %v3435_v8, %v3012_v5 }
 0x1f5   : > { %v3017_v27 = vor.u32 %v3431_v11, %v3014_v12 }
 0x1f6   : > { %v2232_v17 = vadd.f32 %v2231_v57, %v2166_v13  ;;  %v2270_v7 = vmul.f32 %v2166_v13, %v2166_v13 }
 0x1f8   : > { %v2301_v33 = vadd.f32 %v2300_v26, %v2270_v7 }
 0x1f9   : > { %v2078_v35 = vpop.f32.mrf.mxu2  ;;  %v1903_v45 = vpop.f32.mrf.mxu0 }
 0x1fa   : > { %v2167_v38 = vpop.f32.mrf.mxu3  ;;  %v2079_v43 = vadd.f32 %v2078_v35, %v1990_v34  ;;  %v1992_v54 = vpop.f32.mrf.mxu1  ;;  %v1904_v52 = vadd.f32 %v1903_v45, %v4025_v62  ;;  %v3025_v34 = vor.u32 %v3432_v1, %v3022_v16 }
 0x1fc   : > { %v2168_v50 = vadd.f32 %v2167_v38, %v2079_v43  ;;  %1942 = vmatmul.bf16.gmra.mxu0 %v2981_v41  ;;  %v1993_v59 = vadd.f32 %v1992_v54, %v1904_v52 }
 0x1fd   : > { %2031 = vmatmul.bf16.gmra.mxu1 %v2985_v42 }
 0x1fe   : > { %v2233_v55 = vadd.f32 %v2232_v17, %v2168_v50  ;;  %v2271_v44 = vmul.f32 %v2168_v50, %v2168_v50  ;;  %v3532_v21 = vpack.c.bf16 %v2168_v50, %v2166_v13  ;;  %2120 = vmatmul.bf16.gmra.mxu2 %v2989_v46  ;;  %v3020_v13 = vld [vmem:[%s3777_s27 + $0x398] sm:$0xf] }
 0x1ff   : > { %2209 = vmatmul.bf16.gmra.mxu3 %v2993_v48 }
 0x200   : > { %v2302_v58 = vadd.f32 %v2301_v33, %v2271_v44  ;;  %3592 = vst [vmem:[%s4172_s22 + $0x20] sm:$0xff] %v3532_v21   ;;  %v3021_v33 = vor.u32 %v3436_v15, %v3020_v13  ;;  %v3044_v21 = vld [vmem:[%s3777_s27 + $0x3d0] sm:$0xf] }
 0x201   : > { %v2081_v61 = vpop.f32.mrf.mxu2  ;;  %v1905_v57 = vpop.f32.mrf.mxu0 }
 0x202   : > { %v2170_v62 = vpop.f32.mrf.mxu3  ;;  %v2082_v3 = vadd.f32 %v2081_v61, %v1993_v59  ;;  %v1994_v4 = vpop.f32.mrf.mxu1  ;;  %v1906_v26 = vadd.f32 %v1905_v57, %v4035_v20  ;;  %v3052_v57 = vld [vmem:[%s3777_s27 + $0x3d8] sm:$0xf] }
 0x204   : > { %v2171_v0 = vadd.f32 %v2170_v62, %v2082_v3  ;;  %v1995_v7 = vadd.f32 %v1994_v4, %v1906_v26  ;;  %v3439_v62 = vld [vmem:[%s3777_s27 + $0x3d4] sm:$0xf]  ;;  %v3444_v4 = vld [vmem:[%s3777_s27 + $0x3f4] sm:$0xf0]  ;;  %v3054_v26 = vld [vmem:[%s3777_s27 + $0x3f8] sm:$0xf0] }
 0x205   : > { %v3046_v3 = vld [vmem:[%s3777_s27 + $0x3f0] sm:$0xf0]  ;;  %v3053_v1 = vor.u32 %v3444_v4, %v3052_v57 }
 0x206   : > { %v2234_v32 = vadd.f32 %v2233_v55, %v2171_v0  ;;  %v2272_v9 = vmul.f32 %v2171_v0, %v2171_v0  ;;  %v3049_v12 = vor.u32 %v3439_v62, %v3046_v3 }
 0x208   : > { %v2303_v17 = vadd.f32 %v2302_v58, %v2272_v9  ;;  %v3443_v58 = vld [vmem:[%s3777_s27 + $0x3ec] sm:$0xf0] }
 0x209   : > { %v2083_v36 = vpop.f32.mrf.mxu2  ;;  %v1908_v31 = vpop.f32.mrf.mxu0  ;;  %v3045_v11 = vor.u32 %v3443_v58, %v3044_v21 }
 0x20a   : > { %v2172_v22 = vpop.f32.mrf.mxu3  ;;  %v2084_v28 = vadd.f32 %v2083_v36, %v1995_v7  ;;  %v1997_v20 = vpop.f32.mrf.mxu1  ;;  %v1909_v38 = vadd.f32 %v1908_v31, %v4037_v29 }
 0x20c   : > { %v2173_v35 = vadd.f32 %v2172_v22, %v2084_v28  ;;  %1947 = vmatmul.bf16.gmra.mxu0 %v3013_v23  ;;  %v1998_v54 = vadd.f32 %v1997_v20, %v1909_v38 }
 0x20d   : > { %2036 = vmatmul.bf16.gmra.mxu1 %v3017_v27 }
 0x20e   : > { %v2235_v41 = vadd.f32 %v2234_v32, %v2173_v35  ;;  %v2273_v42 = vmul.f32 %v2173_v35, %v2173_v35  ;;  %v3537_v43 = vpack.c.bf16 %v2173_v35, %v2171_v0  ;;  %2125 = vmatmul.bf16.gmra.mxu2 %v3021_v33  ;;  %v3440_v0 = vld [vmem:[%s3777_s27 + $0x3dc] sm:$0xf] }
 0x20f   : > { %2214 = vmatmul.bf16.gmra.mxu3 %v3025_v34  ;;  %v3057_v16 = vor.u32 %v3440_v0, %v3054_v26 }
 0x210   : > { %v2304_v45 = vadd.f32 %v2303_v17, %v2273_v42  ;;  %3593 = vst [vmem:[%s4172_s22 + $0x28] sm:$0xff] %v3537_v43  }
 0x211   : > { %v2086_v46 = vpop.f32.mrf.mxu2  ;;  %v1910_v50 = vpop.f32.mrf.mxu0 }
 0x212   : > { %v2175_v29 = vpop.f32.mrf.mxu3  ;;  %v2087_v48 = vadd.f32 %v2086_v46, %v1998_v54  ;;  %v1999_v52 = vpop.f32.mrf.mxu1  ;;  %v1911_v44 = vadd.f32 %v1910_v50, %v4047_v51 }
 0x214   : > { %v2176_v55 = vadd.f32 %v2175_v29, %v2087_v48  ;;  %v2000_v8 = vadd.f32 %v1999_v52, %v1911_v44 }
 0x216   : > { %v2236_v59 = vadd.f32 %v2235_v41, %v2176_v55  ;;  %v2274_v61 = vmul.f32 %v2176_v55, %v2176_v55 }
 0x218   : > { %v2305_v5 = vadd.f32 %v2304_v45, %v2274_v61 }
 0x219   : > { %v2088_v32 = vpop.f32.mrf.mxu2  ;;  %v1913_v15 = vpop.f32.mrf.mxu0 }
 0x21a   : > { %v2177_v9 = vpop.f32.mrf.mxu3  ;;  %v2089_v13 = vadd.f32 %v2088_v32, %v2000_v8  ;;  %v2002_v51 = vpop.f32.mrf.mxu1  ;;  %v1914_v7 = vadd.f32 %v1913_v15, %v4049_v60 }
 0x21c   : > { %v2178_v17 = vadd.f32 %v2177_v9, %v2089_v13  ;;  %1952 = vmatmul.bf16.gmra.mxu0 %v3045_v11  ;;  %v2003_v28 = vadd.f32 %v2002_v51, %v1914_v7 }
 0x21d   : > { %2041 = vmatmul.bf16.gmra.mxu1 %v3049_v12 }
 0x21e   : > { %v2237_v36 = vadd.f32 %v2236_v59, %v2178_v17  ;;  %v2275_v22 = vmul.f32 %v2178_v17, %v2178_v17  ;;  %v3542_v23 = vpack.c.bf16 %v2178_v17, %v2176_v55  ;;  %2130 = vmatmul.bf16.gmra.mxu2 %v3053_v1 }
 0x21f   : > { %2219 = vmatmul.bf16.gmra.mxu3 %v3057_v16 }
 0x220   : > { %v2306_v27 = vadd.f32 %v2305_v5, %v2275_v22  ;;  %3594 = vst [vmem:[%s4172_s22 + $0x30] sm:$0xff] %v3542_v23  }
 0x221   : > { %v2091_v31 = vpop.f32.mrf.mxu2  ;;  %v1915_v34 = vpop.f32.mrf.mxu0 }
 0x222   : > { %v2180_v20 = vpop.f32.mrf.mxu3  ;;  %v2092_v33 = vadd.f32 %v2091_v31, %v2003_v28  ;;  %v2004_v35 = vpop.f32.mrf.mxu1  ;;  %v1916_v41 = vadd.f32 %v1915_v34, %v4059_v19 }
 0x224   : > { %v2181_v38 = vadd.f32 %v2180_v20, %v2092_v33  ;;  %v2005_v45 = vadd.f32 %v2004_v35, %v1916_v41 }
 0x226   : > { %v2238_v60 = vadd.f32 %v2237_v36, %v2181_v38  ;;  %v2276_v42 = vmul.f32 %v2181_v38, %v2181_v38 }
 0x228   : > { %v2307_v43 = vadd.f32 %v2306_v27, %v2276_v42 }
 0x229   : > { %v2093_v54 = vpop.f32.mrf.mxu2  ;;  %v1918_v48 = vpop.f32.mrf.mxu0 }
 0x22a   : > { %v2182_v46 = vpop.f32.mrf.mxu3  ;;  %v2094_v29 = vadd.f32 %v2093_v54, %v2005_v45  ;;  %v2007_v50 = vpop.f32.mrf.mxu1  ;;  %v1919_v55 = vadd.f32 %v1918_v48, %v4061_v30 }
 0x22c   : > { %v2183_v52 = vadd.f32 %v2182_v46, %v2094_v29  ;;  %v2008_v61 = vadd.f32 %v2007_v50, %v1919_v55 }
 0x22e   : > { %v2239_v44 = vadd.f32 %v2238_v60, %v2183_v52  ;;  %v2277_v21 = vmul.f32 %v2183_v52, %v2183_v52  ;;  %v3547_v58 = vpack.c.bf16 %v2183_v52, %v2181_v38 }
 0x230   : > { %v2308_v59 = vadd.f32 %v2307_v43, %v2277_v21  ;;  %3595 = vst [vmem:[%s4172_s22 + $0x38] sm:$0xff] %v3547_v58  }
 0x231   : > { %v2096_v19 = vpop.f32.mrf.mxu2  ;;  %v1920_v57 = vpop.f32.mrf.mxu0 }
 0x232   : > { %v2185_v62 = vpop.f32.mrf.mxu3  ;;  %v2097_v3 = vadd.f32 %v2096_v19, %v2008_v61  ;;  %v2009_v4 = vpop.f32.mrf.mxu1  ;;  %v1921_v26 = vadd.f32 %v1920_v57, %v4071_v53 }
 0x234   : > { %v2186_v0 = vadd.f32 %v2185_v62, %v2097_v3  ;;  %v2010_v9 = vadd.f32 %v2009_v4, %v1921_v26 }
 0x236   : > { %v2240_v5 = vadd.f32 %v2239_v44, %v2186_v0  ;;  %v2278_v8 = vmul.f32 %v2186_v0, %v2186_v0 }
 0x238   : > { %v2309_v32 = vadd.f32 %v2308_v59, %v2278_v8 }
 0x239   : > { %v2098_v30 = vpop.f32.mrf.mxu2  ;;  %v1923_v13 = vpop.f32.mrf.mxu0 }
 0x23a   : > { %v2187_v11 = vpop.f32.mrf.mxu3  ;;  %v2099_v12 = vadd.f32 %v2098_v30, %v2010_v9  ;;  %v2012_v15 = vpop.f32.mrf.mxu1  ;;  %v1924_v1 = vadd.f32 %v1923_v13, %v4073_v2 }
 0x23c   : > { %v2188_v51 = vadd.f32 %v2187_v11, %v2099_v12  ;;  %v2013_v22 = vadd.f32 %v2012_v15, %v1924_v1 }
 0x23e   : > { %v2241_v16 = vadd.f32 %v2240_v5, %v2188_v51  ;;  %v2279_v17 = vmul.f32 %v2188_v51, %v2188_v51  ;;  %v3552_v7 = vpack.c.bf16 %v2188_v51, %v2186_v0 }
 0x240   : > { %v2310_v36 = vadd.f32 %v2309_v32, %v2279_v17  ;;  %3596 = vst [vmem:[%s4172_s22 + $0x40] sm:$0xff] %v3552_v7  }
 0x241   : > { %v2101_v53 = vpop.f32.mrf.mxu2  ;;  %v1925_v28 = vpop.f32.mrf.mxu0 }
 0x242   : > { %v2190_v23 = vpop.f32.mrf.mxu3  ;;  %v2102_v27 = vadd.f32 %v2101_v53, %v2013_v22  ;;  %v2014_v31 = vpop.f32.mrf.mxu1  ;;  %v1926_v33 = vadd.f32 %v1925_v28, %v4083_v25 }
 0x244   : > { %v2191_v20 = vadd.f32 %v2190_v23, %v2102_v27  ;;  %v2015_v41 = vadd.f32 %v2014_v31, %v1926_v33 }
 0x246   : > { %v2242_v34 = vadd.f32 %v2241_v16, %v2191_v20  ;;  %v2280_v35 = vmul.f32 %v2191_v20, %v2191_v20 }
 0x248   : > { %v2311_v38 = vadd.f32 %v2310_v36, %v2280_v35 }
 0x249   : > { %v2103_v2 = vpop.f32.mrf.mxu2  ;;  %v1928_v43 = vpop.f32.mrf.mxu0 }
 0x24a   : > { %v2192_v60 = vpop.f32.mrf.mxu3  ;;  %v2104_v42 = vadd.f32 %v2103_v2, %v2015_v41  ;;  %v2017_v45 = vpop.f32.mrf.mxu1  ;;  %v1929_v46 = vadd.f32 %v1928_v43, %v4085_v37 }
 0x24c   : > { %v2193_v54 = vadd.f32 %v2192_v60, %v2104_v42  ;;  %v2018_v55 = vadd.f32 %v2017_v45, %v1929_v46 }
 0x24e   : > { %v2243_v29 = vadd.f32 %v2242_v34, %v2193_v54  ;;  %v2281_v48 = vmul.f32 %v2193_v54, %v2193_v54  ;;  %v3557_v50 = vpack.c.bf16 %v2193_v54, %v2191_v20 }
 0x250   : > { %v2312_v52 = vadd.f32 %v2311_v38, %v2281_v48  ;;  %3597 = vst [vmem:[%s4172_s22 + $0x48] sm:$0xff] %v3557_v50  }
 0x251   : > { %v2106_v25 = vpop.f32.mrf.mxu2  ;;  %v1930_v58 = vpop.f32.mrf.mxu0 }
 0x252   : > { %v2195_v44 = vpop.f32.mrf.mxu3  ;;  %v2107_v21 = vadd.f32 %v2106_v25, %v2018_v55  ;;  %v2019_v59 = vpop.f32.mrf.mxu1  ;;  %v1931_v19 = vadd.f32 %v1930_v58, %v4095_v63 }
 0x254   : > { %v2196_v61 = vadd.f32 %v2195_v44, %v2107_v21  ;;  %v2020_v4 = vadd.f32 %v2019_v59, %v1931_v19 }
 0x256   : > { %v2244_v62 = vadd.f32 %v2243_v29, %v2196_v61  ;;  %v2282_v3 = vmul.f32 %v2196_v61, %v2196_v61 }
 0x258   : > { %v2313_v57 = vadd.f32 %v2312_v52, %v2282_v3 }
 0x259   : > { %v2108_v37 = vpop.f32.mrf.mxu2  ;;  %v1933_v5 = vpop.f32.mrf.mxu0 }
 0x25a   : > { %v2197_v0 = vpop.f32.mrf.mxu3  ;;  %v2109_v26 = vadd.f32 %v2108_v37, %v2020_v4  ;;  %v2022_v8 = vpop.f32.mrf.mxu1  ;;  %v1934_v9 = vadd.f32 %v1933_v5, %v4097_v10 }
 0x25c   : > { %v2198_v32 = vadd.f32 %v2197_v0, %v2109_v26  ;;  %v2023_v15 = vadd.f32 %v2022_v8, %v1934_v9 }
 0x25e   : > { %v2245_v30 = vadd.f32 %v2244_v62, %v2198_v32  ;;  %v2283_v11 = vmul.f32 %v2198_v32, %v2198_v32  ;;  %v3562_v12 = vpack.c.bf16 %v2198_v32, %v2196_v61 }
 0x260   : > { %v2314_v13 = vadd.f32 %v2313_v57, %v2283_v11  ;;  %3598 = vst [vmem:[%s4172_s22 + $0x50] sm:$0xff] %v3562_v12  }
 0x261   : > { %v2111_v63 = vpop.f32.mrf.mxu2  ;;  %v1935_v16 = vpop.f32.mrf.mxu0 }
 0x262   : > { %v2200_v51 = vpop.f32.mrf.mxu3  ;;  %v2112_v1 = vadd.f32 %v2111_v63, %v2023_v15  ;;  %v2024_v17 = vpop.f32.mrf.mxu1  ;;  %v1936_v36 = vadd.f32 %v1935_v16, %v4107_v39 }
 0x264   : > { %v2201_v7 = vadd.f32 %v2200_v51, %v2112_v1  ;;  %v2025_v27 = vadd.f32 %v2024_v17, %v1936_v36 }
 0x266   : > { %v2246_v22 = vadd.f32 %v2245_v30, %v2201_v7  ;;  %v2284_v53 = vmul.f32 %v2201_v7, %v2201_v7 }
 0x268   : > { %v2315_v23 = vadd.f32 %v2314_v13, %v2284_v53 }
 0x269   : > { %v2113_v10 = vpop.f32.mrf.mxu2  ;;  %v1938_v20 = vpop.f32.mrf.mxu0 }
 0x26a   : > { %v2202_v28 = vpop.f32.mrf.mxu3  ;;  %v2114_v31 = vadd.f32 %v2113_v10, %v2025_v27  ;;  %v2027_v33 = vpop.f32.mrf.mxu1  ;;  %v1939_v35 = vadd.f32 %v1938_v20, %v4109_v47 }
 0x26c   : > { %v2203_v34 = vadd.f32 %v2202_v28, %v2114_v31  ;;  %v2028_v42 = vadd.f32 %v2027_v33, %v1939_v35 }
 0x26e   : > { %v2247_v38 = vadd.f32 %v2246_v22, %v2203_v34  ;;  %v2285_v41 = vmul.f32 %v2203_v34, %v2203_v34  ;;  %v3567_v2 = vpack.c.bf16 %v2203_v34, %v2201_v7 }
 0x270   : > { %v2316_v60 = vadd.f32 %v2315_v23, %v2285_v41  ;;  %3599 = vst [vmem:[%s4172_s22 + $0x58] sm:$0xff] %v3567_v2  }
 0x271   : > { %v2116_v39 = vpop.f32.mrf.mxu2  ;;  %v1940_v54 = vpop.f32.mrf.mxu0 }
 0x272   : > { %v2205_v43 = vpop.f32.mrf.mxu3  ;;  %v2117_v45 = vadd.f32 %v2116_v39, %v2028_v42  ;;  %v2029_v46 = vpop.f32.mrf.mxu1  ;;  %v1941_v48 = vadd.f32 %v1940_v54, %v4119_v14 }
 0x274   : > { %v2206_v29 = vadd.f32 %v2205_v43, %v2117_v45  ;;  %v2030_v25 = vadd.f32 %v2029_v46, %v1941_v48 }
 0x276   : > { %v2248_v50 = vadd.f32 %v2247_v38, %v2206_v29  ;;  %v2286_v52 = vmul.f32 %v2206_v29, %v2206_v29 }
 0x278   : > { %v2317_v55 = vadd.f32 %v2316_v60, %v2286_v52 }
 0x279   : > { %v2118_v47 = vpop.f32.mrf.mxu2  ;;  %v1943_v58 = vpop.f32.mrf.mxu0 }
 0x27a   : > { %v2207_v44 = vpop.f32.mrf.mxu3  ;;  %v2119_v21 = vadd.f32 %v2118_v47, %v2030_v25  ;;  %v2032_v59 = vpop.f32.mrf.mxu1  ;;  %v1944_v19 = vadd.f32 %v1943_v58, %v4121_v24 }
 0x27c   : > { %v2208_v61 = vadd.f32 %v2207_v44, %v2119_v21  ;;  %v2033_v37 = vadd.f32 %v2032_v59, %v1944_v19 }
 0x27e   : > { %v2249_v62 = vadd.f32 %v2248_v50, %v2208_v61  ;;  %v2287_v3 = vmul.f32 %v2208_v61, %v2208_v61  ;;  %v3572_v57 = vpack.c.bf16 %v2208_v61, %v2206_v29 }
 0x280   : > { %v2318_v4 = vadd.f32 %v2317_v55, %v2287_v3  ;;  %3600 = vst [vmem:[%s4172_s22 + $0x60] sm:$0xff] %v3572_v57  }
 0x281   : > { %v2121_v14 = vpop.f32.mrf.mxu2  ;;  %v1945_v5 = vpop.f32.mrf.mxu0 }
 0x282   : > { %v2210_v0 = vpop.f32.mrf.mxu3  ;;  %v2122_v26 = vadd.f32 %v2121_v14, %v2033_v37  ;;  %v2034_v8 = vpop.f32.mrf.mxu1  ;;  %v1946_v9 = vadd.f32 %v1945_v5, %v4131_v56 }
 0x284   : > { %v2211_v32 = vadd.f32 %v2210_v0, %v2122_v26  ;;  %v2035_v13 = vadd.f32 %v2034_v8, %v1946_v9 }
 0x286   : > { %v2250_v30 = vadd.f32 %v2249_v62, %v2211_v32  ;;  %v2288_v11 = vmul.f32 %v2211_v32, %v2211_v32 }
 0x288   : > { %v2319_v12 = vadd.f32 %v2318_v4, %v2288_v11 }
 0x289   : > { %v2123_v24 = vpop.f32.mrf.mxu2  ;;  %v1948_v51 = vpop.f32.mrf.mxu0 }
 0x28a   : > { %v2212_v15 = vpop.f32.mrf.mxu3  ;;  %v2124_v63 = vadd.f32 %v2123_v24, %v2035_v13  ;;  %v2037_v1 = vpop.f32.mrf.mxu1  ;;  %v1949_v17 = vadd.f32 %v1948_v51, %v4133_v6 }
 0x28c   : > { %v2213_v16 = vadd.f32 %v2212_v15, %v2124_v63  ;;  %v2038_v23 = vadd.f32 %v2037_v1, %v1949_v17 }
 0x28e   : > { %v2251_v7 = vadd.f32 %v2250_v30, %v2213_v16  ;;  %v2289_v36 = vmul.f32 %v2213_v16, %v2213_v16  ;;  %v3577_v22 = vpack.c.bf16 %v2213_v16, %v2211_v32 }
 0x290   : > { %v2320_v53 = vadd.f32 %v2319_v12, %v2289_v36  ;;  %3601 = vst [vmem:[%s4172_s22 + $0x68] sm:$0xff] %v3577_v22  }
 0x291   : > { %v2126_v56 = vpop.f32.mrf.mxu2  ;;  %v1950_v28 = vpop.f32.mrf.mxu0 }
 0x292   : > { %v2215_v27 = vpop.f32.mrf.mxu3  ;;  %v2127_v10 = vadd.f32 %v2126_v56, %v2038_v23  ;;  %v2039_v31 = vpop.f32.mrf.mxu1  ;;  %v1951_v33 = vadd.f32 %v1950_v28, %v4143_v40 }
 0x294   : > { %v2216_v20 = vadd.f32 %v2215_v27, %v2127_v10  ;;  %v2040_v41 = vadd.f32 %v2039_v31, %v1951_v33 }
 0x296   : > { %v2252_v34 = vadd.f32 %v2251_v7, %v2216_v20  ;;  %v2290_v35 = vmul.f32 %v2216_v20, %v2216_v20 }
 0x298   : > { %v2321_v38 = vadd.f32 %v2320_v53, %v2290_v35 }
 0x299   : > { %v2128_v6 = vpop.f32.mrf.mxu2  ;;  %v1953_v42 = vpop.f32.mrf.mxu0 }
 0x29a   : > { %v2217_v2 = vpop.f32.mrf.mxu3  ;;  %v2129_v60 = vadd.f32 %v2128_v6, %v2040_v41  ;;  %v1954_v43 = vadd.f32 %v1953_v42, %v4145_v49  ;;  %v2042_v45 = vpop.f32.mrf.mxu1 }
 0x29c   : > { %v2218_v39 = vadd.f32 %v2217_v2, %v2129_v60  ;;  %v2043_v50 = vadd.f32 %v2042_v45, %v1954_v43 }
 0x29e   : > { %v2253_v54 = vadd.f32 %v2252_v34, %v2218_v39  ;;  %v2291_v46 = vmul.f32 %v2218_v39, %v2218_v39  ;;  %v3582_v29 = vpack.c.bf16 %v2218_v39, %v2216_v20 }
 0x2a0   : > { %v2322_v48 = vadd.f32 %v2321_v38, %v2291_v46  ;;  %3602 = vst [vmem:[%s4172_s22 + $0x70] sm:$0xff] %v3582_v29  }
 0x2a1   : > { %v2131_v40 = vpop.f32.mrf.mxu2  ;;  %v1955_v25 = vpop.f32.mrf.mxu0 }
 0x2a2   : > { %v2220_v52 = vpop.f32.mrf.mxu3  ;;  %v2132_v55 = vadd.f32 %v2131_v40, %v2043_v50  ;;  %v1956_v44 = vadd.f32 %v1955_v25, %v4155_v18  ;;  %v2044_v59 = vpop.f32.mrf.mxu1  ;;  %v2331_v18 = vlaneseq }
 0x2a4   : > { %v2221_v47 = vadd.f32 %v2220_v52, %v2132_v55  ;;  %v2045_v61 = vadd.f32 %v2044_v59, %v1956_v44  ;;  %v2332_v12 = vshrl.u32 %v2331_v18, 7 }
 0x2a6   : > { %v2254_v21 = vadd.f32 %v2253_v54, %v2221_v47  ;;  %v2292_v58 = vmul.f32 %v2221_v47, %v2221_v47  ;;  %vm2333_vm0 = vcmp.eq.s32.totalorder %v2332_v12, 0  ;;  %vm2335_vm1 = vcmp.eq.s32.totalorder %v2332_v12, 1 }
 0x2a8   : > { %v2323_v49 = vadd.f32 %v2322_v48, %v2292_v58 }
 0x2a9   : > { %v2133_v19 = vpop.f32.mrf.mxu2 }
 0x2aa   : > { %v2134_v62 = vadd.f32 %v2133_v19, %v2045_v61  ;;  %v2222_v3 = vpop.f32.mrf.mxu3 }
 0x2ac   : > { %v2223_v57 = vadd.f32 %v2222_v3, %v2134_v62 }
 0x2ae   : > { %v2255_v4 = vadd.f32 %v2254_v21, %v2223_v57  ;;  %v2293_v37 = vmul.f32 %v2223_v57, %v2223_v57  ;;  %v3587_v14 = vpack.c.bf16 %v2223_v57, %v2221_v47 }
 0x2b0   : > { %v2256_v0 = vrot.slane %v2255_v4, 4  ;;  %v2324_v26 = vadd.f32 %v2323_v49, %v2293_v37  ;;  %3603 = vst [vmem:[%s4172_s22 + $0x78] sm:$0xff] %v3587_v14  }
 0x2b2   : > { %v2257_v5 = vadd.f32 %v2256_v0, %v2255_v4  ;;  %v2325_v8 = vrot.slane %v2324_v26, 4 }
 0x2b4   : > { %v2258_v32 = vrot.slane %v2257_v5, 2  ;;  %v2326_v9 = vadd.f32 %v2325_v8, %v2324_v26 }
 0x2b6   : > { %v2259_v30 = vadd.f32 %v2258_v32, %v2257_v5  ;;  %v2327_v11 = vrot.slane %v2326_v9, 2 }
 0x2b8   : > { %v2260_v13 = vrot.slane %v2259_v30, 1  ;;  %v2328_v24 = vadd.f32 %v2327_v11, %v2326_v9 }
 0x2ba   : > { %v2261_v15 = vadd.f32 %v2260_v13, %v2259_v30  ;;  %v2329_v63 = vrot.slane %v2328_v24, 1 }
 0x2bc   : > { %v2330_v51 = vadd.f32 %v2329_v63, %v2328_v24  ;;  %v2334_v1 = vsel %vm2333_vm0, %v2261_v15, 0.0 }
 0x2be   : > { %v2336_v16 = vsel %vm2335_vm1, %v2330_v51, 0.0 }
 0x2bf   : > { %v2337_v17 = vadd.f32 %v2336_v16, %v2334_v1 }
 0x2c1   : > { %2338 = vst [vmem:[%s232_s24] sm:$0xff] %v2337_v17 }
 0x2c2 PF: > { %s14_s14 = sadd.s32 1, %s3650_s14   ;;  %s4285_s12 = smov %s3646_s13 }
 0x2c3   : > { %p11_p6 = scmp.ge.s32.totalorder %s14_s14, 4   ;;  %s4286_s13 = smov %s4288_s15 }
 0x2c5   :  { %13 = sbr.rel (!%p11_p6) target bundleno = 2 (0x2), region = 73 }

// kernel: discriminator_forward.6
= control target key start
LH: loop header
LB: loop body
LE: loop exit
PB: predicated region body
PF: predicated region fallthrough
CT: control target
= control target key end

     0   :  { %s6705_s12 = smov 0   ;;  %s6707_s13 = smov 0   ;;  %s8370_s0 = inlined_call_operand.vmem [shape: bf16[128,2048], index: 0, kind: input, shape index: {}]   ;;  %s8371_s1 = inlined_call_operand.vmem [shape: bf16[2048,256], index: 1, kind: input, shape index: {}]   ;;  %s8372_s2 = inlined_call_operand.vmem [shape: bf16[128,256], index: 2, kind: output, shape index: {0}]   ;;  %s8373_s3 = inlined_call_operand.vmem [shape: f32[8,256], index: 3, kind: output, shape index: {1}]  }
   0x1   :  { %s6709_s14 = smov 0   ;;  %s6711_s15 = smov 0  }
   0x2   :  { %s6713_s16 = smov 0  }
   0x3 LB: > { %s23_s17 = sadd.s32 1, %s6679_s15  ;;  %s5263_s18 = sadd.s32 4294967295, %s6683_s16   ;;  %s6683_s16 = sphi %s6713_s16, %s14_s16   ;;  %s6679_s15 = sphi %s6711_s15, %s8378_s15   ;;  %s6675_s14 = sphi %s6709_s14, %s8377_s14   ;;  %s6671_s13 = sphi %s6707_s13, %s8376_s13   ;;  %s6667_s12 = sphi %s6705_s12, %s8375_s12  }
   0x4   : > { %p24_p0 = scmp.ge.s32.totalorder %s23_s17, 2  ;;  %p66_p1 = scmp.ne.s32.totalorder %s6671_s13, %s6667_s12 }
   0x5   : > { %p67_p2 = scmp.eq.s32.totalorder %s6683_s16, 0  ;;  %p98_p4 = scmp.eq.s32.totalorder %s5263_s18, 1 }
   0x6   : > { %s8380_s17 = smov (%p24_p0, %s23_s17), 0  ;;  %s59_s20 = sadd.s32 1, %s6671_s13 }
   0x7   : > { %p68_p3 = por %p67_p2, %p66_p1  ;;  %s56_s19 = ssub.s32 %s6679_s15, %s8380_s17 }
   0x8   : > { %p57_p5 = scmp.eq.s32.totalorder %s56_s19, 0  ;;  %p6740_p6 = por %p98_p4, %p66_p1 }
   0x9   : > { %p5267_p7 = scmp.ge.s32.totalorder %s6683_s16, 2 }
   0xa   : > { %s6745_s22 = scalar_select %p57_p5, %s6671_s13, %s59_s20  }
   0xb   : > { %158 = sbr.rel (%p5267_p7) target bundleno = 276 (0x114), region = 20 }
  0x10   : > { %161 = sbr.rel (!%p68_p3) target bundleno = 276 (0x114), region = 24  ;;  %s163_s23 = sand.u32 (%p68_p3), 1, %s6671_s13  }
  0x11   : > { %s5269_s24 = sshll.u32 (%p68_p3), %s6679_s15, 2  ;;  %s5268_s25 = sshll.u32 (%p68_p3), %s163_s23, 10 }
  0x12   : > { %s6753_s28 = scalar_lea.vmem (%p68_p3), %s8371_s1, %s5269_s24  ;;  %s6757_s29 = scalar_lea.vmem (%p68_p3), [#allocation2], %s5268_s25 }
  0x13   : > { %v184_v0 = vld [vmem:[%s6753_s28] sm:$0xf] (%p68_p3)  ;;  %v186_v1 = vld [vmem:[%s6753_s28 + $0x8] sm:$0xf] (%p68_p3)  ;;  %v188_v2 = vld [vmem:[%s6753_s28 + $0x10] sm:$0xf] (%p68_p3) }
  0x14   : > { %185 = vst [vmem:[%s6757_s29] sm:$0xf] (%p68_p3), %v184_v0  ;;  %v190_v3 = vld [vmem:[%s6753_s28 + $0x18] sm:$0xf] (%p68_p3)  ;;  %v192_v4 = vld [vmem:[%s6753_s28 + $0x20] sm:$0xf] (%p68_p3) }
  0x15   : > { %187 = vst [vmem:[%s6757_s29 + $0x4] sm:$0xf] %v186_v1  ;;  %v194_v5 = vld [vmem:[%s6753_s28 + $0x28] sm:$0xf]  ;;  %v196_v6 = vld [vmem:[%s6753_s28 + $0x30] sm:$0xf] }
  0x16   : > { %189 = vst [vmem:[%s6757_s29 + $0x8] sm:$0xf] %v188_v2  ;;  %v198_v7 = vld [vmem:[%s6753_s28 + $0x38] sm:$0xf]  ;;  %v200_v8 = vld [vmem:[%s6753_s28 + $0x40] sm:$0xf] }
  0x17   : > { %191 = vst [vmem:[%s6757_s29 + $0xc] sm:$0xf] %v190_v3  ;;  %v202_v9 = vld [vmem:[%s6753_s28 + $0x48] sm:$0xf]  ;;  %v204_v10 = vld [vmem:[%s6753_s28 + $0x50] sm:$0xf] }
  0x18   : > { %193 = vst [vmem:[%s6757_s29 + $0x10] sm:$0xf] %v192_v4  ;;  %v206_v11 = vld [vmem:[%s6753_s28 + $0x58] sm:$0xf]  ;;  %v208_v12 = vld [vmem:[%s6753_s28 + $0x60] sm:$0xf] }
  0x19   : > { %195 = vst [vmem:[%s6757_s29 + $0x14] sm:$0xf] %v194_v5  ;;  %v210_v13 = vld [vmem:[%s6753_s28 + $0x68] sm:$0xf]  ;;  %v212_v14 = vld [vmem:[%s6753_s28 + $0x70] sm:$0xf] }
  0x1a   : > { %197 = vst [vmem:[%s6757_s29 + $0x18] sm:$0xf] %v196_v6  ;;  %v214_v15 = vld [vmem:[%s6753_s28 + $0x78] sm:$0xf]  ;;  %v216_v16 = vld [vmem:[%s6753_s28 + $0x80] sm:$0xf] }
  0x1b   : > { %199 = vst [vmem:[%s6757_s29 + $0x1c] sm:$0xf] %v198_v7  ;;  %v218_v17 = vld [vmem:[%s6753_s28 + $0x88] sm:$0xf]  ;;  %v220_v18 = vld [vmem:[%s6753_s28 + $0x90] sm:$0xf] }
  0x1c   : > { %201 = vst [vmem:[%s6757_s29 + $0x20] sm:$0xf] %v200_v8  ;;  %v222_v19 = vld [vmem:[%s6753_s28 + $0x98] sm:$0xf]  ;;  %v224_v20 = vld [vmem:[%s6753_s28 + $0xa0] sm:$0xf] }
  0x1d   : > { %203 = vst [vmem:[%s6757_s29 + $0x24] sm:$0xf] %v202_v9  ;;  %v226_v21 = vld [vmem:[%s6753_s28 + $0xa8] sm:$0xf]  ;;  %v228_v22 = vld [vmem:[%s6753_s28 + $0xb0] sm:$0xf] }
  0x1e   : > { %205 = vst [vmem:[%s6757_s29 + $0x28] sm:$0xf] %v204_v10  ;;  %v230_v23 = vld [vmem:[%s6753_s28 + $0xb8] sm:$0xf]  ;;  %v232_v24 = vld [vmem:[%s6753_s28 + $0xc0] sm:$0xf] }
  0x1f   : > { %207 = vst [vmem:[%s6757_s29 + $0x2c] sm:$0xf] %v206_v11  ;;  %v234_v25 = vld [vmem:[%s6753_s28 + $0xc8] sm:$0xf]  ;;  %v236_v26 = vld [vmem:[%s6753_s28 + $0xd0] sm:$0xf] }
  0x20   : > { %209 = vst [vmem:[%s6757_s29 + $0x30] sm:$0xf] %v208_v12  ;;  %v238_v27 = vld [vmem:[%s6753_s28 + $0xd8] sm:$0xf]  ;;  %v240_v28 = vld [vmem:[%s6753_s28 + $0xe0] sm:$0xf] }
  0x21   : > { %211 = vst [vmem:[%s6757_s29 + $0x34] sm:$0xf] %v210_v13  ;;  %v242_v29 = vld [vmem:[%s6753_s28 + $0xe8] sm:$0xf]  ;;  %v244_v30 = vld [vmem:[%s6753_s28 + $0xf0] sm:$0xf] }
  0x22   : > { %213 = vst [vmem:[%s6757_s29 + $0x38] sm:$0xf] %v212_v14  ;;  %v246_v31 = vld [vmem:[%s6753_s28 + $0xf8] sm:$0xf]  ;;  %v248_v32 = vld [vmem:[%s6753_s28 + $0x100] sm:$0xf] }
  0x23   : > { %215 = vst [vmem:[%s6757_s29 + $0x3c] sm:$0xf] %v214_v15  ;;  %v250_v33 = vld [vmem:[%s6753_s28 + $0x108] sm:$0xf]  ;;  %v252_v34 = vld [vmem:[%s6753_s28 + $0x110] sm:$0xf] }
  0x24   : > { %217 = vst [vmem:[%s6757_s29 + $0x40] sm:$0xf] %v216_v16  ;;  %v254_v35 = vld [vmem:[%s6753_s28 + $0x118] sm:$0xf]  ;;  %v256_v36 = vld [vmem:[%s6753_s28 + $0x120] sm:$0xf] }
  0x25   : > { %219 = vst [vmem:[%s6757_s29 + $0x44] sm:$0xf] %v218_v17  ;;  %v258_v37 = vld [vmem:[%s6753_s28 + $0x128] sm:$0xf]  ;;  %v260_v38 = vld [vmem:[%s6753_s28 + $0x130] sm:$0xf] }
  0x26   : > { %221 = vst [vmem:[%s6757_s29 + $0x48] sm:$0xf] %v220_v18  ;;  %v262_v39 = vld [vmem:[%s6753_s28 + $0x138] sm:$0xf]  ;;  %v264_v40 = vld [vmem:[%s6753_s28 + $0x140] sm:$0xf] }
  0x27   : > { %223 = vst [vmem:[%s6757_s29 + $0x4c] sm:$0xf] %v222_v19  ;;  %v266_v41 = vld [vmem:[%s6753_s28 + $0x148] sm:$0xf]  ;;  %v268_v42 = vld [vmem:[%s6753_s28 + $0x150] sm:$0xf] }
  0x28   : > { %225 = vst [vmem:[%s6757_s29 + $0x50] sm:$0xf] %v224_v20  ;;  %v270_v43 = vld [vmem:[%s6753_s28 + $0x158] sm:$0xf]  ;;  %v272_v44 = vld [vmem:[%s6753_s28 + $0x160] sm:$0xf] }
  0x29   : > { %227 = vst [vmem:[%s6757_s29 + $0x54] sm:$0xf] %v226_v21  ;;  %v274_v45 = vld [vmem:[%s6753_s28 + $0x168] sm:$0xf]  ;;  %v276_v46 = vld [vmem:[%s6753_s28 + $0x170] sm:$0xf] }
  0x2a   : > { %229 = vst [vmem:[%s6757_s29 + $0x58] sm:$0xf] %v228_v22  ;;  %v278_v47 = vld [vmem:[%s6753_s28 + $0x178] sm:$0xf]  ;;  %v280_v48 = vld [vmem:[%s6753_s28 + $0x180] sm:$0xf] }
  0x2b   : > { %231 = vst [vmem:[%s6757_s29 + $0x5c] sm:$0xf] %v230_v23  ;;  %v282_v49 = vld [vmem:[%s6753_s28 + $0x188] sm:$0xf]  ;;  %v284_v50 = vld [vmem:[%s6753_s28 + $0x190] sm:$0xf] }
  0x2c   : > { %233 = vst [vmem:[%s6757_s29 + $0x60] sm:$0xf] %v232_v24  ;;  %v286_v51 = vld [vmem:[%s6753_s28 + $0x198] sm:$0xf]  ;;  %v288_v52 = vld [vmem:[%s6753_s28 + $0x1a0] sm:$0xf] }
  0x2d   : > { %235 = vst [vmem:[%s6757_s29 + $0x64] sm:$0xf] %v234_v25  ;;  %v290_v53 = vld [vmem:[%s6753_s28 + $0x1a8] sm:$0xf]  ;;  %v292_v54 = vld [vmem:[%s6753_s28 + $0x1b0] sm:$0xf] }
  0x2e   : > { %237 = vst [vmem:[%s6757_s29 + $0x68] sm:$0xf] %v236_v26  ;;  %v294_v55 = vld [vmem:[%s6753_s28 + $0x1b8] sm:$0xf]  ;;  %v296_v56 = vld [vmem:[%s6753_s28 + $0x1c0] sm:$0xf] }
  0x2f   : > { %239 = vst [vmem:[%s6757_s29 + $0x6c] sm:$0xf] %v238_v27  ;;  %v298_v57 = vld [vmem:[%s6753_s28 + $0x1c8] sm:$0xf]  ;;  %v300_v58 = vld [vmem:[%s6753_s28 + $0x1d0] sm:$0xf] }
  0x30   : > { %241 = vst [vmem:[%s6757_s29 + $0x70] sm:$0xf] %v240_v28  ;;  %v302_v59 = vld [vmem:[%s6753_s28 + $0x1d8] sm:$0xf]  ;;  %v304_v60 = vld [vmem:[%s6753_s28 + $0x1e0] sm:$0xf] }
  0x31   : > { %243 = vst [vmem:[%s6757_s29 + $0x74] sm:$0xf] %v242_v29  ;;  %v306_v61 = vld [vmem:[%s6753_s28 + $0x1e8] sm:$0xf]  ;;  %v308_v62 = vld [vmem:[%s6753_s28 + $0x1f0] sm:$0xf] }
  0x32   : > { %245 = vst [vmem:[%s6757_s29 + $0x78] sm:$0xf] %v244_v30  ;;  %v310_v63 = vld [vmem:[%s6753_s28 + $0x1f8] sm:$0xf]  ;;  %v312_v0 = vld [vmem:[%s6753_s28 + $0x200] sm:$0xf] }
  0x33   : > { %247 = vst [vmem:[%s6757_s29 + $0x7c] sm:$0xf] %v246_v31  ;;  %v314_v1 = vld [vmem:[%s6753_s28 + $0x208] sm:$0xf]  ;;  %v316_v2 = vld [vmem:[%s6753_s28 + $0x210] sm:$0xf] }
  0x34   : > { %249 = vst [vmem:[%s6757_s29 + $0x80] sm:$0xf] %v248_v32  ;;  %v318_v3 = vld [vmem:[%s6753_s28 + $0x218] sm:$0xf]  ;;  %v320_v4 = vld [vmem:[%s6753_s28 + $0x220] sm:$0xf] }
  0x35   : > { %251 = vst [vmem:[%s6757_s29 + $0x84] sm:$0xf] %v250_v33  ;;  %v322_v5 = vld [vmem:[%s6753_s28 + $0x228] sm:$0xf]  ;;  %v324_v6 = vld [vmem:[%s6753_s28 + $0x230] sm:$0xf] }
  0x36   : > { %253 = vst [vmem:[%s6757_s29 + $0x88] sm:$0xf] %v252_v34  ;;  %v326_v7 = vld [vmem:[%s6753_s28 + $0x238] sm:$0xf]  ;;  %v328_v8 = vld [vmem:[%s6753_s28 + $0x240] sm:$0xf] }
  0x37   : > { %255 = vst [vmem:[%s6757_s29 + $0x8c] sm:$0xf] %v254_v35  ;;  %v330_v9 = vld [vmem:[%s6753_s28 + $0x248] sm:$0xf]  ;;  %v332_v10 = vld [vmem:[%s6753_s28 + $0x250] sm:$0xf] }
  0x38   : > { %257 = vst [vmem:[%s6757_s29 + $0x90] sm:$0xf] %v256_v36  ;;  %v334_v11 = vld [vmem:[%s6753_s28 + $0x258] sm:$0xf]  ;;  %v336_v12 = vld [vmem:[%s6753_s28 + $0x260] sm:$0xf] }
  0x39   : > { %259 = vst [vmem:[%s6757_s29 + $0x94] sm:$0xf] %v258_v37  ;;  %v338_v13 = vld [vmem:[%s6753_s28 + $0x268] sm:$0xf]  ;;  %v340_v14 = vld [vmem:[%s6753_s28 + $0x270] sm:$0xf] }
  0x3a   : > { %261 = vst [vmem:[%s6757_s29 + $0x98] sm:$0xf] %v260_v38  ;;  %v342_v15 = vld [vmem:[%s6753_s28 + $0x278] sm:$0xf]  ;;  %v344_v16 = vld [vmem:[%s6753_s28 + $0x280] sm:$0xf] }
  0x3b   : > { %263 = vst [vmem:[%s6757_s29 + $0x9c] sm:$0xf] %v262_v39  ;;  %v346_v17 = vld [vmem:[%s6753_s28 + $0x288] sm:$0xf]  ;;  %v348_v18 = vld [vmem:[%s6753_s28 + $0x290] sm:$0xf] }
  0x3c   : > { %265 = vst [vmem:[%s6757_s29 + $0xa0] sm:$0xf] %v264_v40  ;;  %v350_v19 = vld [vmem:[%s6753_s28 + $0x298] sm:$0xf]  ;;  %v352_v20 = vld [vmem:[%s6753_s28 + $0x2a0] sm:$0xf] }
  0x3d   : > { %267 = vst [vmem:[%s6757_s29 + $0xa4] sm:$0xf] %v266_v41  ;;  %v354_v21 = vld [vmem:[%s6753_s28 + $0x2a8] sm:$0xf]  ;;  %v356_v22 = vld [vmem:[%s6753_s28 + $0x2b0] sm:$0xf] }
  0x3e   : > { %269 = vst [vmem:[%s6757_s29 + $0xa8] sm:$0xf] %v268_v42  ;;  %v358_v23 = vld [vmem:[%s6753_s28 + $0x2b8] sm:$0xf]  ;;  %v360_v24 = vld [vmem:[%s6753_s28 + $0x2c0] sm:$0xf] }
  0x3f   : > { %271 = vst [vmem:[%s6757_s29 + $0xac] sm:$0xf] %v270_v43  ;;  %v362_v25 = vld [vmem:[%s6753_s28 + $0x2c8] sm:$0xf]  ;;  %v364_v26 = vld [vmem:[%s6753_s28 + $0x2d0] sm:$0xf] }
  0x40   : > { %273 = vst [vmem:[%s6757_s29 + $0xb0] sm:$0xf] %v272_v44  ;;  %v366_v27 = vld [vmem:[%s6753_s28 + $0x2d8] sm:$0xf]  ;;  %v368_v28 = vld [vmem:[%s6753_s28 + $0x2e0] sm:$0xf] }
  0x41   : > { %275 = vst [vmem:[%s6757_s29 + $0xb4] sm:$0xf] %v274_v45  ;;  %v370_v29 = vld [vmem:[%s6753_s28 + $0x2e8] sm:$0xf]  ;;  %v372_v30 = vld [vmem:[%s6753_s28 + $0x2f0] sm:$0xf] }
  0x42   : > { %277 = vst [vmem:[%s6757_s29 + $0xb8] sm:$0xf] %v276_v46  ;;  %v374_v31 = vld [vmem:[%s6753_s28 + $0x2f8] sm:$0xf]  ;;  %v376_v32 = vld [vmem:[%s6753_s28 + $0x300] sm:$0xf] }
  0x43   : > { %279 = vst [vmem:[%s6757_s29 + $0xbc] sm:$0xf] %v278_v47  ;;  %v378_v33 = vld [vmem:[%s6753_s28 + $0x308] sm:$0xf]  ;;  %v380_v34 = vld [vmem:[%s6753_s28 + $0x310] sm:$0xf] }
  0x44   : > { %281 = vst [vmem:[%s6757_s29 + $0xc0] sm:$0xf] %v280_v48  ;;  %v382_v35 = vld [vmem:[%s6753_s28 + $0x318] sm:$0xf]  ;;  %v384_v36 = vld [vmem:[%s6753_s28 + $0x320] sm:$0xf] }
  0x45   : > { %283 = vst [vmem:[%s6757_s29 + $0xc4] sm:$0xf] %v282_v49  ;;  %v386_v37 = vld [vmem:[%s6753_s28 + $0x328] sm:$0xf]  ;;  %v388_v38 = vld [vmem:[%s6753_s28 + $0x330] sm:$0xf] }
  0x46   : > { %285 = vst [vmem:[%s6757_s29 + $0xc8] sm:$0xf] %v284_v50  ;;  %v390_v39 = vld [vmem:[%s6753_s28 + $0x338] sm:$0xf]  ;;  %v392_v40 = vld [vmem:[%s6753_s28 + $0x340] sm:$0xf] }
  0x47   : > { %287 = vst [vmem:[%s6757_s29 + $0xcc] sm:$0xf] %v286_v51  ;;  %v394_v41 = vld [vmem:[%s6753_s28 + $0x348] sm:$0xf]  ;;  %v396_v42 = vld [vmem:[%s6753_s28 + $0x350] sm:$0xf] }
  0x48   : > { %289 = vst [vmem:[%s6757_s29 + $0xd0] sm:$0xf] %v288_v52  ;;  %v398_v43 = vld [vmem:[%s6753_s28 + $0x358] sm:$0xf]  ;;  %v400_v44 = vld [vmem:[%s6753_s28 + $0x360] sm:$0xf] }
  0x49   : > { %291 = vst [vmem:[%s6757_s29 + $0xd4] sm:$0xf] %v290_v53  ;;  %v402_v45 = vld [vmem:[%s6753_s28 + $0x368] sm:$0xf]  ;;  %v404_v46 = vld [vmem:[%s6753_s28 + $0x370] sm:$0xf] }
  0x4a   : > { %293 = vst [vmem:[%s6757_s29 + $0xd8] sm:$0xf] %v292_v54  ;;  %v406_v47 = vld [vmem:[%s6753_s28 + $0x378] sm:$0xf]  ;;  %v408_v48 = vld [vmem:[%s6753_s28 + $0x380] sm:$0xf] }
  0x4b   : > { %295 = vst [vmem:[%s6757_s29 + $0xdc] sm:$0xf] %v294_v55  ;;  %v410_v49 = vld [vmem:[%s6753_s28 + $0x388] sm:$0xf]  ;;  %v412_v50 = vld [vmem:[%s6753_s28 + $0x390] sm:$0xf] }
  0x4c   : > { %297 = vst [vmem:[%s6757_s29 + $0xe0] sm:$0xf] %v296_v56  ;;  %v414_v51 = vld [vmem:[%s6753_s28 + $0x398] sm:$0xf]  ;;  %v416_v52 = vld [vmem:[%s6753_s28 + $0x3a0] sm:$0xf] }
  0x4d   : > { %299 = vst [vmem:[%s6757_s29 + $0xe4] sm:$0xf] %v298_v57  ;;  %v418_v53 = vld [vmem:[%s6753_s28 + $0x3a8] sm:$0xf]  ;;  %v420_v54 = vld [vmem:[%s6753_s28 + $0x3b0] sm:$0xf] }
  0x4e   : > { %301 = vst [vmem:[%s6757_s29 + $0xe8] sm:$0xf] %v300_v58  ;;  %v422_v55 = vld [vmem:[%s6753_s28 + $0x3b8] sm:$0xf]  ;;  %v424_v56 = vld [vmem:[%s6753_s28 + $0x3c0] sm:$0xf] }
  0x4f   : > { %303 = vst [vmem:[%s6757_s29 + $0xec] sm:$0xf] %v302_v59  ;;  %v426_v57 = vld [vmem:[%s6753_s28 + $0x3c8] sm:$0xf]  ;;  %v428_v58 = vld [vmem:[%s6753_s28 + $0x3d0] sm:$0xf] }
  0x50   : > { %305 = vst [vmem:[%s6757_s29 + $0xf0] sm:$0xf] %v304_v60  ;;  %v430_v59 = vld [vmem:[%s6753_s28 + $0x3d8] sm:$0xf]  ;;  %v432_v60 = vld [vmem:[%s6753_s28 + $0x3e0] sm:$0xf] }
  0x51   : > { %307 = vst [vmem:[%s6757_s29 + $0xf4] sm:$0xf] %v306_v61  ;;  %v434_v61 = vld [vmem:[%s6753_s28 + $0x3e8] sm:$0xf] }
  0x52   : > { %309 = vst [vmem:[%s6757_s29 + $0xf8] sm:$0xf] %v308_v62  ;;  %v436_v62 = vld [vmem:[%s6753_s28 + $0x3f0] sm:$0xf] }
  0x53   : > { %311 = vst [vmem:[%s6757_s29 + $0xfc] sm:$0xf] %v310_v63  ;;  %v438_v63 = vld [vmem:[%s6753_s28 + $0x3f8] sm:$0xf] }
  0x54   : > { %313 = vst [vmem:[%s6757_s29 + $0x100] sm:$0xf] %v312_v0  ;;  %v440_v0 = vld [vmem:[%s6753_s28 + $0x400] sm:$0xf] }
  0x55   : > { %315 = vst [vmem:[%s6757_s29 + $0x104] sm:$0xf] %v314_v1  ;;  %v442_v1 = vld [vmem:[%s6753_s28 + $0x408] sm:$0xf] }
  0x56   : > { %317 = vst [vmem:[%s6757_s29 + $0x108] sm:$0xf] %v316_v2  ;;  %v444_v2 = vld [vmem:[%s6753_s28 + $0x410] sm:$0xf] }
  0x57   : > { %319 = vst [vmem:[%s6757_s29 + $0x10c] sm:$0xf] %v318_v3  ;;  %v446_v3 = vld [vmem:[%s6753_s28 + $0x418] sm:$0xf] }
  0x58   : > { %321 = vst [vmem:[%s6757_s29 + $0x110] sm:$0xf] %v320_v4  ;;  %v448_v4 = vld [vmem:[%s6753_s28 + $0x420] sm:$0xf] }
  0x59   : > { %323 = vst [vmem:[%s6757_s29 + $0x114] sm:$0xf] %v322_v5  ;;  %v450_v5 = vld [vmem:[%s6753_s28 + $0x428] sm:$0xf] }
  0x5a   : > { %325 = vst [vmem:[%s6757_s29 + $0x118] sm:$0xf] %v324_v6  ;;  %v452_v6 = vld [vmem:[%s6753_s28 + $0x430] sm:$0xf] }
  0x5b   : > { %327 = vst [vmem:[%s6757_s29 + $0x11c] sm:$0xf] %v326_v7  ;;  %v454_v7 = vld [vmem:[%s6753_s28 + $0x438] sm:$0xf] }
  0x5c   : > { %329 = vst [vmem:[%s6757_s29 + $0x120] sm:$0xf] %v328_v8  ;;  %v456_v8 = vld [vmem:[%s6753_s28 + $0x440] sm:$0xf] }
  0x5d   : > { %331 = vst [vmem:[%s6757_s29 + $0x124] sm:$0xf] %v330_v9  ;;  %v458_v9 = vld [vmem:[%s6753_s28 + $0x448] sm:$0xf] }
  0x5e   : > { %333 = vst [vmem:[%s6757_s29 + $0x128] sm:$0xf] %v332_v10  ;;  %v460_v10 = vld [vmem:[%s6753_s28 + $0x450] sm:$0xf] }
  0x5f   : > { %335 = vst [vmem:[%s6757_s29 + $0x12c] sm:$0xf] %v334_v11  ;;  %v462_v11 = vld [vmem:[%s6753_s28 + $0x458] sm:$0xf] }
  0x60   : > { %337 = vst [vmem:[%s6757_s29 + $0x130] sm:$0xf] %v336_v12  ;;  %v464_v12 = vld [vmem:[%s6753_s28 + $0x460] sm:$0xf] }
  0x61   : > { %339 = vst [vmem:[%s6757_s29 + $0x134] sm:$0xf] %v338_v13  ;;  %v466_v13 = vld [vmem:[%s6753_s28 + $0x468] sm:$0xf] }
  0x62   : > { %341 = vst [vmem:[%s6757_s29 + $0x138] sm:$0xf] %v340_v14  ;;  %v468_v14 = vld [vmem:[%s6753_s28 + $0x470] sm:$0xf] }
  0x63   : > { %343 = vst [vmem:[%s6757_s29 + $0x13c] sm:$0xf] %v342_v15  ;;  %v470_v15 = vld [vmem:[%s6753_s28 + $0x478] sm:$0xf] }
  0x64   : > { %345 = vst [vmem:[%s6757_s29 + $0x140] sm:$0xf] %v344_v16  ;;  %v472_v16 = vld [vmem:[%s6753_s28 + $0x480] sm:$0xf] }
  0x65   : > { %347 = vst [vmem:[%s6757_s29 + $0x144] sm:$0xf] %v346_v17  ;;  %v474_v17 = vld [vmem:[%s6753_s28 + $0x488] sm:$0xf] }
  0x66   : > { %349 = vst [vmem:[%s6757_s29 + $0x148] sm:$0xf] %v348_v18  ;;  %v476_v18 = vld [vmem:[%s6753_s28 + $0x490] sm:$0xf] }
  0x67   : > { %351 = vst [vmem:[%s6757_s29 + $0x14c] sm:$0xf] %v350_v19  ;;  %v478_v19 = vld [vmem:[%s6753_s28 + $0x498] sm:$0xf] }
  0x68   : > { %353 = vst [vmem:[%s6757_s29 + $0x150] sm:$0xf] %v352_v20  ;;  %v480_v20 = vld [vmem:[%s6753_s28 + $0x4a0] sm:$0xf] }
  0x69   : > { %355 = vst [vmem:[%s6757_s29 + $0x154] sm:$0xf] %v354_v21  ;;  %v482_v21 = vld [vmem:[%s6753_s28 + $0x4a8] sm:$0xf] }
  0x6a   : > { %357 = vst [vmem:[%s6757_s29 + $0x158] sm:$0xf] %v356_v22  ;;  %v484_v22 = vld [vmem:[%s6753_s28 + $0x4b0] sm:$0xf] }
  0x6b   : > { %359 = vst [vmem:[%s6757_s29 + $0x15c] sm:$0xf] %v358_v23  ;;  %v486_v23 = vld [vmem:[%s6753_s28 + $0x4b8] sm:$0xf] }
  0x6c   : > { %361 = vst [vmem:[%s6757_s29 + $0x160] sm:$0xf] %v360_v24  ;;  %v488_v24 = vld [vmem:[%s6753_s28 + $0x4c0] sm:$0xf] }
  0x6d   : > { %363 = vst [vmem:[%s6757_s29 + $0x164] sm:$0xf] %v362_v25  ;;  %v490_v25 = vld [vmem:[%s6753_s28 + $0x4c8] sm:$0xf] }
  0x6e   : > { %365 = vst [vmem:[%s6757_s29 + $0x168] sm:$0xf] %v364_v26  ;;  %v492_v26 = vld [vmem:[%s6753_s28 + $0x4d0] sm:$0xf] }
  0x6f   : > { %367 = vst [vmem:[%s6757_s29 + $0x16c] sm:$0xf] %v366_v27  ;;  %v494_v27 = vld [vmem:[%s6753_s28 + $0x4d8] sm:$0xf] }
  0x70   : > { %369 = vst [vmem:[%s6757_s29 + $0x170] sm:$0xf] %v368_v28  ;;  %v496_v28 = vld [vmem:[%s6753_s28 + $0x4e0] sm:$0xf] }
  0x71   : > { %371 = vst [vmem:[%s6757_s29 + $0x174] sm:$0xf] %v370_v29  ;;  %v498_v29 = vld [vmem:[%s6753_s28 + $0x4e8] sm:$0xf] }
  0x72   : > { %373 = vst [vmem:[%s6757_s29 + $0x178] sm:$0xf] %v372_v30  ;;  %v500_v30 = vld [vmem:[%s6753_s28 + $0x4f0] sm:$0xf] }
  0x73   : > { %375 = vst [vmem:[%s6757_s29 + $0x17c] sm:$0xf] %v374_v31  ;;  %v502_v31 = vld [vmem:[%s6753_s28 + $0x4f8] sm:$0xf] }
  0x74   : > { %377 = vst [vmem:[%s6757_s29 + $0x180] sm:$0xf] %v376_v32  ;;  %v504_v32 = vld [vmem:[%s6753_s28 + $0x500] sm:$0xf] }
  0x75   : > { %379 = vst [vmem:[%s6757_s29 + $0x184] sm:$0xf] %v378_v33  ;;  %v506_v33 = vld [vmem:[%s6753_s28 + $0x508] sm:$0xf] }
  0x76   : > { %381 = vst [vmem:[%s6757_s29 + $0x188] sm:$0xf] %v380_v34  ;;  %v508_v34 = vld [vmem:[%s6753_s28 + $0x510] sm:$0xf] }
  0x77   : > { %383 = vst [vmem:[%s6757_s29 + $0x18c] sm:$0xf] %v382_v35  ;;  %v510_v35 = vld [vmem:[%s6753_s28 + $0x518] sm:$0xf] }
  0x78   : > { %385 = vst [vmem:[%s6757_s29 + $0x190] sm:$0xf] %v384_v36  ;;  %v512_v36 = vld [vmem:[%s6753_s28 + $0x520] sm:$0xf] }
  0x79   : > { %387 = vst [vmem:[%s6757_s29 + $0x194] sm:$0xf] %v386_v37  ;;  %v514_v37 = vld [vmem:[%s6753_s28 + $0x528] sm:$0xf] }
  0x7a   : > { %389 = vst [vmem:[%s6757_s29 + $0x198] sm:$0xf] %v388_v38  ;;  %v516_v38 = vld [vmem:[%s6753_s28 + $0x530] sm:$0xf] }
  0x7b   : > { %391 = vst [vmem:[%s6757_s29 + $0x19c] sm:$0xf] %v390_v39  ;;  %v518_v39 = vld [vmem:[%s6753_s28 + $0x538] sm:$0xf] }
  0x7c   : > { %393 = vst [vmem:[%s6757_s29 + $0x1a0] sm:$0xf] %v392_v40  ;;  %v520_v40 = vld [vmem:[%s6753_s28 + $0x540] sm:$0xf] }
  0x7d   : > { %395 = vst [vmem:[%s6757_s29 + $0x1a4] sm:$0xf] %v394_v41  ;;  %v522_v41 = vld [vmem:[%s6753_s28 + $0x548] sm:$0xf] }
  0x7e   : > { %397 = vst [vmem:[%s6757_s29 + $0x1a8] sm:$0xf] %v396_v42  ;;  %v524_v42 = vld [vmem:[%s6753_s28 + $0x550] sm:$0xf] }
  0x7f   : > { %399 = vst [vmem:[%s6757_s29 + $0x1ac] sm:$0xf] %v398_v43  ;;  %v526_v43 = vld [vmem:[%s6753_s28 + $0x558] sm:$0xf] }
  0x80   : > { %401 = vst [vmem:[%s6757_s29 + $0x1b0] sm:$0xf] %v400_v44  ;;  %v528_v44 = vld [vmem:[%s6753_s28 + $0x560] sm:$0xf] }
  0x81   : > { %403 = vst [vmem:[%s6757_s29 + $0x1b4] sm:$0xf] %v402_v45  ;;  %v530_v45 = vld [vmem:[%s6753_s28 + $0x568] sm:$0xf] }
  0x82   : > { %405 = vst [vmem:[%s6757_s29 + $0x1b8] sm:$0xf] %v404_v46  ;;  %v532_v46 = vld [vmem:[%s6753_s28 + $0x570] sm:$0xf] }
  0x83   : > { %407 = vst [vmem:[%s6757_s29 + $0x1bc] sm:$0xf] %v406_v47  ;;  %v534_v47 = vld [vmem:[%s6753_s28 + $0x578] sm:$0xf] }
  0x84   : > { %409 = vst [vmem:[%s6757_s29 + $0x1c0] sm:$0xf] %v408_v48  ;;  %v536_v48 = vld [vmem:[%s6753_s28 + $0x580] sm:$0xf] }
  0x85   : > { %411 = vst [vmem:[%s6757_s29 + $0x1c4] sm:$0xf] %v410_v49  ;;  %v538_v49 = vld [vmem:[%s6753_s28 + $0x588] sm:$0xf] }
  0x86   : > { %413 = vst [vmem:[%s6757_s29 + $0x1c8] sm:$0xf] %v412_v50  ;;  %v540_v50 = vld [vmem:[%s6753_s28 + $0x590] sm:$0xf] }
  0x87   : > { %415 = vst [vmem:[%s6757_s29 + $0x1cc] sm:$0xf] %v414_v51  ;;  %v542_v51 = vld [vmem:[%s6753_s28 + $0x598] sm:$0xf] }
  0x88   : > { %417 = vst [vmem:[%s6757_s29 + $0x1d0] sm:$0xf] %v416_v52  ;;  %v544_v52 = vld [vmem:[%s6753_s28 + $0x5a0] sm:$0xf] }
  0x89   : > { %419 = vst [vmem:[%s6757_s29 + $0x1d4] sm:$0xf] %v418_v53  ;;  %v546_v53 = vld [vmem:[%s6753_s28 + $0x5a8] sm:$0xf] }
  0x8a   : > { %421 = vst [vmem:[%s6757_s29 + $0x1d8] sm:$0xf] %v420_v54  ;;  %v548_v54 = vld [vmem:[%s6753_s28 + $0x5b0] sm:$0xf] }
  0x8b   : > { %423 = vst [vmem:[%s6757_s29 + $0x1dc] sm:$0xf] %v422_v55  ;;  %v550_v55 = vld [vmem:[%s6753_s28 + $0x5b8] sm:$0xf] }
  0x8c   : > { %425 = vst [vmem:[%s6757_s29 + $0x1e0] sm:$0xf] %v424_v56  ;;  %v552_v56 = vld [vmem:[%s6753_s28 + $0x5c0] sm:$0xf] }
  0x8d   : > { %427 = vst [vmem:[%s6757_s29 + $0x1e4] sm:$0xf] %v426_v57  ;;  %v554_v57 = vld [vmem:[%s6753_s28 + $0x5c8] sm:$0xf] }
  0x8e   : > { %429 = vst [vmem:[%s6757_s29 + $0x1e8] sm:$0xf] %v428_v58  ;;  %v556_v58 = vld [vmem:[%s6753_s28 + $0x5d0] sm:$0xf] }
  0x8f   : > { %431 = vst [vmem:[%s6757_s29 + $0x1ec] sm:$0xf] %v430_v59  ;;  %v558_v59 = vld [vmem:[%s6753_s28 + $0x5d8] sm:$0xf] }
  0x90   : > { %433 = vst [vmem:[%s6757_s29 + $0x1f0] sm:$0xf] %v432_v60  ;;  %v560_v60 = vld [vmem:[%s6753_s28 + $0x5e0] sm:$0xf] }
  0x91   : > { %435 = vst [vmem:[%s6757_s29 + $0x1f4] sm:$0xf] %v434_v61  ;;  %v562_v61 = vld [vmem:[%s6753_s28 + $0x5e8] sm:$0xf] }
  0x92   : > { %437 = vst [vmem:[%s6757_s29 + $0x1f8] sm:$0xf] %v436_v62  ;;  %v564_v62 = vld [vmem:[%s6753_s28 + $0x5f0] sm:$0xf] }
  0x93   : > { %439 = vst [vmem:[%s6757_s29 + $0x1fc] sm:$0xf] %v438_v63  ;;  %v566_v63 = vld [vmem:[%s6753_s28 + $0x5f8] sm:$0xf] }
  0x94   : > { %441 = vst [vmem:[%s6757_s29 + $0x200] sm:$0xf] %v440_v0  ;;  %v568_v0 = vld [vmem:[%s6753_s28 + $0x600] sm:$0xf] }
  0x95   : > { %443 = vst [vmem:[%s6757_s29 + $0x204] sm:$0xf] %v442_v1  ;;  %v570_v1 = vld [vmem:[%s6753_s28 + $0x608] sm:$0xf] }
  0x96   : > { %445 = vst [vmem:[%s6757_s29 + $0x208] sm:$0xf] %v444_v2  ;;  %v572_v2 = vld [vmem:[%s6753_s28 + $0x610] sm:$0xf] }
  0x97   : > { %447 = vst [vmem:[%s6757_s29 + $0x20c] sm:$0xf] %v446_v3  ;;  %v574_v3 = vld [vmem:[%s6753_s28 + $0x618] sm:$0xf] }
  0x98   : > { %449 = vst [vmem:[%s6757_s29 + $0x210] sm:$0xf] %v448_v4  ;;  %v576_v4 = vld [vmem:[%s6753_s28 + $0x620] sm:$0xf] }
  0x99   : > { %451 = vst [vmem:[%s6757_s29 + $0x214] sm:$0xf] %v450_v5  ;;  %v578_v5 = vld [vmem:[%s6753_s28 + $0x628] sm:$0xf] }
  0x9a   : > { %453 = vst [vmem:[%s6757_s29 + $0x218] sm:$0xf] %v452_v6  ;;  %v580_v6 = vld [vmem:[%s6753_s28 + $0x630] sm:$0xf] }
  0x9b   : > { %455 = vst [vmem:[%s6757_s29 + $0x21c] sm:$0xf] %v454_v7  ;;  %v582_v7 = vld [vmem:[%s6753_s28 + $0x638] sm:$0xf] }
  0x9c   : > { %457 = vst [vmem:[%s6757_s29 + $0x220] sm:$0xf] %v456_v8  ;;  %v584_v8 = vld [vmem:[%s6753_s28 + $0x640] sm:$0xf] }
  0x9d   : > { %459 = vst [vmem:[%s6757_s29 + $0x224] sm:$0xf] %v458_v9  ;;  %v586_v9 = vld [vmem:[%s6753_s28 + $0x648] sm:$0xf] }
  0x9e   : > { %461 = vst [vmem:[%s6757_s29 + $0x228] sm:$0xf] %v460_v10  ;;  %v588_v10 = vld [vmem:[%s6753_s28 + $0x650] sm:$0xf] }
  0x9f   : > { %463 = vst [vmem:[%s6757_s29 + $0x22c] sm:$0xf] %v462_v11  ;;  %v590_v11 = vld [vmem:[%s6753_s28 + $0x658] sm:$0xf] }
  0xa0   : > { %465 = vst [vmem:[%s6757_s29 + $0x230] sm:$0xf] %v464_v12  ;;  %v592_v12 = vld [vmem:[%s6753_s28 + $0x660] sm:$0xf] }
  0xa1   : > { %467 = vst [vmem:[%s6757_s29 + $0x234] sm:$0xf] %v466_v13  ;;  %v594_v13 = vld [vmem:[%s6753_s28 + $0x668] sm:$0xf] }
  0xa2   : > { %469 = vst [vmem:[%s6757_s29 + $0x238] sm:$0xf] %v468_v14  ;;  %v596_v14 = vld [vmem:[%s6753_s28 + $0x670] sm:$0xf] }
  0xa3   : > { %471 = vst [vmem:[%s6757_s29 + $0x23c] sm:$0xf] %v470_v15  ;;  %v598_v15 = vld [vmem:[%s6753_s28 + $0x678] sm:$0xf] }
  0xa4   : > { %473 = vst [vmem:[%s6757_s29 + $0x240] sm:$0xf] %v472_v16  ;;  %v600_v16 = vld [vmem:[%s6753_s28 + $0x680] sm:$0xf] }
  0xa5   : > { %475 = vst [vmem:[%s6757_s29 + $0x244] sm:$0xf] %v474_v17  ;;  %v602_v17 = vld [vmem:[%s6753_s28 + $0x688] sm:$0xf] }
  0xa6   : > { %477 = vst [vmem:[%s6757_s29 + $0x248] sm:$0xf] %v476_v18  ;;  %v604_v18 = vld [vmem:[%s6753_s28 + $0x690] sm:$0xf] }
  0xa7   : > { %479 = vst [vmem:[%s6757_s29 + $0x24c] sm:$0xf] %v478_v19  ;;  %v606_v19 = vld [vmem:[%s6753_s28 + $0x698] sm:$0xf] }
  0xa8   : > { %481 = vst [vmem:[%s6757_s29 + $0x250] sm:$0xf] %v480_v20  ;;  %v608_v20 = vld [vmem:[%s6753_s28 + $0x6a0] sm:$0xf] }
  0xa9   : > { %483 = vst [vmem:[%s6757_s29 + $0x254] sm:$0xf] %v482_v21  ;;  %v610_v21 = vld [vmem:[%s6753_s28 + $0x6a8] sm:$0xf] }
  0xaa   : > { %485 = vst [vmem:[%s6757_s29 + $0x258] sm:$0xf] %v484_v22  ;;  %v612_v22 = vld [vmem:[%s6753_s28 + $0x6b0] sm:$0xf] }
  0xab   : > { %487 = vst [vmem:[%s6757_s29 + $0x25c] sm:$0xf] %v486_v23  ;;  %v614_v23 = vld [vmem:[%s6753_s28 + $0x6b8] sm:$0xf] }
  0xac   : > { %489 = vst [vmem:[%s6757_s29 + $0x260] sm:$0xf] %v488_v24  ;;  %v616_v24 = vld [vmem:[%s6753_s28 + $0x6c0] sm:$0xf] }
  0xad   : > { %491 = vst [vmem:[%s6757_s29 + $0x264] sm:$0xf] %v490_v25  ;;  %v618_v25 = vld [vmem:[%s6753_s28 + $0x6c8] sm:$0xf] }
  0xae   : > { %493 = vst [vmem:[%s6757_s29 + $0x268] sm:$0xf] %v492_v26  ;;  %v620_v26 = vld [vmem:[%s6753_s28 + $0x6d0] sm:$0xf] }
  0xaf   : > { %495 = vst [vmem:[%s6757_s29 + $0x26c] sm:$0xf] %v494_v27  ;;  %v622_v27 = vld [vmem:[%s6753_s28 + $0x6d8] sm:$0xf] }
  0xb0   : > { %497 = vst [vmem:[%s6757_s29 + $0x270] sm:$0xf] %v496_v28  ;;  %v624_v28 = vld [vmem:[%s6753_s28 + $0x6e0] sm:$0xf] }
  0xb1   : > { %499 = vst [vmem:[%s6757_s29 + $0x274] sm:$0xf] %v498_v29  ;;  %v626_v29 = vld [vmem:[%s6753_s28 + $0x6e8] sm:$0xf] }
  0xb2   : > { %501 = vst [vmem:[%s6757_s29 + $0x278] sm:$0xf] %v500_v30  ;;  %v628_v30 = vld [vmem:[%s6753_s28 + $0x6f0] sm:$0xf] }
  0xb3   : > { %503 = vst [vmem:[%s6757_s29 + $0x27c] sm:$0xf] %v502_v31  ;;  %v630_v31 = vld [vmem:[%s6753_s28 + $0x6f8] sm:$0xf] }
  0xb4   : > { %505 = vst [vmem:[%s6757_s29 + $0x280] sm:$0xf] %v504_v32  ;;  %v632_v32 = vld [vmem:[%s6753_s28 + $0x700] sm:$0xf] }
  0xb5   : > { %507 = vst [vmem:[%s6757_s29 + $0x284] sm:$0xf] %v506_v33  ;;  %v634_v33 = vld [vmem:[%s6753_s28 + $0x708] sm:$0xf] }
  0xb6   : > { %509 = vst [vmem:[%s6757_s29 + $0x288] sm:$0xf] %v508_v34  ;;  %v636_v34 = vld [vmem:[%s6753_s28 + $0x710] sm:$0xf] }
  0xb7   : > { %511 = vst [vmem:[%s6757_s29 + $0x28c] sm:$0xf] %v510_v35  ;;  %v638_v35 = vld [vmem:[%s6753_s28 + $0x718] sm:$0xf] }
  0xb8   : > { %513 = vst [vmem:[%s6757_s29 + $0x290] sm:$0xf] %v512_v36  ;;  %v640_v36 = vld [vmem:[%s6753_s28 + $0x720] sm:$0xf] }
  0xb9   : > { %515 = vst [vmem:[%s6757_s29 + $0x294] sm:$0xf] %v514_v37  ;;  %v642_v37 = vld [vmem:[%s6753_s28 + $0x728] sm:$0xf] }
  0xba   : > { %517 = vst [vmem:[%s6757_s29 + $0x298] sm:$0xf] %v516_v38  ;;  %v644_v38 = vld [vmem:[%s6753_s28 + $0x730] sm:$0xf] }
  0xbb   : > { %519 = vst [vmem:[%s6757_s29 + $0x29c] sm:$0xf] %v518_v39  ;;  %v646_v39 = vld [vmem:[%s6753_s28 + $0x738] sm:$0xf] }
  0xbc   : > { %521 = vst [vmem:[%s6757_s29 + $0x2a0] sm:$0xf] %v520_v40  ;;  %v648_v40 = vld [vmem:[%s6753_s28 + $0x740] sm:$0xf] }
  0xbd   : > { %523 = vst [vmem:[%s6757_s29 + $0x2a4] sm:$0xf] %v522_v41  ;;  %v650_v41 = vld [vmem:[%s6753_s28 + $0x748] sm:$0xf] }
  0xbe   : > { %525 = vst [vmem:[%s6757_s29 + $0x2a8] sm:$0xf] %v524_v42  ;;  %v652_v42 = vld [vmem:[%s6753_s28 + $0x750] sm:$0xf] }
  0xbf   : > { %527 = vst [vmem:[%s6757_s29 + $0x2ac] sm:$0xf] %v526_v43  ;;  %v654_v43 = vld [vmem:[%s6753_s28 + $0x758] sm:$0xf] }
  0xc0   : > { %529 = vst [vmem:[%s6757_s29 + $0x2b0] sm:$0xf] %v528_v44  ;;  %v656_v44 = vld [vmem:[%s6753_s28 + $0x760] sm:$0xf] }
  0xc1   : > { %531 = vst [vmem:[%s6757_s29 + $0x2b4] sm:$0xf] %v530_v45  ;;  %v658_v45 = vld [vmem:[%s6753_s28 + $0x768] sm:$0xf] }
  0xc2   : > { %533 = vst [vmem:[%s6757_s29 + $0x2b8] sm:$0xf] %v532_v46  ;;  %v660_v46 = vld [vmem:[%s6753_s28 + $0x770] sm:$0xf] }
  0xc3   : > { %535 = vst [vmem:[%s6757_s29 + $0x2bc] sm:$0xf] %v534_v47  ;;  %v662_v47 = vld [vmem:[%s6753_s28 + $0x778] sm:$0xf] }
  0xc4   : > { %537 = vst [vmem:[%s6757_s29 + $0x2c0] sm:$0xf] %v536_v48  ;;  %v664_v48 = vld [vmem:[%s6753_s28 + $0x780] sm:$0xf] }
  0xc5   : > { %539 = vst [vmem:[%s6757_s29 + $0x2c4] sm:$0xf] %v538_v49  ;;  %v666_v49 = vld [vmem:[%s6753_s28 + $0x788] sm:$0xf] }
  0xc6   : > { %541 = vst [vmem:[%s6757_s29 + $0x2c8] sm:$0xf] %v540_v50  ;;  %v668_v50 = vld [vmem:[%s6753_s28 + $0x790] sm:$0xf] }
  0xc7   : > { %543 = vst [vmem:[%s6757_s29 + $0x2cc] sm:$0xf] %v542_v51  ;;  %v670_v51 = vld [vmem:[%s6753_s28 + $0x798] sm:$0xf] }
  0xc8   : > { %545 = vst [vmem:[%s6757_s29 + $0x2d0] sm:$0xf] %v544_v52  ;;  %v672_v52 = vld [vmem:[%s6753_s28 + $0x7a0] sm:$0xf] }
  0xc9   : > { %547 = vst [vmem:[%s6757_s29 + $0x2d4] sm:$0xf] %v546_v53  ;;  %v674_v53 = vld [vmem:[%s6753_s28 + $0x7a8] sm:$0xf] }
  0xca   : > { %549 = vst [vmem:[%s6757_s29 + $0x2d8] sm:$0xf] %v548_v54  ;;  %v676_v54 = vld [vmem:[%s6753_s28 + $0x7b0] sm:$0xf] }
  0xcb   : > { %551 = vst [vmem:[%s6757_s29 + $0x2dc] sm:$0xf] %v550_v55  ;;  %v678_v55 = vld [vmem:[%s6753_s28 + $0x7b8] sm:$0xf] }
  0xcc   : > { %553 = vst [vmem:[%s6757_s29 + $0x2e0] sm:$0xf] %v552_v56  ;;  %v680_v56 = vld [vmem:[%s6753_s28 + $0x7c0] sm:$0xf] }
  0xcd   : > { %555 = vst [vmem:[%s6757_s29 + $0x2e4] sm:$0xf] %v554_v57  ;;  %v682_v57 = vld [vmem:[%s6753_s28 + $0x7c8] sm:$0xf] }
  0xce   : > { %557 = vst [vmem:[%s6757_s29 + $0x2e8] sm:$0xf] %v556_v58  ;;  %v684_v58 = vld [vmem:[%s6753_s28 + $0x7d0] sm:$0xf] }
  0xcf   : > { %559 = vst [vmem:[%s6757_s29 + $0x2ec] sm:$0xf] %v558_v59  ;;  %v686_v59 = vld [vmem:[%s6753_s28 + $0x7d8] sm:$0xf] }
  0xd0   : > { %561 = vst [vmem:[%s6757_s29 + $0x2f0] sm:$0xf] %v560_v60  ;;  %v688_v60 = vld [vmem:[%s6753_s28 + $0x7e0] sm:$0xf] }
  0xd1   : > { %563 = vst [vmem:[%s6757_s29 + $0x2f4] sm:$0xf] %v562_v61  ;;  %v690_v61 = vld [vmem:[%s6753_s28 + $0x7e8] sm:$0xf] }
  0xd2   : > { %565 = vst [vmem:[%s6757_s29 + $0x2f8] sm:$0xf] %v564_v62  ;;  %v692_v62 = vld [vmem:[%s6753_s28 + $0x7f0] sm:$0xf] }
  0xd3   : > { %567 = vst [vmem:[%s6757_s29 + $0x2fc] sm:$0xf] %v566_v63  ;;  %v694_v63 = vld [vmem:[%s6753_s28 + $0x7f8] sm:$0xf] }
  0xd4   : > { %569 = vst [vmem:[%s6757_s29 + $0x300] sm:$0xf] %v568_v0 }
  0xd5   : > { %571 = vst [vmem:[%s6757_s29 + $0x304] sm:$0xf] %v570_v1 }
  0xd6   : > { %573 = vst [vmem:[%s6757_s29 + $0x308] sm:$0xf] %v572_v2 }
  0xd7   : > { %575 = vst [vmem:[%s6757_s29 + $0x30c] sm:$0xf] %v574_v3 }
  0xd8   : > { %577 = vst [vmem:[%s6757_s29 + $0x310] sm:$0xf] %v576_v4 }
  0xd9   : > { %579 = vst [vmem:[%s6757_s29 + $0x314] sm:$0xf] %v578_v5 }
  0xda   : > { %581 = vst [vmem:[%s6757_s29 + $0x318] sm:$0xf] %v580_v6 }
  0xdb   : > { %583 = vst [vmem:[%s6757_s29 + $0x31c] sm:$0xf] %v582_v7 }
  0xdc   : > { %585 = vst [vmem:[%s6757_s29 + $0x320] sm:$0xf] %v584_v8 }
  0xdd   : > { %587 = vst [vmem:[%s6757_s29 + $0x324] sm:$0xf] %v586_v9 }
  0xde   : > { %589 = vst [vmem:[%s6757_s29 + $0x328] sm:$0xf] %v588_v10 }
  0xdf   : > { %591 = vst [vmem:[%s6757_s29 + $0x32c] sm:$0xf] %v590_v11 }
  0xe0   : > { %593 = vst [vmem:[%s6757_s29 + $0x330] sm:$0xf] %v592_v12 }
  0xe1   : > { %595 = vst [vmem:[%s6757_s29 + $0x334] sm:$0xf] %v594_v13 }
  0xe2   : > { %597 = vst [vmem:[%s6757_s29 + $0x338] sm:$0xf] %v596_v14 }
  0xe3   : > { %599 = vst [vmem:[%s6757_s29 + $0x33c] sm:$0xf] %v598_v15 }
  0xe4   : > { %601 = vst [vmem:[%s6757_s29 + $0x340] sm:$0xf] %v600_v16 }
  0xe5   : > { %603 = vst [vmem:[%s6757_s29 + $0x344] sm:$0xf] %v602_v17 }
  0xe6   : > { %605 = vst [vmem:[%s6757_s29 + $0x348] sm:$0xf] %v604_v18 }
  0xe7   : > { %607 = vst [vmem:[%s6757_s29 + $0x34c] sm:$0xf] %v606_v19 }
  0xe8   : > { %609 = vst [vmem:[%s6757_s29 + $0x350] sm:$0xf] %v608_v20 }
  0xe9   : > { %611 = vst [vmem:[%s6757_s29 + $0x354] sm:$0xf] %v610_v21 }
  0xea   : > { %613 = vst [vmem:[%s6757_s29 + $0x358] sm:$0xf] %v612_v22 }
  0xeb   : > { %615 = vst [vmem:[%s6757_s29 + $0x35c] sm:$0xf] %v614_v23 }
  0xec   : > { %617 = vst [vmem:[%s6757_s29 + $0x360] sm:$0xf] %v616_v24 }
  0xed   : > { %619 = vst [vmem:[%s6757_s29 + $0x364] sm:$0xf] %v618_v25 }
  0xee   : > { %621 = vst [vmem:[%s6757_s29 + $0x368] sm:$0xf] %v620_v26 }
  0xef   : > { %623 = vst [vmem:[%s6757_s29 + $0x36c] sm:$0xf] %v622_v27 }
  0xf0   : > { %625 = vst [vmem:[%s6757_s29 + $0x370] sm:$0xf] %v624_v28 }
  0xf1   : > { %627 = vst [vmem:[%s6757_s29 + $0x374] sm:$0xf] %v626_v29 }
  0xf2   : > { %629 = vst [vmem:[%s6757_s29 + $0x378] sm:$0xf] %v628_v30 }
  0xf3   : > { %631 = vst [vmem:[%s6757_s29 + $0x37c] sm:$0xf] %v630_v31 }
  0xf4   : > { %633 = vst [vmem:[%s6757_s29 + $0x380] sm:$0xf] %v632_v32 }
  0xf5   : > { %635 = vst [vmem:[%s6757_s29 + $0x384] sm:$0xf] %v634_v33 }
  0xf6   : > { %637 = vst [vmem:[%s6757_s29 + $0x388] sm:$0xf] %v636_v34 }
  0xf7   : > { %639 = vst [vmem:[%s6757_s29 + $0x38c] sm:$0xf] %v638_v35 }
  0xf8   : > { %641 = vst [vmem:[%s6757_s29 + $0x390] sm:$0xf] %v640_v36 }
  0xf9   : > { %643 = vst [vmem:[%s6757_s29 + $0x394] sm:$0xf] %v642_v37 }
  0xfa   : > { %645 = vst [vmem:[%s6757_s29 + $0x398] sm:$0xf] %v644_v38 }
  0xfb   : > { %647 = vst [vmem:[%s6757_s29 + $0x39c] sm:$0xf] %v646_v39 }
  0xfc   : > { %649 = vst [vmem:[%s6757_s29 + $0x3a0] sm:$0xf] %v648_v40 }
  0xfd   : > { %651 = vst [vmem:[%s6757_s29 + $0x3a4] sm:$0xf] %v650_v41 }
  0xfe   : > { %653 = vst [vmem:[%s6757_s29 + $0x3a8] sm:$0xf] %v652_v42 }
  0xff   : > { %655 = vst [vmem:[%s6757_s29 + $0x3ac] sm:$0xf] %v654_v43 }
 0x100   : > { %657 = vst [vmem:[%s6757_s29 + $0x3b0] sm:$0xf] %v656_v44 }
 0x101   : > { %659 = vst [vmem:[%s6757_s29 + $0x3b4] sm:$0xf] %v658_v45 }
 0x102   : > { %661 = vst [vmem:[%s6757_s29 + $0x3b8] sm:$0xf] %v660_v46 }
 0x103   : > { %663 = vst [vmem:[%s6757_s29 + $0x3bc] sm:$0xf] %v662_v47 }
 0x104   : > { %665 = vst [vmem:[%s6757_s29 + $0x3c0] sm:$0xf] %v664_v48 }
 0x105   : > { %667 = vst [vmem:[%s6757_s29 + $0x3c4] sm:$0xf] %v666_v49 }
 0x106   : > { %669 = vst [vmem:[%s6757_s29 + $0x3c8] sm:$0xf] %v668_v50 }
 0x107   : > { %671 = vst [vmem:[%s6757_s29 + $0x3cc] sm:$0xf] %v670_v51 }
 0x108   : > { %673 = vst [vmem:[%s6757_s29 + $0x3d0] sm:$0xf] %v672_v52 }
 0x109   : > { %675 = vst [vmem:[%s6757_s29 + $0x3d4] sm:$0xf] %v674_v53 }
 0x10a   : > { %677 = vst [vmem:[%s6757_s29 + $0x3d8] sm:$0xf] %v676_v54 }
 0x10b   : > { %679 = vst [vmem:[%s6757_s29 + $0x3dc] sm:$0xf] %v678_v55 }
 0x10c   : > { %681 = vst [vmem:[%s6757_s29 + $0x3e0] sm:$0xf] %v680_v56 }
 0x10d   : > { %683 = vst [vmem:[%s6757_s29 + $0x3e4] sm:$0xf] %v682_v57 }
 0x10e   : > { %685 = vst [vmem:[%s6757_s29 + $0x3e8] sm:$0xf] %v684_v58 }
 0x10f   : > { %687 = vst [vmem:[%s6757_s29 + $0x3ec] sm:$0xf] %v686_v59 }
 0x110   : > { %689 = vst [vmem:[%s6757_s29 + $0x3f0] sm:$0xf] %v688_v60 }
 0x111   : > { %691 = vst [vmem:[%s6757_s29 + $0x3f4] sm:$0xf] %v690_v61 }
 0x112   : > { %693 = vst [vmem:[%s6757_s29 + $0x3f8] sm:$0xf] %v692_v62 }
 0x113   : > { %695 = vst [vmem:[%s6757_s29 + $0x3fc] sm:$0xf] %v694_v63 }
 0x114 PF: > { %p5270_p8 = scmp.ge.s32.totalorder %s6683_s16, 1  ;;  %p2280_p9 = scmp.lt.s32.totalorder %s6683_s16, 3 }
 0x116   : > { %p2281_p10 = pnand %p5270_p8, %p2280_p9 }
 0x117   : > { %s2287_s30 = sand.u32 (!%p2281_p10), 1, %s6667_s12   ;;  %p2333_p11 = scmp.lt.s32.totalorder (!%p2281_p10), %s6675_s14, 1 }
 0x118   : > { %2284 = sbr.rel (%p2281_p10) target bundleno = 979 (0x3d3), region = 76  ;;  %s5271_s4 = sshll.u32 (!%p2281_p10), %s2287_s30, 10 }
 0x119   : > { %s7274_s5 = scalar_lea.vmem (!%p2281_p10), [#allocation2], %s5271_s4  ;;  %s5272_s24 = sshll.u32 (!%p2281_p10), %s2287_s30, 6 }
 0x11a   : > { %s8305_s25 = scalar_lea.vmem (!%p2281_p10), [#allocation3], %s5272_s24 }
 0x11d   : > { %v6437_v0 = vld [vmem:[%s7274_s5 + $0x38] sm:$0xff]  ;;  %v6436_v4 = vld [vmem:[%s7274_s5 + $0x30] sm:$0xff]  ;;  %v6435_v8 = vld [vmem:[%s7274_s5 + $0x28] sm:$0xff]  ;;  %s2334_s12 = scalar_select %p2333_p11, %s6675_s14, 1 }
 0x11e   : > { %v6445_v1 = vld [vmem:[%s7274_s5 + $0x78] sm:$0xff]  ;;  %4131 = vmatpush.bf16.msra.mxu0 %v6437_v0  ;;  %v6444_v5 = vld [vmem:[%s7274_s5 + $0x70] sm:$0xff]  ;;  %v6443_v9 = vld [vmem:[%s7274_s5 + $0x68] sm:$0xff]  ;;  %s6299_s29 = sshll.u32 (%p6740_p6), %s6675_s14, 2 }
 0x11f   : > { %v6453_v2 = vld [vmem:[%s7274_s5 + $0xb8] sm:$0xff]  ;;  %4180 = vmatpush.bf16.msra.mxu1 %v6445_v1  ;;  %v6452_v6 = vld [vmem:[%s7274_s5 + $0xb0] sm:$0xff]  ;;  %v6451_v10 = vld [vmem:[%s7274_s5 + $0xa8] sm:$0xff]  ;;  %s5273_s30 = sshll.u32 %s2334_s12, 3  ;;  %s5032_s7 = scalar_lea.vmem (%p6740_p6), %s8372_s2, %s6299_s29 }
 0x120   : > { %v6461_v3 = vld [vmem:[%s7274_s5 + $0xf8] sm:$0xff]  ;;  %4229 = vmatpush.bf16.msra.mxu2 %v6453_v2  ;;  %v6460_v7 = vld [vmem:[%s7274_s5 + $0xf0] sm:$0xff]  ;;  %v6459_v11 = vld [vmem:[%s7274_s5 + $0xe8] sm:$0xff]  ;;  %s2338_s28 = scalar_lea.vmem %s8373_s3, %s5273_s30 }
 0x121   : > { %4278 = vmatpush.bf16.msra.mxu3 %v6461_v3  ;;  %v6434_v12 = vld [vmem:[%s7274_s5 + $0x20] sm:$0xff]  ;;  %v6433_v16 = vld [vmem:[%s7274_s5 + $0x18] sm:$0xff]  ;;  %v6432_v20 = vld [vmem:[%s7274_s5 + $0x10] sm:$0xff] }
 0x122   : > { %4132 = vmatpush.bf16.msra.mxu0 %v6436_v4  ;;  %v6442_v13 = vld [vmem:[%s7274_s5 + $0x60] sm:$0xff]  ;;  %v6441_v17 = vld [vmem:[%s7274_s5 + $0x58] sm:$0xff]  ;;  %v6440_v21 = vld [vmem:[%s7274_s5 + $0x50] sm:$0xff] }
 0x123   : > { %4181 = vmatpush.bf16.msra.mxu1 %v6444_v5  ;;  %v6450_v14 = vld [vmem:[%s7274_s5 + $0xa0] sm:$0xff]  ;;  %v6449_v18 = vld [vmem:[%s7274_s5 + $0x98] sm:$0xff]  ;;  %v6448_v22 = vld [vmem:[%s7274_s5 + $0x90] sm:$0xff] }
 0x124   : > { %4230 = vmatpush.bf16.msra.mxu2 %v6452_v6  ;;  %v6458_v15 = vld [vmem:[%s7274_s5 + $0xe0] sm:$0xff]  ;;  %v6457_v19 = vld [vmem:[%s7274_s5 + $0xd8] sm:$0xff]  ;;  %v6456_v23 = vld [vmem:[%s7274_s5 + $0xd0] sm:$0xff] }
 0x125   : > { %4279 = vmatpush.bf16.msra.mxu3 %v6460_v7  ;;  %v6431_v24 = vld [vmem:[%s7274_s5 + $0x8] sm:$0xff]  ;;  %v6430_v28 = vld [vmem:[%s7274_s5] sm:$0xff]  ;;  %v6485_v40 = vld [vmem:[%s7274_s5 + $0x1b8] sm:$0xff] }
 0x126   : > { %4133 = vmatpush.bf16.msra.mxu0 %v6435_v8  ;;  %v6439_v25 = vld [vmem:[%s7274_s5 + $0x48] sm:$0xff]  ;;  %v5276_v29 = vld [vmem:[%s8370_s0] sm:$0xf]  ;;  %v6302_v34 = vld [vmem:[%s8370_s0 + $0x4] sm:$0xf] }
 0x127   : > { %4182 = vmatpush.bf16.msra.mxu1 %v6443_v9  ;;  %v6447_v26 = vld [vmem:[%s7274_s5 + $0x88] sm:$0xff]  ;;  %v6310_v30 = vld [vmem:[%s8370_s0 + $0x3c] sm:$0xf0]  ;;  %v5278_v35 = vld [vmem:[%s8370_s0 + $0x40] sm:$0xf0] }
 0x128   : > { %4231 = vmatpush.bf16.msra.mxu2 %v6451_v10  ;;  %v6455_v27 = vld [vmem:[%s7274_s5 + $0xc8] sm:$0xff]  ;;  %v6438_v31 = vld [vmem:[%s7274_s5 + $0x40] sm:$0xff]  ;;  %v6469_v41 = vld [vmem:[%s7274_s5 + $0x138] sm:$0xff]  ;;  %v5277_v42 = vor.u32 %v6310_v30, %v5276_v29  ;;  %v5281_v43 = vor.u32 %v6302_v34, %v5278_v35 }
 0x129   : > { %4280 = vmatpush.bf16.msra.mxu3 %v6459_v11  ;;  %v6446_v32 = vld [vmem:[%s7274_s5 + $0x80] sm:$0xff]  ;;  %v5284_v36 = vld [vmem:[%s8370_s0 + $0x8] sm:$0xf]  ;;  %v6303_v38 = vld [vmem:[%s8370_s0 + $0xc] sm:$0xf] }
 0x12a   : > { %4134 = vmatpush.bf16.msra.mxu0 %v6434_v12  ;;  %v6454_v33 = vld [vmem:[%s7274_s5 + $0xc0] sm:$0xff]  ;;  %v6311_v37 = vld [vmem:[%s8370_s0 + $0x44] sm:$0xf0]  ;;  %v5286_v39 = vld [vmem:[%s8370_s0 + $0x48] sm:$0xf0] }
 0x12b   : > { %4183 = vmatpush.bf16.msra.mxu1 %v6442_v13  ;;  %v5285_v44 = vor.u32 %v6311_v37, %v5284_v36  ;;  %v5289_v45 = vor.u32 %v6303_v38, %v5286_v39  ;;  %v6493_v46 = vld [vmem:[%s7274_s5 + $0x1f8] sm:$0xff]  ;;  %v6484_v48 = vld [vmem:[%s7274_s5 + $0x1b0] sm:$0xff]  ;;  %v6483_v52 = vld [vmem:[%s7274_s5 + $0x1a8] sm:$0xff] }
 0x12c   : > { %4232 = vmatpush.bf16.msra.mxu2 %v6450_v14  ;;  %v6477_v47 = vld [vmem:[%s7274_s5 + $0x178] sm:$0xff]  ;;  %v6468_v49 = vld [vmem:[%s7274_s5 + $0x130] sm:$0xff]  ;;  %v6467_v53 = vld [vmem:[%s7274_s5 + $0x128] sm:$0xff] }
 0x12d   : > { %4281 = vmatpush.bf16.msra.mxu3 %v6458_v15  ;;  %v6492_v50 = vld [vmem:[%s7274_s5 + $0x1f0] sm:$0xff]  ;;  %v6491_v54 = vld [vmem:[%s7274_s5 + $0x1e8] sm:$0xff]  ;;  %v5340_v56 = vld [vmem:[%s8370_s0 + $0x80] sm:$0xf] }
 0x12e   : > { %4135 = vmatpush.bf16.msra.mxu0 %v6433_v16  ;;  %v6476_v51 = vld [vmem:[%s7274_s5 + $0x170] sm:$0xff]  ;;  %v6475_v55 = vld [vmem:[%s7274_s5 + $0x168] sm:$0xff]  ;;  %v6326_v57 = vld [vmem:[%s8370_s0 + $0xbc] sm:$0xf0] }
 0x12f   : > { %4184 = vmatpush.bf16.msra.mxu1 %v6441_v17  ;;  %v6318_v58 = vld [vmem:[%s8370_s0 + $0x84] sm:$0xf]  ;;  %v5348_v60 = vld [vmem:[%s8370_s0 + $0x88] sm:$0xf]  ;;  %v6319_v62 = vld [vmem:[%s8370_s0 + $0x8c] sm:$0xf]  ;;  %v5341_v0 = vor.u32 %v6326_v57, %v5340_v56 }
 0x130   : > { %4233 = vmatpush.bf16.msra.mxu2 %v6449_v18  ;;  %v5342_v59 = vld [vmem:[%s8370_s0 + $0xc0] sm:$0xf0]  ;;  %v6327_v61 = vld [vmem:[%s8370_s0 + $0xc4] sm:$0xf0]  ;;  %v5350_v63 = vld [vmem:[%s8370_s0 + $0xc8] sm:$0xf0] }
 0x131   : > { %4282 = vmatpush.bf16.msra.mxu3 %v6457_v19  ;;  %v5345_v1 = vor.u32 %v6318_v58, %v5342_v59  ;;  %v5349_v2 = vor.u32 %v6327_v61, %v5348_v60  ;;  %v5353_v3 = vor.u32 %v6319_v62, %v5350_v63  ;;  %v6482_v4 = vld [vmem:[%s7274_s5 + $0x1a0] sm:$0xff]  ;;  %v5412_v12 = vld [vmem:[%s8370_s0 + $0x108] sm:$0xf]  ;;  %v6335_v14 = vld [vmem:[%s8370_s0 + $0x10c] sm:$0xf] }
 0x132   : > { %4136 = vmatpush.bf16.msra.mxu0 %v6432_v20  ;;  %v6466_v5 = vld [vmem:[%s7274_s5 + $0x120] sm:$0xff]  ;;  %v6343_v13 = vld [vmem:[%s8370_s0 + $0x144] sm:$0xf0]  ;;  %v5414_v15 = vld [vmem:[%s8370_s0 + $0x148] sm:$0xf0] }
 0x133   : > { %4185 = vmatpush.bf16.msra.mxu1 %v6440_v21  ;;  %v6490_v6 = vld [vmem:[%s7274_s5 + $0x1e0] sm:$0xff]  ;;  %v5413_v18 = vor.u32 %v6343_v13, %v5412_v12  ;;  %v5417_v19 = vor.u32 %v6335_v14, %v5414_v15  ;;  %v6481_v20 = vld [vmem:[%s7274_s5 + $0x198] sm:$0xff]  ;;  %v6359_v29 = vld [vmem:[%s8370_s0 + $0x1c4] sm:$0xf0] }
 0x134   : > { %4234 = vmatpush.bf16.msra.mxu2 %v6448_v22  ;;  %v6474_v7 = vld [vmem:[%s7274_s5 + $0x160] sm:$0xff]  ;;  %v6465_v21 = vld [vmem:[%s7274_s5 + $0x118] sm:$0xff]  ;;  %v6351_v30 = vld [vmem:[%s8370_s0 + $0x18c] sm:$0xf] }
 0x135   : > { %4283 = vmatpush.bf16.msra.mxu3 %v6456_v23  ;;  %v5404_v8 = vld [vmem:[%s8370_s0 + $0x100] sm:$0xf]  ;;  %v6334_v10 = vld [vmem:[%s8370_s0 + $0x104] sm:$0xf]  ;;  %v6489_v22 = vld [vmem:[%s7274_s5 + $0x1d8] sm:$0xff] }
 0x136   : > { %4137 = vmatpush.bf16.msra.mxu0 %v6431_v24  ;;  %v6342_v9 = vld [vmem:[%s8370_s0 + $0x13c] sm:$0xf0]  ;;  %v5406_v11 = vld [vmem:[%s8370_s0 + $0x140] sm:$0xf0]  ;;  %v6473_v23 = vld [vmem:[%s7274_s5 + $0x158] sm:$0xff] }
 0x137   : > { %4186 = vmatpush.bf16.msra.mxu1 %v6439_v25  ;;  %v5405_v16 = vor.u32 %v6342_v9, %v5404_v8  ;;  %v5409_v17 = vor.u32 %v6334_v10, %v5406_v11  ;;  %v5468_v24 = vld [vmem:[%s8370_s0 + $0x180] sm:$0xf]  ;;  %v6480_v36 = vld [vmem:[%s7274_s5 + $0x190] sm:$0xff]  ;;  %v6382_v58 = vld [vmem:[%s8370_s0 + $0x284] sm:$0xf] }
 0x138   : > { %4235 = vmatpush.bf16.msra.mxu2 %v6447_v26  ;;  %v6358_v25 = vld [vmem:[%s8370_s0 + $0x1bc] sm:$0xf0]  ;;  %v6350_v26 = vld [vmem:[%s8370_s0 + $0x184] sm:$0xf]  ;;  %v6464_v37 = vld [vmem:[%s7274_s5 + $0x110] sm:$0xff] }
 0x139   : > { %4284 = vmatpush.bf16.msra.mxu3 %v6455_v27  ;;  %v5470_v27 = vld [vmem:[%s8370_s0 + $0x1c0] sm:$0xf0]  ;;  %v6488_v38 = vld [vmem:[%s7274_s5 + $0x1d0] sm:$0xff]  ;;  %v5596_v56 = vld [vmem:[%s8370_s0 + $0x280] sm:$0xf] }
 0x13a   : > { %4138 = vmatpush.bf16.msra.mxu0 %v6430_v28  ;;  %v5476_v28 = vld [vmem:[%s8370_s0 + $0x188] sm:$0xf]  ;;  %v6472_v39 = vld [vmem:[%s7274_s5 + $0x150] sm:$0xff]  ;;  %v6390_v57 = vld [vmem:[%s8370_s0 + $0x2bc] sm:$0xf0] }
 0x13b   : > { %4187 = vmatpush.bf16.msra.mxu1 %v6438_v31  ;;  %v5478_v31 = vld [vmem:[%s8370_s0 + $0x1c8] sm:$0xf0]  ;;  %v5477_v34 = vor.u32 %v6359_v29, %v5476_v28  ;;  %v5598_v59 = vld [vmem:[%s8370_s0 + $0x2c0] sm:$0xf0]  ;;  %v5604_v60 = vld [vmem:[%s8370_s0 + $0x288] sm:$0xf] }
 0x13c   : > { %4236 = vmatpush.bf16.msra.mxu2 %v6446_v32  ;;  %v5469_v32 = vor.u32 %v6358_v25, %v5468_v24  ;;  %v5481_v35 = vor.u32 %v6351_v30, %v5478_v31  ;;  %v6391_v61 = vld [vmem:[%s8370_s0 + $0x2c4] sm:$0xf0]  ;;  %v6383_v62 = vld [vmem:[%s8370_s0 + $0x28c] sm:$0xf]  ;;  %v5660_v8 = vld [vmem:[%s8370_s0 + $0x300] sm:$0xf] }
 0x13d   : > { %4285 = vmatpush.bf16.msra.mxu3 %v6454_v33  ;;  %4139 = vmatmul.bf16.vlgmr.msra.gmra.mxu0 %v5277_v42  ;;  %v5473_v33 = vor.u32 %v6350_v26, %v5470_v27  ;;  %v6366_v42 = vld [vmem:[%s8370_s0 + $0x204] sm:$0xf]  ;;  %v5606_v63 = vld [vmem:[%s8370_s0 + $0x2c8] sm:$0xf0]  ;;  %v6406_v9 = vld [vmem:[%s8370_s0 + $0x33c] sm:$0xf0] }
 0x13e   : > { %4327 = vmatpush.bf16.msrb.mxu0 %v6469_v41  ;;  %4188 = vmatmul.bf16.vlgmr.msra.gmra.mxu1 %v5281_v43  ;;  %v6374_v41 = vld [vmem:[%s8370_s0 + $0x23c] sm:$0xf0]  ;;  %v5534_v43 = vld [vmem:[%s8370_s0 + $0x240] sm:$0xf0]  ;;  %v5668_v12 = vld [vmem:[%s8370_s0 + $0x308] sm:$0xf] }
 0x13f   : > { %4237 = vmatmul.bf16.vlgmr.msra.gmra.mxu2 %v5285_v44  ;;  %4376 = vmatpush.bf16.msrb.mxu1 %v6477_v47  ;;  %v5540_v44 = vld [vmem:[%s8370_s0 + $0x208] sm:$0xf]  ;;  %v5542_v47 = vld [vmem:[%s8370_s0 + $0x248] sm:$0xf0]  ;;  %v6398_v10 = vld [vmem:[%s8370_s0 + $0x304] sm:$0xf] }
 0x140   : > { %4425 = vmatpush.bf16.msrb.mxu2 %v6485_v40  ;;  %4286 = vmatmul.bf16.vlgmr.msra.gmra.mxu3 %v5289_v45  ;;  %v5532_v40 = vld [vmem:[%s8370_s0 + $0x200] sm:$0xf]  ;;  %v6375_v45 = vld [vmem:[%s8370_s0 + $0x244] sm:$0xf0]  ;;  %v5662_v11 = vld [vmem:[%s8370_s0 + $0x340] sm:$0xf0] }
 0x141   : > { %4474 = vmatpush.bf16.msrb.mxu3 %v6493_v46  ;;  %v6367_v46 = vld [vmem:[%s8370_s0 + $0x20c] sm:$0xf]  ;;  %v6407_v13 = vld [vmem:[%s8370_s0 + $0x344] sm:$0xf0]  ;;  %v5724_v24 = vld [vmem:[%s8370_s0 + $0x380] sm:$0xf] }
 0x142   : > { %4328 = vmatpush.bf16.msrb.mxu0 %v6468_v49  ;;  %v5537_v49 = vor.u32 %v6366_v42, %v5534_v43  ;;  %v6399_v14 = vld [vmem:[%s8370_s0 + $0x30c] sm:$0xf]  ;;  %v6422_v25 = vld [vmem:[%s8370_s0 + $0x3bc] sm:$0xf0]  ;;  %v6414_v26 = vld [vmem:[%s8370_s0 + $0x384] sm:$0xf] }
 0x143   : > { %4377 = vmatpush.bf16.msrb.mxu1 %v6476_v51  ;;  %v5545_v51 = vor.u32 %v6367_v46, %v5542_v47  ;;  %v5670_v15 = vld [vmem:[%s8370_s0 + $0x348] sm:$0xf0]  ;;  %v5726_v27 = vld [vmem:[%s8370_s0 + $0x3c0] sm:$0xf0]  ;;  %v5732_v28 = vld [vmem:[%s8370_s0 + $0x388] sm:$0xf] }
 0x144   : > { %4426 = vmatpush.bf16.msrb.mxu2 %v6484_v48  ;;  %v5533_v48 = vor.u32 %v6374_v41, %v5532_v40  ;;  %v6423_v29 = vld [vmem:[%s8370_s0 + $0x3c4] sm:$0xf0]  ;;  %v6415_v30 = vld [vmem:[%s8370_s0 + $0x38c] sm:$0xf]  ;;  %v5292_v40 = vld [vmem:[%s8370_s0 + $0x10] sm:$0xf] }
 0x145   : > { %4475 = vmatpush.bf16.msrb.mxu3 %v6492_v50  ;;  %v5541_v50 = vor.u32 %v6375_v45, %v5540_v44  ;;  %v5734_v31 = vld [vmem:[%s8370_s0 + $0x3c8] sm:$0xf0]  ;;  %v6312_v41 = vld [vmem:[%s8370_s0 + $0x4c] sm:$0xf0]  ;;  %v6304_v42 = vld [vmem:[%s8370_s0 + $0x14] sm:$0xf] }
 0x146   : > { %4329 = vmatpush.bf16.msrb.mxu0 %v6467_v53  ;;  %v6463_v53 = vld [vmem:[%s7274_s5 + $0x108] sm:$0xff]  ;;  %v5294_v43 = vld [vmem:[%s8370_s0 + $0x50] sm:$0xf0]  ;;  %v5300_v44 = vld [vmem:[%s8370_s0 + $0x18] sm:$0xf] }
 0x147   : > { %4378 = vmatpush.bf16.msrb.mxu1 %v6475_v55  ;;  %v6471_v55 = vld [vmem:[%s7274_s5 + $0x148] sm:$0xff]  ;;  %v6313_v45 = vld [vmem:[%s8370_s0 + $0x54] sm:$0xf0]  ;;  %v6305_v46 = vld [vmem:[%s8370_s0 + $0x1c] sm:$0xf] }
 0x148   : > { %4427 = vmatpush.bf16.msrb.mxu2 %v6483_v52  ;;  %v6479_v52 = vld [vmem:[%s7274_s5 + $0x188] sm:$0xff]  ;;  %v5302_v47 = vld [vmem:[%s8370_s0 + $0x58] sm:$0xf0] }
 0x149   : > { %4476 = vmatpush.bf16.msrb.mxu3 %v6491_v54  ;;  %v6487_v54 = vld [vmem:[%s7274_s5 + $0x1c8] sm:$0xff] }
 0x14a   : > { %4330 = vmatpush.bf16.msrb.mxu0 %v6466_v5  ;;  %v6462_v5 = vld [vmem:[%s7274_s5 + $0x100] sm:$0xff] }
 0x14b   : > { %4379 = vmatpush.bf16.msrb.mxu1 %v6474_v7  ;;  %v6470_v7 = vld [vmem:[%s7274_s5 + $0x140] sm:$0xff] }
 0x14c   : > { %4428 = vmatpush.bf16.msrb.mxu2 %v6482_v4  ;;  %v6478_v4 = vld [vmem:[%s7274_s5 + $0x180] sm:$0xff] }
 0x14d   : > { %4144 = vmatmul.bf16.gmra.mxu0 %v5341_v0  ;;  %4477 = vmatpush.bf16.msrb.mxu3 %v6490_v6  ;;  %v5597_v0 = vor.u32 %v6390_v57, %v5596_v56  ;;  %v6486_v6 = vld [vmem:[%s7274_s5 + $0x1c0] sm:$0xff]  ;;  %v6499_v56 = vld [vmem:[%s7274_s5 + $0x228] sm:$0xff] }
 0x14e   : > { %4193 = vmatmul.bf16.gmra.mxu1 %v5345_v1  ;;  %4331 = vmatpush.bf16.msrb.mxu0 %v6465_v21  ;;  %v5601_v1 = vor.u32 %v6382_v58, %v5598_v59  ;;  %v6501_v21 = vld [vmem:[%s7274_s5 + $0x238] sm:$0xff]  ;;  %v6523_v57 = vld [vmem:[%s7274_s5 + $0x2e8] sm:$0xff] }
 0x14f   : > { %4242 = vmatmul.bf16.gmra.mxu2 %v5349_v2  ;;  %4380 = vmatpush.bf16.msrb.mxu1 %v6473_v23  ;;  %v5605_v2 = vor.u32 %v6391_v61, %v5604_v60  ;;  %v6509_v23 = vld [vmem:[%s7274_s5 + $0x278] sm:$0xff] }
 0x150   : > { %4291 = vmatmul.bf16.gmra.mxu3 %v5353_v3  ;;  %4429 = vmatpush.bf16.msrb.mxu2 %v6481_v20  ;;  %v5609_v3 = vor.u32 %v6383_v62, %v5606_v63  ;;  %v6517_v20 = vld [vmem:[%s7274_s5 + $0x2b8] sm:$0xff] }
 0x151   : > { %4478 = vmatpush.bf16.msrb.mxu3 %v6489_v22  ;;  %v6525_v22 = vld [vmem:[%s7274_s5 + $0x2f8] sm:$0xff] }
 0x152   : > { %4332 = vmatpush.bf16.msrb.mxu0 %v6464_v37  ;;  %v6500_v37 = vld [vmem:[%s7274_s5 + $0x230] sm:$0xff] }
 0x153   : > { %4381 = vmatpush.bf16.msrb.mxu1 %v6472_v39  ;;  %v6508_v39 = vld [vmem:[%s7274_s5 + $0x270] sm:$0xff] }
 0x154   : > { %4430 = vmatpush.bf16.msrb.mxu2 %v6480_v36  ;;  %v6516_v36 = vld [vmem:[%s7274_s5 + $0x2b0] sm:$0xff] }
 0x155   : > { %4479 = vmatpush.bf16.msrb.mxu3 %v6488_v38  ;;  %v6524_v38 = vld [vmem:[%s7274_s5 + $0x2f0] sm:$0xff] }
 0x156   : > { %4333 = vmatpush.bf16.msrb.mxu0 %v6463_v53  ;;  %v5305_v53 = vor.u32 %v6305_v46, %v5302_v47 }
 0x157   : > { %4382 = vmatpush.bf16.msrb.mxu1 %v6471_v55  ;;  %v6515_v55 = vld [vmem:[%s7274_s5 + $0x2a8] sm:$0xff] }
 0x158   : > { %4431 = vmatpush.bf16.msrb.mxu2 %v6479_v52  ;;  %v5301_v52 = vor.u32 %v6313_v45, %v5300_v44 }
 0x159   : > { %4480 = vmatpush.bf16.msrb.mxu3 %v6487_v54 }
 0x15a   : > { %4334 = vmatpush.bf16.msrb.mxu0 %v6462_v5  ;;  %v5358_v5 = vld [vmem:[%s8370_s0 + $0xd0] sm:$0xf0] }
 0x15b   : > { %4383 = vmatpush.bf16.msrb.mxu1 %v6470_v7  ;;  %v6329_v7 = vld [vmem:[%s8370_s0 + $0xd4] sm:$0xf0] }
 0x15c   : > { %4432 = vmatpush.bf16.msrb.mxu2 %v6478_v4  ;;  %v6320_v4 = vld [vmem:[%s8370_s0 + $0x94] sm:$0xf] }
 0x15d   : > { %4149 = vmatmul.bf16.gmra.mxu0 %v5405_v16  ;;  %4481 = vmatpush.bf16.msrb.mxu3 %v6486_v6  ;;  %v5661_v16 = vor.u32 %v6406_v9, %v5660_v8  ;;  %v5364_v6 = vld [vmem:[%s8370_s0 + $0x98] sm:$0xf]  ;;  %v6321_v8 = vld [vmem:[%s8370_s0 + $0x9c] sm:$0xf] }
 0x15e   : > { %4198 = vmatmul.bf16.gmra.mxu1 %v5409_v17  ;;  %v5665_v17 = vor.u32 %v6398_v10, %v5662_v11  ;;  %4523 = vmatpush.bf16.msra.mxu0 %v6501_v21  ;;  %v5366_v9 = vld [vmem:[%s8370_s0 + $0xd8] sm:$0xf0]  ;;  %v6514_v21 = vld [vmem:[%s7274_s5 + $0x2a0] sm:$0xff] }
 0x15f   : > { %4247 = vmatmul.bf16.gmra.mxu2 %v5413_v18  ;;  %v5669_v18 = vor.u32 %v6407_v13, %v5668_v12  ;;  %4572 = vmatpush.bf16.msra.mxu1 %v6509_v23  ;;  %v5361_v13 = vor.u32 %v6320_v4, %v5358_v5  ;;  %v6522_v23 = vld [vmem:[%s7274_s5 + $0x2e0] sm:$0xff]  ;;  %v6361_v4 = vld [vmem:[%s8370_s0 + $0x1d4] sm:$0xf0]  ;;  %v6353_v5 = vld [vmem:[%s8370_s0 + $0x19c] sm:$0xf] }
 0x160   : > { %4296 = vmatmul.bf16.gmra.mxu3 %v5417_v19  ;;  %v5673_v19 = vor.u32 %v6399_v14, %v5670_v15  ;;  %4621 = vmatpush.bf16.msra.mxu2 %v6517_v20 }
 0x161   : > { %4670 = vmatpush.bf16.msra.mxu3 %v6525_v22  ;;  %v6498_v22 = vld [vmem:[%s7274_s5 + $0x220] sm:$0xff] }
 0x162   : > { %4524 = vmatpush.bf16.msra.mxu0 %v6500_v37  ;;  %v6345_v37 = vld [vmem:[%s8370_s0 + $0x154] sm:$0xf0] }
 0x163   : > { %4573 = vmatpush.bf16.msra.mxu1 %v6508_v39  ;;  %v5430_v39 = vld [vmem:[%s8370_s0 + $0x158] sm:$0xf0] }
 0x164   : > { %4622 = vmatpush.bf16.msra.mxu2 %v6516_v36  ;;  %v5428_v36 = vld [vmem:[%s8370_s0 + $0x118] sm:$0xf] }
 0x165   : > { %4671 = vmatpush.bf16.msra.mxu3 %v6524_v38  ;;  %v6337_v38 = vld [vmem:[%s8370_s0 + $0x11c] sm:$0xf]  ;;  %v5429_v47 = vor.u32 %v6345_v37, %v5428_v36  ;;  %v6377_v36 = vld [vmem:[%s8370_s0 + $0x254] sm:$0xf0] }
 0x166   : > { %4525 = vmatpush.bf16.msra.mxu0 %v6499_v56  ;;  %v6369_v37 = vld [vmem:[%s8370_s0 + $0x21c] sm:$0xf] }
 0x168   : > { %4623 = vmatpush.bf16.msra.mxu2 %v6515_v55 }
 0x169   : > { %4672 = vmatpush.bf16.msra.mxu3 %v6523_v57 }
 0x16a   : > { %4526 = vmatpush.bf16.msra.mxu0 %v6498_v22 }
 0x16c   : > { %4624 = vmatpush.bf16.msra.mxu2 %v6514_v21  ;;  %v6520_v21 = vld [vmem:[%s7274_s5 + $0x2d0] sm:$0xff] }
 0x16d   : > { %4154 = vmatmul.bf16.gmra.mxu0 %v5469_v32  ;;  %v5725_v32 = vor.u32 %v6422_v25, %v5724_v24  ;;  %4673 = vmatpush.bf16.msra.mxu3 %v6522_v23 }
 0x16e   : > { %4203 = vmatmul.bf16.gmra.mxu1 %v5473_v33  ;;  %v5729_v33 = vor.u32 %v6414_v26, %v5726_v27 }
 0x16f   : > { %4252 = vmatmul.bf16.gmra.mxu2 %v5477_v34  ;;  %v5733_v34 = vor.u32 %v6423_v29, %v5732_v28 }
 0x170   : > { %4301 = vmatmul.bf16.gmra.mxu3 %v5481_v35  ;;  %v5737_v35 = vor.u32 %v6415_v30, %v5734_v31  ;;  %v6506_v31 = vld [vmem:[%s7274_s5 + $0x260] sm:$0xff] }
 0x17d   : > { %4159 = vmatmul.bf16.gmra.mxu0 %v5533_v48  ;;  %v5293_v48 = vor.u32 %v6312_v41, %v5292_v40 }
 0x17e   : > { %4208 = vmatmul.bf16.gmra.mxu1 %v5537_v49  ;;  %v5297_v49 = vor.u32 %v6304_v42, %v5294_v43 }
 0x17f   : > { %4257 = vmatmul.bf16.gmra.mxu2 %v5541_v50 }
 0x180   : > { %4306 = vmatmul.bf16.gmra.mxu3 %v5545_v51 }
 0x18d   : > { %4164 = vmatmul.bf16.gmra.mxu0 %v5597_v0 }
 0x18e   : > { %4213 = vmatmul.bf16.gmra.mxu1 %v5601_v1  ;;  %v6507_v1 = vld [vmem:[%s7274_s5 + $0x268] sm:$0xff] }
 0x18f   : > { %4262 = vmatmul.bf16.gmra.mxu2 %v5605_v2  ;;  %v5356_v2 = vld [vmem:[%s8370_s0 + $0x90] sm:$0xf]  ;;  %4574 = vmatpush.bf16.msra.mxu1 %v6507_v1  ;;  %v6352_v1 = vld [vmem:[%s8370_s0 + $0x194] sm:$0xf] }
 0x190   : > { %4311 = vmatmul.bf16.gmra.mxu3 %v5609_v3  ;;  %v6328_v3 = vld [vmem:[%s8370_s0 + $0xcc] sm:$0xf0] }
 0x191   : > { %v5357_v12 = vor.u32 %v6328_v3, %v5356_v2  ;;  %v5486_v2 = vld [vmem:[%s8370_s0 + $0x1d0] sm:$0xf0]  ;;  %v5492_v3 = vld [vmem:[%s8370_s0 + $0x198] sm:$0xf] }
 0x193   : > { %4575 = vmatpush.bf16.msra.mxu1 %v6506_v31  ;;  %v5548_v31 = vld [vmem:[%s8370_s0 + $0x210] sm:$0xf] }
 0x19d   : > { %4169 = vmatmul.bf16.gmra.mxu0 %v5661_v16 }
 0x19e   : > { %4218 = vmatmul.bf16.gmra.mxu1 %v5665_v17  ;;  %v5365_v17 = vor.u32 %v6329_v7, %v5364_v6  ;;  %v5494_v6 = vld [vmem:[%s8370_s0 + $0x1d8] sm:$0xf0] }
 0x19f   : > { %4267 = vmatmul.bf16.gmra.mxu2 %v5669_v18  ;;  %v5369_v18 = vor.u32 %v6321_v8, %v5366_v9 }
 0x1a0   : > { %4316 = vmatmul.bf16.gmra.mxu3 %v5673_v19 }
 0x1ad   : > { %4174 = vmatmul.bf16.gmra.mxu0 %v5725_v32  ;;  %v5420_v32 = vld [vmem:[%s8370_s0 + $0x110] sm:$0xf] }
 0x1ae   : > { %4223 = vmatmul.bf16.gmra.mxu1 %v5729_v33  ;;  %v6344_v33 = vld [vmem:[%s8370_s0 + $0x14c] sm:$0xf0] }
 0x1af   : > { %4272 = vmatmul.bf16.gmra.mxu2 %v5733_v34  ;;  %v6336_v34 = vld [vmem:[%s8370_s0 + $0x114] sm:$0xf]  ;;  %v5421_v42 = vor.u32 %v6344_v33, %v5420_v32  ;;  %v6376_v32 = vld [vmem:[%s8370_s0 + $0x24c] sm:$0xf0] }
 0x1b0   : > { %4321 = vmatmul.bf16.gmra.mxu3 %v5737_v35  ;;  %v5422_v35 = vld [vmem:[%s8370_s0 + $0x150] sm:$0xf0] }
 0x1b1   : > { %v5425_v43 = vor.u32 %v6336_v34, %v5422_v35  ;;  %v6368_v33 = vld [vmem:[%s8370_s0 + $0x214] sm:$0xf]  ;;  %v5556_v35 = vld [vmem:[%s8370_s0 + $0x218] sm:$0xf] }
 0x1b2   : > { %v5550_v34 = vld [vmem:[%s8370_s0 + $0x250] sm:$0xf0] }
 0x1ba   : > { %v4140_v50 = vpop.f32.mrf.mxu0 }
 0x1bb   : > { %v4189_v51 = vpop.f32.mrf.mxu1 }
 0x1bc   : > { %v4190_v54 = vadd.f32 %v4189_v51, %v4140_v50  ;;  %v6513_v51 = vld [vmem:[%s7274_s5 + $0x298] sm:$0xff] }
 0x1bd   : > { %4335 = vmatmul.bf16.vlgmr.msrb.gmra.mxu0 %v5293_v48  ;;  %v5433_v48 = vor.u32 %v6337_v38, %v5430_v39  ;;  %4625 = vmatpush.bf16.msra.mxu2 %v6513_v51  ;;  %v5558_v38 = vld [vmem:[%s8370_s0 + $0x258] sm:$0xf0]  ;;  %v6511_v51 = vld [vmem:[%s7274_s5 + $0x288] sm:$0xff] }
 0x1be   : > { %4384 = vmatmul.bf16.vlgmr.msrb.gmra.mxu1 %v5297_v49 }
 0x1bf   : > { %4433 = vmatmul.bf16.vlgmr.msrb.gmra.mxu2 %v5301_v52  ;;  %v6497_v52 = vld [vmem:[%s7274_s5 + $0x218] sm:$0xff] }
 0x1c0   : > { %4482 = vmatmul.bf16.vlgmr.msrb.gmra.mxu3 %v5305_v53  ;;  %v6521_v53 = vld [vmem:[%s7274_s5 + $0x2d8] sm:$0xff]  ;;  %4527 = vmatpush.bf16.msra.mxu0 %v6497_v52  ;;  %v6495_v52 = vld [vmem:[%s7274_s5 + $0x208] sm:$0xff] }
 0x1c1   : > { %4674 = vmatpush.bf16.msra.mxu3 %v6521_v53  ;;  %v6519_v53 = vld [vmem:[%s7274_s5 + $0x2c8] sm:$0xff] }
 0x1c2   : > { %v4238_v58 = vpop.f32.mrf.mxu2  ;;  %v4142_v61 = vpop.f32.mrf.mxu0 }
 0x1c3   : > { %v4287_v59 = vpop.f32.mrf.mxu3  ;;  %v4239_v60 = vadd.f32 %v4238_v58, %v4190_v54  ;;  %v4191_v62 = vpop.f32.mrf.mxu1 }
 0x1c4   : > { %v4192_v63 = vadd.f32 %v4191_v62, %v4142_v61  ;;  %v6505_v61 = vld [vmem:[%s7274_s5 + $0x258] sm:$0xff]  ;;  %v5484_v62 = vld [vmem:[%s8370_s0 + $0x190] sm:$0xf] }
 0x1c5   : > { %v7567_v0 = vadd.f32 %v4287_v59, %v4239_v60  ;;  %4576 = vmatpush.bf16.msra.mxu1 %v6505_v61  ;;  %4675 = vmatpush.bf16.msra.mxu3 %v6520_v21  ;;  %v6510_v21 = vld [vmem:[%s7274_s5 + $0x280] sm:$0xff] }
 0x1c9   : > { %4676 = vmatpush.bf16.msra.mxu3 %v6519_v53 }
 0x1ca   : > { %v4240_v10 = vpop.f32.mrf.mxu2  ;;  %v4145_v15 = vpop.f32.mrf.mxu0 }
 0x1cb   : > { %v4289_v11 = vpop.f32.mrf.mxu3  ;;  %v4241_v14 = vadd.f32 %v4240_v10, %v4192_v63  ;;  %v4194_v16 = vpop.f32.mrf.mxu1  ;;  %v6360_v63 = vld [vmem:[%s8370_s0 + $0x1cc] sm:$0xf0]  ;;  %v5489_v10 = vor.u32 %v6352_v1, %v5486_v2  ;;  %v6384_v2 = vld [vmem:[%s8370_s0 + $0x294] sm:$0xf] }
 0x1cc   : > { %v4195_v19 = vadd.f32 %v4194_v16, %v4145_v15  ;;  %v5485_v9 = vor.u32 %v6360_v63, %v5484_v62  ;;  %v5497_v15 = vor.u32 %v6353_v5, %v5494_v6  ;;  %v6503_v62 = vld [vmem:[%s7274_s5 + $0x248] sm:$0xff]  ;;  %v5612_v63 = vld [vmem:[%s8370_s0 + $0x290] sm:$0xf]  ;;  %v6393_v5 = vld [vmem:[%s8370_s0 + $0x2d4] sm:$0xf0] }
 0x1cd   : > { %v7594_v20 = vadd.f32 %v4289_v11, %v4241_v14  ;;  %4340 = vmatmul.bf16.gmra.mxu0 %v5357_v12  ;;  %v5493_v14 = vor.u32 %v6361_v4, %v5492_v3  ;;  %v6392_v1 = vld [vmem:[%s8370_s0 + $0x2cc] sm:$0xf0]  ;;  %v5614_v3 = vld [vmem:[%s8370_s0 + $0x2d0] sm:$0xf0]  ;;  %v5620_v4 = vld [vmem:[%s8370_s0 + $0x298] sm:$0xf] }
 0x1ce   : > { %4389 = vmatmul.bf16.gmra.mxu1 %v5361_v13  ;;  %v6385_v6 = vld [vmem:[%s8370_s0 + $0x29c] sm:$0xf] }
 0x1cf   : > { %4438 = vmatmul.bf16.gmra.mxu2 %v5365_v17 }
 0x1d0   : > { %4487 = vmatmul.bf16.gmra.mxu3 %v5369_v18  ;;  %v6512_v18 = vld [vmem:[%s7274_s5 + $0x290] sm:$0xff] }
 0x1d1   : > { %4626 = vmatpush.bf16.msra.mxu2 %v6512_v18 }
 0x1d2   : > { %v4243_v24 = vpop.f32.mrf.mxu2  ;;  %v4147_v27 = vpop.f32.mrf.mxu0 }
 0x1d3   : > { %v4292_v25 = vpop.f32.mrf.mxu3  ;;  %v4244_v26 = vadd.f32 %v4243_v24, %v4195_v19  ;;  %v4196_v28 = vpop.f32.mrf.mxu1  ;;  %v6496_v19 = vld [vmem:[%s7274_s5 + $0x210] sm:$0xff] }
 0x1d4   : > { %v4197_v29 = vadd.f32 %v4196_v28, %v4147_v27  ;;  %4528 = vmatpush.bf16.msra.mxu0 %v6496_v19 }
 0x1d5   : > { %v7599_v30 = vadd.f32 %v4292_v25, %v4244_v26  ;;  %4627 = vmatpush.bf16.msra.mxu2 %v6511_v51 }
 0x1d8   : > { %4529 = vmatpush.bf16.msra.mxu0 %v6495_v52 }
 0x1d9   : > { %4628 = vmatpush.bf16.msra.mxu2 %v6510_v21 }
 0x1da   : > { %v4245_v40 = vpop.f32.mrf.mxu2  ;;  %v4150_v45 = vpop.f32.mrf.mxu0 }
 0x1db   : > { %v4294_v41 = vpop.f32.mrf.mxu3  ;;  %v4246_v44 = vadd.f32 %v4245_v40, %v4197_v29  ;;  %v4199_v46 = vpop.f32.mrf.mxu1  ;;  %v6504_v29 = vld [vmem:[%s7274_s5 + $0x250] sm:$0xff] }
 0x1dc   : > { %v4200_v49 = vadd.f32 %v4199_v46, %v4150_v45  ;;  %4577 = vmatpush.bf16.msra.mxu1 %v6504_v29  ;;  %v5557_v46 = vor.u32 %v6377_v36, %v5556_v35  ;;  %v6408_v35 = vld [vmem:[%s8370_s0 + $0x34c] sm:$0xf0]  ;;  %v6400_v36 = vld [vmem:[%s8370_s0 + $0x314] sm:$0xf] }
 0x1dd   : > { %v7626_v50 = vadd.f32 %v4294_v41, %v4246_v44  ;;  %4345 = vmatmul.bf16.gmra.mxu0 %v5421_v42  ;;  %v5549_v41 = vor.u32 %v6376_v32, %v5548_v31  ;;  %v5553_v42 = vor.u32 %v6368_v33, %v5550_v34  ;;  %v6502_v33 = vld [vmem:[%s7274_s5 + $0x240] sm:$0xff]  ;;  %v5676_v34 = vld [vmem:[%s8370_s0 + $0x310] sm:$0xf] }
 0x1de   : > { %4394 = vmatmul.bf16.gmra.mxu1 %v5425_v43 }
 0x1df   : > { %4443 = vmatmul.bf16.gmra.mxu2 %v5429_v47  ;;  %v5561_v47 = vor.u32 %v6369_v37, %v5558_v38  ;;  %v5678_v37 = vld [vmem:[%s8370_s0 + $0x350] sm:$0xf0]  ;;  %v5684_v38 = vld [vmem:[%s8370_s0 + $0x318] sm:$0xf] }
 0x1e0   : > { %4492 = vmatmul.bf16.gmra.mxu3 %v5433_v48  ;;  %4578 = vmatpush.bf16.msra.mxu1 %v6503_v62 }
 0x1e2   : > { %v4248_v54 = vpop.f32.mrf.mxu2  ;;  %v4152_v57 = vpop.f32.mrf.mxu0 }
 0x1e3   : > { %v4297_v55 = vpop.f32.mrf.mxu3  ;;  %v4249_v56 = vadd.f32 %v4248_v54, %v4200_v49  ;;  %v4201_v58 = vpop.f32.mrf.mxu1 }
 0x1e4   : > { %v4202_v59 = vadd.f32 %v4201_v58, %v4152_v57  ;;  %4579 = vmatpush.bf16.msra.mxu1 %v6502_v33 }
 0x1e5   : > { %v7631_v60 = vadd.f32 %v4297_v55, %v4249_v56 }
 0x1ea   : > { %v4250_v7 = vpop.f32.mrf.mxu2  ;;  %v4155_v12 = vpop.f32.mrf.mxu0 }
 0x1eb   : > { %v4299_v8 = vpop.f32.mrf.mxu3  ;;  %v4251_v11 = vadd.f32 %v4250_v7, %v4202_v59  ;;  %v4204_v13 = vpop.f32.mrf.mxu1  ;;  %v5622_v7 = vld [vmem:[%s8370_s0 + $0x2d8] sm:$0xf0] }
 0x1ec   : > { %v4205_v16 = vadd.f32 %v4204_v13, %v4155_v12 }
 0x1ed   : > { %v7658_v17 = vadd.f32 %v4299_v8, %v4251_v11  ;;  %4350 = vmatmul.bf16.gmra.mxu0 %v5485_v9  ;;  %v5617_v11 = vor.u32 %v6384_v2, %v5614_v3 }
 0x1ee   : > { %4399 = vmatmul.bf16.gmra.mxu1 %v5489_v10  ;;  %v5613_v10 = vor.u32 %v6392_v1, %v5612_v63 }
 0x1ef   : > { %4448 = vmatmul.bf16.gmra.mxu2 %v5493_v14 }
 0x1f0   : > { %4497 = vmatmul.bf16.gmra.mxu3 %v5497_v15  ;;  %v5621_v15 = vor.u32 %v6393_v5, %v5620_v4  ;;  %v6541_v4 = vld [vmem:[%s7274_s5 + $0x378] sm:$0xff]  ;;  %v5740_v5 = vld [vmem:[%s8370_s0 + $0x390] sm:$0xf] }
 0x1f1   : > { %4768 = vmatpush.bf16.msrb.mxu1 %v6541_v4  ;;  %v6547_v4 = vld [vmem:[%s7274_s5 + $0x3a8] sm:$0xff] }
 0x1f2   : > { %v4253_v22 = vpop.f32.mrf.mxu2  ;;  %v4157_v25 = vpop.f32.mrf.mxu0 }
 0x1f3   : > { %v4302_v23 = vpop.f32.mrf.mxu3  ;;  %v4254_v24 = vadd.f32 %v4253_v22, %v4205_v16  ;;  %v4206_v26 = vpop.f32.mrf.mxu1  ;;  %v5625_v16 = vor.u32 %v6385_v6, %v5622_v7  ;;  %v6494_v22 = vld [vmem:[%s7274_s5 + $0x200] sm:$0xff]  ;;  %v6424_v6 = vld [vmem:[%s8370_s0 + $0x3cc] sm:$0xf0]  ;;  %v6416_v7 = vld [vmem:[%s8370_s0 + $0x394] sm:$0xf] }
 0x1f4   : > { %v4207_v27 = vadd.f32 %v4206_v26, %v4157_v25  ;;  %4530 = vmatpush.bf16.msra.mxu0 %v6494_v22 }
 0x1f5   : > { %v7663_v28 = vadd.f32 %v4302_v23, %v4254_v24  ;;  %v6518_v23 = vld [vmem:[%s7274_s5 + $0x2c0] sm:$0xff] }
 0x1f6   : > { %4677 = vmatpush.bf16.msra.mxu3 %v6518_v23 }
 0x1fa   : > { %v4255_v39 = vpop.f32.mrf.mxu2  ;;  %v4160_v44 = vpop.f32.mrf.mxu0 }
 0x1fb   : > { %v4304_v40 = vpop.f32.mrf.mxu3  ;;  %v4256_v43 = vadd.f32 %v4255_v39, %v4207_v27  ;;  %v4209_v45 = vpop.f32.mrf.mxu1  ;;  %v6409_v39 = vld [vmem:[%s8370_s0 + $0x354] sm:$0xf0] }
 0x1fc   : > { %v4210_v48 = vadd.f32 %v4209_v45, %v4160_v44  ;;  %v5677_v44 = vor.u32 %v6408_v35, %v5676_v34  ;;  %v5681_v45 = vor.u32 %v6400_v36, %v5678_v37  ;;  %v5685_v51 = vor.u32 %v6409_v39, %v5684_v38 }
 0x1fd   : > { %v7690_v49 = vadd.f32 %v4304_v40, %v4256_v43  ;;  %4355 = vmatmul.bf16.gmra.mxu0 %v5549_v41  ;;  %v6401_v40 = vld [vmem:[%s8370_s0 + $0x31c] sm:$0xf] }
 0x1fe   : > { %4404 = vmatmul.bf16.gmra.mxu1 %v5553_v42  ;;  %v5686_v41 = vld [vmem:[%s8370_s0 + $0x358] sm:$0xf0] }
 0x1ff   : > { %4453 = vmatmul.bf16.gmra.mxu2 %v5557_v46  ;;  %v5689_v52 = vor.u32 %v6401_v40, %v5686_v41  ;;  %v6540_v40 = vld [vmem:[%s7274_s5 + $0x370] sm:$0xff]  ;;  %v5308_v41 = vld [vmem:[%s8370_s0 + $0x20] sm:$0xf] }
 0x200   : > { %4502 = vmatmul.bf16.gmra.mxu3 %v5561_v47  ;;  %4769 = vmatpush.bf16.msrb.mxu1 %v6540_v40 }
 0x202   : > { %v4258_v54 = vpop.f32.mrf.mxu2  ;;  %v4162_v57 = vpop.f32.mrf.mxu0 }
 0x203   : > { %v4307_v55 = vpop.f32.mrf.mxu3  ;;  %v4259_v56 = vadd.f32 %v4258_v54, %v4210_v48  ;;  %v4211_v58 = vpop.f32.mrf.mxu1 }
 0x204   : > { %v4212_v59 = vadd.f32 %v4211_v58, %v4162_v57  ;;  %v6557_v57 = vld [vmem:[%s7274_s5 + $0x3f8] sm:$0xff] }
 0x205   : > { %v7695_v61 = vadd.f32 %v4307_v55, %v4259_v56  ;;  %v6549_v55 = vld [vmem:[%s7274_s5 + $0x3b8] sm:$0xff]  ;;  %4866 = vmatpush.bf16.msrb.mxu3 %v6557_v57 }
 0x206   : > { %v6533_v56 = vld [vmem:[%s7274_s5 + $0x338] sm:$0xff]  ;;  %4817 = vmatpush.bf16.msrb.mxu2 %v6549_v55 }
 0x207   : > { %4719 = vmatpush.bf16.msrb.mxu0 %v6533_v56 }
 0x20a   : > { %v4260_v8 = vpop.f32.mrf.mxu2  ;;  %v4165_v13 = vpop.f32.mrf.mxu0 }
 0x20b   : > { %v4309_v9 = vpop.f32.mrf.mxu3  ;;  %v4261_v12 = vadd.f32 %v4260_v8, %v4212_v59  ;;  %v4214_v14 = vpop.f32.mrf.mxu1  ;;  %v5742_v8 = vld [vmem:[%s8370_s0 + $0x3d0] sm:$0xf0] }
 0x20c   : > { %v4215_v18 = vadd.f32 %v4214_v14, %v4165_v13 }
 0x20d   : > { %v7722_v19 = vadd.f32 %v4309_v9, %v4261_v12  ;;  %4360 = vmatmul.bf16.gmra.mxu0 %v5613_v10  ;;  %v5748_v9 = vld [vmem:[%s8370_s0 + $0x398] sm:$0xf]  ;;  %v5750_v12 = vld [vmem:[%s8370_s0 + $0x3d8] sm:$0xf0] }
 0x20e   : > { %4409 = vmatmul.bf16.gmra.mxu1 %v5617_v11  ;;  %v6425_v10 = vld [vmem:[%s8370_s0 + $0x3d4] sm:$0xf0]  ;;  %v6417_v11 = vld [vmem:[%s8370_s0 + $0x39c] sm:$0xf] }
 0x20f   : > { %4458 = vmatmul.bf16.gmra.mxu2 %v5621_v15  ;;  %v5741_v15 = vor.u32 %v6424_v6, %v5740_v5  ;;  %v5749_v23 = vor.u32 %v6425_v10, %v5748_v9  ;;  %v6531_v5 = vld [vmem:[%s7274_s5 + $0x328] sm:$0xff] }
 0x210   : > { %4507 = vmatmul.bf16.gmra.mxu3 %v5625_v16  ;;  %v5745_v16 = vor.u32 %v6416_v7, %v5742_v8  ;;  %v6555_v6 = vld [vmem:[%s7274_s5 + $0x3e8] sm:$0xff] }
 0x212   : > { %v4263_v24 = vpop.f32.mrf.mxu2  ;;  %v4167_v27 = vpop.f32.mrf.mxu0 }
 0x213   : > { %v4312_v25 = vpop.f32.mrf.mxu3  ;;  %v4264_v26 = vadd.f32 %v4263_v24, %v4215_v18  ;;  %v4216_v29 = vpop.f32.mrf.mxu1  ;;  %v5753_v24 = vor.u32 %v6417_v11, %v5750_v12 }
 0x214   : > { %v4217_v31 = vadd.f32 %v4216_v29, %v4167_v27  ;;  %v6548_v27 = vld [vmem:[%s7274_s5 + $0x3b0] sm:$0xff] }
 0x215   : > { %v7727_v32 = vadd.f32 %v4312_v25, %v4264_v26  ;;  %v6532_v29 = vld [vmem:[%s7274_s5 + $0x330] sm:$0xff]  ;;  %4818 = vmatpush.bf16.msrb.mxu2 %v6548_v27 }
 0x216   : > { %4720 = vmatpush.bf16.msrb.mxu0 %v6532_v29 }
 0x219   : > { %4819 = vmatpush.bf16.msrb.mxu2 %v6547_v4 }
 0x21a   : > { %v4265_v42 = vpop.f32.mrf.mxu2  ;;  %v4170_v47 = vpop.f32.mrf.mxu0  ;;  %4721 = vmatpush.bf16.msrb.mxu0 %v6531_v5 }
 0x21b   : > { %v4314_v43 = vpop.f32.mrf.mxu3  ;;  %v4266_v46 = vadd.f32 %v4265_v42, %v4217_v31  ;;  %v4219_v48 = vpop.f32.mrf.mxu1  ;;  %v6556_v31 = vld [vmem:[%s7274_s5 + $0x3f0] sm:$0xff]  ;;  %v6314_v42 = vld [vmem:[%s8370_s0 + $0x5c] sm:$0xf0] }
 0x21c   : > { %v4220_v53 = vadd.f32 %v4219_v48, %v4170_v47  ;;  %4867 = vmatpush.bf16.msrb.mxu3 %v6556_v31  ;;  %v6307_v47 = vld [vmem:[%s8370_s0 + $0x2c] sm:$0xf] }
 0x21d   : > { %v7754_v54 = vadd.f32 %v4314_v43, %v4266_v46  ;;  %4365 = vmatmul.bf16.gmra.mxu0 %v5677_v44  ;;  %v6306_v43 = vld [vmem:[%s8370_s0 + $0x24] sm:$0xf]  ;;  %v6315_v46 = vld [vmem:[%s8370_s0 + $0x64] sm:$0xf0]  ;;  %v5318_v48 = vld [vmem:[%s8370_s0 + $0x68] sm:$0xf0] }
 0x21e   : > { %4414 = vmatmul.bf16.gmra.mxu1 %v5681_v45  ;;  %v5310_v44 = vld [vmem:[%s8370_s0 + $0x60] sm:$0xf0]  ;;  %v5316_v45 = vld [vmem:[%s8370_s0 + $0x28] sm:$0xf] }
 0x21f   : > { %4463 = vmatmul.bf16.gmra.mxu2 %v5685_v51  ;;  %v5313_v55 = vor.u32 %v6306_v43, %v5310_v44  ;;  %v6530_v43 = vld [vmem:[%s7274_s5 + $0x320] sm:$0xff] }
 0x220   : > { %4512 = vmatmul.bf16.gmra.mxu3 %v5689_v52  ;;  %v6554_v44 = vld [vmem:[%s7274_s5 + $0x3e0] sm:$0xff]  ;;  %4722 = vmatpush.bf16.msrb.mxu0 %v6530_v43 }
 0x221   : > { %4868 = vmatpush.bf16.msrb.mxu3 %v6555_v6 }
 0x222   : > { %v4268_v58 = vpop.f32.mrf.mxu2  ;;  %v4172_v63 = vpop.f32.mrf.mxu0 }
 0x223   : > { %v4317_v59 = vpop.f32.mrf.mxu3  ;;  %v4269_v62 = vadd.f32 %v4268_v58, %v4220_v53  ;;  %v4221_v1 = vpop.f32.mrf.mxu1  ;;  %v5309_v53 = vor.u32 %v6314_v42, %v5308_v41  ;;  %v6546_v42 = vld [vmem:[%s7274_s5 + $0x3a0] sm:$0xff] }
 0x224   : > { %v4222_v2 = vadd.f32 %v4221_v1, %v4172_v63  ;;  %4820 = vmatpush.bf16.msrb.mxu2 %v6546_v42 }
 0x225   : > { %v7759_v3 = vadd.f32 %v4317_v59, %v4269_v62  ;;  %v5317_v59 = vor.u32 %v6315_v46, %v5316_v45  ;;  %v5321_v62 = vor.u32 %v6307_v47, %v5318_v48  ;;  %4869 = vmatpush.bf16.msrb.mxu3 %v6554_v44 }
 0x22a   : > { %v4270_v13 = vpop.f32.mrf.mxu2  ;;  %v4175_v21 = vpop.f32.mrf.mxu0 }
 0x22b   : > { %v4319_v14 = vpop.f32.mrf.mxu3  ;;  %v4271_v18 = vadd.f32 %v4270_v13, %v4222_v2  ;;  %v4224_v22 = vpop.f32.mrf.mxu1  ;;  %v6539_v13 = vld [vmem:[%s7274_s5 + $0x368] sm:$0xff] }
 0x22c   : > { %v4225_v25 = vadd.f32 %v4224_v22, %v4175_v21  ;;  %v5380_v21 = vld [vmem:[%s8370_s0 + $0xa8] sm:$0xf]  ;;  %4770 = vmatpush.bf16.msrb.mxu1 %v6539_v13 }
 0x22d   : > { %v7786_v26 = vadd.f32 %v4319_v14, %v4271_v18  ;;  %4370 = vmatmul.bf16.gmra.mxu0 %v5741_v15  ;;  %v5372_v15 = vld [vmem:[%s8370_s0 + $0xa0] sm:$0xf]  ;;  %v6322_v18 = vld [vmem:[%s8370_s0 + $0xa4] sm:$0xf]  ;;  %v6331_v22 = vld [vmem:[%s8370_s0 + $0xe4] sm:$0xf0] }
 0x22e   : > { %4419 = vmatmul.bf16.gmra.mxu1 %v5745_v16  ;;  %v6330_v16 = vld [vmem:[%s8370_s0 + $0xdc] sm:$0xf0] }
 0x22f   : > { %4468 = vmatmul.bf16.gmra.mxu2 %v5749_v23  ;;  %v6323_v23 = vld [vmem:[%s8370_s0 + $0xac] sm:$0xf]  ;;  %v5373_v29 = vor.u32 %v6330_v16, %v5372_v15  ;;  %v6545_v16 = vld [vmem:[%s7274_s5 + $0x398] sm:$0xff] }
 0x230   : > { %4517 = vmatmul.bf16.gmra.mxu3 %v5753_v24  ;;  %v5382_v24 = vld [vmem:[%s8370_s0 + $0xe8] sm:$0xf0]  ;;  %4821 = vmatpush.bf16.msrb.mxu2 %v6545_v16 }
 0x232   : > { %v4273_v33 = vpop.f32.mrf.mxu2  ;;  %v4177_v36 = vpop.f32.mrf.mxu0 }
 0x233   : > { %v4322_v34 = vpop.f32.mrf.mxu3  ;;  %v4274_v35 = vadd.f32 %v4273_v33, %v4225_v25  ;;  %v4226_v37 = vpop.f32.mrf.mxu1 }
 0x234   : > { %v4227_v38 = vadd.f32 %v4226_v37, %v4177_v36  ;;  %v5381_v36 = vor.u32 %v6331_v22, %v5380_v21  ;;  %v5385_v37 = vor.u32 %v6323_v23, %v5382_v24 }
 0x235   : > { %v7791_v39 = vadd.f32 %v4322_v34, %v4274_v35 }
 0x23a   : > { %v4275_v51 = vpop.f32.mrf.mxu2  ;;  %v4336_v57 = vpop.f32.mrf.mxu0 }
 0x23b   : > { %v4324_v52 = vpop.f32.mrf.mxu3  ;;  %v4276_v56 = vadd.f32 %v4275_v51, %v4227_v38  ;;  %v4385_v58 = vpop.f32.mrf.mxu1  ;;  %v4337_v63 = vadd.f32 %v4336_v57, %v7567_v0  ;;  %v6346_v57 = vld [vmem:[%s8370_s0 + $0x15c] sm:$0xf0] }
 0x23d   : > { %v7819_v1 = vadd.f32 %v4324_v52, %v4276_v56  ;;  %v4386_v2 = vadd.f32 %v4385_v58, %v4337_v63  ;;  %4531 = vmatmul.bf16.vlgmr.msra.gmra.mxu0 %v5309_v53  ;;  %v6538_v53 = vld [vmem:[%s7274_s5 + $0x360] sm:$0xff]  ;;  %v6339_v63 = vld [vmem:[%s8370_s0 + $0x12c] sm:$0xf] }
 0x23e   : > { %4580 = vmatmul.bf16.vlgmr.msra.gmra.mxu1 %v5313_v55  ;;  %v5436_v56 = vld [vmem:[%s8370_s0 + $0x120] sm:$0xf]  ;;  %v6338_v58 = vld [vmem:[%s8370_s0 + $0x124] sm:$0xf] }
 0x23f   : > { %4629 = vmatmul.bf16.vlgmr.msra.gmra.mxu2 %v5317_v59  ;;  %v5444_v59 = vld [vmem:[%s8370_s0 + $0x128] sm:$0xf]  ;;  %4771 = vmatpush.bf16.msrb.mxu1 %v6538_v53  ;;  %v5437_v6 = vor.u32 %v6346_v57, %v5436_v56  ;;  %v6544_v57 = vld [vmem:[%s7274_s5 + $0x390] sm:$0xff] }
 0x240   : > { %4678 = vmatmul.bf16.vlgmr.msra.gmra.mxu3 %v5321_v62  ;;  %v6347_v62 = vld [vmem:[%s8370_s0 + $0x164] sm:$0xf0]  ;;  %4822 = vmatpush.bf16.msrb.mxu2 %v6544_v57 }
 0x242   : > { %v4434_v7 = vpop.f32.mrf.mxu2  ;;  %v4338_v10 = vpop.f32.mrf.mxu0 }
 0x243   : > { %v4483_v8 = vpop.f32.mrf.mxu3  ;;  %v4435_v9 = vadd.f32 %v4434_v7, %v4386_v2  ;;  %v4387_v11 = vpop.f32.mrf.mxu1  ;;  %v4339_v0 = vadd.f32 %v4338_v10, %v7594_v20  ;;  %v5374_v20 = vld [vmem:[%s8370_s0 + $0xe0] sm:$0xf0]  ;;  %v5446_v2 = vld [vmem:[%s8370_s0 + $0x168] sm:$0xf0] }
 0x244   : > { %v5377_v31 = vor.u32 %v6322_v18, %v5374_v20  ;;  %v6529_v18 = vld [vmem:[%s7274_s5 + $0x318] sm:$0xff] }
 0x245   : > { %v7825_v12 = vadd.f32 %v4483_v8, %v4435_v9  ;;  %v4388_v14 = vadd.f32 %v4387_v11, %v4339_v0  ;;  %v5445_v11 = vor.u32 %v6347_v62, %v5444_v59  ;;  %v5449_v0 = vor.u32 %v6339_v63, %v5446_v2  ;;  %v6553_v20 = vld [vmem:[%s7274_s5 + $0x3d8] sm:$0xff]  ;;  %4723 = vmatpush.bf16.msrb.mxu0 %v6529_v18 }
 0x246   : > { %4870 = vmatpush.bf16.msrb.mxu3 %v6553_v20 }
 0x24a   : > { %v4436_v25 = vpop.f32.mrf.mxu2  ;;  %v4341_v34 = vpop.f32.mrf.mxu0 }
 0x24b   : > { %v4485_v27 = vpop.f32.mrf.mxu3  ;;  %v4437_v33 = vadd.f32 %v4436_v25, %v4388_v14  ;;  %v4390_v35 = vpop.f32.mrf.mxu1  ;;  %v4342_v38 = vadd.f32 %v4341_v34, %v7599_v30  ;;  %v6362_v34 = vld [vmem:[%s8370_s0 + $0x1dc] sm:$0xf0] }
 0x24d   : > { %v7853_v40 = vadd.f32 %v4485_v27, %v4437_v33  ;;  %v4391_v41 = vadd.f32 %v4390_v35, %v4342_v38  ;;  %4536 = vmatmul.bf16.gmra.mxu0 %v5373_v29  ;;  %v6537_v29 = vld [vmem:[%s7274_s5 + $0x358] sm:$0xff]  ;;  %v5500_v33 = vld [vmem:[%s8370_s0 + $0x1a0] sm:$0xf]  ;;  %v6354_v35 = vld [vmem:[%s8370_s0 + $0x1a4] sm:$0xf] }
 0x24e   : > { %4585 = vmatmul.bf16.gmra.mxu1 %v5377_v31  ;;  %v6355_v38 = vld [vmem:[%s8370_s0 + $0x1ac] sm:$0xf]  ;;  %v5501_v44 = vor.u32 %v6362_v34, %v5500_v33 }
 0x24f   : > { %4634 = vmatmul.bf16.gmra.mxu2 %v5381_v36  ;;  %v5508_v36 = vld [vmem:[%s8370_s0 + $0x1a8] sm:$0xf]  ;;  %4772 = vmatpush.bf16.msrb.mxu1 %v6537_v29 }
 0x250   : > { %4683 = vmatmul.bf16.gmra.mxu3 %v5385_v37  ;;  %v6363_v37 = vld [vmem:[%s8370_s0 + $0x1e4] sm:$0xf0] }
 0x251   : > { %v6543_v34 = vld [vmem:[%s7274_s5 + $0x388] sm:$0xff] }
 0x252   : > { %v4439_v45 = vpop.f32.mrf.mxu2  ;;  %v4343_v48 = vpop.f32.mrf.mxu0  ;;  %4823 = vmatpush.bf16.msrb.mxu2 %v6543_v34 }
 0x253   : > { %v4488_v46 = vpop.f32.mrf.mxu3  ;;  %v4440_v47 = vadd.f32 %v4439_v45, %v4391_v41  ;;  %v4392_v51 = vpop.f32.mrf.mxu1  ;;  %v4344_v30 = vadd.f32 %v4343_v48, %v7626_v50  ;;  %v5438_v50 = vld [vmem:[%s8370_s0 + $0x160] sm:$0xf0]  ;;  %v5510_v41 = vld [vmem:[%s8370_s0 + $0x1e8] sm:$0xf0] }
 0x254   : > { %v5441_v7 = vor.u32 %v6338_v58, %v5438_v50  ;;  %v6528_v58 = vld [vmem:[%s7274_s5 + $0x310] sm:$0xff] }
 0x255   : > { %v7859_v52 = vadd.f32 %v4488_v46, %v4440_v47  ;;  %v4393_v55 = vadd.f32 %v4392_v51, %v4344_v30  ;;  %v5509_v51 = vor.u32 %v6363_v37, %v5508_v36  ;;  %v5513_v30 = vor.u32 %v6355_v38, %v5510_v41  ;;  %v6552_v50 = vld [vmem:[%s7274_s5 + $0x3d0] sm:$0xff]  ;;  %4724 = vmatpush.bf16.msrb.mxu0 %v6528_v58 }
 0x256   : > { %4871 = vmatpush.bf16.msrb.mxu3 %v6552_v50 }
 0x25a   : > { %v4441_v4 = vpop.f32.mrf.mxu2  ;;  %v4346_v9 = vpop.f32.mrf.mxu0 }
 0x25b   : > { %v4490_v5 = vpop.f32.mrf.mxu3  ;;  %v4442_v8 = vadd.f32 %v4441_v4, %v4393_v55  ;;  %v4395_v10 = vpop.f32.mrf.mxu1  ;;  %v4347_v13 = vadd.f32 %v4346_v9, %v7631_v60  ;;  %v6378_v9 = vld [vmem:[%s8370_s0 + $0x25c] sm:$0xf0] }
 0x25d   : > { %v7887_v14 = vadd.f32 %v4490_v5, %v4442_v8  ;;  %v4396_v15 = vadd.f32 %v4395_v10, %v4347_v13  ;;  %4541 = vmatmul.bf16.gmra.mxu0 %v5437_v6  ;;  %v6536_v6 = vld [vmem:[%s7274_s5 + $0x350] sm:$0xff]  ;;  %v5564_v8 = vld [vmem:[%s8370_s0 + $0x220] sm:$0xf]  ;;  %v6370_v10 = vld [vmem:[%s8370_s0 + $0x224] sm:$0xf] }
 0x25e   : > { %4590 = vmatmul.bf16.gmra.mxu1 %v5441_v7  ;;  %v6371_v13 = vld [vmem:[%s8370_s0 + $0x22c] sm:$0xf]  ;;  %v5565_v20 = vor.u32 %v6378_v9, %v5564_v8  ;;  %v6542_v9 = vld [vmem:[%s7274_s5 + $0x380] sm:$0xff] }
 0x25f   : > { %4639 = vmatmul.bf16.gmra.mxu2 %v5445_v11  ;;  %v5572_v11 = vld [vmem:[%s8370_s0 + $0x228] sm:$0xf]  ;;  %4773 = vmatpush.bf16.msrb.mxu1 %v6536_v6 }
 0x260   : > { %4688 = vmatmul.bf16.gmra.mxu3 %v5449_v0  ;;  %v6379_v0 = vld [vmem:[%s8370_s0 + $0x264] sm:$0xf0]  ;;  %4824 = vmatpush.bf16.msrb.mxu2 %v6542_v9 }
 0x262   : > { %v4444_v21 = vpop.f32.mrf.mxu2  ;;  %v4348_v24 = vpop.f32.mrf.mxu0 }
 0x263   : > { %v4493_v22 = vpop.f32.mrf.mxu3  ;;  %v4445_v23 = vadd.f32 %v4444_v21, %v4396_v15  ;;  %v4397_v25 = vpop.f32.mrf.mxu1  ;;  %v4349_v60 = vadd.f32 %v4348_v24, %v7658_v17  ;;  %v5502_v17 = vld [vmem:[%s8370_s0 + $0x1e0] sm:$0xf0]  ;;  %v5574_v15 = vld [vmem:[%s8370_s0 + $0x268] sm:$0xf0] }
 0x264   : > { %v5505_v45 = vor.u32 %v6354_v35, %v5502_v17  ;;  %v6527_v35 = vld [vmem:[%s7274_s5 + $0x308] sm:$0xff] }
 0x265   : > { %v7893_v27 = vadd.f32 %v4493_v22, %v4445_v23  ;;  %v4398_v31 = vadd.f32 %v4397_v25, %v4349_v60  ;;  %v5573_v25 = vor.u32 %v6379_v0, %v5572_v11  ;;  %v5577_v60 = vor.u32 %v6371_v13, %v5574_v15  ;;  %v6551_v17 = vld [vmem:[%s7274_s5 + $0x3c8] sm:$0xff]  ;;  %4725 = vmatpush.bf16.msrb.mxu0 %v6527_v35 }
 0x266   : > { %4872 = vmatpush.bf16.msrb.mxu3 %v6551_v17 }
 0x26a   : > { %v4446_v42 = vpop.f32.mrf.mxu2  ;;  %v4351_v47 = vpop.f32.mrf.mxu0 }
 0x26b   : > { %v4495_v43 = vpop.f32.mrf.mxu3  ;;  %v4447_v46 = vadd.f32 %v4446_v42, %v4398_v31  ;;  %v4400_v48 = vpop.f32.mrf.mxu1  ;;  %v4352_v53 = vadd.f32 %v4351_v47, %v7663_v28  ;;  %v6394_v47 = vld [vmem:[%s8370_s0 + $0x2dc] sm:$0xf0] }
 0x26d   : > { %v7921_v55 = vadd.f32 %v4495_v43, %v4447_v46  ;;  %v4401_v56 = vadd.f32 %v4400_v48, %v4352_v53  ;;  %4546 = vmatmul.bf16.gmra.mxu0 %v5501_v44  ;;  %v6535_v44 = vld [vmem:[%s7274_s5 + $0x348] sm:$0xff]  ;;  %v5628_v46 = vld [vmem:[%s8370_s0 + $0x2a0] sm:$0xf]  ;;  %v6386_v48 = vld [vmem:[%s8370_s0 + $0x2a4] sm:$0xf] }
 0x26e   : > { %4595 = vmatmul.bf16.gmra.mxu1 %v5505_v45  ;;  %v6387_v53 = vld [vmem:[%s8370_s0 + $0x2ac] sm:$0xf]  ;;  %v5629_v50 = vor.u32 %v6394_v47, %v5628_v46 }
 0x26f   : > { %4644 = vmatmul.bf16.gmra.mxu2 %v5509_v51  ;;  %v5636_v51 = vld [vmem:[%s8370_s0 + $0x2a8] sm:$0xf]  ;;  %4774 = vmatpush.bf16.msrb.mxu1 %v6535_v44 }
 0x270   : > { %4693 = vmatmul.bf16.gmra.mxu3 %v5513_v30  ;;  %v6395_v30 = vld [vmem:[%s8370_s0 + $0x2e4] sm:$0xf0] }
 0x272   : > { %v4449_v59 = vpop.f32.mrf.mxu2  ;;  %v4353_v2 = vpop.f32.mrf.mxu0 }
 0x273   : > { %v4498_v62 = vpop.f32.mrf.mxu3  ;;  %v4450_v63 = vadd.f32 %v4449_v59, %v4401_v56  ;;  %v4402_v4 = vpop.f32.mrf.mxu1  ;;  %v4354_v28 = vadd.f32 %v4353_v2, %v7690_v49  ;;  %v5566_v49 = vld [vmem:[%s8370_s0 + $0x260] sm:$0xf0]  ;;  %v5638_v56 = vld [vmem:[%s8370_s0 + $0x2e8] sm:$0xf0] }
 0x274   : > { %v5569_v21 = vor.u32 %v6370_v10, %v5566_v49  ;;  %v6526_v10 = vld [vmem:[%s7274_s5 + $0x300] sm:$0xff] }
 0x275   : > { %v7927_v5 = vadd.f32 %v4498_v62, %v4450_v63  ;;  %v4403_v7 = vadd.f32 %v4402_v4, %v4354_v28  ;;  %v5637_v4 = vor.u32 %v6395_v30, %v5636_v51  ;;  %v5641_v28 = vor.u32 %v6387_v53, %v5638_v56  ;;  %v6550_v49 = vld [vmem:[%s7274_s5 + $0x3c0] sm:$0xff]  ;;  %4726 = vmatpush.bf16.msrb.mxu0 %v6526_v10 }
 0x276   : > { %4873 = vmatpush.bf16.msrb.mxu3 %v6550_v49 }
 0x27a   : > { %v4451_v16 = vpop.f32.mrf.mxu2  ;;  %v4356_v23 = vpop.f32.mrf.mxu0 }
 0x27b   : > { %v4500_v18 = vpop.f32.mrf.mxu3  ;;  %v4452_v22 = vadd.f32 %v4451_v16, %v4403_v7  ;;  %v4405_v24 = vpop.f32.mrf.mxu1  ;;  %v4357_v29 = vadd.f32 %v4356_v23, %v7695_v61  ;;  %v6410_v23 = vld [vmem:[%s8370_s0 + $0x35c] sm:$0xf0] }
 0x27d   : > { %v7955_v31 = vadd.f32 %v4500_v18, %v4452_v22  ;;  %v4406_v33 = vadd.f32 %v4405_v24, %v4357_v29  ;;  %4551 = vmatmul.bf16.gmra.mxu0 %v5565_v20  ;;  %v6534_v20 = vld [vmem:[%s7274_s5 + $0x340] sm:$0xff]  ;;  %v6403_v29 = vld [vmem:[%s8370_s0 + $0x32c] sm:$0xf] }
 0x27e   : > { %4600 = vmatmul.bf16.gmra.mxu1 %v5569_v21  ;;  %v5692_v22 = vld [vmem:[%s8370_s0 + $0x320] sm:$0xf]  ;;  %v6402_v24 = vld [vmem:[%s8370_s0 + $0x324] sm:$0xf] }
 0x27f   : > { %4649 = vmatmul.bf16.gmra.mxu2 %v5573_v25  ;;  %v5700_v25 = vld [vmem:[%s8370_s0 + $0x328] sm:$0xf]  ;;  %4775 = vmatpush.bf16.msrb.mxu1 %v6534_v20  ;;  %v5693_v17 = vor.u32 %v6410_v23, %v5692_v22 }
 0x280   : > { %4698 = vmatmul.bf16.gmra.mxu3 %v5577_v60  ;;  %v6411_v60 = vld [vmem:[%s8370_s0 + $0x364] sm:$0xf0] }
 0x282   : > { %v4454_v36 = vpop.f32.mrf.mxu2  ;;  %v4358_v41 = vpop.f32.mrf.mxu0 }
 0x283   : > { %v4503_v37 = vpop.f32.mrf.mxu3  ;;  %v4455_v38 = vadd.f32 %v4454_v36, %v4406_v33  ;;  %v4407_v42 = vpop.f32.mrf.mxu1  ;;  %v4359_v61 = vadd.f32 %v4358_v41, %v7722_v19  ;;  %v5630_v19 = vld [vmem:[%s8370_s0 + $0x2e0] sm:$0xf0]  ;;  %v5702_v33 = vld [vmem:[%s8370_s0 + $0x368] sm:$0xf0] }
 0x284   : > { %v5633_v59 = vor.u32 %v6386_v48, %v5630_v19 }
 0x285   : > { %v7961_v43 = vadd.f32 %v4503_v37, %v4455_v38  ;;  %v4408_v45 = vadd.f32 %v4407_v42, %v4359_v61  ;;  %v5701_v42 = vor.u32 %v6411_v60, %v5700_v25  ;;  %v5705_v61 = vor.u32 %v6403_v29, %v5702_v33  ;;  %v6316_v60 = vld [vmem:[%s8370_s0 + $0x6c] sm:$0xf0]  ;;  %v6308_v29 = vld [vmem:[%s8370_s0 + $0x34] sm:$0xf] }
 0x286   : > { %v5326_v33 = vld [vmem:[%s8370_s0 + $0x70] sm:$0xf0] }
 0x28a   : > { %v4456_v57 = vpop.f32.mrf.mxu2  ;;  %v4361_v63 = vpop.f32.mrf.mxu0 }
 0x28b   : > { %v4505_v58 = vpop.f32.mrf.mxu3  ;;  %v4457_v62 = vadd.f32 %v4456_v57, %v4408_v45  ;;  %v4410_v2 = vpop.f32.mrf.mxu1  ;;  %v4362_v6 = vadd.f32 %v4361_v63, %v7727_v32  ;;  %v6419_v63 = vld [vmem:[%s8370_s0 + $0x3ac] sm:$0xf] }
 0x28d   : > { %v7989_v7 = vadd.f32 %v4505_v58, %v4457_v62  ;;  %v4411_v8 = vadd.f32 %v4410_v2, %v4362_v6  ;;  %4556 = vmatmul.bf16.gmra.mxu0 %v5629_v50  ;;  %v6426_v58 = vld [vmem:[%s8370_s0 + $0x3dc] sm:$0xf0]  ;;  %v6418_v50 = vld [vmem:[%s8370_s0 + $0x3a4] sm:$0xf]  ;;  %v6427_v62 = vld [vmem:[%s8370_s0 + $0x3e4] sm:$0xf0] }
 0x28e   : > { %4605 = vmatmul.bf16.gmra.mxu1 %v5633_v59  ;;  %v5758_v59 = vld [vmem:[%s8370_s0 + $0x3e0] sm:$0xf0]  ;;  %v5766_v2 = vld [vmem:[%s8370_s0 + $0x3e8] sm:$0xf0] }
 0x28f   : > { %4654 = vmatmul.bf16.gmra.mxu2 %v5637_v4 }
 0x290   : > { %4703 = vmatmul.bf16.gmra.mxu3 %v5641_v28 }
 0x292   : > { %v4459_v11 = vpop.f32.mrf.mxu2  ;;  %v4363_v15 = vpop.f32.mrf.mxu0 }
 0x293   : > { %v4508_v0 = vpop.f32.mrf.mxu3  ;;  %v4460_v13 = vadd.f32 %v4459_v11, %v4411_v8  ;;  %v4412_v16 = vpop.f32.mrf.mxu1  ;;  %v4364_v32 = vadd.f32 %v4363_v15, %v7754_v54  ;;  %v5694_v54 = vld [vmem:[%s8370_s0 + $0x360] sm:$0xf0]  ;;  %v5761_v8 = vor.u32 %v6418_v50, %v5758_v59 }
 0x294   : > { %v5697_v36 = vor.u32 %v6402_v24, %v5694_v54 }
 0x295   : > { %v7995_v18 = vadd.f32 %v4508_v0, %v4460_v13  ;;  %v4413_v21 = vadd.f32 %v4412_v16, %v4364_v32  ;;  %v5769_v0 = vor.u32 %v6419_v63, %v5766_v2  ;;  %v6324_v63 = vld [vmem:[%s8370_s0 + $0xb4] sm:$0xf] }
 0x296   : > { %v5390_v2 = vld [vmem:[%s8370_s0 + $0xf0] sm:$0xf0] }
 0x29a   : > { %v4461_v34 = vpop.f32.mrf.mxu2  ;;  %v4366_v38 = vpop.f32.mrf.mxu0 }
 0x29b   : > { %v4510_v35 = vpop.f32.mrf.mxu3  ;;  %v4462_v37 = vadd.f32 %v4461_v34, %v4413_v21  ;;  %v4415_v41 = vpop.f32.mrf.mxu1  ;;  %v4367_v44 = vadd.f32 %v4366_v38, %v7759_v3  ;;  %v5756_v3 = vld [vmem:[%s8370_s0 + $0x3a0] sm:$0xf]  ;;  %v6317_v34 = vld [vmem:[%s8370_s0 + $0x74] sm:$0xf0] }
 0x29c   : > { %v5757_v6 = vor.u32 %v6426_v58, %v5756_v3 }
 0x29d   : > { %v8023_v45 = vadd.f32 %v4510_v35, %v4462_v37  ;;  %v4416_v46 = vadd.f32 %v4415_v41, %v4367_v44  ;;  %4561 = vmatmul.bf16.gmra.mxu0 %v5693_v17  ;;  %v6309_v35 = vld [vmem:[%s8370_s0 + $0x3c] sm:$0xf]  ;;  %v5329_v41 = vor.u32 %v6308_v29, %v5326_v33 }
 0x29e   : > { %4610 = vmatmul.bf16.gmra.mxu1 %v5697_v36  ;;  %v5334_v17 = vld [vmem:[%s8370_s0 + $0x78] sm:$0xf0] }
 0x29f   : > { %4659 = vmatmul.bf16.gmra.mxu2 %v5701_v42 }
 0x2a0   : > { %4708 = vmatmul.bf16.gmra.mxu3 %v5705_v61 }
 0x2a2   : > { %v4464_v47 = vpop.f32.mrf.mxu2  ;;  %v4368_v51 = vpop.f32.mrf.mxu0 }
 0x2a3   : > { %v4513_v48 = vpop.f32.mrf.mxu3  ;;  %v4465_v19 = vadd.f32 %v4464_v47, %v4416_v46  ;;  %v4417_v30 = vpop.f32.mrf.mxu1  ;;  %v4369_v53 = vadd.f32 %v4368_v51, %v7786_v26  ;;  %v5764_v26 = vld [vmem:[%s8370_s0 + $0x3a8] sm:$0xf]  ;;  %v5337_v47 = vor.u32 %v6309_v35, %v5334_v17  ;;  %v6340_v35 = vld [vmem:[%s8370_s0 + $0x134] sm:$0xf] }
 0x2a4   : > { %v5765_v11 = vor.u32 %v6427_v62, %v5764_v26  ;;  %v6332_v62 = vld [vmem:[%s8370_s0 + $0xec] sm:$0xf0]  ;;  %v5454_v17 = vld [vmem:[%s8370_s0 + $0x170] sm:$0xf0] }
 0x2a5   : > { %v8026_v56 = vadd.f32 %v4513_v48, %v4465_v19  ;;  %v4418_v57 = vadd.f32 %v4417_v30, %v4369_v53 }
 0x2aa   : > { %v4466_v4 = vpop.f32.mrf.mxu2  ;;  %v4371_v10 = vpop.f32.mrf.mxu0 }
 0x2ab   : > { %v4515_v28 = vpop.f32.mrf.mxu3  ;;  %v4467_v9 = vadd.f32 %v4466_v4, %v4418_v57  ;;  %v4420_v49 = vpop.f32.mrf.mxu1  ;;  %v4372_v13 = vadd.f32 %v4371_v10, %v7791_v39  ;;  %v5324_v39 = vld [vmem:[%s8370_s0 + $0x30] sm:$0xf]  ;;  %v6333_v4 = vld [vmem:[%s8370_s0 + $0xf4] sm:$0xf0] }
 0x2ac   : > { %v5325_v38 = vor.u32 %v6316_v60, %v5324_v39 }
 0x2ad   : > { %v8053_v15 = vadd.f32 %v4515_v28, %v4467_v9  ;;  %v4421_v16 = vadd.f32 %v4420_v49, %v4372_v13  ;;  %4566 = vmatmul.bf16.gmra.mxu0 %v5757_v6  ;;  %v6325_v28 = vld [vmem:[%s8370_s0 + $0xbc] sm:$0xf]  ;;  %v5393_v49 = vor.u32 %v6324_v63, %v5390_v2 }
 0x2ae   : > { %4615 = vmatmul.bf16.gmra.mxu1 %v5761_v8  ;;  %v5398_v6 = vld [vmem:[%s8370_s0 + $0xf8] sm:$0xf0] }
 0x2af   : > { %4664 = vmatmul.bf16.gmra.mxu2 %v5765_v11 }
 0x2b0   : > { %4713 = vmatmul.bf16.gmra.mxu3 %v5769_v0 }
 0x2b2   : > { %v4469_v32 = vpop.f32.mrf.mxu2  ;;  %v4373_v22 = vpop.f32.mrf.mxu0 }
 0x2b3   : > { %v4518_v20 = vpop.f32.mrf.mxu3  ;;  %v4470_v21 = vadd.f32 %v4469_v32, %v4421_v16  ;;  %v4422_v23 = vpop.f32.mrf.mxu1  ;;  %v4374_v24 = vadd.f32 %v4373_v22, %v7819_v1  ;;  %v5332_v1 = vld [vmem:[%s8370_s0 + $0x38] sm:$0xf]  ;;  %v5401_v32 = vor.u32 %v6325_v28, %v5398_v6  ;;  %v6356_v28 = vld [vmem:[%s8370_s0 + $0x1b4] sm:$0xf] }
 0x2b4   : > { %v5333_v46 = vor.u32 %v6317_v34, %v5332_v1  ;;  %v6348_v34 = vld [vmem:[%s8370_s0 + $0x16c] sm:$0xf0]  ;;  %v5518_v6 = vld [vmem:[%s8370_s0 + $0x1f0] sm:$0xf0] }
 0x2b5   : > { %v8056_v54 = vadd.f32 %v4518_v20, %v4470_v21  ;;  %v4423_v25 = vadd.f32 %v4422_v23, %v4374_v24 }
 0x2ba   : > { %v4471_v36 = vpop.f32.mrf.mxu2  ;;  %v4532_v61 = vpop.f32.mrf.mxu0 }
 0x2bb   : > { %v4520_v37 = vpop.f32.mrf.mxu3  ;;  %v4472_v42 = vadd.f32 %v4471_v36, %v4423_v25  ;;  %v4581_v44 = vpop.f32.mrf.mxu1  ;;  %v4533_v48 = vadd.f32 %v4532_v61, %v7825_v12  ;;  %v5388_v12 = vld [vmem:[%s8370_s0 + $0xb0] sm:$0xf]  ;;  %v6349_v36 = vld [vmem:[%s8370_s0 + $0x174] sm:$0xf0] }
 0x2bc   : > { %v5389_v10 = vor.u32 %v6332_v62, %v5388_v12 }
 0x2bd   : > { %v8083_v19 = vadd.f32 %v4520_v37, %v4472_v42  ;;  %v4582_v51 = vadd.f32 %v4581_v44, %v4533_v48  ;;  %4727 = vmatmul.bf16.vlgmr.msrb.gmra.mxu0 %v5325_v38  ;;  %v6341_v37 = vld [vmem:[%s8370_s0 + $0x13c] sm:$0xf]  ;;  %v5457_v44 = vor.u32 %v6340_v35, %v5454_v17 }
 0x2be   : > { %4776 = vmatmul.bf16.vlgmr.msrb.gmra.mxu1 %v5329_v41  ;;  %v5462_v38 = vld [vmem:[%s8370_s0 + $0x178] sm:$0xf0] }
 0x2bf   : > { %4825 = vmatmul.bf16.vlgmr.msrb.gmra.mxu2 %v5333_v46 }
 0x2c0   : > { %4874 = vmatmul.bf16.vlgmr.msrb.gmra.mxu3 %v5337_v47 }
 0x2c2   : > { %v4630_v30 = vpop.f32.mrf.mxu2  ;;  %v4534_v3 = vpop.f32.mrf.mxu0 }
 0x2c3   : > { %v4679_v53 = vpop.f32.mrf.mxu3  ;;  %v4631_v57 = vadd.f32 %v4630_v30, %v4582_v51  ;;  %v4583_v58 = vpop.f32.mrf.mxu1  ;;  %v4535_v50 = vadd.f32 %v4534_v3, %v7853_v40  ;;  %v5396_v40 = vld [vmem:[%s8370_s0 + $0xb8] sm:$0xf]  ;;  %v5465_v30 = vor.u32 %v6341_v37, %v5462_v38  ;;  %v6372_v37 = vld [vmem:[%s8370_s0 + $0x234] sm:$0xf] }
 0x2c4   : > { %v5397_v16 = vor.u32 %v6333_v4, %v5396_v40  ;;  %v6364_v4 = vld [vmem:[%s8370_s0 + $0x1ec] sm:$0xf0]  ;;  %v5582_v38 = vld [vmem:[%s8370_s0 + $0x270] sm:$0xf0] }
 0x2c5   : > { %v8086_v59 = vadd.f32 %v4679_v53, %v4631_v57  ;;  %v4584_v26 = vadd.f32 %v4583_v58, %v4535_v50 }
 0x2ca   : > { %v4632_v8 = vpop.f32.mrf.mxu2  ;;  %v4537_v0 = vpop.f32.mrf.mxu0 }
 0x2cb   : > { %v4681_v9 = vpop.f32.mrf.mxu3  ;;  %v4633_v11 = vadd.f32 %v4632_v8, %v4584_v26  ;;  %v4586_v13 = vpop.f32.mrf.mxu1  ;;  %v4538_v20 = vadd.f32 %v4537_v0, %v7859_v52  ;;  %v5452_v52 = vld [vmem:[%s8370_s0 + $0x130] sm:$0xf]  ;;  %v6365_v8 = vld [vmem:[%s8370_s0 + $0x1f4] sm:$0xf0] }
 0x2cc   : > { %v5453_v61 = vor.u32 %v6348_v34, %v5452_v52 }
 0x2cd   : > { %v8113_v21 = vadd.f32 %v4681_v9, %v4633_v11  ;;  %v4587_v22 = vadd.f32 %v4586_v13, %v4538_v20  ;;  %4732 = vmatmul.bf16.gmra.mxu0 %v5389_v10  ;;  %v6357_v9 = vld [vmem:[%s8370_s0 + $0x1bc] sm:$0xf]  ;;  %v5521_v13 = vor.u32 %v6356_v28, %v5518_v6 }
 0x2ce   : > { %4781 = vmatmul.bf16.gmra.mxu1 %v5393_v49  ;;  %v5526_v10 = vld [vmem:[%s8370_s0 + $0x1f8] sm:$0xf0] }
 0x2cf   : > { %4830 = vmatmul.bf16.gmra.mxu2 %v5397_v16 }
 0x2d0   : > { %4879 = vmatmul.bf16.gmra.mxu3 %v5401_v32 }
 0x2d2   : > { %v4635_v23 = vpop.f32.mrf.mxu2  ;;  %v4539_v39 = vpop.f32.mrf.mxu0 }
 0x2d3   : > { %v4684_v24 = vpop.f32.mrf.mxu3  ;;  %v4636_v25 = vadd.f32 %v4635_v23, %v4587_v22  ;;  %v4588_v60 = vpop.f32.mrf.mxu1  ;;  %v4540_v29 = vadd.f32 %v4539_v39, %v7887_v14  ;;  %v5460_v14 = vld [vmem:[%s8370_s0 + $0x138] sm:$0xf]  ;;  %v5529_v23 = vor.u32 %v6357_v9, %v5526_v10  ;;  %v6388_v9 = vld [vmem:[%s8370_s0 + $0x2b4] sm:$0xf] }
 0x2d4   : > { %v5461_v51 = vor.u32 %v6349_v36, %v5460_v14  ;;  %v6380_v36 = vld [vmem:[%s8370_s0 + $0x26c] sm:$0xf0]  ;;  %v5646_v10 = vld [vmem:[%s8370_s0 + $0x2f0] sm:$0xf0] }
 0x2d5   : > { %v8116_v33 = vadd.f32 %v4684_v24, %v4636_v25  ;;  %v4589_v1 = vadd.f32 %v4588_v60, %v4540_v29 }
 0x2da   : > { %v4637_v41 = vpop.f32.mrf.mxu2  ;;  %v4542_v47 = vpop.f32.mrf.mxu0 }
 0x2db   : > { %v4686_v42 = vpop.f32.mrf.mxu3  ;;  %v4638_v46 = vadd.f32 %v4637_v41, %v4589_v1  ;;  %v4591_v48 = vpop.f32.mrf.mxu1  ;;  %v4543_v53 = vadd.f32 %v4542_v47, %v7893_v27  ;;  %v5516_v27 = vld [vmem:[%s8370_s0 + $0x1b0] sm:$0xf]  ;;  %v6381_v41 = vld [vmem:[%s8370_s0 + $0x274] sm:$0xf0] }
 0x2dc   : > { %v5517_v0 = vor.u32 %v6364_v4, %v5516_v27 }
 0x2dd   : > { %v8143_v57 = vadd.f32 %v4686_v42, %v4638_v46  ;;  %v4592_v3 = vadd.f32 %v4591_v48, %v4543_v53  ;;  %4737 = vmatmul.bf16.gmra.mxu0 %v5453_v61  ;;  %v6373_v42 = vld [vmem:[%s8370_s0 + $0x23c] sm:$0xf]  ;;  %v5585_v48 = vor.u32 %v6372_v37, %v5582_v38 }
 0x2de   : > { %4786 = vmatmul.bf16.gmra.mxu1 %v5457_v44  ;;  %v5590_v61 = vld [vmem:[%s8370_s0 + $0x278] sm:$0xf0] }
 0x2df   : > { %4835 = vmatmul.bf16.gmra.mxu2 %v5461_v51 }
 0x2e0   : > { %4884 = vmatmul.bf16.gmra.mxu3 %v5465_v30 }
 0x2e2   : > { %v4640_v58 = vpop.f32.mrf.mxu2  ;;  %v4544_v12 = vpop.f32.mrf.mxu0 }
 0x2e3   : > { %v4689_v50 = vpop.f32.mrf.mxu3  ;;  %v4641_v26 = vadd.f32 %v4640_v58, %v4592_v3  ;;  %v4593_v62 = vpop.f32.mrf.mxu1  ;;  %v4545_v63 = vadd.f32 %v4544_v12, %v7921_v55  ;;  %v5524_v55 = vld [vmem:[%s8370_s0 + $0x1b8] sm:$0xf]  ;;  %v5593_v58 = vor.u32 %v6373_v42, %v5590_v61  ;;  %v6404_v42 = vld [vmem:[%s8370_s0 + $0x334] sm:$0xf] }
 0x2e4   : > { %v5525_v22 = vor.u32 %v6365_v8, %v5524_v55  ;;  %v6396_v8 = vld [vmem:[%s8370_s0 + $0x2ec] sm:$0xf0]  ;;  %v5710_v61 = vld [vmem:[%s8370_s0 + $0x370] sm:$0xf0] }
 0x2e5   : > { %v8146_v2 = vadd.f32 %v4689_v50, %v4641_v26  ;;  %v4594_v40 = vadd.f32 %v4593_v62, %v4545_v63 }
 0x2ea   : > { %v4642_v49 = vpop.f32.mrf.mxu2  ;;  %v4547_v32 = vpop.f32.mrf.mxu0 }
 0x2eb   : > { %v4691_v11 = vpop.f32.mrf.mxu3  ;;  %v4643_v16 = vadd.f32 %v4642_v49, %v4594_v40  ;;  %v4596_v20 = vpop.f32.mrf.mxu1  ;;  %v4548_v24 = vadd.f32 %v4547_v32, %v7927_v5  ;;  %v5580_v5 = vld [vmem:[%s8370_s0 + $0x230] sm:$0xf]  ;;  %v6397_v49 = vld [vmem:[%s8370_s0 + $0x2f4] sm:$0xf0] }
 0x2ec   : > { %v5581_v47 = vor.u32 %v6380_v36, %v5580_v5 }
 0x2ed   : > { %v8173_v25 = vadd.f32 %v4691_v11, %v4643_v16  ;;  %v4597_v39 = vadd.f32 %v4596_v20, %v4548_v24  ;;  %4742 = vmatmul.bf16.gmra.mxu0 %v5517_v0  ;;  %v6389_v11 = vld [vmem:[%s8370_s0 + $0x2bc] sm:$0xf]  ;;  %v5649_v20 = vor.u32 %v6388_v9, %v5646_v10 }
 0x2ee   : > { %4791 = vmatmul.bf16.gmra.mxu1 %v5521_v13  ;;  %v5654_v0 = vld [vmem:[%s8370_s0 + $0x2f8] sm:$0xf0] }
 0x2ef   : > { %4840 = vmatmul.bf16.gmra.mxu2 %v5525_v22 }
 0x2f0   : > { %4889 = vmatmul.bf16.gmra.mxu3 %v5529_v23 }
 0x2f2   : > { %v4645_v60 = vpop.f32.mrf.mxu2  ;;  %v4549_v52 = vpop.f32.mrf.mxu0 }
 0x2f3   : > { %v4694_v29 = vpop.f32.mrf.mxu3  ;;  %v4646_v1 = vadd.f32 %v4645_v60, %v4597_v39  ;;  %v4598_v34 = vpop.f32.mrf.mxu1  ;;  %v4550_v35 = vadd.f32 %v4549_v52, %v7955_v31  ;;  %v5588_v31 = vld [vmem:[%s8370_s0 + $0x238] sm:$0xf]  ;;  %v5657_v60 = vor.u32 %v6389_v11, %v5654_v0  ;;  %v6420_v11 = vld [vmem:[%s8370_s0 + $0x3b4] sm:$0xf] }
 0x2f4   : > { %v5589_v3 = vor.u32 %v6381_v41, %v5588_v31  ;;  %v6412_v41 = vld [vmem:[%s8370_s0 + $0x36c] sm:$0xf0]  ;;  %v5774_v0 = vld [vmem:[%s8370_s0 + $0x3f0] sm:$0xf0] }
 0x2f5   : > { %v8176_v17 = vadd.f32 %v4694_v29, %v4646_v1  ;;  %v4599_v14 = vadd.f32 %v4598_v34, %v4550_v35 }
 0x2fa   : > { %v4647_v44 = vpop.f32.mrf.mxu2  ;;  %v4552_v30 = vpop.f32.mrf.mxu0 }
 0x2fb   : > { %v4696_v46 = vpop.f32.mrf.mxu3  ;;  %v4648_v51 = vadd.f32 %v4647_v44, %v4599_v14  ;;  %v4601_v53 = vpop.f32.mrf.mxu1  ;;  %v4553_v50 = vadd.f32 %v4552_v30, %v7961_v43  ;;  %v5644_v43 = vld [vmem:[%s8370_s0 + $0x2b0] sm:$0xf]  ;;  %v6413_v44 = vld [vmem:[%s8370_s0 + $0x374] sm:$0xf0] }
 0x2fc   : > { %v5645_v32 = vor.u32 %v6396_v8, %v5644_v43 }
 0x2fd   : > { %v8203_v26 = vadd.f32 %v4696_v46, %v4648_v51  ;;  %v4602_v12 = vadd.f32 %v4601_v53, %v4553_v50  ;;  %4747 = vmatmul.bf16.gmra.mxu0 %v5581_v47  ;;  %v6405_v46 = vld [vmem:[%s8370_s0 + $0x33c] sm:$0xf]  ;;  %v5713_v53 = vor.u32 %v6404_v42, %v5710_v61 }
 0x2fe   : > { %4796 = vmatmul.bf16.gmra.mxu1 %v5585_v48  ;;  %v5718_v47 = vld [vmem:[%s8370_s0 + $0x378] sm:$0xf0] }
 0x2ff   : > { %4845 = vmatmul.bf16.gmra.mxu2 %v5589_v3 }
 0x300   : > { %4894 = vmatmul.bf16.gmra.mxu3 %v5593_v58 }
 0x302   : > { %v4650_v62 = vpop.f32.mrf.mxu2  ;;  %v4554_v27 = vpop.f32.mrf.mxu0 }
 0x303   : > { %v4699_v63 = vpop.f32.mrf.mxu3  ;;  %v4651_v40 = vadd.f32 %v4650_v62, %v4602_v12  ;;  %v4603_v4 = vpop.f32.mrf.mxu1  ;;  %v4555_v28 = vadd.f32 %v4554_v27, %v7989_v7  ;;  %v5652_v7 = vld [vmem:[%s8370_s0 + $0x2b8] sm:$0xf]  ;;  %v5721_v62 = vor.u32 %v6405_v46, %v5718_v47 }
 0x304   : > { %v5653_v39 = vor.u32 %v6397_v49, %v5652_v7  ;;  %v6428_v49 = vld [vmem:[%s8370_s0 + $0x3ec] sm:$0xf0] }
 0x305   : > { %v8206_v6 = vadd.f32 %v4699_v63, %v4651_v40  ;;  %v4604_v55 = vadd.f32 %v4603_v4, %v4555_v28 }
 0x30a   : > { %v4652_v13 = vpop.f32.mrf.mxu2  ;;  %v4557_v23 = vpop.f32.mrf.mxu0 }
 0x30b   : > { %v4701_v16 = vpop.f32.mrf.mxu3  ;;  %v4653_v22 = vadd.f32 %v4652_v13, %v4604_v55  ;;  %v4606_v24 = vpop.f32.mrf.mxu1  ;;  %v4558_v29 = vadd.f32 %v4557_v23, %v7995_v18  ;;  %v5708_v18 = vld [vmem:[%s8370_s0 + $0x330] sm:$0xf]  ;;  %v6429_v13 = vld [vmem:[%s8370_s0 + $0x3f4] sm:$0xf0] }
 0x30c   : > { %v5709_v30 = vor.u32 %v6412_v41, %v5708_v18 }
 0x30d   : > { %v8233_v1 = vadd.f32 %v4701_v16, %v4653_v22  ;;  %v4607_v52 = vadd.f32 %v4606_v24, %v4558_v29  ;;  %4752 = vmatmul.bf16.gmra.mxu0 %v5645_v32  ;;  %v6421_v16 = vld [vmem:[%s8370_s0 + $0x3bc] sm:$0xf]  ;;  %v5777_v24 = vor.u32 %v6420_v11, %v5774_v0 }
 0x30e   : > { %4801 = vmatmul.bf16.gmra.mxu1 %v5649_v20  ;;  %v5782_v32 = vld [vmem:[%s8370_s0 + $0x3f8] sm:$0xf0] }
 0x30f   : > { %4850 = vmatmul.bf16.gmra.mxu2 %v5653_v39 }
 0x310   : > { %4899 = vmatmul.bf16.gmra.mxu3 %v5657_v60 }
 0x312   : > { %v4655_v34 = vpop.f32.mrf.mxu2  ;;  %v4559_v5 = vpop.f32.mrf.mxu0 }
 0x313   : > { %v4704_v35 = vpop.f32.mrf.mxu3  ;;  %v4656_v14 = vadd.f32 %v4655_v34, %v4607_v52  ;;  %v4608_v36 = vpop.f32.mrf.mxu1  ;;  %v4560_v37 = vadd.f32 %v4559_v5, %v8023_v45  ;;  %v5716_v45 = vld [vmem:[%s8370_s0 + $0x338] sm:$0xf]  ;;  %v5785_v34 = vor.u32 %v6421_v16, %v5782_v32 }
 0x314   : > { %v5717_v12 = vor.u32 %v6413_v44, %v5716_v45 }
 0x315   : > { %v8236_v38 = vadd.f32 %v4704_v35, %v4656_v14  ;;  %v4609_v31 = vadd.f32 %v4608_v36, %v4560_v37 }
 0x31a   : > { %v4657_v48 = vpop.f32.mrf.mxu2  ;;  %v4562_v58 = vpop.f32.mrf.mxu0 }
 0x31b   : > { %v4706_v51 = vpop.f32.mrf.mxu3  ;;  %v4658_v3 = vadd.f32 %v4657_v48, %v4609_v31  ;;  %v4611_v50 = vpop.f32.mrf.mxu1  ;;  %v4563_v63 = vadd.f32 %v4562_v58, %v8026_v56  ;;  %v5772_v56 = vld [vmem:[%s8370_s0 + $0x3b0] sm:$0xf] }
 0x31c   : > { %v5773_v23 = vor.u32 %v6428_v49, %v5772_v56 }
 0x31d   : > { %v8263_v40 = vadd.f32 %v4706_v51, %v4658_v3  ;;  %v4612_v27 = vadd.f32 %v4611_v50, %v4563_v63  ;;  %4757 = vmatmul.bf16.gmra.mxu0 %v5709_v30 }
 0x31e   : > { %4806 = vmatmul.bf16.gmra.mxu1 %v5713_v53 }
 0x31f   : > { %4855 = vmatmul.bf16.gmra.mxu2 %v5717_v12 }
 0x320   : > { %4904 = vmatmul.bf16.gmra.mxu3 %v5721_v62 }
 0x322   : > { %v4660_v4 = vpop.f32.mrf.mxu2  ;;  %v4564_v43 = vpop.f32.mrf.mxu0 }
 0x323   : > { %v4709_v28 = vpop.f32.mrf.mxu3  ;;  %v4661_v55 = vadd.f32 %v4660_v4, %v4612_v27  ;;  %v4613_v8 = vpop.f32.mrf.mxu1  ;;  %v4565_v9 = vadd.f32 %v4564_v43, %v8053_v15  ;;  %v5780_v15 = vld [vmem:[%s8370_s0 + $0x3b8] sm:$0xf] }
 0x324   : > { %v5781_v52 = vor.u32 %v6429_v13, %v5780_v15 }
 0x325   : > { %v8266_v10 = vadd.f32 %v4709_v28, %v4661_v55  ;;  %v4614_v7 = vadd.f32 %v4613_v8, %v4565_v9 }
 0x32a   : > { %v4662_v20 = vpop.f32.mrf.mxu2  ;;  %v4567_v60 = vpop.f32.mrf.mxu0 }
 0x32b   : > { %v4711_v22 = vpop.f32.mrf.mxu3  ;;  %v4663_v39 = vadd.f32 %v4662_v20, %v4614_v7  ;;  %v4616_v29 = vpop.f32.mrf.mxu1  ;;  %v4568_v35 = vadd.f32 %v4567_v60, %v8056_v54 }
 0x32d   : > { %v8293_v14 = vadd.f32 %v4711_v22, %v4663_v39  ;;  %v4617_v5 = vadd.f32 %v4616_v29, %v4568_v35  ;;  %4762 = vmatmul.bf16.gmra.mxu0 %v5773_v23 }
 0x32e   : > { %4811 = vmatmul.bf16.gmra.mxu1 %v5777_v24 }
 0x32f   : > { %4860 = vmatmul.bf16.gmra.mxu2 %v5781_v52 }
 0x330   : > { %4909 = vmatmul.bf16.gmra.mxu3 %v5785_v34 }
 0x332   : > { %v4665_v36 = vpop.f32.mrf.mxu2  ;;  %v4569_v18 = vpop.f32.mrf.mxu0 }
 0x333   : > { %v4714_v37 = vpop.f32.mrf.mxu3  ;;  %v4666_v31 = vadd.f32 %v4665_v36, %v4617_v5  ;;  %v4618_v41 = vpop.f32.mrf.mxu1  ;;  %v4570_v42 = vadd.f32 %v4569_v18, %v8083_v19 }
 0x335   : > { %v8296_v61 = vadd.f32 %v4714_v37, %v4666_v31  ;;  %v4619_v45 = vadd.f32 %v4618_v41, %v4570_v42 }
 0x33a   : > { %v4667_v44 = vpop.f32.mrf.mxu2  ;;  %v4728_v47 = vpop.f32.mrf.mxu0 }
 0x33b   : > { %v4716_v46 = vpop.f32.mrf.mxu3  ;;  %v4668_v54 = vadd.f32 %v4667_v44, %v4619_v45  ;;  %v4777_v48 = vpop.f32.mrf.mxu1  ;;  %v4729_v30 = vadd.f32 %v4728_v47, %v8086_v59 }
 0x33d   : > { %v8298_v51 = vadd.f32 %v4716_v46, %v4668_v54  ;;  %v4778_v12 = vadd.f32 %v4777_v48, %v4729_v30 }
 0x342   : > { %v4826_v53 = vpop.f32.mrf.mxu2  ;;  %v4730_v58 = vpop.f32.mrf.mxu0 }
 0x343   : > { %v4875_v3 = vpop.f32.mrf.mxu3  ;;  %v4779_v50 = vpop.f32.mrf.mxu1  ;;  %v4731_v19 = vadd.f32 %v4730_v58, %v8113_v21  ;;  %v4827_v62 = vadd.f32 %v4826_v53, %v4778_v12 }
 0x345   : > { %v4780_v63 = vadd.f32 %v4779_v50, %v4731_v19  ;;  %v4876_v28 = vadd.f32 %v4875_v3, %v4827_v62 }
 0x347   : > { %v4936_v7 = vmul.f32 %v4876_v28, %v4876_v28 }
 0x34a   : > { %v4828_v27 = vpop.f32.mrf.mxu2  ;;  %v4733_v43 = vpop.f32.mrf.mxu0 }
 0x34b   : > { %v4877_v4 = vpop.f32.mrf.mxu3  ;;  %v4829_v55 = vadd.f32 %v4828_v27, %v4780_v63  ;;  %v4782_v8 = vpop.f32.mrf.mxu1  ;;  %v4734_v59 = vadd.f32 %v4733_v43, %v8116_v33 }
 0x34d   : > { %v4878_v9 = vadd.f32 %v4877_v4, %v4829_v55  ;;  %v4783_v21 = vadd.f32 %v4782_v8, %v4734_v59 }
 0x34f   : > { %v4915_v56 = vadd.f32 %v4878_v9, %v4876_v28  ;;  %v4937_v49 = vmul.f32 %v4878_v9, %v4878_v9  ;;  %v6561_v11 = vpack.c.bf16 %v4878_v9, %v4876_v28 }
 0x351   : > { %v4952_v0 = vadd.f32 %v4937_v49, %v4936_v7  ;;  %6562 = vst [vmem:[%s8305_s25] sm:$0xff] %v6561_v11  }
 0x352   : > { %v4831_v15 = vpop.f32.mrf.mxu2  ;;  %v4735_v32 = vpop.f32.mrf.mxu0 }
 0x353   : > { %v4880_v13 = vpop.f32.mrf.mxu3  ;;  %v4832_v16 = vadd.f32 %v4831_v15, %v4783_v21  ;;  %v4784_v20 = vpop.f32.mrf.mxu1  ;;  %v4736_v23 = vadd.f32 %v4735_v32, %v8143_v57 }
 0x355   : > { %v4881_v22 = vadd.f32 %v4880_v13, %v4832_v16  ;;  %v4785_v60 = vadd.f32 %v4784_v20, %v4736_v23 }
 0x357   : > { %v4916_v33 = vadd.f32 %v4915_v56, %v4881_v22  ;;  %v4938_v24 = vmul.f32 %v4881_v22, %v4881_v22 }
 0x359   : > { %v4953_v39 = vadd.f32 %v4952_v0, %v4938_v24 }
 0x35a   : > { %v4833_v29 = vpop.f32.mrf.mxu2  ;;  %v4738_v35 = vpop.f32.mrf.mxu0 }
 0x35b   : > { %v4882_v52 = vpop.f32.mrf.mxu3  ;;  %v4834_v34 = vadd.f32 %v4833_v29, %v4785_v60  ;;  %v4787_v5 = vpop.f32.mrf.mxu1  ;;  %v4739_v37 = vadd.f32 %v4738_v35, %v8146_v2 }
 0x35d   : > { %v4883_v36 = vadd.f32 %v4882_v52, %v4834_v34  ;;  %v4788_v45 = vadd.f32 %v4787_v5, %v4739_v37 }
 0x35f   : > { %v4917_v31 = vadd.f32 %v4916_v33, %v4883_v36  ;;  %v4939_v18 = vmul.f32 %v4883_v36, %v4883_v36  ;;  %v6566_v41 = vpack.c.bf16 %v4883_v36, %v4881_v22 }
 0x361   : > { %v4954_v42 = vadd.f32 %v4953_v39, %v4939_v18  ;;  %6598 = vst [vmem:[%s8305_s25 + $0x8] sm:$0xff] %v6566_v41  }
 0x362   : > { %v4836_v57 = vpop.f32.mrf.mxu2  ;;  %v4740_v54 = vpop.f32.mrf.mxu0 }
 0x363   : > { %v4885_v44 = vpop.f32.mrf.mxu3  ;;  %v4837_v46 = vadd.f32 %v4836_v57, %v4788_v45  ;;  %v4789_v47 = vpop.f32.mrf.mxu1  ;;  %v4741_v30 = vadd.f32 %v4740_v54, %v8173_v25 }
 0x365   : > { %v4886_v48 = vadd.f32 %v4885_v44, %v4837_v46  ;;  %v4790_v50 = vadd.f32 %v4789_v47, %v4741_v30 }
 0x367   : > { %v4918_v53 = vadd.f32 %v4917_v31, %v4886_v48  ;;  %v4940_v3 = vmul.f32 %v4886_v48, %v4886_v48 }
 0x369   : > { %v4955_v58 = vadd.f32 %v4954_v42, %v4940_v3 }
 0x36a   : > { %v4838_v2 = vpop.f32.mrf.mxu2  ;;  %v4743_v62 = vpop.f32.mrf.mxu0 }
 0x36b   : > { %v4887_v12 = vpop.f32.mrf.mxu3  ;;  %v4839_v19 = vadd.f32 %v4838_v2, %v4790_v50  ;;  %v4792_v63 = vpop.f32.mrf.mxu1  ;;  %v4744_v4 = vadd.f32 %v4743_v62, %v8176_v17 }
 0x36d   : > { %v4888_v27 = vadd.f32 %v4887_v12, %v4839_v19  ;;  %v4793_v9 = vadd.f32 %v4792_v63, %v4744_v4 }
 0x36f   : > { %v4919_v28 = vadd.f32 %v4918_v53, %v4888_v27  ;;  %v4941_v55 = vmul.f32 %v4888_v27, %v4888_v27  ;;  %v6571_v43 = vpack.c.bf16 %v4888_v27, %v4886_v48 }
 0x371   : > { %v4956_v8 = vadd.f32 %v4955_v58, %v4941_v55  ;;  %6599 = vst [vmem:[%s8305_s25 + $0x10] sm:$0xff] %v6571_v43  }
 0x372   : > { %v4841_v25 = vpop.f32.mrf.mxu2  ;;  %v4745_v56 = vpop.f32.mrf.mxu0 }
 0x373   : > { %v4890_v59 = vpop.f32.mrf.mxu3  ;;  %v4842_v7 = vadd.f32 %v4841_v25, %v4793_v9  ;;  %v4794_v49 = vpop.f32.mrf.mxu1  ;;  %v4746_v0 = vadd.f32 %v4745_v56, %v8203_v26 }
 0x375   : > { %v4891_v11 = vadd.f32 %v4890_v59, %v4842_v7  ;;  %v4795_v16 = vadd.f32 %v4794_v49, %v4746_v0 }
 0x377   : > { %v4920_v21 = vadd.f32 %v4919_v28, %v4891_v11  ;;  %v4942_v15 = vmul.f32 %v4891_v11, %v4891_v11 }
 0x379   : > { %v4957_v13 = vadd.f32 %v4956_v8, %v4942_v15 }
 0x37a   : > { %v4843_v17 = vpop.f32.mrf.mxu2  ;;  %v4748_v22 = vpop.f32.mrf.mxu0 }
 0x37b   : > { %v4892_v32 = vpop.f32.mrf.mxu3  ;;  %v4844_v20 = vadd.f32 %v4843_v17, %v4795_v16  ;;  %v4797_v23 = vpop.f32.mrf.mxu1  ;;  %v4749_v24 = vadd.f32 %v4748_v22, %v8206_v6 }
 0x37d   : > { %v4893_v33 = vadd.f32 %v4892_v32, %v4844_v20  ;;  %v4798_v34 = vadd.f32 %v4797_v23, %v4749_v24 }
 0x37f   : > { %v4921_v39 = vadd.f32 %v4920_v21, %v4893_v33  ;;  %v4943_v60 = vmul.f32 %v4893_v33, %v4893_v33  ;;  %v6576_v29 = vpack.c.bf16 %v4893_v33, %v4891_v11 }
 0x381   : > { %v4958_v52 = vadd.f32 %v4957_v13, %v4943_v60  ;;  %6600 = vst [vmem:[%s8305_s25 + $0x18] sm:$0xff] %v6576_v29  }
 0x382   : > { %v4846_v26 = vpop.f32.mrf.mxu2  ;;  %v4750_v36 = vpop.f32.mrf.mxu0 }
 0x383   : > { %v4895_v35 = vpop.f32.mrf.mxu3  ;;  %v4847_v5 = vadd.f32 %v4846_v26, %v4798_v34  ;;  %v4799_v37 = vpop.f32.mrf.mxu1  ;;  %v4751_v18 = vadd.f32 %v4750_v36, %v8233_v1 }
 0x385   : > { %v4896_v31 = vadd.f32 %v4895_v35, %v4847_v5  ;;  %v4800_v57 = vadd.f32 %v4799_v37, %v4751_v18 }
 0x387   : > { %v4922_v41 = vadd.f32 %v4921_v39, %v4896_v31  ;;  %v4944_v42 = vmul.f32 %v4896_v31, %v4896_v31 }
 0x389   : > { %v4959_v45 = vadd.f32 %v4958_v52, %v4944_v42 }
 0x38a   : > { %v4848_v6 = vpop.f32.mrf.mxu2  ;;  %v4753_v54 = vpop.f32.mrf.mxu0 }
 0x38b   : > { %v4897_v44 = vpop.f32.mrf.mxu3  ;;  %v4849_v46 = vadd.f32 %v4848_v6, %v4800_v57  ;;  %v4802_v47 = vpop.f32.mrf.mxu1  ;;  %v4754_v30 = vadd.f32 %v4753_v54, %v8236_v38 }
 0x38d   : > { %v4898_v48 = vadd.f32 %v4897_v44, %v4849_v46  ;;  %v4803_v2 = vadd.f32 %v4802_v47, %v4754_v30 }
 0x38f   : > { %v4923_v53 = vadd.f32 %v4922_v41, %v4898_v48  ;;  %v4945_v3 = vmul.f32 %v4898_v48, %v4898_v48  ;;  %v6581_v58 = vpack.c.bf16 %v4898_v48, %v4896_v31 }
 0x391   : > { %v4960_v50 = vadd.f32 %v4959_v45, %v4945_v3  ;;  %6601 = vst [vmem:[%s8305_s25 + $0x20] sm:$0xff] %v6581_v58  }
 0x392   : > { %v4851_v1 = vpop.f32.mrf.mxu2  ;;  %v4755_v62 = vpop.f32.mrf.mxu0 }
 0x393   : > { %v4900_v12 = vpop.f32.mrf.mxu3  ;;  %v4852_v19 = vadd.f32 %v4851_v1, %v4803_v2  ;;  %v4804_v63 = vpop.f32.mrf.mxu1  ;;  %v4756_v4 = vadd.f32 %v4755_v62, %v8263_v40 }
 0x395   : > { %v4901_v27 = vadd.f32 %v4900_v12, %v4852_v19  ;;  %v4805_v8 = vadd.f32 %v4804_v63, %v4756_v4 }
 0x397   : > { %v4924_v28 = vadd.f32 %v4923_v53, %v4901_v27  ;;  %v4946_v55 = vmul.f32 %v4901_v27, %v4901_v27 }
 0x399   : > { %v4961_v43 = vadd.f32 %v4960_v50, %v4946_v55 }
 0x39a   : > { %v4853_v38 = vpop.f32.mrf.mxu2  ;;  %v4758_v59 = vpop.f32.mrf.mxu0 }
 0x39b   : > { %v4902_v9 = vpop.f32.mrf.mxu3  ;;  %v4854_v25 = vadd.f32 %v4853_v38, %v4805_v8  ;;  %v4807_v7 = vpop.f32.mrf.mxu1  ;;  %v4759_v49 = vadd.f32 %v4758_v59, %v8266_v10 }
 0x39d   : > { %v4903_v56 = vadd.f32 %v4902_v9, %v4854_v25  ;;  %v4808_v13 = vadd.f32 %v4807_v7, %v4759_v49 }
 0x39f   : > { %v4925_v11 = vadd.f32 %v4924_v28, %v4903_v56  ;;  %v4947_v0 = vmul.f32 %v4903_v56, %v4903_v56  ;;  %v6586_v21 = vpack.c.bf16 %v4903_v56, %v4901_v27 }
 0x3a1   : > { %v4962_v15 = vadd.f32 %v4961_v43, %v4947_v0  ;;  %6602 = vst [vmem:[%s8305_s25 + $0x28] sm:$0xff] %v6586_v21   ;;  %v5051_v0 = vld [vmem:[%s8305_s25 + $0x4] sm:$0xf] (%p6740_p6)  ;;  %v5053_v21 = vld [vmem:[%s8305_s25 + $0x8] sm:$0xf] (%p6740_p6) }
 0x3a2   : > { %v4856_v40 = vpop.f32.mrf.mxu2  ;;  %v4760_v32 = vpop.f32.mrf.mxu0  ;;  %5052 = vst [vmem:[%s5032_s7 + $0x8] sm:$0xf] (%p6740_p6), %v5051_v0 }
 0x3a3   : > { %v4905_v16 = vpop.f32.mrf.mxu3  ;;  %v4857_v17 = vadd.f32 %v4856_v40, %v4808_v13  ;;  %v4809_v20 = vpop.f32.mrf.mxu1  ;;  %v4761_v23 = vadd.f32 %v4760_v32, %v8293_v14  ;;  %v5057_v13 = vld [vmem:[%s8305_s25 + $0x10] sm:$0xf] (%p6740_p6)  ;;  %5054 = vst [vmem:[%s5032_s7 + $0x10] sm:$0xf] (%p6740_p6), %v5053_v21  ;;  %v5059_v40 = vld [vmem:[%s8305_s25 + $0x14] sm:$0xf] (%p6740_p6) }
 0x3a4   : > { %5058 = vst [vmem:[%s5032_s7 + $0x20] sm:$0xf] (%p6740_p6), %v5057_v13  ;;  %v5065_v32 = vld [vmem:[%s8305_s25 + $0x20] sm:$0xf] (%p6740_p6) }
 0x3a5   : > { %v4906_v22 = vadd.f32 %v4905_v16, %v4857_v17  ;;  %v4810_v60 = vadd.f32 %v4809_v20, %v4761_v23  ;;  %v5061_v16 = vld [vmem:[%s8305_s25 + $0x18] sm:$0xf] (%p6740_p6)  ;;  %v5063_v17 = vld [vmem:[%s8305_s25 + $0x1c] sm:$0xf] (%p6740_p6)  ;;  %5060 = vst [vmem:[%s5032_s7 + $0x28] sm:$0xf] (%p6740_p6), %v5059_v40 }
 0x3a6   : > { %5062 = vst [vmem:[%s5032_s7 + $0x30] sm:$0xf] (%p6740_p6), %v5061_v16  ;;  %v5067_v20 = vld [vmem:[%s8305_s25 + $0x24] sm:$0xf] (%p6740_p6) }
 0x3a7   : > { %v4926_v33 = vadd.f32 %v4925_v11, %v4906_v22  ;;  %v4948_v24 = vmul.f32 %v4906_v22, %v4906_v22  ;;  %v5049_v11 = vld [vmem:[%s8305_s25] sm:$0xf] (%p6740_p6)  ;;  %5064 = vst [vmem:[%s5032_s7 + $0x38] sm:$0xf] (%p6740_p6), %v5063_v17 }
 0x3a8   : > { %5050 = vst [vmem:[%s5032_s7] sm:$0xf] (%p6740_p6), %v5049_v11  ;;  %v5071_v23 = vld [vmem:[%s8305_s25 + $0x2c] sm:$0xf] (%p6740_p6) }
 0x3a9   : > { %v4963_v39 = vadd.f32 %v4962_v15, %v4948_v24  ;;  %v5055_v15 = vld [vmem:[%s8305_s25 + $0xc] sm:$0xf] (%p6740_p6)  ;;  %5066 = vst [vmem:[%s5032_s7 + $0x40] sm:$0xf] (%p6740_p6), %v5065_v32 }
 0x3aa   : > { %v4858_v10 = vpop.f32.mrf.mxu2  ;;  %v4763_v34 = vpop.f32.mrf.mxu0  ;;  %5056 = vst [vmem:[%s5032_s7 + $0x18] sm:$0xf] (%p6740_p6), %v5055_v15 }
 0x3ab   : > { %v4907_v29 = vpop.f32.mrf.mxu3  ;;  %v4859_v52 = vadd.f32 %v4858_v10, %v4810_v60  ;;  %v4764_v35 = vadd.f32 %v4763_v34, %v8296_v61  ;;  %v4812_v5 = vpop.f32.mrf.mxu1  ;;  %5068 = vst [vmem:[%s5032_s7 + $0x48] sm:$0xf] (%p6740_p6), %v5067_v20 }
 0x3ac   : > { %5072 = vst [vmem:[%s5032_s7 + $0x58] sm:$0xf] (%p6740_p6), %v5071_v23 }
 0x3ad   : > { %v4908_v26 = vadd.f32 %v4907_v29, %v4859_v52  ;;  %v4813_v41 = vadd.f32 %v4812_v5, %v4764_v35 }
 0x3af   : > { %v4927_v36 = vadd.f32 %v4926_v33, %v4908_v26  ;;  %v4949_v37 = vmul.f32 %v4908_v26, %v4908_v26  ;;  %v6591_v31 = vpack.c.bf16 %v4908_v26, %v4906_v22  ;;  %v5069_v22 = vld [vmem:[%s8305_s25 + $0x28] sm:$0xf] (%p6740_p6) }
 0x3b0   : > { %5070 = vst [vmem:[%s5032_s7 + $0x50] sm:$0xf] (%p6740_p6), %v5069_v22 }
 0x3b1   : > { %v4964_v18 = vadd.f32 %v4963_v39, %v4949_v37  ;;  %6603 = vst [vmem:[%s8305_s25 + $0x30] sm:$0xff] %v6591_v31  }
 0x3b2   : > { %v4861_v14 = vpop.f32.mrf.mxu2  ;;  %v4765_v57 = vpop.f32.mrf.mxu0 }
 0x3b3   : > { %v4910_v42 = vpop.f32.mrf.mxu3  ;;  %v4862_v45 = vadd.f32 %v4861_v14, %v4813_v41  ;;  %v4766_v44 = vadd.f32 %v4765_v57, %v8298_v51  ;;  %v4814_v47 = vpop.f32.mrf.mxu1  ;;  %v4973_v51 = vlaneseq }
 0x3b5   : > { %v4911_v6 = vadd.f32 %v4910_v42, %v4862_v45  ;;  %v4815_v48 = vadd.f32 %v4814_v47, %v4766_v44  ;;  %v4974_v43 = vshrl.u32 %v4973_v51, 7 }
 0x3b7   : > { %v4928_v46 = vadd.f32 %v4927_v36, %v4911_v6  ;;  %v4950_v54 = vmul.f32 %v4911_v6, %v4911_v6  ;;  %vm4975_vm0 = vcmp.eq.s32.totalorder %v4974_v43, 0  ;;  %vm4977_vm1 = vcmp.eq.s32.totalorder %v4974_v43, 1 }
 0x3b8   : > { %v5073_v33 = vld [vmem:[%s8305_s25 + $0x30] sm:$0xf] (%p6740_p6)  ;;  %v5075_v24 = vld [vmem:[%s8305_s25 + $0x34] sm:$0xf] (%p6740_p6) }
 0x3b9   : > { %v4965_v61 = vadd.f32 %v4964_v18, %v4950_v54  ;;  %5074 = vst [vmem:[%s5032_s7 + $0x60] sm:$0xf] (%p6740_p6), %v5073_v33 }
 0x3ba   : > { %v4863_v30 = vpop.f32.mrf.mxu2  ;;  %5076 = vst [vmem:[%s5032_s7 + $0x68] sm:$0xf] (%p6740_p6), %v5075_v24 }
 0x3bb   : > { %v4864_v53 = vadd.f32 %v4863_v30, %v4815_v48  ;;  %v4912_v3 = vpop.f32.mrf.mxu3 }
 0x3bd   : > { %v4913_v58 = vadd.f32 %v4912_v3, %v4864_v53 }
 0x3bf   : > { %v4929_v50 = vadd.f32 %v4928_v46, %v4913_v58  ;;  %v4951_v2 = vmul.f32 %v4913_v58, %v4913_v58  ;;  %v6596_v1 = vpack.c.bf16 %v4913_v58, %v4911_v6 }
 0x3c1   : > { %v4930_v12 = vrot.slane %v4929_v50, 4  ;;  %v4966_v19 = vadd.f32 %v4965_v61, %v4951_v2  ;;  %6604 = vst [vmem:[%s8305_s25 + $0x38] sm:$0xff] %v6596_v1  }
 0x3c3   : > { %v4931_v62 = vadd.f32 %v4930_v12, %v4929_v50  ;;  %v4967_v63 = vrot.slane %v4966_v19, 4 }
 0x3c5   : > { %v4932_v27 = vrot.slane %v4931_v62, 2  ;;  %v4968_v4 = vadd.f32 %v4967_v63, %v4966_v19 }
 0x3c7   : > { %v4933_v28 = vadd.f32 %v4932_v27, %v4931_v62  ;;  %v4969_v55 = vrot.slane %v4968_v4, 2 }
 0x3c8   : > { %v5077_v39 = vld [vmem:[%s8305_s25 + $0x38] sm:$0xf] (%p6740_p6)  ;;  %v5079_v60 = vld [vmem:[%s8305_s25 + $0x3c] sm:$0xf] (%p6740_p6) }
 0x3c9   : > { %v4934_v8 = vrot.slane %v4933_v28, 1  ;;  %v4970_v38 = vadd.f32 %v4969_v55, %v4968_v4  ;;  %5078 = vst [vmem:[%s5032_s7 + $0x70] sm:$0xf] (%p6740_p6), %v5077_v39 }
 0x3ca   : > { %5080 = vst [vmem:[%s5032_s7 + $0x78] sm:$0xf] (%p6740_p6), %v5079_v60 }
 0x3cb   : > { %v4935_v9 = vadd.f32 %v4934_v8, %v4933_v28  ;;  %v4971_v25 = vrot.slane %v4970_v38, 1 }
 0x3cd   : > { %v4972_v59 = vadd.f32 %v4971_v25, %v4970_v38  ;;  %v4976_v7 = vsel %vm4975_vm0, %v4935_v9, 0.0 }
 0x3ce   : > { %5027 = sbr.rel (!%p6740_p6) target bundleno = 979 (0x3d3), region = 84 }
 0x3cf   : > { %v4978_v56 = vsel %vm4977_vm1, %v4972_v59, 0.0 }
 0x3d0   : > { %v4979_v49 = vadd.f32 %v4978_v56, %v4976_v7 }
 0x3d2   : > { %4980 = vst [vmem:[%s2338_s28] sm:$0xff] %v4979_v49 }
 0x3d3 PF: > { %s14_s16 = sadd.s32 1, %s6683_s16   ;;  %s8375_s12 = smov %s6671_s13 }
 0x3d4   : > { %p11_p12 = scmp.ge.s32.totalorder %s14_s16, 4   ;;  %s8376_s13 = smov %s6745_s22 }
 0x3d5   : > { %s8377_s14 = smov %s6679_s15  ;;  %s8378_s15 = smov %s8380_s17 }
 0x3d6   :  { %13 = sbr.rel (!%p11_p12) target bundleno = 3 (0x3), region = 175 }

// kernel: discriminator_forward.7
= control target key start
LH: loop header
LB: loop body
LE: loop exit
PB: predicated region body
PF: predicated region fallthrough
CT: control target
= control target key end

     0   :  { %s9270_s9 = smov 0   ;;  %s9272_s10 = smov 0   ;;  %s11043_s0 = inlined_call_operand.vmem [shape: bf16[32,4096], index: 0, kind: input, shape index: {}]   ;;  %s11044_s1 = inlined_call_operand.vmem [shape: bf16[4096,256], index: 1, kind: input, shape index: {}]   ;;  %s11045_s2 = inlined_call_operand.vmem [shape: bf16[32,256], index: 2, kind: output, shape index: {}]  }
   0x1   :  { %s9274_s11 = smov 0   ;;  %s9276_s12 = smov 0  }
   0x2   :  { %s9278_s13 = smov 0  }
   0x3 LB: > { %s21_s14 = sadd.s32 1, %s9249_s12  ;;  %s7550_s15 = sadd.s32 4294967295, %s9253_s13   ;;  %s9253_s13 = sphi %s9278_s13, %s12_s13   ;;  %s9249_s12 = sphi %s9276_s12, %s11050_s12   ;;  %s9245_s11 = sphi %s9274_s11, %s11049_s11   ;;  %s9241_s10 = sphi %s9272_s10, %s11048_s10   ;;  %s9237_s9 = sphi %s9270_s9, %s11047_s9  }
   0x4   : > { %p22_p0 = scmp.ge.s32.totalorder %s21_s14, 2  ;;  %p64_p1 = scmp.ne.s32.totalorder %s9241_s10, %s9237_s9 }
   0x5   : > { %p65_p2 = scmp.eq.s32.totalorder %s9253_s13, 0  ;;  %p96_p4 = scmp.eq.s32.totalorder %s7550_s15, 1 }
   0x6   : > { %s11052_s14 = smov (%p22_p0, %s21_s14), 0  ;;  %s57_s17 = sadd.s32 1, %s9241_s10 }
   0x7   : > { %p66_p3 = por %p65_p2, %p64_p1  ;;  %s54_s16 = ssub.s32 %s9249_s12, %s11052_s14 }
   0x8   : > { %p55_p5 = scmp.eq.s32.totalorder %s54_s16, 0  ;;  %p9305_p6 = por %p96_p4, %p64_p1 }
   0x9   : > { %p7554_p7 = scmp.ge.s32.totalorder %s9253_s13, 2 }
   0xa   : > { %s9310_s19 = scalar_select %p55_p5, %s9241_s10, %s57_s17  }
   0xb   : > { %128 = sbr.rel (%p7554_p7) target bundleno = 532 (0x214), region = 20 }
  0x10   : > { %131 = sbr.rel (!%p66_p3) target bundleno = 532 (0x214), region = 24  ;;  %s133_s20 = sand.u32 (%p66_p3), 1, %s9241_s10  }
  0x11   : > { %s7556_s21 = sshll.u32 (%p66_p3), %s9249_s12, 2  ;;  %s7555_s22 = sshll.u32 (%p66_p3), %s133_s20, 11 }
  0x12   : > { %s9318_s25 = scalar_lea.vmem (%p66_p3), %s11044_s1, %s7556_s21  ;;  %s9322_s26 = scalar_lea.vmem (%p66_p3), [#allocation2], %s7555_s22 }
  0x13   : > { %v154_v0 = vld [vmem:[%s9318_s25] sm:$0xf] (%p66_p3)  ;;  %v156_v1 = vld [vmem:[%s9318_s25 + $0x8] sm:$0xf] (%p66_p3)  ;;  %v158_v2 = vld [vmem:[%s9318_s25 + $0x10] sm:$0xf] (%p66_p3) }
  0x14   : > { %155 = vst [vmem:[%s9322_s26] sm:$0xf] (%p66_p3), %v154_v0  ;;  %v160_v3 = vld [vmem:[%s9318_s25 + $0x18] sm:$0xf] (%p66_p3)  ;;  %v162_v4 = vld [vmem:[%s9318_s25 + $0x20] sm:$0xf] (%p66_p3) }
  0x15   : > { %157 = vst [vmem:[%s9322_s26 + $0x4] sm:$0xf] %v156_v1  ;;  %v164_v5 = vld [vmem:[%s9318_s25 + $0x28] sm:$0xf]  ;;  %v166_v6 = vld [vmem:[%s9318_s25 + $0x30] sm:$0xf] }
  0x16   : > { %159 = vst [vmem:[%s9322_s26 + $0x8] sm:$0xf] %v158_v2  ;;  %v168_v7 = vld [vmem:[%s9318_s25 + $0x38] sm:$0xf]  ;;  %v170_v8 = vld [vmem:[%s9318_s25 + $0x40] sm:$0xf] }
  0x17   : > { %161 = vst [vmem:[%s9322_s26 + $0xc] sm:$0xf] %v160_v3  ;;  %v172_v9 = vld [vmem:[%s9318_s25 + $0x48] sm:$0xf]  ;;  %v174_v10 = vld [vmem:[%s9318_s25 + $0x50] sm:$0xf] }
  0x18   : > { %163 = vst [vmem:[%s9322_s26 + $0x10] sm:$0xf] %v162_v4  ;;  %v176_v11 = vld [vmem:[%s9318_s25 + $0x58] sm:$0xf]  ;;  %v178_v12 = vld [vmem:[%s9318_s25 + $0x60] sm:$0xf] }
  0x19   : > { %165 = vst [vmem:[%s9322_s26 + $0x14] sm:$0xf] %v164_v5  ;;  %v180_v13 = vld [vmem:[%s9318_s25 + $0x68] sm:$0xf]  ;;  %v182_v14 = vld [vmem:[%s9318_s25 + $0x70] sm:$0xf] }
  0x1a   : > { %167 = vst [vmem:[%s9322_s26 + $0x18] sm:$0xf] %v166_v6  ;;  %v184_v15 = vld [vmem:[%s9318_s25 + $0x78] sm:$0xf]  ;;  %v186_v16 = vld [vmem:[%s9318_s25 + $0x80] sm:$0xf] }
  0x1b   : > { %169 = vst [vmem:[%s9322_s26 + $0x1c] sm:$0xf] %v168_v7  ;;  %v188_v17 = vld [vmem:[%s9318_s25 + $0x88] sm:$0xf]  ;;  %v190_v18 = vld [vmem:[%s9318_s25 + $0x90] sm:$0xf] }
  0x1c   : > { %171 = vst [vmem:[%s9322_s26 + $0x20] sm:$0xf] %v170_v8  ;;  %v192_v19 = vld [vmem:[%s9318_s25 + $0x98] sm:$0xf]  ;;  %v194_v20 = vld [vmem:[%s9318_s25 + $0xa0] sm:$0xf] }
  0x1d   : > { %173 = vst [vmem:[%s9322_s26 + $0x24] sm:$0xf] %v172_v9  ;;  %v196_v21 = vld [vmem:[%s9318_s25 + $0xa8] sm:$0xf]  ;;  %v198_v22 = vld [vmem:[%s9318_s25 + $0xb0] sm:$0xf] }
  0x1e   : > { %175 = vst [vmem:[%s9322_s26 + $0x28] sm:$0xf] %v174_v10  ;;  %v200_v23 = vld [vmem:[%s9318_s25 + $0xb8] sm:$0xf]  ;;  %v202_v24 = vld [vmem:[%s9318_s25 + $0xc0] sm:$0xf] }
  0x1f   : > { %177 = vst [vmem:[%s9322_s26 + $0x2c] sm:$0xf] %v176_v11  ;;  %v204_v25 = vld [vmem:[%s9318_s25 + $0xc8] sm:$0xf]  ;;  %v206_v26 = vld [vmem:[%s9318_s25 + $0xd0] sm:$0xf] }
  0x20   : > { %179 = vst [vmem:[%s9322_s26 + $0x30] sm:$0xf] %v178_v12  ;;  %v208_v27 = vld [vmem:[%s9318_s25 + $0xd8] sm:$0xf]  ;;  %v210_v28 = vld [vmem:[%s9318_s25 + $0xe0] sm:$0xf] }
  0x21   : > { %181 = vst [vmem:[%s9322_s26 + $0x34] sm:$0xf] %v180_v13  ;;  %v212_v29 = vld [vmem:[%s9318_s25 + $0xe8] sm:$0xf]  ;;  %v214_v30 = vld [vmem:[%s9318_s25 + $0xf0] sm:$0xf] }
  0x22   : > { %183 = vst [vmem:[%s9322_s26 + $0x38] sm:$0xf] %v182_v14  ;;  %v216_v31 = vld [vmem:[%s9318_s25 + $0xf8] sm:$0xf]  ;;  %v218_v32 = vld [vmem:[%s9318_s25 + $0x100] sm:$0xf] }
  0x23   : > { %185 = vst [vmem:[%s9322_s26 + $0x3c] sm:$0xf] %v184_v15  ;;  %v220_v33 = vld [vmem:[%s9318_s25 + $0x108] sm:$0xf]  ;;  %v222_v34 = vld [vmem:[%s9318_s25 + $0x110] sm:$0xf] }
  0x24   : > { %187 = vst [vmem:[%s9322_s26 + $0x40] sm:$0xf] %v186_v16  ;;  %v224_v35 = vld [vmem:[%s9318_s25 + $0x118] sm:$0xf]  ;;  %v226_v36 = vld [vmem:[%s9318_s25 + $0x120] sm:$0xf] }
  0x25   : > { %189 = vst [vmem:[%s9322_s26 + $0x44] sm:$0xf] %v188_v17  ;;  %v228_v37 = vld [vmem:[%s9318_s25 + $0x128] sm:$0xf]  ;;  %v230_v38 = vld [vmem:[%s9318_s25 + $0x130] sm:$0xf] }
  0x26   : > { %191 = vst [vmem:[%s9322_s26 + $0x48] sm:$0xf] %v190_v18  ;;  %v232_v39 = vld [vmem:[%s9318_s25 + $0x138] sm:$0xf]  ;;  %v234_v40 = vld [vmem:[%s9318_s25 + $0x140] sm:$0xf] }
  0x27   : > { %193 = vst [vmem:[%s9322_s26 + $0x4c] sm:$0xf] %v192_v19  ;;  %v236_v41 = vld [vmem:[%s9318_s25 + $0x148] sm:$0xf]  ;;  %v238_v42 = vld [vmem:[%s9318_s25 + $0x150] sm:$0xf] }
  0x28   : > { %195 = vst [vmem:[%s9322_s26 + $0x50] sm:$0xf] %v194_v20  ;;  %v240_v43 = vld [vmem:[%s9318_s25 + $0x158] sm:$0xf]  ;;  %v242_v44 = vld [vmem:[%s9318_s25 + $0x160] sm:$0xf] }
  0x29   : > { %197 = vst [vmem:[%s9322_s26 + $0x54] sm:$0xf] %v196_v21  ;;  %v244_v45 = vld [vmem:[%s9318_s25 + $0x168] sm:$0xf]  ;;  %v246_v46 = vld [vmem:[%s9318_s25 + $0x170] sm:$0xf] }
  0x2a   : > { %199 = vst [vmem:[%s9322_s26 + $0x58] sm:$0xf] %v198_v22  ;;  %v248_v47 = vld [vmem:[%s9318_s25 + $0x178] sm:$0xf]  ;;  %v250_v48 = vld [vmem:[%s9318_s25 + $0x180] sm:$0xf] }
  0x2b   : > { %201 = vst [vmem:[%s9322_s26 + $0x5c] sm:$0xf] %v200_v23  ;;  %v252_v49 = vld [vmem:[%s9318_s25 + $0x188] sm:$0xf]  ;;  %v254_v50 = vld [vmem:[%s9318_s25 + $0x190] sm:$0xf] }
  0x2c   : > { %203 = vst [vmem:[%s9322_s26 + $0x60] sm:$0xf] %v202_v24  ;;  %v256_v51 = vld [vmem:[%s9318_s25 + $0x198] sm:$0xf]  ;;  %v258_v52 = vld [vmem:[%s9318_s25 + $0x1a0] sm:$0xf] }
  0x2d   : > { %205 = vst [vmem:[%s9322_s26 + $0x64] sm:$0xf] %v204_v25  ;;  %v260_v53 = vld [vmem:[%s9318_s25 + $0x1a8] sm:$0xf]  ;;  %v262_v54 = vld [vmem:[%s9318_s25 + $0x1b0] sm:$0xf] }
  0x2e   : > { %207 = vst [vmem:[%s9322_s26 + $0x68] sm:$0xf] %v206_v26  ;;  %v264_v55 = vld [vmem:[%s9318_s25 + $0x1b8] sm:$0xf]  ;;  %v266_v56 = vld [vmem:[%s9318_s25 + $0x1c0] sm:$0xf] }
  0x2f   : > { %209 = vst [vmem:[%s9322_s26 + $0x6c] sm:$0xf] %v208_v27  ;;  %v268_v57 = vld [vmem:[%s9318_s25 + $0x1c8] sm:$0xf]  ;;  %v270_v58 = vld [vmem:[%s9318_s25 + $0x1d0] sm:$0xf] }
  0x30   : > { %211 = vst [vmem:[%s9322_s26 + $0x70] sm:$0xf] %v210_v28  ;;  %v272_v59 = vld [vmem:[%s9318_s25 + $0x1d8] sm:$0xf]  ;;  %v274_v60 = vld [vmem:[%s9318_s25 + $0x1e0] sm:$0xf] }
  0x31   : > { %213 = vst [vmem:[%s9322_s26 + $0x74] sm:$0xf] %v212_v29  ;;  %v276_v61 = vld [vmem:[%s9318_s25 + $0x1e8] sm:$0xf]  ;;  %v278_v62 = vld [vmem:[%s9318_s25 + $0x1f0] sm:$0xf] }
  0x32   : > { %215 = vst [vmem:[%s9322_s26 + $0x78] sm:$0xf] %v214_v30  ;;  %v280_v63 = vld [vmem:[%s9318_s25 + $0x1f8] sm:$0xf]  ;;  %v282_v0 = vld [vmem:[%s9318_s25 + $0x200] sm:$0xf] }
  0x33   : > { %217 = vst [vmem:[%s9322_s26 + $0x7c] sm:$0xf] %v216_v31  ;;  %v284_v1 = vld [vmem:[%s9318_s25 + $0x208] sm:$0xf]  ;;  %v286_v2 = vld [vmem:[%s9318_s25 + $0x210] sm:$0xf] }
  0x34   : > { %219 = vst [vmem:[%s9322_s26 + $0x80] sm:$0xf] %v218_v32  ;;  %v288_v3 = vld [vmem:[%s9318_s25 + $0x218] sm:$0xf]  ;;  %v290_v4 = vld [vmem:[%s9318_s25 + $0x220] sm:$0xf] }
  0x35   : > { %221 = vst [vmem:[%s9322_s26 + $0x84] sm:$0xf] %v220_v33  ;;  %v292_v5 = vld [vmem:[%s9318_s25 + $0x228] sm:$0xf]  ;;  %v294_v6 = vld [vmem:[%s9318_s25 + $0x230] sm:$0xf] }
  0x36   : > { %223 = vst [vmem:[%s9322_s26 + $0x88] sm:$0xf] %v222_v34  ;;  %v296_v7 = vld [vmem:[%s9318_s25 + $0x238] sm:$0xf]  ;;  %v298_v8 = vld [vmem:[%s9318_s25 + $0x240] sm:$0xf] }
  0x37   : > { %225 = vst [vmem:[%s9322_s26 + $0x8c] sm:$0xf] %v224_v35  ;;  %v300_v9 = vld [vmem:[%s9318_s25 + $0x248] sm:$0xf]  ;;  %v302_v10 = vld [vmem:[%s9318_s25 + $0x250] sm:$0xf] }
  0x38   : > { %227 = vst [vmem:[%s9322_s26 + $0x90] sm:$0xf] %v226_v36  ;;  %v304_v11 = vld [vmem:[%s9318_s25 + $0x258] sm:$0xf]  ;;  %v306_v12 = vld [vmem:[%s9318_s25 + $0x260] sm:$0xf] }
  0x39   : > { %229 = vst [vmem:[%s9322_s26 + $0x94] sm:$0xf] %v228_v37  ;;  %v308_v13 = vld [vmem:[%s9318_s25 + $0x268] sm:$0xf]  ;;  %v310_v14 = vld [vmem:[%s9318_s25 + $0x270] sm:$0xf] }
  0x3a   : > { %231 = vst [vmem:[%s9322_s26 + $0x98] sm:$0xf] %v230_v38  ;;  %v312_v15 = vld [vmem:[%s9318_s25 + $0x278] sm:$0xf]  ;;  %v314_v16 = vld [vmem:[%s9318_s25 + $0x280] sm:$0xf] }
  0x3b   : > { %233 = vst [vmem:[%s9322_s26 + $0x9c] sm:$0xf] %v232_v39  ;;  %v316_v17 = vld [vmem:[%s9318_s25 + $0x288] sm:$0xf]  ;;  %v318_v18 = vld [vmem:[%s9318_s25 + $0x290] sm:$0xf] }
  0x3c   : > { %235 = vst [vmem:[%s9322_s26 + $0xa0] sm:$0xf] %v234_v40  ;;  %v320_v19 = vld [vmem:[%s9318_s25 + $0x298] sm:$0xf]  ;;  %v322_v20 = vld [vmem:[%s9318_s25 + $0x2a0] sm:$0xf] }
  0x3d   : > { %237 = vst [vmem:[%s9322_s26 + $0xa4] sm:$0xf] %v236_v41  ;;  %v324_v21 = vld [vmem:[%s9318_s25 + $0x2a8] sm:$0xf]  ;;  %v326_v22 = vld [vmem:[%s9318_s25 + $0x2b0] sm:$0xf] }
  0x3e   : > { %239 = vst [vmem:[%s9322_s26 + $0xa8] sm:$0xf] %v238_v42  ;;  %v328_v23 = vld [vmem:[%s9318_s25 + $0x2b8] sm:$0xf]  ;;  %v330_v24 = vld [vmem:[%s9318_s25 + $0x2c0] sm:$0xf] }
  0x3f   : > { %241 = vst [vmem:[%s9322_s26 + $0xac] sm:$0xf] %v240_v43  ;;  %v332_v25 = vld [vmem:[%s9318_s25 + $0x2c8] sm:$0xf]  ;;  %v334_v26 = vld [vmem:[%s9318_s25 + $0x2d0] sm:$0xf] }
  0x40   : > { %243 = vst [vmem:[%s9322_s26 + $0xb0] sm:$0xf] %v242_v44  ;;  %v336_v27 = vld [vmem:[%s9318_s25 + $0x2d8] sm:$0xf]  ;;  %v338_v28 = vld [vmem:[%s9318_s25 + $0x2e0] sm:$0xf] }
  0x41   : > { %245 = vst [vmem:[%s9322_s26 + $0xb4] sm:$0xf] %v244_v45  ;;  %v340_v29 = vld [vmem:[%s9318_s25 + $0x2e8] sm:$0xf]  ;;  %v342_v30 = vld [vmem:[%s9318_s25 + $0x2f0] sm:$0xf] }
  0x42   : > { %247 = vst [vmem:[%s9322_s26 + $0xb8] sm:$0xf] %v246_v46  ;;  %v344_v31 = vld [vmem:[%s9318_s25 + $0x2f8] sm:$0xf]  ;;  %v346_v32 = vld [vmem:[%s9318_s25 + $0x300] sm:$0xf] }
  0x43   : > { %249 = vst [vmem:[%s9322_s26 + $0xbc] sm:$0xf] %v248_v47  ;;  %v348_v33 = vld [vmem:[%s9318_s25 + $0x308] sm:$0xf]  ;;  %v350_v34 = vld [vmem:[%s9318_s25 + $0x310] sm:$0xf] }
  0x44   : > { %251 = vst [vmem:[%s9322_s26 + $0xc0] sm:$0xf] %v250_v48  ;;  %v352_v35 = vld [vmem:[%s9318_s25 + $0x318] sm:$0xf]  ;;  %v354_v36 = vld [vmem:[%s9318_s25 + $0x320] sm:$0xf] }
  0x45   : > { %253 = vst [vmem:[%s9322_s26 + $0xc4] sm:$0xf] %v252_v49  ;;  %v356_v37 = vld [vmem:[%s9318_s25 + $0x328] sm:$0xf]  ;;  %v358_v38 = vld [vmem:[%s9318_s25 + $0x330] sm:$0xf] }
  0x46   : > { %255 = vst [vmem:[%s9322_s26 + $0xc8] sm:$0xf] %v254_v50  ;;  %v360_v39 = vld [vmem:[%s9318_s25 + $0x338] sm:$0xf]  ;;  %v362_v40 = vld [vmem:[%s9318_s25 + $0x340] sm:$0xf] }
  0x47   : > { %257 = vst [vmem:[%s9322_s26 + $0xcc] sm:$0xf] %v256_v51  ;;  %v364_v41 = vld [vmem:[%s9318_s25 + $0x348] sm:$0xf]  ;;  %v366_v42 = vld [vmem:[%s9318_s25 + $0x350] sm:$0xf] }
  0x48   : > { %259 = vst [vmem:[%s9322_s26 + $0xd0] sm:$0xf] %v258_v52  ;;  %v368_v43 = vld [vmem:[%s9318_s25 + $0x358] sm:$0xf]  ;;  %v370_v44 = vld [vmem:[%s9318_s25 + $0x360] sm:$0xf] }
  0x49   : > { %261 = vst [vmem:[%s9322_s26 + $0xd4] sm:$0xf] %v260_v53  ;;  %v372_v45 = vld [vmem:[%s9318_s25 + $0x368] sm:$0xf]  ;;  %v374_v46 = vld [vmem:[%s9318_s25 + $0x370] sm:$0xf] }
  0x4a   : > { %263 = vst [vmem:[%s9322_s26 + $0xd8] sm:$0xf] %v262_v54  ;;  %v376_v47 = vld [vmem:[%s9318_s25 + $0x378] sm:$0xf]  ;;  %v378_v48 = vld [vmem:[%s9318_s25 + $0x380] sm:$0xf] }
  0x4b   : > { %265 = vst [vmem:[%s9322_s26 + $0xdc] sm:$0xf] %v264_v55  ;;  %v380_v49 = vld [vmem:[%s9318_s25 + $0x388] sm:$0xf]  ;;  %v382_v50 = vld [vmem:[%s9318_s25 + $0x390] sm:$0xf] }
  0x4c   : > { %267 = vst [vmem:[%s9322_s26 + $0xe0] sm:$0xf] %v266_v56  ;;  %v384_v51 = vld [vmem:[%s9318_s25 + $0x398] sm:$0xf]  ;;  %v386_v52 = vld [vmem:[%s9318_s25 + $0x3a0] sm:$0xf] }
  0x4d   : > { %269 = vst [vmem:[%s9322_s26 + $0xe4] sm:$0xf] %v268_v57  ;;  %v388_v53 = vld [vmem:[%s9318_s25 + $0x3a8] sm:$0xf]  ;;  %v390_v54 = vld [vmem:[%s9318_s25 + $0x3b0] sm:$0xf] }
  0x4e   : > { %271 = vst [vmem:[%s9322_s26 + $0xe8] sm:$0xf] %v270_v58  ;;  %v392_v55 = vld [vmem:[%s9318_s25 + $0x3b8] sm:$0xf]  ;;  %v394_v56 = vld [vmem:[%s9318_s25 + $0x3c0] sm:$0xf] }
  0x4f   : > { %273 = vst [vmem:[%s9322_s26 + $0xec] sm:$0xf] %v272_v59  ;;  %v396_v57 = vld [vmem:[%s9318_s25 + $0x3c8] sm:$0xf]  ;;  %v398_v58 = vld [vmem:[%s9318_s25 + $0x3d0] sm:$0xf] }
  0x50   : > { %275 = vst [vmem:[%s9322_s26 + $0xf0] sm:$0xf] %v274_v60  ;;  %v400_v59 = vld [vmem:[%s9318_s25 + $0x3d8] sm:$0xf]  ;;  %v402_v60 = vld [vmem:[%s9318_s25 + $0x3e0] sm:$0xf] }
  0x51   : > { %277 = vst [vmem:[%s9322_s26 + $0xf4] sm:$0xf] %v276_v61  ;;  %v404_v61 = vld [vmem:[%s9318_s25 + $0x3e8] sm:$0xf] }
  0x52   : > { %279 = vst [vmem:[%s9322_s26 + $0xf8] sm:$0xf] %v278_v62  ;;  %v406_v62 = vld [vmem:[%s9318_s25 + $0x3f0] sm:$0xf] }
  0x53   : > { %281 = vst [vmem:[%s9322_s26 + $0xfc] sm:$0xf] %v280_v63  ;;  %v408_v63 = vld [vmem:[%s9318_s25 + $0x3f8] sm:$0xf] }
  0x54   : > { %283 = vst [vmem:[%s9322_s26 + $0x100] sm:$0xf] %v282_v0  ;;  %v410_v0 = vld [vmem:[%s9318_s25 + $0x400] sm:$0xf] }
  0x55   : > { %285 = vst [vmem:[%s9322_s26 + $0x104] sm:$0xf] %v284_v1  ;;  %v412_v1 = vld [vmem:[%s9318_s25 + $0x408] sm:$0xf] }
  0x56   : > { %287 = vst [vmem:[%s9322_s26 + $0x108] sm:$0xf] %v286_v2  ;;  %v414_v2 = vld [vmem:[%s9318_s25 + $0x410] sm:$0xf] }
  0x57   : > { %289 = vst [vmem:[%s9322_s26 + $0x10c] sm:$0xf] %v288_v3  ;;  %v416_v3 = vld [vmem:[%s9318_s25 + $0x418] sm:$0xf] }
  0x58   : > { %291 = vst [vmem:[%s9322_s26 + $0x110] sm:$0xf] %v290_v4  ;;  %v418_v4 = vld [vmem:[%s9318_s25 + $0x420] sm:$0xf] }
  0x59   : > { %293 = vst [vmem:[%s9322_s26 + $0x114] sm:$0xf] %v292_v5  ;;  %v420_v5 = vld [vmem:[%s9318_s25 + $0x428] sm:$0xf] }
  0x5a   : > { %295 = vst [vmem:[%s9322_s26 + $0x118] sm:$0xf] %v294_v6  ;;  %v422_v6 = vld [vmem:[%s9318_s25 + $0x430] sm:$0xf] }
  0x5b   : > { %297 = vst [vmem:[%s9322_s26 + $0x11c] sm:$0xf] %v296_v7  ;;  %v424_v7 = vld [vmem:[%s9318_s25 + $0x438] sm:$0xf] }
  0x5c   : > { %299 = vst [vmem:[%s9322_s26 + $0x120] sm:$0xf] %v298_v8  ;;  %v426_v8 = vld [vmem:[%s9318_s25 + $0x440] sm:$0xf] }
  0x5d   : > { %301 = vst [vmem:[%s9322_s26 + $0x124] sm:$0xf] %v300_v9  ;;  %v428_v9 = vld [vmem:[%s9318_s25 + $0x448] sm:$0xf] }
  0x5e   : > { %303 = vst [vmem:[%s9322_s26 + $0x128] sm:$0xf] %v302_v10  ;;  %v430_v10 = vld [vmem:[%s9318_s25 + $0x450] sm:$0xf] }
  0x5f   : > { %305 = vst [vmem:[%s9322_s26 + $0x12c] sm:$0xf] %v304_v11  ;;  %v432_v11 = vld [vmem:[%s9318_s25 + $0x458] sm:$0xf] }
  0x60   : > { %307 = vst [vmem:[%s9322_s26 + $0x130] sm:$0xf] %v306_v12  ;;  %v434_v12 = vld [vmem:[%s9318_s25 + $0x460] sm:$0xf] }
  0x61   : > { %309 = vst [vmem:[%s9322_s26 + $0x134] sm:$0xf] %v308_v13  ;;  %v436_v13 = vld [vmem:[%s9318_s25 + $0x468] sm:$0xf] }
  0x62   : > { %311 = vst [vmem:[%s9322_s26 + $0x138] sm:$0xf] %v310_v14  ;;  %v438_v14 = vld [vmem:[%s9318_s25 + $0x470] sm:$0xf] }
  0x63   : > { %313 = vst [vmem:[%s9322_s26 + $0x13c] sm:$0xf] %v312_v15  ;;  %v440_v15 = vld [vmem:[%s9318_s25 + $0x478] sm:$0xf] }
  0x64   : > { %315 = vst [vmem:[%s9322_s26 + $0x140] sm:$0xf] %v314_v16  ;;  %v442_v16 = vld [vmem:[%s9318_s25 + $0x480] sm:$0xf] }
  0x65   : > { %317 = vst [vmem:[%s9322_s26 + $0x144] sm:$0xf] %v316_v17  ;;  %v444_v17 = vld [vmem:[%s9318_s25 + $0x488] sm:$0xf] }
  0x66   : > { %319 = vst [vmem:[%s9322_s26 + $0x148] sm:$0xf] %v318_v18  ;;  %v446_v18 = vld [vmem:[%s9318_s25 + $0x490] sm:$0xf] }
  0x67   : > { %321 = vst [vmem:[%s9322_s26 + $0x14c] sm:$0xf] %v320_v19  ;;  %v448_v19 = vld [vmem:[%s9318_s25 + $0x498] sm:$0xf] }
  0x68   : > { %323 = vst [vmem:[%s9322_s26 + $0x150] sm:$0xf] %v322_v20  ;;  %v450_v20 = vld [vmem:[%s9318_s25 + $0x4a0] sm:$0xf] }
  0x69   : > { %325 = vst [vmem:[%s9322_s26 + $0x154] sm:$0xf] %v324_v21  ;;  %v452_v21 = vld [vmem:[%s9318_s25 + $0x4a8] sm:$0xf] }
  0x6a   : > { %327 = vst [vmem:[%s9322_s26 + $0x158] sm:$0xf] %v326_v22  ;;  %v454_v22 = vld [vmem:[%s9318_s25 + $0x4b0] sm:$0xf] }
  0x6b   : > { %329 = vst [vmem:[%s9322_s26 + $0x15c] sm:$0xf] %v328_v23  ;;  %v456_v23 = vld [vmem:[%s9318_s25 + $0x4b8] sm:$0xf] }
  0x6c   : > { %331 = vst [vmem:[%s9322_s26 + $0x160] sm:$0xf] %v330_v24  ;;  %v458_v24 = vld [vmem:[%s9318_s25 + $0x4c0] sm:$0xf] }
  0x6d   : > { %333 = vst [vmem:[%s9322_s26 + $0x164] sm:$0xf] %v332_v25  ;;  %v460_v25 = vld [vmem:[%s9318_s25 + $0x4c8] sm:$0xf] }
  0x6e   : > { %335 = vst [vmem:[%s9322_s26 + $0x168] sm:$0xf] %v334_v26  ;;  %v462_v26 = vld [vmem:[%s9318_s25 + $0x4d0] sm:$0xf] }
  0x6f   : > { %337 = vst [vmem:[%s9322_s26 + $0x16c] sm:$0xf] %v336_v27  ;;  %v464_v27 = vld [vmem:[%s9318_s25 + $0x4d8] sm:$0xf] }
  0x70   : > { %339 = vst [vmem:[%s9322_s26 + $0x170] sm:$0xf] %v338_v28  ;;  %v466_v28 = vld [vmem:[%s9318_s25 + $0x4e0] sm:$0xf] }
  0x71   : > { %341 = vst [vmem:[%s9322_s26 + $0x174] sm:$0xf] %v340_v29  ;;  %v468_v29 = vld [vmem:[%s9318_s25 + $0x4e8] sm:$0xf] }
  0x72   : > { %343 = vst [vmem:[%s9322_s26 + $0x178] sm:$0xf] %v342_v30  ;;  %v470_v30 = vld [vmem:[%s9318_s25 + $0x4f0] sm:$0xf] }
  0x73   : > { %345 = vst [vmem:[%s9322_s26 + $0x17c] sm:$0xf] %v344_v31  ;;  %v472_v31 = vld [vmem:[%s9318_s25 + $0x4f8] sm:$0xf] }
  0x74   : > { %347 = vst [vmem:[%s9322_s26 + $0x180] sm:$0xf] %v346_v32  ;;  %v474_v32 = vld [vmem:[%s9318_s25 + $0x500] sm:$0xf] }
  0x75   : > { %349 = vst [vmem:[%s9322_s26 + $0x184] sm:$0xf] %v348_v33  ;;  %v476_v33 = vld [vmem:[%s9318_s25 + $0x508] sm:$0xf] }
  0x76   : > { %351 = vst [vmem:[%s9322_s26 + $0x188] sm:$0xf] %v350_v34  ;;  %v478_v34 = vld [vmem:[%s9318_s25 + $0x510] sm:$0xf] }
  0x77   : > { %353 = vst [vmem:[%s9322_s26 + $0x18c] sm:$0xf] %v352_v35  ;;  %v480_v35 = vld [vmem:[%s9318_s25 + $0x518] sm:$0xf] }
  0x78   : > { %355 = vst [vmem:[%s9322_s26 + $0x190] sm:$0xf] %v354_v36  ;;  %v482_v36 = vld [vmem:[%s9318_s25 + $0x520] sm:$0xf] }
  0x79   : > { %357 = vst [vmem:[%s9322_s26 + $0x194] sm:$0xf] %v356_v37  ;;  %v484_v37 = vld [vmem:[%s9318_s25 + $0x528] sm:$0xf] }
  0x7a   : > { %359 = vst [vmem:[%s9322_s26 + $0x198] sm:$0xf] %v358_v38  ;;  %v486_v38 = vld [vmem:[%s9318_s25 + $0x530] sm:$0xf] }
  0x7b   : > { %361 = vst [vmem:[%s9322_s26 + $0x19c] sm:$0xf] %v360_v39  ;;  %v488_v39 = vld [vmem:[%s9318_s25 + $0x538] sm:$0xf] }
  0x7c   : > { %363 = vst [vmem:[%s9322_s26 + $0x1a0] sm:$0xf] %v362_v40  ;;  %v490_v40 = vld [vmem:[%s9318_s25 + $0x540] sm:$0xf] }
  0x7d   : > { %365 = vst [vmem:[%s9322_s26 + $0x1a4] sm:$0xf] %v364_v41  ;;  %v492_v41 = vld [vmem:[%s9318_s25 + $0x548] sm:$0xf] }
  0x7e   : > { %367 = vst [vmem:[%s9322_s26 + $0x1a8] sm:$0xf] %v366_v42  ;;  %v494_v42 = vld [vmem:[%s9318_s25 + $0x550] sm:$0xf] }
  0x7f   : > { %369 = vst [vmem:[%s9322_s26 + $0x1ac] sm:$0xf] %v368_v43  ;;  %v496_v43 = vld [vmem:[%s9318_s25 + $0x558] sm:$0xf] }
  0x80   : > { %371 = vst [vmem:[%s9322_s26 + $0x1b0] sm:$0xf] %v370_v44  ;;  %v498_v44 = vld [vmem:[%s9318_s25 + $0x560] sm:$0xf] }
  0x81   : > { %373 = vst [vmem:[%s9322_s26 + $0x1b4] sm:$0xf] %v372_v45  ;;  %v500_v45 = vld [vmem:[%s9318_s25 + $0x568] sm:$0xf] }
  0x82   : > { %375 = vst [vmem:[%s9322_s26 + $0x1b8] sm:$0xf] %v374_v46  ;;  %v502_v46 = vld [vmem:[%s9318_s25 + $0x570] sm:$0xf] }
  0x83   : > { %377 = vst [vmem:[%s9322_s26 + $0x1bc] sm:$0xf] %v376_v47  ;;  %v504_v47 = vld [vmem:[%s9318_s25 + $0x578] sm:$0xf] }
  0x84   : > { %379 = vst [vmem:[%s9322_s26 + $0x1c0] sm:$0xf] %v378_v48  ;;  %v506_v48 = vld [vmem:[%s9318_s25 + $0x580] sm:$0xf] }
  0x85   : > { %381 = vst [vmem:[%s9322_s26 + $0x1c4] sm:$0xf] %v380_v49  ;;  %v508_v49 = vld [vmem:[%s9318_s25 + $0x588] sm:$0xf] }
  0x86   : > { %383 = vst [vmem:[%s9322_s26 + $0x1c8] sm:$0xf] %v382_v50  ;;  %v510_v50 = vld [vmem:[%s9318_s25 + $0x590] sm:$0xf] }
  0x87   : > { %385 = vst [vmem:[%s9322_s26 + $0x1cc] sm:$0xf] %v384_v51  ;;  %v512_v51 = vld [vmem:[%s9318_s25 + $0x598] sm:$0xf] }
  0x88   : > { %387 = vst [vmem:[%s9322_s26 + $0x1d0] sm:$0xf] %v386_v52  ;;  %v514_v52 = vld [vmem:[%s9318_s25 + $0x5a0] sm:$0xf] }
  0x89   : > { %389 = vst [vmem:[%s9322_s26 + $0x1d4] sm:$0xf] %v388_v53  ;;  %v516_v53 = vld [vmem:[%s9318_s25 + $0x5a8] sm:$0xf] }
  0x8a   : > { %391 = vst [vmem:[%s9322_s26 + $0x1d8] sm:$0xf] %v390_v54  ;;  %v518_v54 = vld [vmem:[%s9318_s25 + $0x5b0] sm:$0xf] }
  0x8b   : > { %393 = vst [vmem:[%s9322_s26 + $0x1dc] sm:$0xf] %v392_v55  ;;  %v520_v55 = vld [vmem:[%s9318_s25 + $0x5b8] sm:$0xf] }
  0x8c   : > { %395 = vst [vmem:[%s9322_s26 + $0x1e0] sm:$0xf] %v394_v56  ;;  %v522_v56 = vld [vmem:[%s9318_s25 + $0x5c0] sm:$0xf] }
  0x8d   : > { %397 = vst [vmem:[%s9322_s26 + $0x1e4] sm:$0xf] %v396_v57  ;;  %v524_v57 = vld [vmem:[%s9318_s25 + $0x5c8] sm:$0xf] }
  0x8e   : > { %399 = vst [vmem:[%s9322_s26 + $0x1e8] sm:$0xf] %v398_v58  ;;  %v526_v58 = vld [vmem:[%s9318_s25 + $0x5d0] sm:$0xf] }
  0x8f   : > { %401 = vst [vmem:[%s9322_s26 + $0x1ec] sm:$0xf] %v400_v59  ;;  %v528_v59 = vld [vmem:[%s9318_s25 + $0x5d8] sm:$0xf] }
  0x90   : > { %403 = vst [vmem:[%s9322_s26 + $0x1f0] sm:$0xf] %v402_v60  ;;  %v530_v60 = vld [vmem:[%s9318_s25 + $0x5e0] sm:$0xf] }
  0x91   : > { %405 = vst [vmem:[%s9322_s26 + $0x1f4] sm:$0xf] %v404_v61  ;;  %v532_v61 = vld [vmem:[%s9318_s25 + $0x5e8] sm:$0xf] }
  0x92   : > { %407 = vst [vmem:[%s9322_s26 + $0x1f8] sm:$0xf] %v406_v62  ;;  %v534_v62 = vld [vmem:[%s9318_s25 + $0x5f0] sm:$0xf] }
  0x93   : > { %409 = vst [vmem:[%s9322_s26 + $0x1fc] sm:$0xf] %v408_v63  ;;  %v536_v63 = vld [vmem:[%s9318_s25 + $0x5f8] sm:$0xf] }
  0x94   : > { %411 = vst [vmem:[%s9322_s26 + $0x200] sm:$0xf] %v410_v0  ;;  %v538_v0 = vld [vmem:[%s9318_s25 + $0x600] sm:$0xf] }
  0x95   : > { %413 = vst [vmem:[%s9322_s26 + $0x204] sm:$0xf] %v412_v1  ;;  %v540_v1 = vld [vmem:[%s9318_s25 + $0x608] sm:$0xf] }
  0x96   : > { %415 = vst [vmem:[%s9322_s26 + $0x208] sm:$0xf] %v414_v2  ;;  %v542_v2 = vld [vmem:[%s9318_s25 + $0x610] sm:$0xf] }
  0x97   : > { %417 = vst [vmem:[%s9322_s26 + $0x20c] sm:$0xf] %v416_v3  ;;  %v544_v3 = vld [vmem:[%s9318_s25 + $0x618] sm:$0xf] }
  0x98   : > { %419 = vst [vmem:[%s9322_s26 + $0x210] sm:$0xf] %v418_v4  ;;  %v546_v4 = vld [vmem:[%s9318_s25 + $0x620] sm:$0xf] }
  0x99   : > { %421 = vst [vmem:[%s9322_s26 + $0x214] sm:$0xf] %v420_v5  ;;  %v548_v5 = vld [vmem:[%s9318_s25 + $0x628] sm:$0xf] }
  0x9a   : > { %423 = vst [vmem:[%s9322_s26 + $0x218] sm:$0xf] %v422_v6  ;;  %v550_v6 = vld [vmem:[%s9318_s25 + $0x630] sm:$0xf] }
  0x9b   : > { %425 = vst [vmem:[%s9322_s26 + $0x21c] sm:$0xf] %v424_v7  ;;  %v552_v7 = vld [vmem:[%s9318_s25 + $0x638] sm:$0xf] }
  0x9c   : > { %427 = vst [vmem:[%s9322_s26 + $0x220] sm:$0xf] %v426_v8  ;;  %v554_v8 = vld [vmem:[%s9318_s25 + $0x640] sm:$0xf] }
  0x9d   : > { %429 = vst [vmem:[%s9322_s26 + $0x224] sm:$0xf] %v428_v9  ;;  %v556_v9 = vld [vmem:[%s9318_s25 + $0x648] sm:$0xf] }
  0x9e   : > { %431 = vst [vmem:[%s9322_s26 + $0x228] sm:$0xf] %v430_v10  ;;  %v558_v10 = vld [vmem:[%s9318_s25 + $0x650] sm:$0xf] }
  0x9f   : > { %433 = vst [vmem:[%s9322_s26 + $0x22c] sm:$0xf] %v432_v11  ;;  %v560_v11 = vld [vmem:[%s9318_s25 + $0x658] sm:$0xf] }
  0xa0   : > { %435 = vst [vmem:[%s9322_s26 + $0x230] sm:$0xf] %v434_v12  ;;  %v562_v12 = vld [vmem:[%s9318_s25 + $0x660] sm:$0xf] }
  0xa1   : > { %437 = vst [vmem:[%s9322_s26 + $0x234] sm:$0xf] %v436_v13  ;;  %v564_v13 = vld [vmem:[%s9318_s25 + $0x668] sm:$0xf] }
  0xa2   : > { %439 = vst [vmem:[%s9322_s26 + $0x238] sm:$0xf] %v438_v14  ;;  %v566_v14 = vld [vmem:[%s9318_s25 + $0x670] sm:$0xf] }
  0xa3   : > { %441 = vst [vmem:[%s9322_s26 + $0x23c] sm:$0xf] %v440_v15  ;;  %v568_v15 = vld [vmem:[%s9318_s25 + $0x678] sm:$0xf] }
  0xa4   : > { %443 = vst [vmem:[%s9322_s26 + $0x240] sm:$0xf] %v442_v16  ;;  %v570_v16 = vld [vmem:[%s9318_s25 + $0x680] sm:$0xf] }
  0xa5   : > { %445 = vst [vmem:[%s9322_s26 + $0x244] sm:$0xf] %v444_v17  ;;  %v572_v17 = vld [vmem:[%s9318_s25 + $0x688] sm:$0xf] }
  0xa6   : > { %447 = vst [vmem:[%s9322_s26 + $0x248] sm:$0xf] %v446_v18  ;;  %v574_v18 = vld [vmem:[%s9318_s25 + $0x690] sm:$0xf] }
  0xa7   : > { %449 = vst [vmem:[%s9322_s26 + $0x24c] sm:$0xf] %v448_v19  ;;  %v576_v19 = vld [vmem:[%s9318_s25 + $0x698] sm:$0xf] }
  0xa8   : > { %451 = vst [vmem:[%s9322_s26 + $0x250] sm:$0xf] %v450_v20  ;;  %v578_v20 = vld [vmem:[%s9318_s25 + $0x6a0] sm:$0xf] }
  0xa9   : > { %453 = vst [vmem:[%s9322_s26 + $0x254] sm:$0xf] %v452_v21  ;;  %v580_v21 = vld [vmem:[%s9318_s25 + $0x6a8] sm:$0xf] }
  0xaa   : > { %455 = vst [vmem:[%s9322_s26 + $0x258] sm:$0xf] %v454_v22  ;;  %v582_v22 = vld [vmem:[%s9318_s25 + $0x6b0] sm:$0xf] }
  0xab   : > { %457 = vst [vmem:[%s9322_s26 + $0x25c] sm:$0xf] %v456_v23  ;;  %v584_v23 = vld [vmem:[%s9318_s25 + $0x6b8] sm:$0xf] }
  0xac   : > { %459 = vst [vmem:[%s9322_s26 + $0x260] sm:$0xf] %v458_v24  ;;  %v586_v24 = vld [vmem:[%s9318_s25 + $0x6c0] sm:$0xf] }
  0xad   : > { %461 = vst [vmem:[%s9322_s26 + $0x264] sm:$0xf] %v460_v25  ;;  %v588_v25 = vld [vmem:[%s9318_s25 + $0x6c8] sm:$0xf] }
  0xae   : > { %463 = vst [vmem:[%s9322_s26 + $0x268] sm:$0xf] %v462_v26  ;;  %v590_v26 = vld [vmem:[%s9318_s25 + $0x6d0] sm:$0xf] }
  0xaf   : > { %465 = vst [vmem:[%s9322_s26 + $0x26c] sm:$0xf] %v464_v27  ;;  %v592_v27 = vld [vmem:[%s9318_s25 + $0x6d8] sm:$0xf] }
  0xb0   : > { %467 = vst [vmem:[%s9322_s26 + $0x270] sm:$0xf] %v466_v28  ;;  %v594_v28 = vld [vmem:[%s9318_s25 + $0x6e0] sm:$0xf] }
  0xb1   : > { %469 = vst [vmem:[%s9322_s26 + $0x274] sm:$0xf] %v468_v29  ;;  %v596_v29 = vld [vmem:[%s9318_s25 + $0x6e8] sm:$0xf] }
  0xb2   : > { %471 = vst [vmem:[%s9322_s26 + $0x278] sm:$0xf] %v470_v30  ;;  %v598_v30 = vld [vmem:[%s9318_s25 + $0x6f0] sm:$0xf] }
  0xb3   : > { %473 = vst [vmem:[%s9322_s26 + $0x27c] sm:$0xf] %v472_v31  ;;  %v600_v31 = vld [vmem:[%s9318_s25 + $0x6f8] sm:$0xf] }
  0xb4   : > { %475 = vst [vmem:[%s9322_s26 + $0x280] sm:$0xf] %v474_v32  ;;  %v602_v32 = vld [vmem:[%s9318_s25 + $0x700] sm:$0xf] }
  0xb5   : > { %477 = vst [vmem:[%s9322_s26 + $0x284] sm:$0xf] %v476_v33  ;;  %v604_v33 = vld [vmem:[%s9318_s25 + $0x708] sm:$0xf] }
  0xb6   : > { %479 = vst [vmem:[%s9322_s26 + $0x288] sm:$0xf] %v478_v34  ;;  %v606_v34 = vld [vmem:[%s9318_s25 + $0x710] sm:$0xf] }
  0xb7   : > { %481 = vst [vmem:[%s9322_s26 + $0x28c] sm:$0xf] %v480_v35  ;;  %v608_v35 = vld [vmem:[%s9318_s25 + $0x718] sm:$0xf] }
  0xb8   : > { %483 = vst [vmem:[%s9322_s26 + $0x290] sm:$0xf] %v482_v36  ;;  %v610_v36 = vld [vmem:[%s9318_s25 + $0x720] sm:$0xf] }
  0xb9   : > { %485 = vst [vmem:[%s9322_s26 + $0x294] sm:$0xf] %v484_v37  ;;  %v612_v37 = vld [vmem:[%s9318_s25 + $0x728] sm:$0xf] }
  0xba   : > { %487 = vst [vmem:[%s9322_s26 + $0x298] sm:$0xf] %v486_v38  ;;  %v614_v38 = vld [vmem:[%s9318_s25 + $0x730] sm:$0xf] }
  0xbb   : > { %489 = vst [vmem:[%s9322_s26 + $0x29c] sm:$0xf] %v488_v39  ;;  %v616_v39 = vld [vmem:[%s9318_s25 + $0x738] sm:$0xf] }
  0xbc   : > { %491 = vst [vmem:[%s9322_s26 + $0x2a0] sm:$0xf] %v490_v40  ;;  %v618_v40 = vld [vmem:[%s9318_s25 + $0x740] sm:$0xf] }
  0xbd   : > { %493 = vst [vmem:[%s9322_s26 + $0x2a4] sm:$0xf] %v492_v41  ;;  %v620_v41 = vld [vmem:[%s9318_s25 + $0x748] sm:$0xf] }
  0xbe   : > { %495 = vst [vmem:[%s9322_s26 + $0x2a8] sm:$0xf] %v494_v42  ;;  %v622_v42 = vld [vmem:[%s9318_s25 + $0x750] sm:$0xf] }
  0xbf   : > { %497 = vst [vmem:[%s9322_s26 + $0x2ac] sm:$0xf] %v496_v43  ;;  %v624_v43 = vld [vmem:[%s9318_s25 + $0x758] sm:$0xf] }
  0xc0   : > { %499 = vst [vmem:[%s9322_s26 + $0x2b0] sm:$0xf] %v498_v44  ;;  %v626_v44 = vld [vmem:[%s9318_s25 + $0x760] sm:$0xf] }
  0xc1   : > { %501 = vst [vmem:[%s9322_s26 + $0x2b4] sm:$0xf] %v500_v45  ;;  %v628_v45 = vld [vmem:[%s9318_s25 + $0x768] sm:$0xf] }
  0xc2   : > { %503 = vst [vmem:[%s9322_s26 + $0x2b8] sm:$0xf] %v502_v46  ;;  %v630_v46 = vld [vmem:[%s9318_s25 + $0x770] sm:$0xf] }
  0xc3   : > { %505 = vst [vmem:[%s9322_s26 + $0x2bc] sm:$0xf] %v504_v47  ;;  %v632_v47 = vld [vmem:[%s9318_s25 + $0x778] sm:$0xf] }
  0xc4   : > { %507 = vst [vmem:[%s9322_s26 + $0x2c0] sm:$0xf] %v506_v48  ;;  %v634_v48 = vld [vmem:[%s9318_s25 + $0x780] sm:$0xf] }
  0xc5   : > { %509 = vst [vmem:[%s9322_s26 + $0x2c4] sm:$0xf] %v508_v49  ;;  %v636_v49 = vld [vmem:[%s9318_s25 + $0x788] sm:$0xf] }
  0xc6   : > { %511 = vst [vmem:[%s9322_s26 + $0x2c8] sm:$0xf] %v510_v50  ;;  %v638_v50 = vld [vmem:[%s9318_s25 + $0x790] sm:$0xf] }
  0xc7   : > { %513 = vst [vmem:[%s9322_s26 + $0x2cc] sm:$0xf] %v512_v51  ;;  %v640_v51 = vld [vmem:[%s9318_s25 + $0x798] sm:$0xf] }
  0xc8   : > { %515 = vst [vmem:[%s9322_s26 + $0x2d0] sm:$0xf] %v514_v52  ;;  %v642_v52 = vld [vmem:[%s9318_s25 + $0x7a0] sm:$0xf] }
  0xc9   : > { %517 = vst [vmem:[%s9322_s26 + $0x2d4] sm:$0xf] %v516_v53  ;;  %v644_v53 = vld [vmem:[%s9318_s25 + $0x7a8] sm:$0xf] }
  0xca   : > { %519 = vst [vmem:[%s9322_s26 + $0x2d8] sm:$0xf] %v518_v54  ;;  %v646_v54 = vld [vmem:[%s9318_s25 + $0x7b0] sm:$0xf] }
  0xcb   : > { %521 = vst [vmem:[%s9322_s26 + $0x2dc] sm:$0xf] %v520_v55  ;;  %v648_v55 = vld [vmem:[%s9318_s25 + $0x7b8] sm:$0xf] }
  0xcc   : > { %523 = vst [vmem:[%s9322_s26 + $0x2e0] sm:$0xf] %v522_v56  ;;  %v650_v56 = vld [vmem:[%s9318_s25 + $0x7c0] sm:$0xf] }
  0xcd   : > { %525 = vst [vmem:[%s9322_s26 + $0x2e4] sm:$0xf] %v524_v57  ;;  %v652_v57 = vld [vmem:[%s9318_s25 + $0x7c8] sm:$0xf] }
  0xce   : > { %527 = vst [vmem:[%s9322_s26 + $0x2e8] sm:$0xf] %v526_v58  ;;  %v654_v58 = vld [vmem:[%s9318_s25 + $0x7d0] sm:$0xf] }
  0xcf   : > { %529 = vst [vmem:[%s9322_s26 + $0x2ec] sm:$0xf] %v528_v59  ;;  %v656_v59 = vld [vmem:[%s9318_s25 + $0x7d8] sm:$0xf] }
  0xd0   : > { %531 = vst [vmem:[%s9322_s26 + $0x2f0] sm:$0xf] %v530_v60  ;;  %v658_v60 = vld [vmem:[%s9318_s25 + $0x7e0] sm:$0xf] }
  0xd1   : > { %533 = vst [vmem:[%s9322_s26 + $0x2f4] sm:$0xf] %v532_v61  ;;  %v660_v61 = vld [vmem:[%s9318_s25 + $0x7e8] sm:$0xf] }
  0xd2   : > { %535 = vst [vmem:[%s9322_s26 + $0x2f8] sm:$0xf] %v534_v62  ;;  %v662_v62 = vld [vmem:[%s9318_s25 + $0x7f0] sm:$0xf] }
  0xd3   : > { %537 = vst [vmem:[%s9322_s26 + $0x2fc] sm:$0xf] %v536_v63  ;;  %v664_v63 = vld [vmem:[%s9318_s25 + $0x7f8] sm:$0xf] }
  0xd4   : > { %539 = vst [vmem:[%s9322_s26 + $0x300] sm:$0xf] %v538_v0  ;;  %v666_v0 = vld [vmem:[%s9318_s25 + $0x800] sm:$0xf] }
  0xd5   : > { %541 = vst [vmem:[%s9322_s26 + $0x304] sm:$0xf] %v540_v1  ;;  %v668_v1 = vld [vmem:[%s9318_s25 + $0x808] sm:$0xf] }
  0xd6   : > { %543 = vst [vmem:[%s9322_s26 + $0x308] sm:$0xf] %v542_v2  ;;  %v670_v2 = vld [vmem:[%s9318_s25 + $0x810] sm:$0xf] }
  0xd7   : > { %545 = vst [vmem:[%s9322_s26 + $0x30c] sm:$0xf] %v544_v3  ;;  %v672_v3 = vld [vmem:[%s9318_s25 + $0x818] sm:$0xf] }
  0xd8   : > { %547 = vst [vmem:[%s9322_s26 + $0x310] sm:$0xf] %v546_v4  ;;  %v674_v4 = vld [vmem:[%s9318_s25 + $0x820] sm:$0xf] }
  0xd9   : > { %549 = vst [vmem:[%s9322_s26 + $0x314] sm:$0xf] %v548_v5  ;;  %v676_v5 = vld [vmem:[%s9318_s25 + $0x828] sm:$0xf] }
  0xda   : > { %551 = vst [vmem:[%s9322_s26 + $0x318] sm:$0xf] %v550_v6  ;;  %v678_v6 = vld [vmem:[%s9318_s25 + $0x830] sm:$0xf] }
  0xdb   : > { %553 = vst [vmem:[%s9322_s26 + $0x31c] sm:$0xf] %v552_v7  ;;  %v680_v7 = vld [vmem:[%s9318_s25 + $0x838] sm:$0xf] }
  0xdc   : > { %555 = vst [vmem:[%s9322_s26 + $0x320] sm:$0xf] %v554_v8  ;;  %v682_v8 = vld [vmem:[%s9318_s25 + $0x840] sm:$0xf] }
  0xdd   : > { %557 = vst [vmem:[%s9322_s26 + $0x324] sm:$0xf] %v556_v9  ;;  %v684_v9 = vld [vmem:[%s9318_s25 + $0x848] sm:$0xf] }
  0xde   : > { %559 = vst [vmem:[%s9322_s26 + $0x328] sm:$0xf] %v558_v10  ;;  %v686_v10 = vld [vmem:[%s9318_s25 + $0x850] sm:$0xf] }
  0xdf   : > { %561 = vst [vmem:[%s9322_s26 + $0x32c] sm:$0xf] %v560_v11  ;;  %v688_v11 = vld [vmem:[%s9318_s25 + $0x858] sm:$0xf] }
  0xe0   : > { %563 = vst [vmem:[%s9322_s26 + $0x330] sm:$0xf] %v562_v12  ;;  %v690_v12 = vld [vmem:[%s9318_s25 + $0x860] sm:$0xf] }
  0xe1   : > { %565 = vst [vmem:[%s9322_s26 + $0x334] sm:$0xf] %v564_v13  ;;  %v692_v13 = vld [vmem:[%s9318_s25 + $0x868] sm:$0xf] }
  0xe2   : > { %567 = vst [vmem:[%s9322_s26 + $0x338] sm:$0xf] %v566_v14  ;;  %v694_v14 = vld [vmem:[%s9318_s25 + $0x870] sm:$0xf] }
  0xe3   : > { %569 = vst [vmem:[%s9322_s26 + $0x33c] sm:$0xf] %v568_v15  ;;  %v696_v15 = vld [vmem:[%s9318_s25 + $0x878] sm:$0xf] }
  0xe4   : > { %571 = vst [vmem:[%s9322_s26 + $0x340] sm:$0xf] %v570_v16  ;;  %v698_v16 = vld [vmem:[%s9318_s25 + $0x880] sm:$0xf] }
  0xe5   : > { %573 = vst [vmem:[%s9322_s26 + $0x344] sm:$0xf] %v572_v17  ;;  %v700_v17 = vld [vmem:[%s9318_s25 + $0x888] sm:$0xf] }
  0xe6   : > { %575 = vst [vmem:[%s9322_s26 + $0x348] sm:$0xf] %v574_v18  ;;  %v702_v18 = vld [vmem:[%s9318_s25 + $0x890] sm:$0xf] }
  0xe7   : > { %577 = vst [vmem:[%s9322_s26 + $0x34c] sm:$0xf] %v576_v19  ;;  %v704_v19 = vld [vmem:[%s9318_s25 + $0x898] sm:$0xf] }
  0xe8   : > { %579 = vst [vmem:[%s9322_s26 + $0x350] sm:$0xf] %v578_v20  ;;  %v706_v20 = vld [vmem:[%s9318_s25 + $0x8a0] sm:$0xf] }
  0xe9   : > { %581 = vst [vmem:[%s9322_s26 + $0x354] sm:$0xf] %v580_v21  ;;  %v708_v21 = vld [vmem:[%s9318_s25 + $0x8a8] sm:$0xf] }
  0xea   : > { %583 = vst [vmem:[%s9322_s26 + $0x358] sm:$0xf] %v582_v22  ;;  %v710_v22 = vld [vmem:[%s9318_s25 + $0x8b0] sm:$0xf] }
  0xeb   : > { %585 = vst [vmem:[%s9322_s26 + $0x35c] sm:$0xf] %v584_v23  ;;  %v712_v23 = vld [vmem:[%s9318_s25 + $0x8b8] sm:$0xf] }
  0xec   : > { %587 = vst [vmem:[%s9322_s26 + $0x360] sm:$0xf] %v586_v24  ;;  %v714_v24 = vld [vmem:[%s9318_s25 + $0x8c0] sm:$0xf] }
  0xed   : > { %589 = vst [vmem:[%s9322_s26 + $0x364] sm:$0xf] %v588_v25  ;;  %v716_v25 = vld [vmem:[%s9318_s25 + $0x8c8] sm:$0xf] }
  0xee   : > { %591 = vst [vmem:[%s9322_s26 + $0x368] sm:$0xf] %v590_v26  ;;  %v718_v26 = vld [vmem:[%s9318_s25 + $0x8d0] sm:$0xf] }
  0xef   : > { %593 = vst [vmem:[%s9322_s26 + $0x36c] sm:$0xf] %v592_v27  ;;  %v720_v27 = vld [vmem:[%s9318_s25 + $0x8d8] sm:$0xf] }
  0xf0   : > { %595 = vst [vmem:[%s9322_s26 + $0x370] sm:$0xf] %v594_v28  ;;  %v722_v28 = vld [vmem:[%s9318_s25 + $0x8e0] sm:$0xf] }
  0xf1   : > { %597 = vst [vmem:[%s9322_s26 + $0x374] sm:$0xf] %v596_v29  ;;  %v724_v29 = vld [vmem:[%s9318_s25 + $0x8e8] sm:$0xf] }
  0xf2   : > { %599 = vst [vmem:[%s9322_s26 + $0x378] sm:$0xf] %v598_v30  ;;  %v726_v30 = vld [vmem:[%s9318_s25 + $0x8f0] sm:$0xf] }
  0xf3   : > { %601 = vst [vmem:[%s9322_s26 + $0x37c] sm:$0xf] %v600_v31  ;;  %v728_v31 = vld [vmem:[%s9318_s25 + $0x8f8] sm:$0xf] }
  0xf4   : > { %603 = vst [vmem:[%s9322_s26 + $0x380] sm:$0xf] %v602_v32  ;;  %v730_v32 = vld [vmem:[%s9318_s25 + $0x900] sm:$0xf] }
  0xf5   : > { %605 = vst [vmem:[%s9322_s26 + $0x384] sm:$0xf] %v604_v33  ;;  %v732_v33 = vld [vmem:[%s9318_s25 + $0x908] sm:$0xf] }
  0xf6   : > { %607 = vst [vmem:[%s9322_s26 + $0x388] sm:$0xf] %v606_v34  ;;  %v734_v34 = vld [vmem:[%s9318_s25 + $0x910] sm:$0xf] }
  0xf7   : > { %609 = vst [vmem:[%s9322_s26 + $0x38c] sm:$0xf] %v608_v35  ;;  %v736_v35 = vld [vmem:[%s9318_s25 + $0x918] sm:$0xf] }
  0xf8   : > { %611 = vst [vmem:[%s9322_s26 + $0x390] sm:$0xf] %v610_v36  ;;  %v738_v36 = vld [vmem:[%s9318_s25 + $0x920] sm:$0xf] }
  0xf9   : > { %613 = vst [vmem:[%s9322_s26 + $0x394] sm:$0xf] %v612_v37  ;;  %v740_v37 = vld [vmem:[%s9318_s25 + $0x928] sm:$0xf] }
  0xfa   : > { %615 = vst [vmem:[%s9322_s26 + $0x398] sm:$0xf] %v614_v38  ;;  %v742_v38 = vld [vmem:[%s9318_s25 + $0x930] sm:$0xf] }
  0xfb   : > { %617 = vst [vmem:[%s9322_s26 + $0x39c] sm:$0xf] %v616_v39  ;;  %v744_v39 = vld [vmem:[%s9318_s25 + $0x938] sm:$0xf] }
  0xfc   : > { %619 = vst [vmem:[%s9322_s26 + $0x3a0] sm:$0xf] %v618_v40  ;;  %v746_v40 = vld [vmem:[%s9318_s25 + $0x940] sm:$0xf] }
  0xfd   : > { %621 = vst [vmem:[%s9322_s26 + $0x3a4] sm:$0xf] %v620_v41  ;;  %v748_v41 = vld [vmem:[%s9318_s25 + $0x948] sm:$0xf] }
  0xfe   : > { %623 = vst [vmem:[%s9322_s26 + $0x3a8] sm:$0xf] %v622_v42  ;;  %v750_v42 = vld [vmem:[%s9318_s25 + $0x950] sm:$0xf] }
  0xff   : > { %625 = vst [vmem:[%s9322_s26 + $0x3ac] sm:$0xf] %v624_v43  ;;  %v752_v43 = vld [vmem:[%s9318_s25 + $0x958] sm:$0xf] }
 0x100   : > { %627 = vst [vmem:[%s9322_s26 + $0x3b0] sm:$0xf] %v626_v44  ;;  %v754_v44 = vld [vmem:[%s9318_s25 + $0x960] sm:$0xf] }
 0x101   : > { %629 = vst [vmem:[%s9322_s26 + $0x3b4] sm:$0xf] %v628_v45  ;;  %v756_v45 = vld [vmem:[%s9318_s25 + $0x968] sm:$0xf] }
 0x102   : > { %631 = vst [vmem:[%s9322_s26 + $0x3b8] sm:$0xf] %v630_v46  ;;  %v758_v46 = vld [vmem:[%s9318_s25 + $0x970] sm:$0xf] }
 0x103   : > { %633 = vst [vmem:[%s9322_s26 + $0x3bc] sm:$0xf] %v632_v47  ;;  %v760_v47 = vld [vmem:[%s9318_s25 + $0x978] sm:$0xf] }
 0x104   : > { %635 = vst [vmem:[%s9322_s26 + $0x3c0] sm:$0xf] %v634_v48  ;;  %v762_v48 = vld [vmem:[%s9318_s25 + $0x980] sm:$0xf] }
 0x105   : > { %637 = vst [vmem:[%s9322_s26 + $0x3c4] sm:$0xf] %v636_v49  ;;  %v764_v49 = vld [vmem:[%s9318_s25 + $0x988] sm:$0xf] }
 0x106   : > { %639 = vst [vmem:[%s9322_s26 + $0x3c8] sm:$0xf] %v638_v50  ;;  %v766_v50 = vld [vmem:[%s9318_s25 + $0x990] sm:$0xf] }
 0x107   : > { %641 = vst [vmem:[%s9322_s26 + $0x3cc] sm:$0xf] %v640_v51  ;;  %v768_v51 = vld [vmem:[%s9318_s25 + $0x998] sm:$0xf] }
 0x108   : > { %643 = vst [vmem:[%s9322_s26 + $0x3d0] sm:$0xf] %v642_v52  ;;  %v770_v52 = vld [vmem:[%s9318_s25 + $0x9a0] sm:$0xf] }
 0x109   : > { %645 = vst [vmem:[%s9322_s26 + $0x3d4] sm:$0xf] %v644_v53  ;;  %v772_v53 = vld [vmem:[%s9318_s25 + $0x9a8] sm:$0xf] }
 0x10a   : > { %647 = vst [vmem:[%s9322_s26 + $0x3d8] sm:$0xf] %v646_v54  ;;  %v774_v54 = vld [vmem:[%s9318_s25 + $0x9b0] sm:$0xf] }
 0x10b   : > { %649 = vst [vmem:[%s9322_s26 + $0x3dc] sm:$0xf] %v648_v55  ;;  %v776_v55 = vld [vmem:[%s9318_s25 + $0x9b8] sm:$0xf] }
 0x10c   : > { %651 = vst [vmem:[%s9322_s26 + $0x3e0] sm:$0xf] %v650_v56  ;;  %v778_v56 = vld [vmem:[%s9318_s25 + $0x9c0] sm:$0xf] }
 0x10d   : > { %653 = vst [vmem:[%s9322_s26 + $0x3e4] sm:$0xf] %v652_v57  ;;  %v780_v57 = vld [vmem:[%s9318_s25 + $0x9c8] sm:$0xf] }
 0x10e   : > { %655 = vst [vmem:[%s9322_s26 + $0x3e8] sm:$0xf] %v654_v58  ;;  %v782_v58 = vld [vmem:[%s9318_s25 + $0x9d0] sm:$0xf] }
 0x10f   : > { %657 = vst [vmem:[%s9322_s26 + $0x3ec] sm:$0xf] %v656_v59  ;;  %v784_v59 = vld [vmem:[%s9318_s25 + $0x9d8] sm:$0xf] }
 0x110   : > { %659 = vst [vmem:[%s9322_s26 + $0x3f0] sm:$0xf] %v658_v60  ;;  %v786_v60 = vld [vmem:[%s9318_s25 + $0x9e0] sm:$0xf] }
 0x111   : > { %661 = vst [vmem:[%s9322_s26 + $0x3f4] sm:$0xf] %v660_v61  ;;  %v788_v61 = vld [vmem:[%s9318_s25 + $0x9e8] sm:$0xf] }
 0x112   : > { %663 = vst [vmem:[%s9322_s26 + $0x3f8] sm:$0xf] %v662_v62  ;;  %v790_v62 = vld [vmem:[%s9318_s25 + $0x9f0] sm:$0xf] }
 0x113   : > { %665 = vst [vmem:[%s9322_s26 + $0x3fc] sm:$0xf] %v664_v63  ;;  %v792_v63 = vld [vmem:[%s9318_s25 + $0x9f8] sm:$0xf] }
 0x114   : > { %667 = vst [vmem:[%s9322_s26 + $0x400] sm:$0xf] %v666_v0  ;;  %v794_v0 = vld [vmem:[%s9318_s25 + $0xa00] sm:$0xf] }
 0x115   : > { %669 = vst [vmem:[%s9322_s26 + $0x404] sm:$0xf] %v668_v1  ;;  %v796_v1 = vld [vmem:[%s9318_s25 + $0xa08] sm:$0xf] }
 0x116   : > { %671 = vst [vmem:[%s9322_s26 + $0x408] sm:$0xf] %v670_v2  ;;  %v798_v2 = vld [vmem:[%s9318_s25 + $0xa10] sm:$0xf] }
 0x117   : > { %673 = vst [vmem:[%s9322_s26 + $0x40c] sm:$0xf] %v672_v3  ;;  %v800_v3 = vld [vmem:[%s9318_s25 + $0xa18] sm:$0xf] }
 0x118   : > { %675 = vst [vmem:[%s9322_s26 + $0x410] sm:$0xf] %v674_v4  ;;  %v802_v4 = vld [vmem:[%s9318_s25 + $0xa20] sm:$0xf] }
 0x119   : > { %677 = vst [vmem:[%s9322_s26 + $0x414] sm:$0xf] %v676_v5  ;;  %v804_v5 = vld [vmem:[%s9318_s25 + $0xa28] sm:$0xf] }
 0x11a   : > { %679 = vst [vmem:[%s9322_s26 + $0x418] sm:$0xf] %v678_v6  ;;  %v806_v6 = vld [vmem:[%s9318_s25 + $0xa30] sm:$0xf] }
 0x11b   : > { %681 = vst [vmem:[%s9322_s26 + $0x41c] sm:$0xf] %v680_v7  ;;  %v808_v7 = vld [vmem:[%s9318_s25 + $0xa38] sm:$0xf] }
 0x11c   : > { %683 = vst [vmem:[%s9322_s26 + $0x420] sm:$0xf] %v682_v8  ;;  %v810_v8 = vld [vmem:[%s9318_s25 + $0xa40] sm:$0xf] }
 0x11d   : > { %685 = vst [vmem:[%s9322_s26 + $0x424] sm:$0xf] %v684_v9  ;;  %v812_v9 = vld [vmem:[%s9318_s25 + $0xa48] sm:$0xf] }
 0x11e   : > { %687 = vst [vmem:[%s9322_s26 + $0x428] sm:$0xf] %v686_v10  ;;  %v814_v10 = vld [vmem:[%s9318_s25 + $0xa50] sm:$0xf] }
 0x11f   : > { %689 = vst [vmem:[%s9322_s26 + $0x42c] sm:$0xf] %v688_v11  ;;  %v816_v11 = vld [vmem:[%s9318_s25 + $0xa58] sm:$0xf] }
 0x120   : > { %691 = vst [vmem:[%s9322_s26 + $0x430] sm:$0xf] %v690_v12  ;;  %v818_v12 = vld [vmem:[%s9318_s25 + $0xa60] sm:$0xf] }
 0x121   : > { %693 = vst [vmem:[%s9322_s26 + $0x434] sm:$0xf] %v692_v13  ;;  %v820_v13 = vld [vmem:[%s9318_s25 + $0xa68] sm:$0xf] }
 0x122   : > { %695 = vst [vmem:[%s9322_s26 + $0x438] sm:$0xf] %v694_v14  ;;  %v822_v14 = vld [vmem:[%s9318_s25 + $0xa70] sm:$0xf] }
 0x123   : > { %697 = vst [vmem:[%s9322_s26 + $0x43c] sm:$0xf] %v696_v15  ;;  %v824_v15 = vld [vmem:[%s9318_s25 + $0xa78] sm:$0xf] }
 0x124   : > { %699 = vst [vmem:[%s9322_s26 + $0x440] sm:$0xf] %v698_v16  ;;  %v826_v16 = vld [vmem:[%s9318_s25 + $0xa80] sm:$0xf] }
 0x125   : > { %701 = vst [vmem:[%s9322_s26 + $0x444] sm:$0xf] %v700_v17  ;;  %v828_v17 = vld [vmem:[%s9318_s25 + $0xa88] sm:$0xf] }
 0x126   : > { %703 = vst [vmem:[%s9322_s26 + $0x448] sm:$0xf] %v702_v18  ;;  %v830_v18 = vld [vmem:[%s9318_s25 + $0xa90] sm:$0xf] }
 0x127   : > { %705 = vst [vmem:[%s9322_s26 + $0x44c] sm:$0xf] %v704_v19  ;;  %v832_v19 = vld [vmem:[%s9318_s25 + $0xa98] sm:$0xf] }
 0x128   : > { %707 = vst [vmem:[%s9322_s26 + $0x450] sm:$0xf] %v706_v20  ;;  %v834_v20 = vld [vmem:[%s9318_s25 + $0xaa0] sm:$0xf] }
 0x129   : > { %709 = vst [vmem:[%s9322_s26 + $0x454] sm:$0xf] %v708_v21  ;;  %v836_v21 = vld [vmem:[%s9318_s25 + $0xaa8] sm:$0xf] }
 0x12a   : > { %711 = vst [vmem:[%s9322_s26 + $0x458] sm:$0xf] %v710_v22  ;;  %v838_v22 = vld [vmem:[%s9318_s25 + $0xab0] sm:$0xf] }
 0x12b   : > { %713 = vst [vmem:[%s9322_s26 + $0x45c] sm:$0xf] %v712_v23  ;;  %v840_v23 = vld [vmem:[%s9318_s25 + $0xab8] sm:$0xf] }
 0x12c   : > { %715 = vst [vmem:[%s9322_s26 + $0x460] sm:$0xf] %v714_v24  ;;  %v842_v24 = vld [vmem:[%s9318_s25 + $0xac0] sm:$0xf] }
 0x12d   : > { %717 = vst [vmem:[%s9322_s26 + $0x464] sm:$0xf] %v716_v25  ;;  %v844_v25 = vld [vmem:[%s9318_s25 + $0xac8] sm:$0xf] }
 0x12e   : > { %719 = vst [vmem:[%s9322_s26 + $0x468] sm:$0xf] %v718_v26  ;;  %v846_v26 = vld [vmem:[%s9318_s25 + $0xad0] sm:$0xf] }
 0x12f   : > { %721 = vst [vmem:[%s9322_s26 + $0x46c] sm:$0xf] %v720_v27  ;;  %v848_v27 = vld [vmem:[%s9318_s25 + $0xad8] sm:$0xf] }
 0x130   : > { %723 = vst [vmem:[%s9322_s26 + $0x470] sm:$0xf] %v722_v28  ;;  %v850_v28 = vld [vmem:[%s9318_s25 + $0xae0] sm:$0xf] }
 0x131   : > { %725 = vst [vmem:[%s9322_s26 + $0x474] sm:$0xf] %v724_v29  ;;  %v852_v29 = vld [vmem:[%s9318_s25 + $0xae8] sm:$0xf] }
 0x132   : > { %727 = vst [vmem:[%s9322_s26 + $0x478] sm:$0xf] %v726_v30  ;;  %v854_v30 = vld [vmem:[%s9318_s25 + $0xaf0] sm:$0xf] }
 0x133   : > { %729 = vst [vmem:[%s9322_s26 + $0x47c] sm:$0xf] %v728_v31  ;;  %v856_v31 = vld [vmem:[%s9318_s25 + $0xaf8] sm:$0xf] }
 0x134   : > { %731 = vst [vmem:[%s9322_s26 + $0x480] sm:$0xf] %v730_v32  ;;  %v858_v32 = vld [vmem:[%s9318_s25 + $0xb00] sm:$0xf] }
 0x135   : > { %733 = vst [vmem:[%s9322_s26 + $0x484] sm:$0xf] %v732_v33  ;;  %v860_v33 = vld [vmem:[%s9318_s25 + $0xb08] sm:$0xf] }
 0x136   : > { %735 = vst [vmem:[%s9322_s26 + $0x488] sm:$0xf] %v734_v34  ;;  %v862_v34 = vld [vmem:[%s9318_s25 + $0xb10] sm:$0xf] }
 0x137   : > { %737 = vst [vmem:[%s9322_s26 + $0x48c] sm:$0xf] %v736_v35  ;;  %v864_v35 = vld [vmem:[%s9318_s25 + $0xb18] sm:$0xf] }
 0x138   : > { %739 = vst [vmem:[%s9322_s26 + $0x490] sm:$0xf] %v738_v36  ;;  %v866_v36 = vld [vmem:[%s9318_s25 + $0xb20] sm:$0xf] }
 0x139   : > { %741 = vst [vmem:[%s9322_s26 + $0x494] sm:$0xf] %v740_v37  ;;  %v868_v37 = vld [vmem:[%s9318_s25 + $0xb28] sm:$0xf] }
 0x13a   : > { %743 = vst [vmem:[%s9322_s26 + $0x498] sm:$0xf] %v742_v38  ;;  %v870_v38 = vld [vmem:[%s9318_s25 + $0xb30] sm:$0xf] }
 0x13b   : > { %745 = vst [vmem:[%s9322_s26 + $0x49c] sm:$0xf] %v744_v39  ;;  %v872_v39 = vld [vmem:[%s9318_s25 + $0xb38] sm:$0xf] }
 0x13c   : > { %747 = vst [vmem:[%s9322_s26 + $0x4a0] sm:$0xf] %v746_v40  ;;  %v874_v40 = vld [vmem:[%s9318_s25 + $0xb40] sm:$0xf] }
 0x13d   : > { %749 = vst [vmem:[%s9322_s26 + $0x4a4] sm:$0xf] %v748_v41  ;;  %v876_v41 = vld [vmem:[%s9318_s25 + $0xb48] sm:$0xf] }
 0x13e   : > { %751 = vst [vmem:[%s9322_s26 + $0x4a8] sm:$0xf] %v750_v42  ;;  %v878_v42 = vld [vmem:[%s9318_s25 + $0xb50] sm:$0xf] }
 0x13f   : > { %753 = vst [vmem:[%s9322_s26 + $0x4ac] sm:$0xf] %v752_v43  ;;  %v880_v43 = vld [vmem:[%s9318_s25 + $0xb58] sm:$0xf] }
 0x140   : > { %755 = vst [vmem:[%s9322_s26 + $0x4b0] sm:$0xf] %v754_v44  ;;  %v882_v44 = vld [vmem:[%s9318_s25 + $0xb60] sm:$0xf] }
 0x141   : > { %757 = vst [vmem:[%s9322_s26 + $0x4b4] sm:$0xf] %v756_v45  ;;  %v884_v45 = vld [vmem:[%s9318_s25 + $0xb68] sm:$0xf] }
 0x142   : > { %759 = vst [vmem:[%s9322_s26 + $0x4b8] sm:$0xf] %v758_v46  ;;  %v886_v46 = vld [vmem:[%s9318_s25 + $0xb70] sm:$0xf] }
 0x143   : > { %761 = vst [vmem:[%s9322_s26 + $0x4bc] sm:$0xf] %v760_v47  ;;  %v888_v47 = vld [vmem:[%s9318_s25 + $0xb78] sm:$0xf] }
 0x144   : > { %763 = vst [vmem:[%s9322_s26 + $0x4c0] sm:$0xf] %v762_v48  ;;  %v890_v48 = vld [vmem:[%s9318_s25 + $0xb80] sm:$0xf] }
 0x145   : > { %765 = vst [vmem:[%s9322_s26 + $0x4c4] sm:$0xf] %v764_v49  ;;  %v892_v49 = vld [vmem:[%s9318_s25 + $0xb88] sm:$0xf] }
 0x146   : > { %767 = vst [vmem:[%s9322_s26 + $0x4c8] sm:$0xf] %v766_v50  ;;  %v894_v50 = vld [vmem:[%s9318_s25 + $0xb90] sm:$0xf] }
 0x147   : > { %769 = vst [vmem:[%s9322_s26 + $0x4cc] sm:$0xf] %v768_v51  ;;  %v896_v51 = vld [vmem:[%s9318_s25 + $0xb98] sm:$0xf] }
 0x148   : > { %771 = vst [vmem:[%s9322_s26 + $0x4d0] sm:$0xf] %v770_v52  ;;  %v898_v52 = vld [vmem:[%s9318_s25 + $0xba0] sm:$0xf] }
 0x149   : > { %773 = vst [vmem:[%s9322_s26 + $0x4d4] sm:$0xf] %v772_v53  ;;  %v900_v53 = vld [vmem:[%s9318_s25 + $0xba8] sm:$0xf] }
 0x14a   : > { %775 = vst [vmem:[%s9322_s26 + $0x4d8] sm:$0xf] %v774_v54  ;;  %v902_v54 = vld [vmem:[%s9318_s25 + $0xbb0] sm:$0xf] }
 0x14b   : > { %777 = vst [vmem:[%s9322_s26 + $0x4dc] sm:$0xf] %v776_v55  ;;  %v904_v55 = vld [vmem:[%s9318_s25 + $0xbb8] sm:$0xf] }
 0x14c   : > { %779 = vst [vmem:[%s9322_s26 + $0x4e0] sm:$0xf] %v778_v56  ;;  %v906_v56 = vld [vmem:[%s9318_s25 + $0xbc0] sm:$0xf] }
 0x14d   : > { %781 = vst [vmem:[%s9322_s26 + $0x4e4] sm:$0xf] %v780_v57  ;;  %v908_v57 = vld [vmem:[%s9318_s25 + $0xbc8] sm:$0xf] }
 0x14e   : > { %783 = vst [vmem:[%s9322_s26 + $0x4e8] sm:$0xf] %v782_v58  ;;  %v910_v58 = vld [vmem:[%s9318_s25 + $0xbd0] sm:$0xf] }
 0x14f   : > { %785 = vst [vmem:[%s9322_s26 + $0x4ec] sm:$0xf] %v784_v59  ;;  %v912_v59 = vld [vmem:[%s9318_s25 + $0xbd8] sm:$0xf] }
 0x150   : > { %787 = vst [vmem:[%s9322_s26 + $0x4f0] sm:$0xf] %v786_v60  ;;  %v914_v60 = vld [vmem:[%s9318_s25 + $0xbe0] sm:$0xf] }
 0x151   : > { %789 = vst [vmem:[%s9322_s26 + $0x4f4] sm:$0xf] %v788_v61  ;;  %v916_v61 = vld [vmem:[%s9318_s25 + $0xbe8] sm:$0xf] }
 0x152   : > { %791 = vst [vmem:[%s9322_s26 + $0x4f8] sm:$0xf] %v790_v62  ;;  %v918_v62 = vld [vmem:[%s9318_s25 + $0xbf0] sm:$0xf] }
 0x153   : > { %793 = vst [vmem:[%s9322_s26 + $0x4fc] sm:$0xf] %v792_v63  ;;  %v920_v63 = vld [vmem:[%s9318_s25 + $0xbf8] sm:$0xf] }
 0x154   : > { %795 = vst [vmem:[%s9322_s26 + $0x500] sm:$0xf] %v794_v0  ;;  %v922_v0 = vld [vmem:[%s9318_s25 + $0xc00] sm:$0xf] }
 0x155   : > { %797 = vst [vmem:[%s9322_s26 + $0x504] sm:$0xf] %v796_v1  ;;  %v924_v1 = vld [vmem:[%s9318_s25 + $0xc08] sm:$0xf] }
 0x156   : > { %799 = vst [vmem:[%s9322_s26 + $0x508] sm:$0xf] %v798_v2  ;;  %v926_v2 = vld [vmem:[%s9318_s25 + $0xc10] sm:$0xf] }
 0x157   : > { %801 = vst [vmem:[%s9322_s26 + $0x50c] sm:$0xf] %v800_v3  ;;  %v928_v3 = vld [vmem:[%s9318_s25 + $0xc18] sm:$0xf] }
 0x158   : > { %803 = vst [vmem:[%s9322_s26 + $0x510] sm:$0xf] %v802_v4  ;;  %v930_v4 = vld [vmem:[%s9318_s25 + $0xc20] sm:$0xf] }
 0x159   : > { %805 = vst [vmem:[%s9322_s26 + $0x514] sm:$0xf] %v804_v5  ;;  %v932_v5 = vld [vmem:[%s9318_s25 + $0xc28] sm:$0xf] }
 0x15a   : > { %807 = vst [vmem:[%s9322_s26 + $0x518] sm:$0xf] %v806_v6  ;;  %v934_v6 = vld [vmem:[%s9318_s25 + $0xc30] sm:$0xf] }
 0x15b   : > { %809 = vst [vmem:[%s9322_s26 + $0x51c] sm:$0xf] %v808_v7  ;;  %v936_v7 = vld [vmem:[%s9318_s25 + $0xc38] sm:$0xf] }
 0x15c   : > { %811 = vst [vmem:[%s9322_s26 + $0x520] sm:$0xf] %v810_v8  ;;  %v938_v8 = vld [vmem:[%s9318_s25 + $0xc40] sm:$0xf] }
 0x15d   : > { %813 = vst [vmem:[%s9322_s26 + $0x524] sm:$0xf] %v812_v9  ;;  %v940_v9 = vld [vmem:[%s9318_s25 + $0xc48] sm:$0xf] }
 0x15e   : > { %815 = vst [vmem:[%s9322_s26 + $0x528] sm:$0xf] %v814_v10  ;;  %v942_v10 = vld [vmem:[%s9318_s25 + $0xc50] sm:$0xf] }
 0x15f   : > { %817 = vst [vmem:[%s9322_s26 + $0x52c] sm:$0xf] %v816_v11  ;;  %v944_v11 = vld [vmem:[%s9318_s25 + $0xc58] sm:$0xf] }
 0x160   : > { %819 = vst [vmem:[%s9322_s26 + $0x530] sm:$0xf] %v818_v12  ;;  %v946_v12 = vld [vmem:[%s9318_s25 + $0xc60] sm:$0xf] }
 0x161   : > { %821 = vst [vmem:[%s9322_s26 + $0x534] sm:$0xf] %v820_v13  ;;  %v948_v13 = vld [vmem:[%s9318_s25 + $0xc68] sm:$0xf] }
 0x162   : > { %823 = vst [vmem:[%s9322_s26 + $0x538] sm:$0xf] %v822_v14  ;;  %v950_v14 = vld [vmem:[%s9318_s25 + $0xc70] sm:$0xf] }
 0x163   : > { %825 = vst [vmem:[%s9322_s26 + $0x53c] sm:$0xf] %v824_v15  ;;  %v952_v15 = vld [vmem:[%s9318_s25 + $0xc78] sm:$0xf] }
 0x164   : > { %827 = vst [vmem:[%s9322_s26 + $0x540] sm:$0xf] %v826_v16  ;;  %v954_v16 = vld [vmem:[%s9318_s25 + $0xc80] sm:$0xf] }
 0x165   : > { %829 = vst [vmem:[%s9322_s26 + $0x544] sm:$0xf] %v828_v17  ;;  %v956_v17 = vld [vmem:[%s9318_s25 + $0xc88] sm:$0xf] }
 0x166   : > { %831 = vst [vmem:[%s9322_s26 + $0x548] sm:$0xf] %v830_v18  ;;  %v958_v18 = vld [vmem:[%s9318_s25 + $0xc90] sm:$0xf] }
 0x167   : > { %833 = vst [vmem:[%s9322_s26 + $0x54c] sm:$0xf] %v832_v19  ;;  %v960_v19 = vld [vmem:[%s9318_s25 + $0xc98] sm:$0xf] }
 0x168   : > { %835 = vst [vmem:[%s9322_s26 + $0x550] sm:$0xf] %v834_v20  ;;  %v962_v20 = vld [vmem:[%s9318_s25 + $0xca0] sm:$0xf] }
 0x169   : > { %837 = vst [vmem:[%s9322_s26 + $0x554] sm:$0xf] %v836_v21  ;;  %v964_v21 = vld [vmem:[%s9318_s25 + $0xca8] sm:$0xf] }
 0x16a   : > { %839 = vst [vmem:[%s9322_s26 + $0x558] sm:$0xf] %v838_v22  ;;  %v966_v22 = vld [vmem:[%s9318_s25 + $0xcb0] sm:$0xf] }
 0x16b   : > { %841 = vst [vmem:[%s9322_s26 + $0x55c] sm:$0xf] %v840_v23  ;;  %v968_v23 = vld [vmem:[%s9318_s25 + $0xcb8] sm:$0xf] }
 0x16c   : > { %843 = vst [vmem:[%s9322_s26 + $0x560] sm:$0xf] %v842_v24  ;;  %v970_v24 = vld [vmem:[%s9318_s25 + $0xcc0] sm:$0xf] }
 0x16d   : > { %845 = vst [vmem:[%s9322_s26 + $0x564] sm:$0xf] %v844_v25  ;;  %v972_v25 = vld [vmem:[%s9318_s25 + $0xcc8] sm:$0xf] }
 0x16e   : > { %847 = vst [vmem:[%s9322_s26 + $0x568] sm:$0xf] %v846_v26  ;;  %v974_v26 = vld [vmem:[%s9318_s25 + $0xcd0] sm:$0xf] }
 0x16f   : > { %849 = vst [vmem:[%s9322_s26 + $0x56c] sm:$0xf] %v848_v27  ;;  %v976_v27 = vld [vmem:[%s9318_s25 + $0xcd8] sm:$0xf] }
 0x170   : > { %851 = vst [vmem:[%s9322_s26 + $0x570] sm:$0xf] %v850_v28  ;;  %v978_v28 = vld [vmem:[%s9318_s25 + $0xce0] sm:$0xf] }
 0x171   : > { %853 = vst [vmem:[%s9322_s26 + $0x574] sm:$0xf] %v852_v29  ;;  %v980_v29 = vld [vmem:[%s9318_s25 + $0xce8] sm:$0xf] }
 0x172   : > { %855 = vst [vmem:[%s9322_s26 + $0x578] sm:$0xf] %v854_v30  ;;  %v982_v30 = vld [vmem:[%s9318_s25 + $0xcf0] sm:$0xf] }
 0x173   : > { %857 = vst [vmem:[%s9322_s26 + $0x57c] sm:$0xf] %v856_v31  ;;  %v984_v31 = vld [vmem:[%s9318_s25 + $0xcf8] sm:$0xf] }
 0x174   : > { %859 = vst [vmem:[%s9322_s26 + $0x580] sm:$0xf] %v858_v32  ;;  %v986_v32 = vld [vmem:[%s9318_s25 + $0xd00] sm:$0xf] }
 0x175   : > { %861 = vst [vmem:[%s9322_s26 + $0x584] sm:$0xf] %v860_v33  ;;  %v988_v33 = vld [vmem:[%s9318_s25 + $0xd08] sm:$0xf] }
 0x176   : > { %863 = vst [vmem:[%s9322_s26 + $0x588] sm:$0xf] %v862_v34  ;;  %v990_v34 = vld [vmem:[%s9318_s25 + $0xd10] sm:$0xf] }
 0x177   : > { %865 = vst [vmem:[%s9322_s26 + $0x58c] sm:$0xf] %v864_v35  ;;  %v992_v35 = vld [vmem:[%s9318_s25 + $0xd18] sm:$0xf] }
 0x178   : > { %867 = vst [vmem:[%s9322_s26 + $0x590] sm:$0xf] %v866_v36  ;;  %v994_v36 = vld [vmem:[%s9318_s25 + $0xd20] sm:$0xf] }
 0x179   : > { %869 = vst [vmem:[%s9322_s26 + $0x594] sm:$0xf] %v868_v37  ;;  %v996_v37 = vld [vmem:[%s9318_s25 + $0xd28] sm:$0xf] }
 0x17a   : > { %871 = vst [vmem:[%s9322_s26 + $0x598] sm:$0xf] %v870_v38  ;;  %v998_v38 = vld [vmem:[%s9318_s25 + $0xd30] sm:$0xf] }
 0x17b   : > { %873 = vst [vmem:[%s9322_s26 + $0x59c] sm:$0xf] %v872_v39  ;;  %v1000_v39 = vld [vmem:[%s9318_s25 + $0xd38] sm:$0xf] }
 0x17c   : > { %875 = vst [vmem:[%s9322_s26 + $0x5a0] sm:$0xf] %v874_v40  ;;  %v1002_v40 = vld [vmem:[%s9318_s25 + $0xd40] sm:$0xf] }
 0x17d   : > { %877 = vst [vmem:[%s9322_s26 + $0x5a4] sm:$0xf] %v876_v41  ;;  %v1004_v41 = vld [vmem:[%s9318_s25 + $0xd48] sm:$0xf] }
 0x17e   : > { %879 = vst [vmem:[%s9322_s26 + $0x5a8] sm:$0xf] %v878_v42  ;;  %v1006_v42 = vld [vmem:[%s9318_s25 + $0xd50] sm:$0xf] }
 0x17f   : > { %881 = vst [vmem:[%s9322_s26 + $0x5ac] sm:$0xf] %v880_v43  ;;  %v1008_v43 = vld [vmem:[%s9318_s25 + $0xd58] sm:$0xf] }
 0x180   : > { %883 = vst [vmem:[%s9322_s26 + $0x5b0] sm:$0xf] %v882_v44  ;;  %v1010_v44 = vld [vmem:[%s9318_s25 + $0xd60] sm:$0xf] }
 0x181   : > { %885 = vst [vmem:[%s9322_s26 + $0x5b4] sm:$0xf] %v884_v45  ;;  %v1012_v45 = vld [vmem:[%s9318_s25 + $0xd68] sm:$0xf] }
 0x182   : > { %887 = vst [vmem:[%s9322_s26 + $0x5b8] sm:$0xf] %v886_v46  ;;  %v1014_v46 = vld [vmem:[%s9318_s25 + $0xd70] sm:$0xf] }
 0x183   : > { %889 = vst [vmem:[%s9322_s26 + $0x5bc] sm:$0xf] %v888_v47  ;;  %v1016_v47 = vld [vmem:[%s9318_s25 + $0xd78] sm:$0xf] }
 0x184   : > { %891 = vst [vmem:[%s9322_s26 + $0x5c0] sm:$0xf] %v890_v48  ;;  %v1018_v48 = vld [vmem:[%s9318_s25 + $0xd80] sm:$0xf] }
 0x185   : > { %893 = vst [vmem:[%s9322_s26 + $0x5c4] sm:$0xf] %v892_v49  ;;  %v1020_v49 = vld [vmem:[%s9318_s25 + $0xd88] sm:$0xf] }
 0x186   : > { %895 = vst [vmem:[%s9322_s26 + $0x5c8] sm:$0xf] %v894_v50  ;;  %v1022_v50 = vld [vmem:[%s9318_s25 + $0xd90] sm:$0xf] }
 0x187   : > { %897 = vst [vmem:[%s9322_s26 + $0x5cc] sm:$0xf] %v896_v51  ;;  %v1024_v51 = vld [vmem:[%s9318_s25 + $0xd98] sm:$0xf] }
 0x188   : > { %899 = vst [vmem:[%s9322_s26 + $0x5d0] sm:$0xf] %v898_v52  ;;  %v1026_v52 = vld [vmem:[%s9318_s25 + $0xda0] sm:$0xf] }
 0x189   : > { %901 = vst [vmem:[%s9322_s26 + $0x5d4] sm:$0xf] %v900_v53  ;;  %v1028_v53 = vld [vmem:[%s9318_s25 + $0xda8] sm:$0xf] }
 0x18a   : > { %903 = vst [vmem:[%s9322_s26 + $0x5d8] sm:$0xf] %v902_v54  ;;  %v1030_v54 = vld [vmem:[%s9318_s25 + $0xdb0] sm:$0xf] }
 0x18b   : > { %905 = vst [vmem:[%s9322_s26 + $0x5dc] sm:$0xf] %v904_v55  ;;  %v1032_v55 = vld [vmem:[%s9318_s25 + $0xdb8] sm:$0xf] }
 0x18c   : > { %907 = vst [vmem:[%s9322_s26 + $0x5e0] sm:$0xf] %v906_v56  ;;  %v1034_v56 = vld [vmem:[%s9318_s25 + $0xdc0] sm:$0xf] }
 0x18d   : > { %909 = vst [vmem:[%s9322_s26 + $0x5e4] sm:$0xf] %v908_v57  ;;  %v1036_v57 = vld [vmem:[%s9318_s25 + $0xdc8] sm:$0xf] }
 0x18e   : > { %911 = vst [vmem:[%s9322_s26 + $0x5e8] sm:$0xf] %v910_v58  ;;  %v1038_v58 = vld [vmem:[%s9318_s25 + $0xdd0] sm:$0xf] }
 0x18f   : > { %913 = vst [vmem:[%s9322_s26 + $0x5ec] sm:$0xf] %v912_v59  ;;  %v1040_v59 = vld [vmem:[%s9318_s25 + $0xdd8] sm:$0xf] }
 0x190   : > { %915 = vst [vmem:[%s9322_s26 + $0x5f0] sm:$0xf] %v914_v60  ;;  %v1042_v60 = vld [vmem:[%s9318_s25 + $0xde0] sm:$0xf] }
 0x191   : > { %917 = vst [vmem:[%s9322_s26 + $0x5f4] sm:$0xf] %v916_v61  ;;  %v1044_v61 = vld [vmem:[%s9318_s25 + $0xde8] sm:$0xf] }
 0x192   : > { %919 = vst [vmem:[%s9322_s26 + $0x5f8] sm:$0xf] %v918_v62  ;;  %v1046_v62 = vld [vmem:[%s9318_s25 + $0xdf0] sm:$0xf] }
 0x193   : > { %921 = vst [vmem:[%s9322_s26 + $0x5fc] sm:$0xf] %v920_v63  ;;  %v1048_v63 = vld [vmem:[%s9318_s25 + $0xdf8] sm:$0xf] }
 0x194   : > { %923 = vst [vmem:[%s9322_s26 + $0x600] sm:$0xf] %v922_v0  ;;  %v1050_v0 = vld [vmem:[%s9318_s25 + $0xe00] sm:$0xf] }
 0x195   : > { %925 = vst [vmem:[%s9322_s26 + $0x604] sm:$0xf] %v924_v1  ;;  %v1052_v1 = vld [vmem:[%s9318_s25 + $0xe08] sm:$0xf] }
 0x196   : > { %927 = vst [vmem:[%s9322_s26 + $0x608] sm:$0xf] %v926_v2  ;;  %v1054_v2 = vld [vmem:[%s9318_s25 + $0xe10] sm:$0xf] }
 0x197   : > { %929 = vst [vmem:[%s9322_s26 + $0x60c] sm:$0xf] %v928_v3  ;;  %v1056_v3 = vld [vmem:[%s9318_s25 + $0xe18] sm:$0xf] }
 0x198   : > { %931 = vst [vmem:[%s9322_s26 + $0x610] sm:$0xf] %v930_v4  ;;  %v1058_v4 = vld [vmem:[%s9318_s25 + $0xe20] sm:$0xf] }
 0x199   : > { %933 = vst [vmem:[%s9322_s26 + $0x614] sm:$0xf] %v932_v5  ;;  %v1060_v5 = vld [vmem:[%s9318_s25 + $0xe28] sm:$0xf] }
 0x19a   : > { %935 = vst [vmem:[%s9322_s26 + $0x618] sm:$0xf] %v934_v6  ;;  %v1062_v6 = vld [vmem:[%s9318_s25 + $0xe30] sm:$0xf] }
 0x19b   : > { %937 = vst [vmem:[%s9322_s26 + $0x61c] sm:$0xf] %v936_v7  ;;  %v1064_v7 = vld [vmem:[%s9318_s25 + $0xe38] sm:$0xf] }
 0x19c   : > { %939 = vst [vmem:[%s9322_s26 + $0x620] sm:$0xf] %v938_v8  ;;  %v1066_v8 = vld [vmem:[%s9318_s25 + $0xe40] sm:$0xf] }
 0x19d   : > { %941 = vst [vmem:[%s9322_s26 + $0x624] sm:$0xf] %v940_v9  ;;  %v1068_v9 = vld [vmem:[%s9318_s25 + $0xe48] sm:$0xf] }
 0x19e   : > { %943 = vst [vmem:[%s9322_s26 + $0x628] sm:$0xf] %v942_v10  ;;  %v1070_v10 = vld [vmem:[%s9318_s25 + $0xe50] sm:$0xf] }
 0x19f   : > { %945 = vst [vmem:[%s9322_s26 + $0x62c] sm:$0xf] %v944_v11  ;;  %v1072_v11 = vld [vmem:[%s9318_s25 + $0xe58] sm:$0xf] }
 0x1a0   : > { %947 = vst [vmem:[%s9322_s26 + $0x630] sm:$0xf] %v946_v12  ;;  %v1074_v12 = vld [vmem:[%s9318_s25 + $0xe60] sm:$0xf] }
 0x1a1   : > { %949 = vst [vmem:[%s9322_s26 + $0x634] sm:$0xf] %v948_v13  ;;  %v1076_v13 = vld [vmem:[%s9318_s25 + $0xe68] sm:$0xf] }
 0x1a2   : > { %951 = vst [vmem:[%s9322_s26 + $0x638] sm:$0xf] %v950_v14  ;;  %v1078_v14 = vld [vmem:[%s9318_s25 + $0xe70] sm:$0xf] }
 0x1a3   : > { %953 = vst [vmem:[%s9322_s26 + $0x63c] sm:$0xf] %v952_v15  ;;  %v1080_v15 = vld [vmem:[%s9318_s25 + $0xe78] sm:$0xf] }
 0x1a4   : > { %955 = vst [vmem:[%s9322_s26 + $0x640] sm:$0xf] %v954_v16  ;;  %v1082_v16 = vld [vmem:[%s9318_s25 + $0xe80] sm:$0xf] }
 0x1a5   : > { %957 = vst [vmem:[%s9322_s26 + $0x644] sm:$0xf] %v956_v17  ;;  %v1084_v17 = vld [vmem:[%s9318_s25 + $0xe88] sm:$0xf] }
 0x1a6   : > { %959 = vst [vmem:[%s9322_s26 + $0x648] sm:$0xf] %v958_v18  ;;  %v1086_v18 = vld [vmem:[%s9318_s25 + $0xe90] sm:$0xf] }
 0x1a7   : > { %961 = vst [vmem:[%s9322_s26 + $0x64c] sm:$0xf] %v960_v19  ;;  %v1088_v19 = vld [vmem:[%s9318_s25 + $0xe98] sm:$0xf] }
 0x1a8   : > { %963 = vst [vmem:[%s9322_s26 + $0x650] sm:$0xf] %v962_v20  ;;  %v1090_v20 = vld [vmem:[%s9318_s25 + $0xea0] sm:$0xf] }
 0x1a9   : > { %965 = vst [vmem:[%s9322_s26 + $0x654] sm:$0xf] %v964_v21  ;;  %v1092_v21 = vld [vmem:[%s9318_s25 + $0xea8] sm:$0xf] }
 0x1aa   : > { %967 = vst [vmem:[%s9322_s26 + $0x658] sm:$0xf] %v966_v22  ;;  %v1094_v22 = vld [vmem:[%s9318_s25 + $0xeb0] sm:$0xf] }
 0x1ab   : > { %969 = vst [vmem:[%s9322_s26 + $0x65c] sm:$0xf] %v968_v23  ;;  %v1096_v23 = vld [vmem:[%s9318_s25 + $0xeb8] sm:$0xf] }
 0x1ac   : > { %971 = vst [vmem:[%s9322_s26 + $0x660] sm:$0xf] %v970_v24  ;;  %v1098_v24 = vld [vmem:[%s9318_s25 + $0xec0] sm:$0xf] }
 0x1ad   : > { %973 = vst [vmem:[%s9322_s26 + $0x664] sm:$0xf] %v972_v25  ;;  %v1100_v25 = vld [vmem:[%s9318_s25 + $0xec8] sm:$0xf] }
 0x1ae   : > { %975 = vst [vmem:[%s9322_s26 + $0x668] sm:$0xf] %v974_v26  ;;  %v1102_v26 = vld [vmem:[%s9318_s25 + $0xed0] sm:$0xf] }
 0x1af   : > { %977 = vst [vmem:[%s9322_s26 + $0x66c] sm:$0xf] %v976_v27  ;;  %v1104_v27 = vld [vmem:[%s9318_s25 + $0xed8] sm:$0xf] }
 0x1b0   : > { %979 = vst [vmem:[%s9322_s26 + $0x670] sm:$0xf] %v978_v28  ;;  %v1106_v28 = vld [vmem:[%s9318_s25 + $0xee0] sm:$0xf] }
 0x1b1   : > { %981 = vst [vmem:[%s9322_s26 + $0x674] sm:$0xf] %v980_v29  ;;  %v1108_v29 = vld [vmem:[%s9318_s25 + $0xee8] sm:$0xf] }
 0x1b2   : > { %983 = vst [vmem:[%s9322_s26 + $0x678] sm:$0xf] %v982_v30  ;;  %v1110_v30 = vld [vmem:[%s9318_s25 + $0xef0] sm:$0xf] }
 0x1b3   : > { %985 = vst [vmem:[%s9322_s26 + $0x67c] sm:$0xf] %v984_v31  ;;  %v1112_v31 = vld [vmem:[%s9318_s25 + $0xef8] sm:$0xf] }
 0x1b4   : > { %987 = vst [vmem:[%s9322_s26 + $0x680] sm:$0xf] %v986_v32  ;;  %v1114_v32 = vld [vmem:[%s9318_s25 + $0xf00] sm:$0xf] }
 0x1b5   : > { %989 = vst [vmem:[%s9322_s26 + $0x684] sm:$0xf] %v988_v33  ;;  %v1116_v33 = vld [vmem:[%s9318_s25 + $0xf08] sm:$0xf] }
 0x1b6   : > { %991 = vst [vmem:[%s9322_s26 + $0x688] sm:$0xf] %v990_v34  ;;  %v1118_v34 = vld [vmem:[%s9318_s25 + $0xf10] sm:$0xf] }
 0x1b7   : > { %993 = vst [vmem:[%s9322_s26 + $0x68c] sm:$0xf] %v992_v35  ;;  %v1120_v35 = vld [vmem:[%s9318_s25 + $0xf18] sm:$0xf] }
 0x1b8   : > { %995 = vst [vmem:[%s9322_s26 + $0x690] sm:$0xf] %v994_v36  ;;  %v1122_v36 = vld [vmem:[%s9318_s25 + $0xf20] sm:$0xf] }
 0x1b9   : > { %997 = vst [vmem:[%s9322_s26 + $0x694] sm:$0xf] %v996_v37  ;;  %v1124_v37 = vld [vmem:[%s9318_s25 + $0xf28] sm:$0xf] }
 0x1ba   : > { %999 = vst [vmem:[%s9322_s26 + $0x698] sm:$0xf] %v998_v38  ;;  %v1126_v38 = vld [vmem:[%s9318_s25 + $0xf30] sm:$0xf] }
 0x1bb   : > { %1001 = vst [vmem:[%s9322_s26 + $0x69c] sm:$0xf] %v1000_v39  ;;  %v1128_v39 = vld [vmem:[%s9318_s25 + $0xf38] sm:$0xf] }
 0x1bc   : > { %1003 = vst [vmem:[%s9322_s26 + $0x6a0] sm:$0xf] %v1002_v40  ;;  %v1130_v40 = vld [vmem:[%s9318_s25 + $0xf40] sm:$0xf] }
 0x1bd   : > { %1005 = vst [vmem:[%s9322_s26 + $0x6a4] sm:$0xf] %v1004_v41  ;;  %v1132_v41 = vld [vmem:[%s9318_s25 + $0xf48] sm:$0xf] }
 0x1be   : > { %1007 = vst [vmem:[%s9322_s26 + $0x6a8] sm:$0xf] %v1006_v42  ;;  %v1134_v42 = vld [vmem:[%s9318_s25 + $0xf50] sm:$0xf] }
 0x1bf   : > { %1009 = vst [vmem:[%s9322_s26 + $0x6ac] sm:$0xf] %v1008_v43  ;;  %v1136_v43 = vld [vmem:[%s9318_s25 + $0xf58] sm:$0xf] }
 0x1c0   : > { %1011 = vst [vmem:[%s9322_s26 + $0x6b0] sm:$0xf] %v1010_v44  ;;  %v1138_v44 = vld [vmem:[%s9318_s25 + $0xf60] sm:$0xf] }
 0x1c1   : > { %1013 = vst [vmem:[%s9322_s26 + $0x6b4] sm:$0xf] %v1012_v45  ;;  %v1140_v45 = vld [vmem:[%s9318_s25 + $0xf68] sm:$0xf] }
 0x1c2   : > { %1015 = vst [vmem:[%s9322_s26 + $0x6b8] sm:$0xf] %v1014_v46  ;;  %v1142_v46 = vld [vmem:[%s9318_s25 + $0xf70] sm:$0xf] }
 0x1c3   : > { %1017 = vst [vmem:[%s9322_s26 + $0x6bc] sm:$0xf] %v1016_v47  ;;  %v1144_v47 = vld [vmem:[%s9318_s25 + $0xf78] sm:$0xf] }
 0x1c4   : > { %1019 = vst [vmem:[%s9322_s26 + $0x6c0] sm:$0xf] %v1018_v48  ;;  %v1146_v48 = vld [vmem:[%s9318_s25 + $0xf80] sm:$0xf] }
 0x1c5   : > { %1021 = vst [vmem:[%s9322_s26 + $0x6c4] sm:$0xf] %v1020_v49  ;;  %v1148_v49 = vld [vmem:[%s9318_s25 + $0xf88] sm:$0xf] }
 0x1c6   : > { %1023 = vst [vmem:[%s9322_s26 + $0x6c8] sm:$0xf] %v1022_v50  ;;  %v1150_v50 = vld [vmem:[%s9318_s25 + $0xf90] sm:$0xf] }
 0x1c7   : > { %1025 = vst [vmem:[%s9322_s26 + $0x6cc] sm:$0xf] %v1024_v51  ;;  %v1152_v51 = vld [vmem:[%s9318_s25 + $0xf98] sm:$0xf] }
 0x1c8   : > { %1027 = vst [vmem:[%s9322_s26 + $0x6d0] sm:$0xf] %v1026_v52  ;;  %v1154_v52 = vld [vmem:[%s9318_s25 + $0xfa0] sm:$0xf] }
 0x1c9   : > { %1029 = vst [vmem:[%s9322_s26 + $0x6d4] sm:$0xf] %v1028_v53  ;;  %v1156_v53 = vld [vmem:[%s9318_s25 + $0xfa8] sm:$0xf] }
 0x1ca   : > { %1031 = vst [vmem:[%s9322_s26 + $0x6d8] sm:$0xf] %v1030_v54  ;;  %v1158_v54 = vld [vmem:[%s9318_s25 + $0xfb0] sm:$0xf] }
 0x1cb   : > { %1033 = vst [vmem:[%s9322_s26 + $0x6dc] sm:$0xf] %v1032_v55  ;;  %v1160_v55 = vld [vmem:[%s9318_s25 + $0xfb8] sm:$0xf] }
 0x1cc   : > { %1035 = vst [vmem:[%s9322_s26 + $0x6e0] sm:$0xf] %v1034_v56  ;;  %v1162_v56 = vld [vmem:[%s9318_s25 + $0xfc0] sm:$0xf] }
 0x1cd   : > { %1037 = vst [vmem:[%s9322_s26 + $0x6e4] sm:$0xf] %v1036_v57  ;;  %v1164_v57 = vld [vmem:[%s9318_s25 + $0xfc8] sm:$0xf] }
 0x1ce   : > { %1039 = vst [vmem:[%s9322_s26 + $0x6e8] sm:$0xf] %v1038_v58  ;;  %v1166_v58 = vld [vmem:[%s9318_s25 + $0xfd0] sm:$0xf] }
 0x1cf   : > { %1041 = vst [vmem:[%s9322_s26 + $0x6ec] sm:$0xf] %v1040_v59  ;;  %v1168_v59 = vld [vmem:[%s9318_s25 + $0xfd8] sm:$0xf] }
 0x1d0   : > { %1043 = vst [vmem:[%s9322_s26 + $0x6f0] sm:$0xf] %v1042_v60  ;;  %v1170_v60 = vld [vmem:[%s9318_s25 + $0xfe0] sm:$0xf] }
 0x1d1   : > { %1045 = vst [vmem:[%s9322_s26 + $0x6f4] sm:$0xf] %v1044_v61  ;;  %v1172_v61 = vld [vmem:[%s9318_s25 + $0xfe8] sm:$0xf] }
 0x1d2   : > { %1047 = vst [vmem:[%s9322_s26 + $0x6f8] sm:$0xf] %v1046_v62  ;;  %v1174_v62 = vld [vmem:[%s9318_s25 + $0xff0] sm:$0xf] }
 0x1d3   : > { %1049 = vst [vmem:[%s9322_s26 + $0x6fc] sm:$0xf] %v1048_v63  ;;  %v1176_v63 = vld [vmem:[%s9318_s25 + $0xff8] sm:$0xf] }
 0x1d4   : > { %1051 = vst [vmem:[%s9322_s26 + $0x700] sm:$0xf] %v1050_v0 }
 0x1d5   : > { %1053 = vst [vmem:[%s9322_s26 + $0x704] sm:$0xf] %v1052_v1 }
 0x1d6   : > { %1055 = vst [vmem:[%s9322_s26 + $0x708] sm:$0xf] %v1054_v2 }
 0x1d7   : > { %1057 = vst [vmem:[%s9322_s26 + $0x70c] sm:$0xf] %v1056_v3 }
 0x1d8   : > { %1059 = vst [vmem:[%s9322_s26 + $0x710] sm:$0xf] %v1058_v4 }
 0x1d9   : > { %1061 = vst [vmem:[%s9322_s26 + $0x714] sm:$0xf] %v1060_v5 }
 0x1da   : > { %1063 = vst [vmem:[%s9322_s26 + $0x718] sm:$0xf] %v1062_v6 }
 0x1db   : > { %1065 = vst [vmem:[%s9322_s26 + $0x71c] sm:$0xf] %v1064_v7 }
 0x1dc   : > { %1067 = vst [vmem:[%s9322_s26 + $0x720] sm:$0xf] %v1066_v8 }
 0x1dd   : > { %1069 = vst [vmem:[%s9322_s26 + $0x724] sm:$0xf] %v1068_v9 }
 0x1de   : > { %1071 = vst [vmem:[%s9322_s26 + $0x728] sm:$0xf] %v1070_v10 }
 0x1df   : > { %1073 = vst [vmem:[%s9322_s26 + $0x72c] sm:$0xf] %v1072_v11 }
 0x1e0   : > { %1075 = vst [vmem:[%s9322_s26 + $0x730] sm:$0xf] %v1074_v12 }
 0x1e1   : > { %1077 = vst [vmem:[%s9322_s26 + $0x734] sm:$0xf] %v1076_v13 }
 0x1e2   : > { %1079 = vst [vmem:[%s9322_s26 + $0x738] sm:$0xf] %v1078_v14 }
 0x1e3   : > { %1081 = vst [vmem:[%s9322_s26 + $0x73c] sm:$0xf] %v1080_v15 }
 0x1e4   : > { %1083 = vst [vmem:[%s9322_s26 + $0x740] sm:$0xf] %v1082_v16 }
 0x1e5   : > { %1085 = vst [vmem:[%s9322_s26 + $0x744] sm:$0xf] %v1084_v17 }
 0x1e6   : > { %1087 = vst [vmem:[%s9322_s26 + $0x748] sm:$0xf] %v1086_v18 }
 0x1e7   : > { %1089 = vst [vmem:[%s9322_s26 + $0x74c] sm:$0xf] %v1088_v19 }
 0x1e8   : > { %1091 = vst [vmem:[%s9322_s26 + $0x750] sm:$0xf] %v1090_v20 }
 0x1e9   : > { %1093 = vst [vmem:[%s9322_s26 + $0x754] sm:$0xf] %v1092_v21 }
 0x1ea   : > { %1095 = vst [vmem:[%s9322_s26 + $0x758] sm:$0xf] %v1094_v22 }
 0x1eb   : > { %1097 = vst [vmem:[%s9322_s26 + $0x75c] sm:$0xf] %v1096_v23 }
 0x1ec   : > { %1099 = vst [vmem:[%s9322_s26 + $0x760] sm:$0xf] %v1098_v24 }
 0x1ed   : > { %1101 = vst [vmem:[%s9322_s26 + $0x764] sm:$0xf] %v1100_v25 }
 0x1ee   : > { %1103 = vst [vmem:[%s9322_s26 + $0x768] sm:$0xf] %v1102_v26 }
 0x1ef   : > { %1105 = vst [vmem:[%s9322_s26 + $0x76c] sm:$0xf] %v1104_v27 }
 0x1f0   : > { %1107 = vst [vmem:[%s9322_s26 + $0x770] sm:$0xf] %v1106_v28 }
 0x1f1   : > { %1109 = vst [vmem:[%s9322_s26 + $0x774] sm:$0xf] %v1108_v29 }
 0x1f2   : > { %1111 = vst [vmem:[%s9322_s26 + $0x778] sm:$0xf] %v1110_v30 }
 0x1f3   : > { %1113 = vst [vmem:[%s9322_s26 + $0x77c] sm:$0xf] %v1112_v31 }
 0x1f4   : > { %1115 = vst [vmem:[%s9322_s26 + $0x780] sm:$0xf] %v1114_v32 }
 0x1f5   : > { %1117 = vst [vmem:[%s9322_s26 + $0x784] sm:$0xf] %v1116_v33 }
 0x1f6   : > { %1119 = vst [vmem:[%s9322_s26 + $0x788] sm:$0xf] %v1118_v34 }
 0x1f7   : > { %1121 = vst [vmem:[%s9322_s26 + $0x78c] sm:$0xf] %v1120_v35 }
 0x1f8   : > { %1123 = vst [vmem:[%s9322_s26 + $0x790] sm:$0xf] %v1122_v36 }
 0x1f9   : > { %1125 = vst [vmem:[%s9322_s26 + $0x794] sm:$0xf] %v1124_v37 }
 0x1fa   : > { %1127 = vst [vmem:[%s9322_s26 + $0x798] sm:$0xf] %v1126_v38 }
 0x1fb   : > { %1129 = vst [vmem:[%s9322_s26 + $0x79c] sm:$0xf] %v1128_v39 }
 0x1fc   : > { %1131 = vst [vmem:[%s9322_s26 + $0x7a0] sm:$0xf] %v1130_v40 }
 0x1fd   : > { %1133 = vst [vmem:[%s9322_s26 + $0x7a4] sm:$0xf] %v1132_v41 }
 0x1fe   : > { %1135 = vst [vmem:[%s9322_s26 + $0x7a8] sm:$0xf] %v1134_v42 }
 0x1ff   : > { %1137 = vst [vmem:[%s9322_s26 + $0x7ac] sm:$0xf] %v1136_v43 }
 0x200   : > { %1139 = vst [vmem:[%s9322_s26 + $0x7b0] sm:$0xf] %v1138_v44 }
 0x201   : > { %1141 = vst [vmem:[%s9322_s26 + $0x7b4] sm:$0xf] %v1140_v45 }
 0x202   : > { %1143 = vst [vmem:[%s9322_s26 + $0x7b8] sm:$0xf] %v1142_v46 }
 0x203   : > { %1145 = vst [vmem:[%s9322_s26 + $0x7bc] sm:$0xf] %v1144_v47 }
 0x204   : > { %1147 = vst [vmem:[%s9322_s26 + $0x7c0] sm:$0xf] %v1146_v48 }
 0x205   : > { %1149 = vst [vmem:[%s9322_s26 + $0x7c4] sm:$0xf] %v1148_v49 }
 0x206   : > { %1151 = vst [vmem:[%s9322_s26 + $0x7c8] sm:$0xf] %v1150_v50 }
 0x207   : > { %1153 = vst [vmem:[%s9322_s26 + $0x7cc] sm:$0xf] %v1152_v51 }
 0x208   : > { %1155 = vst [vmem:[%s9322_s26 + $0x7d0] sm:$0xf] %v1154_v52 }
 0x209   : > { %1157 = vst [vmem:[%s9322_s26 + $0x7d4] sm:$0xf] %v1156_v53 }
 0x20a   : > { %1159 = vst [vmem:[%s9322_s26 + $0x7d8] sm:$0xf] %v1158_v54 }
 0x20b   : > { %1161 = vst [vmem:[%s9322_s26 + $0x7dc] sm:$0xf] %v1160_v55 }
 0x20c   : > { %1163 = vst [vmem:[%s9322_s26 + $0x7e0] sm:$0xf] %v1162_v56 }
 0x20d   : > { %1165 = vst [vmem:[%s9322_s26 + $0x7e4] sm:$0xf] %v1164_v57 }
 0x20e   : > { %1167 = vst [vmem:[%s9322_s26 + $0x7e8] sm:$0xf] %v1166_v58 }
 0x20f   : > { %1169 = vst [vmem:[%s9322_s26 + $0x7ec] sm:$0xf] %v1168_v59 }
 0x210   : > { %1171 = vst [vmem:[%s9322_s26 + $0x7f0] sm:$0xf] %v1170_v60 }
 0x211   : > { %1173 = vst [vmem:[%s9322_s26 + $0x7f4] sm:$0xf] %v1172_v61 }
 0x212   : > { %1175 = vst [vmem:[%s9322_s26 + $0x7f8] sm:$0xf] %v1174_v62 }
 0x213   : > { %1177 = vst [vmem:[%s9322_s26 + $0x7fc] sm:$0xf] %v1176_v63 }
 0x214 PF: > { %p7557_p8 = scmp.ge.s32.totalorder %s9253_s13, 1  ;;  %p4298_p9 = scmp.lt.s32.totalorder %s9253_s13, 3 }
 0x216   : > { %p4299_p10 = pnand %p7557_p8, %p4298_p9 }
 0x217   : > { %s4305_s27 = sand.u32 (!%p4299_p10), 1, %s9237_s9  }
 0x218   : > { %4302 = sbr.rel (%p4299_p10) target bundleno = 975 (0x3cf), region = 76  ;;  %s7558_s28 = sshll.u32 (!%p4299_p10), %s4305_s27, 11 }
 0x219   : > { %s10351_s29 = scalar_lea.vmem (!%p4299_p10), [#allocation2], %s7558_s28  ;;  %s7559_s4 = sshll.u32 (!%p4299_p10), %s4305_s27, 4 }
 0x21a   : > { %s4330_s5 = scalar_lea.vmem (!%p4299_p10), [#allocation3], %s7559_s4 }
 0x21d   : > { %v8915_v0 = vld [vmem:[%s10351_s29 + $0x38] sm:$0xff]  ;;  %v8914_v4 = vld [vmem:[%s10351_s29 + $0x30] sm:$0xff]  ;;  %v8913_v8 = vld [vmem:[%s10351_s29 + $0x28] sm:$0xff]  ;;  %s8841_s9 = sshll.u32 (%p9305_p6), %s9245_s11, 2 }
 0x21e   : > { %v8923_v1 = vld [vmem:[%s10351_s29 + $0x78] sm:$0xff]  ;;  %6771 = vmatpush.bf16.msra.mxu0 %v8915_v0  ;;  %v8922_v5 = vld [vmem:[%s10351_s29 + $0x70] sm:$0xff]  ;;  %v8921_v9 = vld [vmem:[%s10351_s29 + $0x68] sm:$0xff]  ;;  %s7406_s7 = scalar_lea.vmem (%p9305_p6), %s11045_s2, %s8841_s9 }
 0x21f   : > { %v8931_v2 = vld [vmem:[%s10351_s29 + $0xb8] sm:$0xff]  ;;  %6790 = vmatpush.bf16.msra.mxu1 %v8923_v1  ;;  %v8930_v6 = vld [vmem:[%s10351_s29 + $0xb0] sm:$0xff]  ;;  %v8929_v10 = vld [vmem:[%s10351_s29 + $0xa8] sm:$0xff] }
 0x220   : > { %v8939_v3 = vld [vmem:[%s10351_s29 + $0xf8] sm:$0xff]  ;;  %6809 = vmatpush.bf16.msra.mxu2 %v8931_v2  ;;  %v8938_v7 = vld [vmem:[%s10351_s29 + $0xf0] sm:$0xff]  ;;  %v8937_v11 = vld [vmem:[%s10351_s29 + $0xe8] sm:$0xff] }
 0x221   : > { %6828 = vmatpush.bf16.msra.mxu3 %v8939_v3  ;;  %v8912_v12 = vld [vmem:[%s10351_s29 + $0x20] sm:$0xff]  ;;  %v8911_v16 = vld [vmem:[%s10351_s29 + $0x18] sm:$0xff]  ;;  %v8910_v20 = vld [vmem:[%s10351_s29 + $0x10] sm:$0xff] }
 0x222   : > { %6772 = vmatpush.bf16.msra.mxu0 %v8914_v4  ;;  %v8920_v13 = vld [vmem:[%s10351_s29 + $0x60] sm:$0xff]  ;;  %v8919_v17 = vld [vmem:[%s10351_s29 + $0x58] sm:$0xff]  ;;  %v8918_v21 = vld [vmem:[%s10351_s29 + $0x50] sm:$0xff] }
 0x223   : > { %6791 = vmatpush.bf16.msra.mxu1 %v8922_v5  ;;  %v8928_v14 = vld [vmem:[%s10351_s29 + $0xa0] sm:$0xff]  ;;  %v8927_v18 = vld [vmem:[%s10351_s29 + $0x98] sm:$0xff]  ;;  %v8926_v22 = vld [vmem:[%s10351_s29 + $0x90] sm:$0xff] }
 0x224   : > { %6810 = vmatpush.bf16.msra.mxu2 %v8930_v6  ;;  %v8936_v15 = vld [vmem:[%s10351_s29 + $0xe0] sm:$0xff]  ;;  %v8935_v19 = vld [vmem:[%s10351_s29 + $0xd8] sm:$0xff]  ;;  %v8934_v23 = vld [vmem:[%s10351_s29 + $0xd0] sm:$0xff] }
 0x225   : > { %6829 = vmatpush.bf16.msra.mxu3 %v8938_v7  ;;  %v8909_v24 = vld [vmem:[%s10351_s29 + $0x8] sm:$0xff]  ;;  %v8908_v28 = vld [vmem:[%s10351_s29] sm:$0xff]  ;;  %v8963_v40 = vld [vmem:[%s10351_s29 + $0x1b8] sm:$0xff] }
 0x226   : > { %6773 = vmatpush.bf16.msra.mxu0 %v8913_v8  ;;  %v8917_v25 = vld [vmem:[%s10351_s29 + $0x48] sm:$0xff]  ;;  %v7562_v29 = vld [vmem:[%s11043_s0] sm:$0xf]  ;;  %v8844_v34 = vld [vmem:[%s11043_s0 + $0x4] sm:$0xf] }
 0x227   : > { %6792 = vmatpush.bf16.msra.mxu1 %v8921_v9  ;;  %v8925_v26 = vld [vmem:[%s10351_s29 + $0x88] sm:$0xff]  ;;  %v8860_v30 = vld [vmem:[%s11043_s0 + $0x7c] sm:$0xf0]  ;;  %v7564_v35 = vld [vmem:[%s11043_s0 + $0x80] sm:$0xf0] }
 0x228   : > { %6811 = vmatpush.bf16.msra.mxu2 %v8929_v10  ;;  %v8933_v27 = vld [vmem:[%s10351_s29 + $0xc8] sm:$0xff]  ;;  %v8916_v31 = vld [vmem:[%s10351_s29 + $0x40] sm:$0xff]  ;;  %v8947_v41 = vld [vmem:[%s10351_s29 + $0x138] sm:$0xff]  ;;  %v7563_v42 = vor.u32 %v8860_v30, %v7562_v29  ;;  %v7567_v43 = vor.u32 %v8844_v34, %v7564_v35 }
 0x229   : > { %6830 = vmatpush.bf16.msra.mxu3 %v8937_v11  ;;  %v8924_v32 = vld [vmem:[%s10351_s29 + $0x80] sm:$0xff]  ;;  %v7570_v36 = vld [vmem:[%s11043_s0 + $0x8] sm:$0xf]  ;;  %v8845_v38 = vld [vmem:[%s11043_s0 + $0xc] sm:$0xf] }
 0x22a   : > { %6774 = vmatpush.bf16.msra.mxu0 %v8912_v12  ;;  %v8932_v33 = vld [vmem:[%s10351_s29 + $0xc0] sm:$0xff]  ;;  %v8861_v37 = vld [vmem:[%s11043_s0 + $0x84] sm:$0xf0]  ;;  %v7572_v39 = vld [vmem:[%s11043_s0 + $0x88] sm:$0xf0] }
 0x22b   : > { %6793 = vmatpush.bf16.msra.mxu1 %v8920_v13  ;;  %v7571_v44 = vor.u32 %v8861_v37, %v7570_v36  ;;  %v7575_v45 = vor.u32 %v8845_v38, %v7572_v39  ;;  %v8955_v46 = vld [vmem:[%s10351_s29 + $0x178] sm:$0xff]  ;;  %v8962_v48 = vld [vmem:[%s10351_s29 + $0x1b0] sm:$0xff]  ;;  %v8961_v52 = vld [vmem:[%s10351_s29 + $0x1a8] sm:$0xff] }
 0x22c   : > { %6812 = vmatpush.bf16.msra.mxu2 %v8928_v14  ;;  %v8971_v47 = vld [vmem:[%s10351_s29 + $0x1f8] sm:$0xff]  ;;  %v8946_v49 = vld [vmem:[%s10351_s29 + $0x130] sm:$0xff]  ;;  %v8945_v53 = vld [vmem:[%s10351_s29 + $0x128] sm:$0xff] }
 0x22d   : > { %6831 = vmatpush.bf16.msra.mxu3 %v8936_v15  ;;  %v8954_v50 = vld [vmem:[%s10351_s29 + $0x170] sm:$0xff]  ;;  %v8953_v54 = vld [vmem:[%s10351_s29 + $0x168] sm:$0xff]  ;;  %v8960_v56 = vld [vmem:[%s10351_s29 + $0x1a0] sm:$0xff] }
 0x22e   : > { %6775 = vmatpush.bf16.msra.mxu0 %v8911_v16  ;;  %v8970_v51 = vld [vmem:[%s10351_s29 + $0x1f0] sm:$0xff]  ;;  %v8969_v55 = vld [vmem:[%s10351_s29 + $0x1e8] sm:$0xff]  ;;  %v8944_v57 = vld [vmem:[%s10351_s29 + $0x120] sm:$0xff] }
 0x22f   : > { %6794 = vmatpush.bf16.msra.mxu1 %v8919_v17  ;;  %v8952_v58 = vld [vmem:[%s10351_s29 + $0x160] sm:$0xff]  ;;  %v7698_v0 = vld [vmem:[%s11043_s0 + $0x108] sm:$0xf]  ;;  %v8877_v2 = vld [vmem:[%s11043_s0 + $0x10c] sm:$0xf] }
 0x230   : > { %6813 = vmatpush.bf16.msra.mxu2 %v8927_v18  ;;  %v8968_v59 = vld [vmem:[%s10351_s29 + $0x1e0] sm:$0xff]  ;;  %v8893_v1 = vld [vmem:[%s11043_s0 + $0x184] sm:$0xf0]  ;;  %v7700_v3 = vld [vmem:[%s11043_s0 + $0x188] sm:$0xf0] }
 0x231   : > { %6832 = vmatpush.bf16.msra.mxu3 %v8935_v19  ;;  %v7690_v60 = vld [vmem:[%s11043_s0 + $0x100] sm:$0xf]  ;;  %v8876_v62 = vld [vmem:[%s11043_s0 + $0x104] sm:$0xf]  ;;  %v8959_v4 = vld [vmem:[%s10351_s29 + $0x198] sm:$0xff]  ;;  %v7699_v8 = vor.u32 %v8893_v1, %v7698_v0  ;;  %v7703_v9 = vor.u32 %v8877_v2, %v7700_v3 }
 0x232   : > { %6776 = vmatpush.bf16.msra.mxu0 %v8910_v20  ;;  %v8892_v61 = vld [vmem:[%s11043_s0 + $0x17c] sm:$0xf0]  ;;  %v7692_v63 = vld [vmem:[%s11043_s0 + $0x180] sm:$0xf0]  ;;  %v8943_v5 = vld [vmem:[%s10351_s29 + $0x118] sm:$0xff] }
 0x233   : > { %6795 = vmatpush.bf16.msra.mxu1 %v8918_v21  ;;  %v7691_v6 = vor.u32 %v8892_v61, %v7690_v60  ;;  %v7695_v7 = vor.u32 %v8876_v62, %v7692_v63  ;;  %v8951_v10 = vld [vmem:[%s10351_s29 + $0x158] sm:$0xff]  ;;  %v8958_v12 = vld [vmem:[%s10351_s29 + $0x190] sm:$0xff]  ;;  %v8957_v16 = vld [vmem:[%s10351_s29 + $0x188] sm:$0xff] }
 0x234   : > { %6814 = vmatpush.bf16.msra.mxu2 %v8926_v22  ;;  %v8967_v11 = vld [vmem:[%s10351_s29 + $0x1d8] sm:$0xff]  ;;  %v8942_v13 = vld [vmem:[%s10351_s29 + $0x110] sm:$0xff]  ;;  %v8941_v17 = vld [vmem:[%s10351_s29 + $0x108] sm:$0xff] }
 0x235   : > { %6833 = vmatpush.bf16.msra.mxu3 %v8934_v23  ;;  %v8950_v14 = vld [vmem:[%s10351_s29 + $0x150] sm:$0xff]  ;;  %v8949_v18 = vld [vmem:[%s10351_s29 + $0x148] sm:$0xff]  ;;  %v8956_v20 = vld [vmem:[%s10351_s29 + $0x180] sm:$0xff] }
 0x236   : > { %6777 = vmatpush.bf16.msra.mxu0 %v8909_v24  ;;  %v8966_v15 = vld [vmem:[%s10351_s29 + $0x1d0] sm:$0xff]  ;;  %v8965_v19 = vld [vmem:[%s10351_s29 + $0x1c8] sm:$0xff]  ;;  %v8940_v21 = vld [vmem:[%s10351_s29 + $0x100] sm:$0xff] }
 0x237   : > { %6796 = vmatpush.bf16.msra.mxu1 %v8917_v25  ;;  %v8948_v22 = vld [vmem:[%s10351_s29 + $0x140] sm:$0xff]  ;;  %v7578_v24 = vld [vmem:[%s11043_s0 + $0x10] sm:$0xf]  ;;  %v8995_v25 = vld [vmem:[%s10351_s29 + $0x2b8] sm:$0xff] }
 0x238   : > { %6815 = vmatpush.bf16.msra.mxu2 %v8925_v26  ;;  %v8964_v23 = vld [vmem:[%s10351_s29 + $0x1c0] sm:$0xff]  ;;  %v8979_v26 = vld [vmem:[%s10351_s29 + $0x238] sm:$0xff]  ;;  %v7580_v29 = vld [vmem:[%s11043_s0 + $0x90] sm:$0xf0] }
 0x239   : > { %6834 = vmatpush.bf16.msra.mxu3 %v8933_v27  ;;  %v8862_v27 = vld [vmem:[%s11043_s0 + $0x8c] sm:$0xf0]  ;;  %v7586_v30 = vld [vmem:[%s11043_s0 + $0x18] sm:$0xf]  ;;  %v7716_v61 = vld [vmem:[%s11043_s0 + $0x198] sm:$0xf0] }
 0x23a   : > { %6778 = vmatpush.bf16.msra.mxu0 %v8908_v28  ;;  %v8846_v28 = vld [vmem:[%s11043_s0 + $0x14] sm:$0xf]  ;;  %v8987_v34 = vld [vmem:[%s10351_s29 + $0x278] sm:$0xff]  ;;  %v7579_v36 = vor.u32 %v8862_v27, %v7578_v24  ;;  %v7596_v24 = vld [vmem:[%s11043_s0 + $0xa0] sm:$0xf0] }
 0x23b   : > { %6797 = vmatpush.bf16.msra.mxu1 %v8916_v31  ;;  %v8863_v31 = vld [vmem:[%s11043_s0 + $0x94] sm:$0xf0]  ;;  %v8994_v37 = vld [vmem:[%s10351_s29 + $0x2b0] sm:$0xff]  ;;  %v7583_v38 = vor.u32 %v8846_v28, %v7580_v29  ;;  %v8849_v27 = vld [vmem:[%s11043_s0 + $0x2c] sm:$0xf] }
 0x23c   : > { %6816 = vmatpush.bf16.msra.mxu2 %v8924_v32  ;;  %v8847_v32 = vld [vmem:[%s11043_s0 + $0x1c] sm:$0xf]  ;;  %v7587_v39 = vor.u32 %v8863_v31, %v7586_v30  ;;  %v8990_v1 = vld [vmem:[%s10351_s29 + $0x290] sm:$0xff]  ;;  %v7604_v28 = vld [vmem:[%s11043_s0 + $0xa8] sm:$0xf0] }
 0x23d   : > { %6835 = vmatpush.bf16.msra.mxu3 %v8932_v33  ;;  %6779 = vmatmul.bf16.vlgmr.msra.gmra.mxu0 %v7563_v42  ;;  %v7588_v33 = vld [vmem:[%s11043_s0 + $0x98] sm:$0xf0]  ;;  %v8986_v42 = vld [vmem:[%s10351_s29 + $0x270] sm:$0xff] }
 0x23e   : > { %6847 = vmatpush.bf16.msrb.mxu0 %v8947_v41  ;;  %6798 = vmatmul.bf16.vlgmr.msra.gmra.mxu1 %v7567_v43  ;;  %v9003_v35 = vld [vmem:[%s10351_s29 + $0x2f8] sm:$0xff]  ;;  %v8978_v41 = vld [vmem:[%s10351_s29 + $0x230] sm:$0xff] }
 0x23f   : > { %6817 = vmatmul.bf16.vlgmr.msra.gmra.mxu2 %v7571_v44  ;;  %6866 = vmatpush.bf16.msrb.mxu1 %v8955_v46  ;;  %v9002_v43 = vld [vmem:[%s10351_s29 + $0x2f0] sm:$0xff]  ;;  %v8993_v44 = vld [vmem:[%s10351_s29 + $0x2a8] sm:$0xff]  ;;  %v8975_v60 = vld [vmem:[%s10351_s29 + $0x218] sm:$0xff] }
 0x240   : > { %6885 = vmatpush.bf16.msrb.mxu2 %v8963_v40  ;;  %6836 = vmatmul.bf16.vlgmr.msra.gmra.mxu3 %v7575_v45  ;;  %v7591_v40 = vor.u32 %v8847_v32, %v7588_v33  ;;  %v8977_v45 = vld [vmem:[%s10351_s29 + $0x228] sm:$0xff]  ;;  %v8983_v62 = vld [vmem:[%s10351_s29 + $0x258] sm:$0xff]  ;;  %v9018_v30 = vld [vmem:[%s10351_s29 + $0x370] sm:$0xff]  ;;  %v7607_v33 = vor.u32 %v8849_v27, %v7604_v28 }
 0x241   : > { %6904 = vmatpush.bf16.msrb.mxu3 %v8971_v47  ;;  %v8985_v46 = vld [vmem:[%s10351_s29 + $0x268] sm:$0xff]  ;;  %v8999_v63 = vld [vmem:[%s10351_s29 + $0x2d8] sm:$0xff] }
 0x242   : > { %6848 = vmatpush.bf16.msrb.mxu0 %v8946_v49  ;;  %v9001_v47 = vld [vmem:[%s10351_s29 + $0x2e8] sm:$0xff]  ;;  %v8976_v49 = vld [vmem:[%s10351_s29 + $0x220] sm:$0xff] }
 0x243   : > { %6867 = vmatpush.bf16.msrb.mxu1 %v8954_v50  ;;  %v8984_v50 = vld [vmem:[%s10351_s29 + $0x260] sm:$0xff]  ;;  %v9057_v28 = vld [vmem:[%s10351_s29 + $0x4a8] sm:$0xff] }
 0x244   : > { %6886 = vmatpush.bf16.msrb.mxu2 %v8962_v48  ;;  %v8992_v48 = vld [vmem:[%s10351_s29 + $0x2a0] sm:$0xff] }
 0x245   : > { %6905 = vmatpush.bf16.msrb.mxu3 %v8970_v51  ;;  %v9000_v51 = vld [vmem:[%s10351_s29 + $0x2e0] sm:$0xff] }
 0x246   : > { %6849 = vmatpush.bf16.msrb.mxu0 %v8945_v53  ;;  %v8894_v53 = vld [vmem:[%s11043_s0 + $0x18c] sm:$0xf0] }
 0x247   : > { %6868 = vmatpush.bf16.msrb.mxu1 %v8953_v54  ;;  %v8991_v54 = vld [vmem:[%s10351_s29 + $0x298] sm:$0xff] }
 0x248   : > { %6887 = vmatpush.bf16.msrb.mxu2 %v8961_v52  ;;  %v7706_v52 = vld [vmem:[%s11043_s0 + $0x110] sm:$0xf] }
 0x249   : > { %6906 = vmatpush.bf16.msrb.mxu3 %v8969_v55  ;;  %v8878_v55 = vld [vmem:[%s11043_s0 + $0x114] sm:$0xf]  ;;  %v7707_v0 = vor.u32 %v8894_v53, %v7706_v52  ;;  %v8881_v52 = vld [vmem:[%s11043_s0 + $0x12c] sm:$0xf]  ;;  %v9007_v53 = vld [vmem:[%s10351_s29 + $0x318] sm:$0xff] }
 0x24a   : > { %6850 = vmatpush.bf16.msrb.mxu0 %v8944_v57  ;;  %v7714_v57 = vld [vmem:[%s11043_s0 + $0x118] sm:$0xf] }
 0x24b   : > { %6869 = vmatpush.bf16.msrb.mxu1 %v8952_v58  ;;  %v8895_v58 = vld [vmem:[%s11043_s0 + $0x194] sm:$0xf0] }
 0x24c   : > { %6888 = vmatpush.bf16.msrb.mxu2 %v8960_v56  ;;  %v7708_v56 = vld [vmem:[%s11043_s0 + $0x190] sm:$0xf0]  ;;  %v7715_v3 = vor.u32 %v8895_v58, %v7714_v57 }
 0x24d   : > { %6907 = vmatpush.bf16.msrb.mxu3 %v8968_v59  ;;  %6784 = vmatmul.bf16.gmra.mxu0 %v7691_v6  ;;  %v8879_v59 = vld [vmem:[%s11043_s0 + $0x11c] sm:$0xf]  ;;  %v7711_v2 = vor.u32 %v8878_v55, %v7708_v56  ;;  %v8982_v6 = vld [vmem:[%s10351_s29 + $0x250] sm:$0xff] }
 0x24e   : > { %6851 = vmatpush.bf16.msrb.mxu0 %v8943_v5  ;;  %6803 = vmatmul.bf16.gmra.mxu1 %v7695_v7  ;;  %v8974_v5 = vld [vmem:[%s10351_s29 + $0x210] sm:$0xff]  ;;  %v9031_v55 = vld [vmem:[%s10351_s29 + $0x3d8] sm:$0xff] }
 0x24f   : > { %6822 = vmatmul.bf16.gmra.mxu2 %v7699_v8  ;;  %6870 = vmatpush.bf16.msrb.mxu1 %v8951_v10  ;;  %v8998_v7 = vld [vmem:[%s10351_s29 + $0x2d0] sm:$0xff]  ;;  %v8989_v8 = vld [vmem:[%s10351_s29 + $0x288] sm:$0xff] }
 0x250   : > { %6889 = vmatpush.bf16.msrb.mxu2 %v8959_v4  ;;  %6841 = vmatmul.bf16.gmra.mxu3 %v7703_v9  ;;  %v7719_v4 = vor.u32 %v8879_v59, %v7716_v61  ;;  %v8973_v9 = vld [vmem:[%s10351_s29 + $0x208] sm:$0xff]  ;;  %v9022_v56 = vld [vmem:[%s10351_s29 + $0x390] sm:$0xff] }
 0x251   : > { %6908 = vmatpush.bf16.msrb.mxu3 %v8967_v11  ;;  %v8981_v10 = vld [vmem:[%s10351_s29 + $0x248] sm:$0xff]  ;;  %v9014_v58 = vld [vmem:[%s10351_s29 + $0x350] sm:$0xff] }
 0x252   : > { %6852 = vmatpush.bf16.msrb.mxu0 %v8942_v13  ;;  %v8997_v11 = vld [vmem:[%s10351_s29 + $0x2c8] sm:$0xff]  ;;  %v9027_v13 = vld [vmem:[%s10351_s29 + $0x3b8] sm:$0xff] }
 0x253   : > { %6871 = vmatpush.bf16.msrb.mxu1 %v8950_v14  ;;  %v8972_v14 = vld [vmem:[%s10351_s29 + $0x200] sm:$0xff] }
 0x254   : > { %6890 = vmatpush.bf16.msrb.mxu2 %v8958_v12  ;;  %v8988_v12 = vld [vmem:[%s10351_s29 + $0x280] sm:$0xff] }
 0x255   : > { %6909 = vmatpush.bf16.msrb.mxu3 %v8966_v15  ;;  %v8980_v15 = vld [vmem:[%s10351_s29 + $0x240] sm:$0xff] }
 0x256   : > { %6853 = vmatpush.bf16.msrb.mxu0 %v8941_v17  ;;  %v7594_v17 = vld [vmem:[%s11043_s0 + $0x20] sm:$0xf] }
 0x257   : > { %6872 = vmatpush.bf16.msrb.mxu1 %v8949_v18  ;;  %v8864_v18 = vld [vmem:[%s11043_s0 + $0x9c] sm:$0xf0] }
 0x258   : > { %6891 = vmatpush.bf16.msrb.mxu2 %v8957_v16  ;;  %v8996_v16 = vld [vmem:[%s10351_s29 + $0x2c0] sm:$0xff]  ;;  %v7595_v29 = vor.u32 %v8864_v18, %v7594_v17  ;;  %v7612_v17 = vld [vmem:[%s11043_s0 + $0xb0] sm:$0xf0]  ;;  %v7618_v18 = vld [vmem:[%s11043_s0 + $0x38] sm:$0xf] }
 0x259   : > { %6910 = vmatpush.bf16.msrb.mxu3 %v8965_v19  ;;  %v9011_v19 = vld [vmem:[%s10351_s29 + $0x338] sm:$0xff] }
 0x25a   : > { %6854 = vmatpush.bf16.msrb.mxu0 %v8940_v21  ;;  %v8848_v21 = vld [vmem:[%s11043_s0 + $0x24] sm:$0xf] }
 0x25b   : > { %6873 = vmatpush.bf16.msrb.mxu1 %v8948_v22  ;;  %v9035_v22 = vld [vmem:[%s10351_s29 + $0x3f8] sm:$0xff]  ;;  %v7599_v31 = vor.u32 %v8848_v21, %v7596_v24  ;;  %v9066_v24 = vld [vmem:[%s10351_s29 + $0x4f0] sm:$0xff] }
 0x25c   : > { %6892 = vmatpush.bf16.msrb.mxu2 %v8956_v20  ;;  %v9019_v20 = vld [vmem:[%s10351_s29 + $0x378] sm:$0xff] }
 0x25d   : > { %6911 = vmatpush.bf16.msrb.mxu3 %v8964_v23  ;;  %6855 = vmatmul.bf16.vlgmr.msrb.gmra.mxu0 %v7579_v36  ;;  %v9026_v23 = vld [vmem:[%s10351_s29 + $0x3b0] sm:$0xff]  ;;  %v9025_v36 = vld [vmem:[%s10351_s29 + $0x3a8] sm:$0xff]  ;;  %v7620_v21 = vld [vmem:[%s11043_s0 + $0xb8] sm:$0xf0] }
 0x25e   : > { %6923 = vmatpush.bf16.msra.mxu0 %v8979_v26  ;;  %6874 = vmatmul.bf16.vlgmr.msrb.gmra.mxu1 %v7583_v38  ;;  %v8865_v26 = vld [vmem:[%s11043_s0 + $0xa4] sm:$0xf0] }
 0x25f   : > { %6942 = vmatpush.bf16.msra.mxu1 %v8987_v34  ;;  %6893 = vmatmul.bf16.vlgmr.msrb.gmra.mxu2 %v7587_v39  ;;  %v9010_v34 = vld [vmem:[%s10351_s29 + $0x330] sm:$0xff]  ;;  %v9009_v38 = vld [vmem:[%s10351_s29 + $0x328] sm:$0xff] }
 0x260   : > { %6961 = vmatpush.bf16.msra.mxu2 %v8995_v25  ;;  %6912 = vmatmul.bf16.vlgmr.msrb.gmra.mxu3 %v7591_v40  ;;  %v7602_v25 = vld [vmem:[%s11043_s0 + $0x28] sm:$0xf]  ;;  %v9024_v40 = vld [vmem:[%s10351_s29 + $0x3a0] sm:$0xff] }
 0x261   : > { %6980 = vmatpush.bf16.msra.mxu3 %v9003_v35  ;;  %v7603_v32 = vor.u32 %v8865_v26, %v7602_v25  ;;  %v9034_v35 = vld [vmem:[%s10351_s29 + $0x3f0] sm:$0xff]  ;;  %v9033_v39 = vld [vmem:[%s10351_s29 + $0x3e8] sm:$0xff] }
 0x262   : > { %6924 = vmatpush.bf16.msra.mxu0 %v8978_v41  ;;  %v9016_v41 = vld [vmem:[%s10351_s29 + $0x360] sm:$0xff] }
 0x263   : > { %6943 = vmatpush.bf16.msra.mxu1 %v8986_v42  ;;  %v9008_v42 = vld [vmem:[%s10351_s29 + $0x320] sm:$0xff] }
 0x264   : > { %6962 = vmatpush.bf16.msra.mxu2 %v8994_v37  ;;  %v9017_v37 = vld [vmem:[%s10351_s29 + $0x368] sm:$0xff] }
 0x265   : > { %6981 = vmatpush.bf16.msra.mxu3 %v9002_v43  ;;  %v9032_v43 = vld [vmem:[%s10351_s29 + $0x3e0] sm:$0xff] }
 0x266   : > { %6925 = vmatpush.bf16.msra.mxu0 %v8977_v45  ;;  %v7722_v45 = vld [vmem:[%s11043_s0 + $0x120] sm:$0xf] }
 0x267   : > { %6944 = vmatpush.bf16.msra.mxu1 %v8985_v46  ;;  %v8896_v46 = vld [vmem:[%s11043_s0 + $0x19c] sm:$0xf0] }
 0x268   : > { %6963 = vmatpush.bf16.msra.mxu2 %v8993_v44  ;;  %v9023_v44 = vld [vmem:[%s10351_s29 + $0x398] sm:$0xff]  ;;  %v7723_v57 = vor.u32 %v8896_v46, %v7722_v45 }
 0x269   : > { %6982 = vmatpush.bf16.msra.mxu3 %v9001_v47  ;;  %v9015_v47 = vld [vmem:[%s10351_s29 + $0x358] sm:$0xff] }
 0x26a   : > { %6926 = vmatpush.bf16.msra.mxu0 %v8976_v49  ;;  %v7724_v49 = vld [vmem:[%s11043_s0 + $0x1a0] sm:$0xf0]  ;;  %v8899_v45 = vld [vmem:[%s11043_s0 + $0x1b4] sm:$0xf0]  ;;  %v8883_v46 = vld [vmem:[%s11043_s0 + $0x13c] sm:$0xf] }
 0x26b   : > { %6945 = vmatpush.bf16.msra.mxu1 %v8984_v50  ;;  %v7730_v50 = vld [vmem:[%s11043_s0 + $0x128] sm:$0xf] }
 0x26c   : > { %6964 = vmatpush.bf16.msra.mxu2 %v8992_v48  ;;  %v8880_v48 = vld [vmem:[%s11043_s0 + $0x124] sm:$0xf] }
 0x26d   : > { %6983 = vmatpush.bf16.msra.mxu3 %v9000_v51  ;;  %6860 = vmatmul.bf16.gmra.mxu0 %v7707_v0  ;;  %v8897_v51 = vld [vmem:[%s11043_s0 + $0x1a4] sm:$0xf0]  ;;  %v7727_v59 = vor.u32 %v8880_v48, %v7724_v49  ;;  %v7748_v48 = vld [vmem:[%s11043_s0 + $0x1b8] sm:$0xf0]  ;;  %v9038_v49 = vld [vmem:[%s10351_s29 + $0x410] sm:$0xff] }
 0x26e   : > { %6927 = vmatpush.bf16.msra.mxu0 %v8975_v60  ;;  %6879 = vmatmul.bf16.gmra.mxu1 %v7711_v2  ;;  %v7731_v60 = vor.u32 %v8897_v51, %v7730_v50  ;;  %v9021_v0 = vld [vmem:[%s10351_s29 + $0x388] sm:$0xff]  ;;  %v9046_v50 = vld [vmem:[%s10351_s29 + $0x450] sm:$0xff] }
 0x26f   : > { %6946 = vmatpush.bf16.msra.mxu1 %v8983_v62  ;;  %6898 = vmatmul.bf16.gmra.mxu2 %v7715_v3  ;;  %v9006_v62 = vld [vmem:[%s10351_s29 + $0x310] sm:$0xff]  ;;  %v9005_v2 = vld [vmem:[%s10351_s29 + $0x308] sm:$0xff] }
 0x270   : > { %6965 = vmatpush.bf16.msra.mxu2 %v8991_v54  ;;  %6917 = vmatmul.bf16.gmra.mxu3 %v7719_v4  ;;  %v7732_v54 = vld [vmem:[%s11043_s0 + $0x1a8] sm:$0xf0]  ;;  %v9020_v4 = vld [vmem:[%s10351_s29 + $0x380] sm:$0xff] }
 0x271   : > { %6984 = vmatpush.bf16.msra.mxu3 %v8999_v63  ;;  %v7735_v61 = vor.u32 %v8881_v52, %v7732_v54  ;;  %v9030_v63 = vld [vmem:[%s10351_s29 + $0x3d0] sm:$0xff]  ;;  %v9029_v3 = vld [vmem:[%s10351_s29 + $0x3c8] sm:$0xff] }
 0x272   : > { %6928 = vmatpush.bf16.msra.mxu0 %v8974_v5  ;;  %v9012_v5 = vld [vmem:[%s10351_s29 + $0x340] sm:$0xff]  ;;  %v9062_v52 = vld [vmem:[%s10351_s29 + $0x4d0] sm:$0xff] }
 0x273   : > { %6947 = vmatpush.bf16.msra.mxu1 %v8982_v6  ;;  %v9059_v6 = vld [vmem:[%s10351_s29 + $0x4b8] sm:$0xff] }
 0x274   : > { %6966 = vmatpush.bf16.msra.mxu2 %v8990_v1  ;;  %v9013_v1 = vld [vmem:[%s10351_s29 + $0x348] sm:$0xff] }
 0x275   : > { %6985 = vmatpush.bf16.msra.mxu3 %v8998_v7  ;;  %v9051_v7 = vld [vmem:[%s10351_s29 + $0x478] sm:$0xff] }
 0x276   : > { %6929 = vmatpush.bf16.msra.mxu0 %v8973_v9  ;;  %v9028_v9 = vld [vmem:[%s10351_s29 + $0x3c0] sm:$0xff] }
 0x277   : > { %6948 = vmatpush.bf16.msra.mxu1 %v8981_v10  ;;  %v9043_v10 = vld [vmem:[%s10351_s29 + $0x438] sm:$0xff] }
 0x278   : > { %6967 = vmatpush.bf16.msra.mxu2 %v8989_v8  ;;  %v9004_v8 = vld [vmem:[%s10351_s29 + $0x300] sm:$0xff] }
 0x279   : > { %6986 = vmatpush.bf16.msra.mxu3 %v8997_v11  ;;  %v7610_v11 = vld [vmem:[%s11043_s0 + $0x30] sm:$0xf] }
 0x27a   : > { %6930 = vmatpush.bf16.msra.mxu0 %v8972_v14  ;;  %v8866_v14 = vld [vmem:[%s11043_s0 + $0xac] sm:$0xf0] }
 0x27b   : > { %6949 = vmatpush.bf16.msra.mxu1 %v8980_v15  ;;  %v8850_v15 = vld [vmem:[%s11043_s0 + $0x34] sm:$0xf] }
 0x27c   : > { %6968 = vmatpush.bf16.msra.mxu2 %v8988_v12  ;;  %v9067_v12 = vld [vmem:[%s10351_s29 + $0x4f8] sm:$0xff]  ;;  %v7615_v25 = vor.u32 %v8850_v15, %v7612_v17  ;;  %v7636_v15 = vld [vmem:[%s11043_s0 + $0xc8] sm:$0xf0] }
 0x27d   : > { %6987 = vmatpush.bf16.msra.mxu3 %v8996_v16  ;;  %6931 = vmatmul.bf16.vlgmr.msra.gmra.mxu0 %v7595_v29  ;;  %v9050_v16 = vld [vmem:[%s10351_s29 + $0x470] sm:$0xff]  ;;  %v9041_v29 = vld [vmem:[%s10351_s29 + $0x428] sm:$0xff] }
 0x27e   : > { %6999 = vmatpush.bf16.msrb.mxu0 %v9011_v19  ;;  %6950 = vmatmul.bf16.vlgmr.msra.gmra.mxu1 %v7599_v31  ;;  %v8867_v19 = vld [vmem:[%s11043_s0 + $0xb4] sm:$0xf0]  ;;  %v9065_v31 = vld [vmem:[%s10351_s29 + $0x4e8] sm:$0xff] }
 0x27f   : > { %7018 = vmatpush.bf16.msrb.mxu1 %v9019_v20  ;;  %6969 = vmatmul.bf16.vlgmr.msra.gmra.mxu2 %v7603_v32  ;;  %v8851_v20 = vld [vmem:[%s11043_s0 + $0x3c] sm:$0xf]  ;;  %v7619_v26 = vor.u32 %v8867_v19, %v7618_v18  ;;  %v9056_v32 = vld [vmem:[%s10351_s29 + $0x4a0] sm:$0xff]  ;;  %v9089_v17 = vld [vmem:[%s10351_s29 + $0x5a8] sm:$0xff] }
 0x280   : > { %7037 = vmatpush.bf16.msrb.mxu2 %v9027_v13  ;;  %6988 = vmatmul.bf16.vlgmr.msra.gmra.mxu3 %v7607_v33  ;;  %v9058_v13 = vld [vmem:[%s10351_s29 + $0x4b0] sm:$0xff]  ;;  %v7623_v27 = vor.u32 %v8851_v20, %v7620_v21  ;;  %v9040_v33 = vld [vmem:[%s10351_s29 + $0x420] sm:$0xff] }
 0x281   : > { %7056 = vmatpush.bf16.msrb.mxu3 %v9035_v22  ;;  %v9042_v22 = vld [vmem:[%s10351_s29 + $0x430] sm:$0xff] }
 0x282   : > { %7000 = vmatpush.bf16.msrb.mxu0 %v9010_v34  ;;  %v9048_v34 = vld [vmem:[%s10351_s29 + $0x460] sm:$0xff] }
 0x283   : > { %7019 = vmatpush.bf16.msrb.mxu1 %v9018_v30  ;;  %v9049_v30 = vld [vmem:[%s10351_s29 + $0x468] sm:$0xff] }
 0x284   : > { %7038 = vmatpush.bf16.msrb.mxu2 %v9026_v23  ;;  %v7611_v23 = vor.u32 %v8866_v14, %v7610_v11  ;;  %v7634_v11 = vld [vmem:[%s11043_s0 + $0x48] sm:$0xf]  ;;  %v8853_v14 = vld [vmem:[%s11043_s0 + $0x4c] sm:$0xf] }
 0x285   : > { %7057 = vmatpush.bf16.msrb.mxu3 %v9034_v35  ;;  %v9064_v35 = vld [vmem:[%s10351_s29 + $0x4e0] sm:$0xff] }
 0x286   : > { %7001 = vmatpush.bf16.msrb.mxu0 %v9009_v38  ;;  %v9047_v38 = vld [vmem:[%s10351_s29 + $0x458] sm:$0xff] }
 0x287   : > { %7020 = vmatpush.bf16.msrb.mxu1 %v9017_v37  ;;  %v9039_v37 = vld [vmem:[%s10351_s29 + $0x418] sm:$0xff] }
 0x288   : > { %7039 = vmatpush.bf16.msrb.mxu2 %v9025_v36  ;;  %v9055_v36 = vld [vmem:[%s10351_s29 + $0x498] sm:$0xff] }
 0x289   : > { %7058 = vmatpush.bf16.msrb.mxu3 %v9033_v39  ;;  %v7738_v39 = vld [vmem:[%s11043_s0 + $0x130] sm:$0xf] }
 0x28a   : > { %7002 = vmatpush.bf16.msrb.mxu0 %v9008_v42  ;;  %v8882_v42 = vld [vmem:[%s11043_s0 + $0x134] sm:$0xf] }
 0x28b   : > { %7021 = vmatpush.bf16.msrb.mxu1 %v9016_v41  ;;  %v9063_v41 = vld [vmem:[%s10351_s29 + $0x4d8] sm:$0xff] }
 0x28c   : > { %7040 = vmatpush.bf16.msrb.mxu2 %v9024_v40  ;;  %v8898_v40 = vld [vmem:[%s11043_s0 + $0x1ac] sm:$0xf0] }
 0x28d   : > { %7059 = vmatpush.bf16.msrb.mxu3 %v9032_v43  ;;  %6936 = vmatmul.bf16.gmra.mxu0 %v7723_v57  ;;  %v7740_v43 = vld [vmem:[%s11043_s0 + $0x1b0] sm:$0xf0]  ;;  %v7739_v51 = vor.u32 %v8898_v40, %v7738_v39  ;;  %v9037_v57 = vld [vmem:[%s10351_s29 + $0x408] sm:$0xff]  ;;  %v9079_v40 = vld [vmem:[%s10351_s29 + $0x558] sm:$0xff] }
 0x28e   : > { %7003 = vmatpush.bf16.msrb.mxu0 %v9007_v53  ;;  %6955 = vmatmul.bf16.gmra.mxu1 %v7727_v59  ;;  %v7743_v53 = vor.u32 %v8882_v42, %v7740_v43  ;;  %v9061_v59 = vld [vmem:[%s10351_s29 + $0x4c8] sm:$0xff]  ;;  %v7754_v42 = vld [vmem:[%s11043_s0 + $0x140] sm:$0xf] }
 0x28f   : > { %7022 = vmatpush.bf16.msrb.mxu1 %v9015_v47  ;;  %6974 = vmatmul.bf16.gmra.mxu2 %v7731_v60  ;;  %v9054_v47 = vld [vmem:[%s10351_s29 + $0x490] sm:$0xff]  ;;  %v9052_v60 = vld [vmem:[%s10351_s29 + $0x480] sm:$0xff] }
 0x290   : > { %7041 = vmatpush.bf16.msrb.mxu2 %v9023_v44  ;;  %6993 = vmatmul.bf16.gmra.mxu3 %v7735_v61  ;;  %v7746_v44 = vld [vmem:[%s11043_s0 + $0x138] sm:$0xf]  ;;  %v9036_v61 = vld [vmem:[%s10351_s29 + $0x400] sm:$0xff] }
 0x291   : > { %7060 = vmatpush.bf16.msrb.mxu3 %v9031_v55  ;;  %v7747_v54 = vor.u32 %v8899_v45, %v7746_v44  ;;  %v7751_v55 = vor.u32 %v8883_v46, %v7748_v48  ;;  %v8900_v43 = vld [vmem:[%s11043_s0 + $0x1bc] sm:$0xf0]  ;;  %v9086_v44 = vld [vmem:[%s10351_s29 + $0x590] sm:$0xff]  ;;  %v8884_v45 = vld [vmem:[%s11043_s0 + $0x144] sm:$0xf] }
 0x292   : > { %7004 = vmatpush.bf16.msrb.mxu0 %v9006_v62  ;;  %v9044_v62 = vld [vmem:[%s10351_s29 + $0x440] sm:$0xff]  ;;  %v8901_v48 = vld [vmem:[%s11043_s0 + $0x1c4] sm:$0xf0] }
 0x293   : > { %7023 = vmatpush.bf16.msrb.mxu1 %v9014_v58  ;;  %v9045_v58 = vld [vmem:[%s10351_s29 + $0x448] sm:$0xff]  ;;  %v7756_v46 = vld [vmem:[%s11043_s0 + $0x1c0] sm:$0xf0] }
 0x294   : > { %7042 = vmatpush.bf16.msrb.mxu2 %v9022_v56  ;;  %v9053_v56 = vld [vmem:[%s10351_s29 + $0x488] sm:$0xff] }
 0x295   : > { %7061 = vmatpush.bf16.msrb.mxu3 %v9030_v63  ;;  %v9060_v63 = vld [vmem:[%s10351_s29 + $0x4c0] sm:$0xff] }
 0x296   : > { %7005 = vmatpush.bf16.msrb.mxu0 %v9005_v2  ;;  %v9083_v2 = vld [vmem:[%s10351_s29 + $0x578] sm:$0xff] }
 0x297   : > { %7024 = vmatpush.bf16.msrb.mxu1 %v9013_v1  ;;  %v9075_v1 = vld [vmem:[%s10351_s29 + $0x538] sm:$0xff] }
 0x298   : > { %7043 = vmatpush.bf16.msrb.mxu2 %v9021_v0  ;;  %v9091_v0 = vld [vmem:[%s10351_s29 + $0x5b8] sm:$0xff] }
 0x299   : > { %7062 = vmatpush.bf16.msrb.mxu3 %v9029_v3  ;;  %v9099_v3 = vld [vmem:[%s10351_s29 + $0x5f8] sm:$0xff] }
 0x29a   : > { %7006 = vmatpush.bf16.msrb.mxu0 %v9004_v8  ;;  %v7628_v8 = vld [vmem:[%s11043_s0 + $0xc0] sm:$0xf0] }
 0x29b   : > { %7025 = vmatpush.bf16.msrb.mxu1 %v9012_v5  ;;  %v8868_v5 = vld [vmem:[%s11043_s0 + $0xbc] sm:$0xf0] }
 0x29c   : > { %7044 = vmatpush.bf16.msrb.mxu2 %v9020_v4  ;;  %v7626_v4 = vld [vmem:[%s11043_s0 + $0x40] sm:$0xf] }
 0x29d   : > { %7063 = vmatpush.bf16.msrb.mxu3 %v9028_v9  ;;  %7007 = vmatmul.bf16.vlgmr.msrb.gmra.mxu0 %v7611_v23  ;;  %v9074_v9 = vld [vmem:[%s10351_s29 + $0x530] sm:$0xff]  ;;  %v7639_v23 = vor.u32 %v8853_v14, %v7636_v15 }
 0x29e   : > { %7075 = vmatpush.bf16.msra.mxu0 %v9043_v10  ;;  %7026 = vmatmul.bf16.vlgmr.msrb.gmra.mxu1 %v7615_v25  ;;  %v9082_v10 = vld [vmem:[%s10351_s29 + $0x570] sm:$0xff]  ;;  %v9081_v25 = vld [vmem:[%s10351_s29 + $0x568] sm:$0xff] }
 0x29f   : > { %7094 = vmatpush.bf16.msra.mxu1 %v9051_v7  ;;  %7045 = vmatmul.bf16.vlgmr.msrb.gmra.mxu2 %v7619_v26  ;;  %v9090_v7 = vld [vmem:[%s10351_s29 + $0x5b0] sm:$0xff]  ;;  %v9097_v26 = vld [vmem:[%s10351_s29 + $0x5e8] sm:$0xff] }
 0x2a0   : > { %7113 = vmatpush.bf16.msra.mxu2 %v9059_v6  ;;  %7064 = vmatmul.bf16.vlgmr.msrb.gmra.mxu3 %v7623_v27  ;;  %v8852_v6 = vld [vmem:[%s11043_s0 + $0x44] sm:$0xf] }
 0x2a1   : > { %7132 = vmatpush.bf16.msra.mxu3 %v9067_v12  ;;  %v8869_v12 = vld [vmem:[%s11043_s0 + $0xc4] sm:$0xf0]  ;;  %v7631_v20 = vor.u32 %v8852_v6, %v7628_v8  ;;  %v9088_v27 = vld [vmem:[%s10351_s29 + $0x5a0] sm:$0xff]  ;;  %v9123_v6 = vld [vmem:[%s10351_s29 + $0x6b8] sm:$0xff] }
 0x2a2   : > { %7076 = vmatpush.bf16.msra.mxu0 %v9042_v22  ;;  %v7635_v21 = vor.u32 %v8869_v12, %v7634_v11  ;;  %v9076_v8 = vld [vmem:[%s10351_s29 + $0x540] sm:$0xff]  ;;  %v9107_v12 = vld [vmem:[%s10351_s29 + $0x638] sm:$0xff] }
 0x2a3   : > { %7095 = vmatpush.bf16.msra.mxu1 %v9050_v16  ;;  %v7627_v16 = vor.u32 %v8868_v5, %v7626_v4  ;;  %v9093_v4 = vld [vmem:[%s10351_s29 + $0x5c8] sm:$0xff]  ;;  %v9084_v5 = vld [vmem:[%s10351_s29 + $0x580] sm:$0xff] }
 0x2a4   : > { %7114 = vmatpush.bf16.msra.mxu2 %v9058_v13  ;;  %v9098_v13 = vld [vmem:[%s10351_s29 + $0x5f0] sm:$0xff] }
 0x2a5   : > { %7133 = vmatpush.bf16.msra.mxu3 %v9066_v24  ;;  %v9073_v24 = vld [vmem:[%s10351_s29 + $0x528] sm:$0xff] }
 0x2a6   : > { %7077 = vmatpush.bf16.msra.mxu0 %v9041_v29  ;;  %v9080_v29 = vld [vmem:[%s10351_s29 + $0x560] sm:$0xff] }
 0x2a7   : > { %7096 = vmatpush.bf16.msra.mxu1 %v9049_v30  ;;  %v9096_v30 = vld [vmem:[%s10351_s29 + $0x5e0] sm:$0xff] }
 0x2a8   : > { %7115 = vmatpush.bf16.msra.mxu2 %v9057_v28  ;;  %v9072_v28 = vld [vmem:[%s10351_s29 + $0x520] sm:$0xff] }
 0x2a9   : > { %7134 = vmatpush.bf16.msra.mxu3 %v9065_v31 }
 0x2aa   : > { %7078 = vmatpush.bf16.msra.mxu0 %v9040_v33  ;;  %v9087_v33 = vld [vmem:[%s10351_s29 + $0x598] sm:$0xff] }
 0x2ab   : > { %7097 = vmatpush.bf16.msra.mxu1 %v9048_v34 }
 0x2ac   : > { %7116 = vmatpush.bf16.msra.mxu2 %v9056_v32 }
 0x2ad   : > { %7135 = vmatpush.bf16.msra.mxu3 %v9064_v35  ;;  %7012 = vmatmul.bf16.gmra.mxu0 %v7739_v51  ;;  %v7764_v51 = vld [vmem:[%s11043_s0 + $0x1c8] sm:$0xf0] }
 0x2ae   : > { %7079 = vmatpush.bf16.msra.mxu0 %v9039_v37  ;;  %7031 = vmatmul.bf16.gmra.mxu1 %v7743_v53  ;;  %v9094_v53 = vld [vmem:[%s10351_s29 + $0x5d0] sm:$0xff] }
 0x2af   : > { %7098 = vmatpush.bf16.msra.mxu1 %v9047_v38  ;;  %7050 = vmatmul.bf16.gmra.mxu2 %v7747_v54  ;;  %v9071_v38 = vld [vmem:[%s10351_s29 + $0x518] sm:$0xff] }
 0x2b0   : > { %7117 = vmatpush.bf16.msra.mxu2 %v9055_v36  ;;  %7069 = vmatmul.bf16.gmra.mxu3 %v7751_v55 }
 0x2b1   : > { %7136 = vmatpush.bf16.msra.mxu3 %v9063_v41  ;;  %v9095_v41 = vld [vmem:[%s10351_s29 + $0x5d8] sm:$0xff] }
 0x2b2   : > { %7080 = vmatpush.bf16.msra.mxu0 %v9038_v49  ;;  %v8885_v49 = vld [vmem:[%s11043_s0 + $0x14c] sm:$0xf] }
 0x2b3   : > { %7099 = vmatpush.bf16.msra.mxu1 %v9046_v50  ;;  %v9070_v50 = vld [vmem:[%s10351_s29 + $0x510] sm:$0xff] }
 0x2b4   : > { %7118 = vmatpush.bf16.msra.mxu2 %v9054_v47  ;;  %v7762_v47 = vld [vmem:[%s11043_s0 + $0x148] sm:$0xf] }
 0x2b5   : > { %7137 = vmatpush.bf16.msra.mxu3 %v9062_v52  ;;  %v9078_v52 = vld [vmem:[%s10351_s29 + $0x550] sm:$0xff] }
 0x2b6   : > { %7081 = vmatpush.bf16.msra.mxu0 %v9037_v57  ;;  %v9085_v57 = vld [vmem:[%s10351_s29 + $0x588] sm:$0xff] }
 0x2b7   : > { %7100 = vmatpush.bf16.msra.mxu1 %v9045_v58 }
 0x2b8   : > { %7119 = vmatpush.bf16.msra.mxu2 %v9053_v56  ;;  %v7755_v56 = vor.u32 %v8900_v43, %v7754_v42 }
 0x2b9   : > { %7138 = vmatpush.bf16.msra.mxu3 %v9061_v59 }
 0x2ba   : > { %7082 = vmatpush.bf16.msra.mxu0 %v9036_v61  ;;  %v6780_v18 = vpop.f32.mrf.mxu0  ;;  %v7759_v61 = vor.u32 %v8884_v45, %v7756_v46  ;;  %v9105_v45 = vld [vmem:[%s10351_s29 + $0x628] sm:$0xff] }
 0x2bb   : > { %7101 = vmatpush.bf16.msra.mxu1 %v9044_v62  ;;  %v6799_v19 = vpop.f32.mrf.mxu1  ;;  %v7763_v62 = vor.u32 %v8901_v48, %v7762_v47  ;;  %v9129_v47 = vld [vmem:[%s10351_s29 + $0x6e8] sm:$0xff]  ;;  %v9120_v48 = vld [vmem:[%s10351_s29 + $0x6a0] sm:$0xff] }
 0x2bc   : > { %7120 = vmatpush.bf16.msra.mxu2 %v9052_v60  ;;  %v6800_v22 = vadd.f32 %v6799_v19, %v6780_v18  ;;  %v9122_v18 = vld [vmem:[%s10351_s29 + $0x6b0] sm:$0xff] }
 0x2bd   : > { %7139 = vmatpush.bf16.msra.mxu3 %v9060_v63  ;;  %7083 = vmatmul.bf16.vlgmr.msra.gmra.mxu0 %v7627_v16 }
 0x2be   : > { %7151 = vmatpush.bf16.msrb.mxu0 %v9075_v1  ;;  %7102 = vmatmul.bf16.vlgmr.msra.gmra.mxu1 %v7631_v20  ;;  %v9069_v1 = vld [vmem:[%s10351_s29 + $0x508] sm:$0xff] }
 0x2bf   : > { %7170 = vmatpush.bf16.msrb.mxu1 %v9083_v2  ;;  %7121 = vmatmul.bf16.vlgmr.msra.gmra.mxu2 %v7635_v21  ;;  %v7642_v21 = vld [vmem:[%s11043_s0 + $0x50] sm:$0xf] }
 0x2c0   : > { %7189 = vmatpush.bf16.msrb.mxu2 %v9091_v0  ;;  %7140 = vmatmul.bf16.vlgmr.msra.gmra.mxu3 %v7639_v23  ;;  %v7767_v0 = vor.u32 %v8885_v49, %v7764_v51  ;;  %v9106_v23 = vld [vmem:[%s10351_s29 + $0x630] sm:$0xff]  ;;  %v9128_v51 = vld [vmem:[%s10351_s29 + $0x6e0] sm:$0xff] }
 0x2c1   : > { %7208 = vmatpush.bf16.msrb.mxu3 %v9099_v3  ;;  %v9077_v3 = vld [vmem:[%s10351_s29 + $0x548] sm:$0xff] }
 0x2c2   : > { %7152 = vmatpush.bf16.msrb.mxu0 %v9074_v9  ;;  %v6818_v31 = vpop.f32.mrf.mxu2  ;;  %v6782_v35 = vpop.f32.mrf.mxu0  ;;  %v9092_v9 = vld [vmem:[%s10351_s29 + $0x5c0] sm:$0xff] }
 0x2c3   : > { %7171 = vmatpush.bf16.msrb.mxu1 %v9082_v10  ;;  %v6837_v32 = vpop.f32.mrf.mxu3  ;;  %v6819_v34 = vadd.f32 %v6818_v31, %v6800_v22  ;;  %v6801_v36 = vpop.f32.mrf.mxu1  ;;  %v8870_v22 = vld [vmem:[%s11043_s0 + $0xcc] sm:$0xf0]  ;;  %v8855_v31 = vld [vmem:[%s11043_s0 + $0x5c] sm:$0xf] }
 0x2c4   : > { %7190 = vmatpush.bf16.msrb.mxu2 %v9090_v7  ;;  %v6802_v37 = vadd.f32 %v6801_v36, %v6782_v35  ;;  %v9068_v7 = vld [vmem:[%s10351_s29 + $0x500] sm:$0xff]  ;;  %v7643_v35 = vor.u32 %v8870_v22, %v7642_v21  ;;  %v9113_v36 = vld [vmem:[%s10351_s29 + $0x668] sm:$0xff] }
 0x2c5   : > { %7209 = vmatpush.bf16.msrb.mxu3 %v9098_v13  ;;  %v10747_v39 = vadd.f32 %v6837_v32, %v6819_v34  ;;  %v9115_v13 = vld [vmem:[%s10351_s29 + $0x678] sm:$0xff] }
 0x2c6   : > { %7153 = vmatpush.bf16.msrb.mxu0 %v9073_v24  ;;  %v9114_v24 = vld [vmem:[%s10351_s29 + $0x670] sm:$0xff]  ;;  %v7652_v32 = vld [vmem:[%s11043_s0 + $0xd8] sm:$0xf0] }
 0x2c7   : > { %7172 = vmatpush.bf16.msrb.mxu1 %v9081_v25  ;;  %v8854_v25 = vld [vmem:[%s11043_s0 + $0x54] sm:$0xf] }
 0x2c8   : > { %7191 = vmatpush.bf16.msrb.mxu2 %v9089_v17  ;;  %v9131_v17 = vld [vmem:[%s10351_s29 + $0x6f8] sm:$0xff] }
 0x2c9   : > { %7210 = vmatpush.bf16.msrb.mxu3 %v9097_v26  ;;  %v9130_v26 = vld [vmem:[%s10351_s29 + $0x6f0] sm:$0xff] }
 0x2ca   : > { %7154 = vmatpush.bf16.msrb.mxu0 %v9072_v28  ;;  %v6820_v54 = vpop.f32.mrf.mxu2  ;;  %v6785_v59 = vpop.f32.mrf.mxu0  ;;  %v7644_v28 = vld [vmem:[%s11043_s0 + $0xd0] sm:$0xf0] }
 0x2cb   : > { %7173 = vmatpush.bf16.msrb.mxu1 %v9080_v29  ;;  %v6839_v55 = vpop.f32.mrf.mxu3  ;;  %v6821_v58 = vadd.f32 %v6820_v54, %v6802_v37  ;;  %v6804_v60 = vpop.f32.mrf.mxu1  ;;  %v7650_v29 = vld [vmem:[%s11043_s0 + $0x58] sm:$0xf] }
 0x2cc   : > { %7192 = vmatpush.bf16.msrb.mxu2 %v9088_v27  ;;  %v6805_v63 = vadd.f32 %v6804_v60, %v6785_v59  ;;  %v9121_v27 = vld [vmem:[%s10351_s29 + $0x6a8] sm:$0xff]  ;;  %v9111_v54 = vld [vmem:[%s10351_s29 + $0x658] sm:$0xff] }
 0x2cd   : > { %7211 = vmatpush.bf16.msrb.mxu3 %v9096_v30  ;;  %v10781_v2 = vadd.f32 %v6839_v55, %v6821_v58  ;;  %7088 = vmatmul.bf16.gmra.mxu0 %v7755_v56  ;;  %v8871_v30 = vld [vmem:[%s11043_s0 + $0xd4] sm:$0xf0] }
 0x2ce   : > { %7155 = vmatpush.bf16.msrb.mxu0 %v9071_v38  ;;  %7107 = vmatmul.bf16.gmra.mxu1 %v7759_v61  ;;  %v9103_v60 = vld [vmem:[%s10351_s29 + $0x618] sm:$0xff] }
 0x2cf   : > { %7174 = vmatpush.bf16.msrb.mxu1 %v9079_v40  ;;  %7126 = vmatmul.bf16.gmra.mxu2 %v7763_v62  ;;  %v7647_v40 = vor.u32 %v8854_v25, %v7644_v28  ;;  %v9127_v62 = vld [vmem:[%s10351_s29 + $0x6d8] sm:$0xff]  ;;  %v9101_v25 = vld [vmem:[%s10351_s29 + $0x608] sm:$0xff]  ;;  %v9116_v28 = vld [vmem:[%s10351_s29 + $0x680] sm:$0xff] }
 0x2d0   : > { %7193 = vmatpush.bf16.msrb.mxu2 %v9087_v33  ;;  %7145 = vmatmul.bf16.gmra.mxu3 %v7767_v0 }
 0x2d1   : > { %7212 = vmatpush.bf16.msrb.mxu3 %v9095_v41  ;;  %v7651_v41 = vor.u32 %v8871_v30, %v7650_v29  ;;  %v9108_v30 = vld [vmem:[%s10351_s29 + $0x640] sm:$0xff] }
 0x2d2   : > { %7156 = vmatpush.bf16.msrb.mxu0 %v9070_v50  ;;  %v6823_v10 = vpop.f32.mrf.mxu2  ;;  %v6787_v15 = vpop.f32.mrf.mxu0  ;;  %v9112_v50 = vld [vmem:[%s10351_s29 + $0x660] sm:$0xff] }
 0x2d3   : > { %7175 = vmatpush.bf16.msrb.mxu1 %v9078_v52  ;;  %v6842_v11 = vpop.f32.mrf.mxu3  ;;  %v6824_v14 = vadd.f32 %v6823_v10, %v6805_v63  ;;  %v6806_v16 = vpop.f32.mrf.mxu1  ;;  %v9119_v52 = vld [vmem:[%s10351_s29 + $0x698] sm:$0xff]  ;;  %v9118_v63 = vld [vmem:[%s10351_s29 + $0x690] sm:$0xff] }
 0x2d4   : > { %7194 = vmatpush.bf16.msrb.mxu2 %v9086_v44  ;;  %v6807_v19 = vadd.f32 %v6806_v16, %v6787_v15  ;;  %v7655_v44 = vor.u32 %v8855_v31, %v7652_v32  ;;  %v7780_v10 = vld [vmem:[%s11043_s0 + $0x1d8] sm:$0xf0]  ;;  %v9109_v15 = vld [vmem:[%s10351_s29 + $0x648] sm:$0xff]  ;;  %v9100_v32 = vld [vmem:[%s10351_s29 + $0x600] sm:$0xff] }
 0x2d5   : > { %7213 = vmatpush.bf16.msrb.mxu3 %v9094_v53  ;;  %v10794_v20 = vadd.f32 %v6842_v11, %v6824_v14  ;;  %v9126_v11 = vld [vmem:[%s10351_s29 + $0x6d0] sm:$0xff]  ;;  %v9147_v31 = vld [vmem:[%s10351_s29 + $0x778] sm:$0xff] }
 0x2d6   : > { %7157 = vmatpush.bf16.msrb.mxu0 %v9069_v1  ;;  %v7770_v1 = vld [vmem:[%s11043_s0 + $0x150] sm:$0xf] }
 0x2d7   : > { %7176 = vmatpush.bf16.msrb.mxu1 %v9077_v3  ;;  %v9110_v3 = vld [vmem:[%s10351_s29 + $0x650] sm:$0xff] }
 0x2d8   : > { %7195 = vmatpush.bf16.msrb.mxu2 %v9085_v57 }
 0x2d9   : > { %7214 = vmatpush.bf16.msrb.mxu3 %v9093_v4  ;;  %v8886_v4 = vld [vmem:[%s11043_s0 + $0x154] sm:$0xf] }
 0x2da   : > { %7158 = vmatpush.bf16.msrb.mxu0 %v9068_v7  ;;  %v6825_v33 = vpop.f32.mrf.mxu2  ;;  %v6856_v38 = vpop.f32.mrf.mxu0  ;;  %v8903_v7 = vld [vmem:[%s11043_s0 + $0x1d4] sm:$0xf0] }
 0x2db   : > { %7177 = vmatpush.bf16.msrb.mxu1 %v9076_v8  ;;  %v6844_v34 = vpop.f32.mrf.mxu3  ;;  %v6826_v37 = vadd.f32 %v6825_v33, %v6807_v19  ;;  %v6857_v42 = vadd.f32 %v6856_v38, %v10747_v39  ;;  %v6875_v43 = vpop.f32.mrf.mxu1  ;;  %v9104_v39 = vld [vmem:[%s10351_s29 + $0x620] sm:$0xff]  ;;  %v8887_v8 = vld [vmem:[%s11043_s0 + $0x15c] sm:$0xf] }
 0x2dc   : > { %7196 = vmatpush.bf16.msrb.mxu2 %v9084_v5  ;;  %v7772_v5 = vld [vmem:[%s11043_s0 + $0x1d0] sm:$0xf0]  ;;  %v9124_v33 = vld [vmem:[%s10351_s29 + $0x6c0] sm:$0xff] }
 0x2dd   : > { %7215 = vmatpush.bf16.msrb.mxu3 %v9092_v9  ;;  %v10827_v46 = vadd.f32 %v6844_v34, %v6826_v37  ;;  %v6876_v49 = vadd.f32 %v6875_v43, %v6857_v42  ;;  %7159 = vmatmul.bf16.vlgmr.msrb.gmra.mxu0 %v7643_v35  ;;  %v9102_v9 = vld [vmem:[%s10351_s29 + $0x610] sm:$0xff]  ;;  %v7775_v19 = vor.u32 %v8886_v4, %v7772_v5  ;;  %v9139_v34 = vld [vmem:[%s10351_s29 + $0x738] sm:$0xff] }
 0x2de   : > { %7227 = vmatpush.bf16.msra.mxu0 %v9107_v12  ;;  %7178 = vmatmul.bf16.vlgmr.msrb.gmra.mxu1 %v7647_v40  ;;  %v9117_v12 = vld [vmem:[%s10351_s29 + $0x688] sm:$0xff]  ;;  %v9154_v37 = vld [vmem:[%s10351_s29 + $0x7b0] sm:$0xff] }
 0x2df   : > { %7246 = vmatpush.bf16.msra.mxu1 %v9115_v13  ;;  %7197 = vmatmul.bf16.vlgmr.msrb.gmra.mxu2 %v7651_v41  ;;  %v9146_v42 = vld [vmem:[%s10351_s29 + $0x770] sm:$0xff] }
 0x2e0   : > { %7265 = vmatpush.bf16.msra.mxu2 %v9123_v6  ;;  %7216 = vmatmul.bf16.vlgmr.msrb.gmra.mxu3 %v7655_v44  ;;  %v7778_v6 = vld [vmem:[%s11043_s0 + $0x158] sm:$0xf] }
 0x2e1   : > { %7284 = vmatpush.bf16.msra.mxu3 %v9131_v17  ;;  %v7779_v21 = vor.u32 %v8903_v7, %v7778_v6  ;;  %v9152_v7 = vld [vmem:[%s10351_s29 + $0x7a0] sm:$0xff] }
 0x2e2   : > { %7228 = vmatpush.bf16.msra.mxu0 %v9106_v23  ;;  %v6894_v53 = vpop.f32.mrf.mxu2  ;;  %v6858_v57 = vpop.f32.mrf.mxu0 }
 0x2e3   : > { %7247 = vmatpush.bf16.msra.mxu1 %v9114_v24  ;;  %v6895_v55 = vadd.f32 %v6894_v53, %v6876_v49  ;;  %v6913_v56 = vpop.f32.mrf.mxu3  ;;  %v6859_v58 = vadd.f32 %v6858_v57, %v10781_v2  ;;  %v6877_v59 = vpop.f32.mrf.mxu1  ;;  %v8902_v2 = vld [vmem:[%s11043_s0 + $0x1cc] sm:$0xf0]  ;;  %v7783_v24 = vor.u32 %v8887_v8, %v7780_v10  ;;  %v7658_v49 = vld [vmem:[%s11043_s0 + $0x60] sm:$0xf]  ;;  %v7660_v53 = vld [vmem:[%s11043_s0 + $0xe0] sm:$0xf0] }
 0x2e4   : > { %7266 = vmatpush.bf16.msra.mxu2 %v9122_v18  ;;  %v7771_v14 = vor.u32 %v8902_v2, %v7770_v1  ;;  %v7668_v57 = vld [vmem:[%s11043_s0 + $0xe8] sm:$0xf0]  ;;  %v9144_v10 = vld [vmem:[%s10351_s29 + $0x760] sm:$0xff] }
 0x2e5   : > { %7285 = vmatpush.bf16.msra.mxu3 %v9130_v26  ;;  %v10838_v61 = vadd.f32 %v6913_v56, %v6895_v55  ;;  %v6878_v0 = vadd.f32 %v6877_v59, %v6859_v58  ;;  %v8873_v55 = vld [vmem:[%s11043_s0 + $0xe4] sm:$0xf0]  ;;  %v8857_v56 = vld [vmem:[%s11043_s0 + $0x6c] sm:$0xf] }
 0x2e6   : > { %7229 = vmatpush.bf16.msra.mxu0 %v9105_v45  ;;  %v9137_v58 = vld [vmem:[%s10351_s29 + $0x728] sm:$0xff]  ;;  %v7671_v6 = vor.u32 %v8857_v56, %v7668_v57  ;;  %v9156_v56 = vld [vmem:[%s10351_s29 + $0x7c0] sm:$0xff] }
 0x2e7   : > { %7248 = vmatpush.bf16.msra.mxu1 %v9113_v36  ;;  %v9163_v36 = vld [vmem:[%s10351_s29 + $0x7f8] sm:$0xff] }
 0x2e8   : > { %7267 = vmatpush.bf16.msra.mxu2 %v9121_v27  ;;  %v9125_v27 = vld [vmem:[%s10351_s29 + $0x6c8] sm:$0xff] }
 0x2e9   : > { %7286 = vmatpush.bf16.msra.mxu3 %v9129_v47  ;;  %v9138_v47 = vld [vmem:[%s10351_s29 + $0x730] sm:$0xff] }
 0x2ea   : > { %7230 = vmatpush.bf16.msra.mxu0 %v9104_v39  ;;  %v6896_v13 = vpop.f32.mrf.mxu2  ;;  %v6861_v18 = vpop.f32.mrf.mxu0  ;;  %v9153_v39 = vld [vmem:[%s10351_s29 + $0x7a8] sm:$0xff] }
 0x2eb   : > { %7249 = vmatpush.bf16.msra.mxu1 %v9112_v50  ;;  %v6897_v16 = vadd.f32 %v6896_v13, %v6878_v0  ;;  %v6915_v17 = vpop.f32.mrf.mxu3  ;;  %v6862_v22 = vadd.f32 %v6861_v18, %v10794_v20  ;;  %v6880_v23 = vpop.f32.mrf.mxu1  ;;  %v9155_v20 = vld [vmem:[%s10351_s29 + $0x7b8] sm:$0xff]  ;;  %v9162_v50 = vld [vmem:[%s10351_s29 + $0x7f0] sm:$0xff] }
 0x2ec   : > { %7268 = vmatpush.bf16.msra.mxu2 %v9120_v48  ;;  %v9135_v13 = vld [vmem:[%s10351_s29 + $0x718] sm:$0xff] }
 0x2ed   : > { %7287 = vmatpush.bf16.msra.mxu3 %v9128_v51  ;;  %v10873_v26 = vadd.f32 %v6915_v17, %v6897_v16  ;;  %v6881_v29 = vadd.f32 %v6880_v23, %v6862_v22  ;;  %7164 = vmatmul.bf16.gmra.mxu0 %v7771_v14  ;;  %v8856_v51 = vld [vmem:[%s11043_s0 + $0x64] sm:$0xf]  ;;  %v9143_v14 = vld [vmem:[%s10351_s29 + $0x758] sm:$0xff]  ;;  %v9150_v23 = vld [vmem:[%s10351_s29 + $0x790] sm:$0xff] }
 0x2ee   : > { %7231 = vmatpush.bf16.msra.mxu0 %v9103_v60  ;;  %7183 = vmatmul.bf16.gmra.mxu1 %v7775_v19  ;;  %v7663_v2 = vor.u32 %v8856_v51, %v7660_v53  ;;  %v9159_v16 = vld [vmem:[%s10351_s29 + $0x7d8] sm:$0xff]  ;;  %v9148_v51 = vld [vmem:[%s10351_s29 + $0x780] sm:$0xff] }
 0x2ef   : > { %7250 = vmatpush.bf16.msra.mxu1 %v9111_v54  ;;  %7202 = vmatmul.bf16.gmra.mxu2 %v7779_v21  ;;  %v7666_v54 = vld [vmem:[%s11043_s0 + $0x68] sm:$0xf]  ;;  %v9132_v53 = vld [vmem:[%s10351_s29 + $0x700] sm:$0xff] }
 0x2f0   : > { %7269 = vmatpush.bf16.msra.mxu2 %v9119_v52  ;;  %7221 = vmatmul.bf16.gmra.mxu3 %v7783_v24  ;;  %v9145_v52 = vld [vmem:[%s10351_s29 + $0x768] sm:$0xff] }
 0x2f1   : > { %7288 = vmatpush.bf16.msra.mxu3 %v9127_v62  ;;  %v9161_v62 = vld [vmem:[%s10351_s29 + $0x7e8] sm:$0xff] }
 0x2f2   : > { %7232 = vmatpush.bf16.msra.mxu0 %v9102_v9  ;;  %v6899_v35 = vpop.f32.mrf.mxu2  ;;  %v6863_v41 = vpop.f32.mrf.mxu0  ;;  %v9136_v9 = vld [vmem:[%s10351_s29 + $0x720] sm:$0xff] }
 0x2f3   : > { %7251 = vmatpush.bf16.msra.mxu1 %v9110_v3  ;;  %v6900_v38 = vadd.f32 %v6899_v35, %v6881_v29  ;;  %v6918_v40 = vpop.f32.mrf.mxu3  ;;  %v6864_v43 = vadd.f32 %v6863_v41, %v10827_v46  ;;  %v6882_v44 = vpop.f32.mrf.mxu1  ;;  %v8872_v46 = vld [vmem:[%s11043_s0 + $0xdc] sm:$0xf0]  ;;  %v7667_v3 = vor.u32 %v8873_v55, %v7666_v54  ;;  %v9149_v35 = vld [vmem:[%s10351_s29 + $0x788] sm:$0xff] }
 0x2f4   : > { %7270 = vmatpush.bf16.msra.mxu2 %v9118_v63  ;;  %v7659_v60 = vor.u32 %v8872_v46, %v7658_v49  ;;  %v7786_v29 = vld [vmem:[%s11043_s0 + $0x160] sm:$0xf] }
 0x2f5   : > { %7289 = vmatpush.bf16.msra.mxu3 %v9126_v11  ;;  %v10887_v45 = vadd.f32 %v6918_v40, %v6900_v38  ;;  %v6883_v48 = vadd.f32 %v6882_v44, %v6864_v43  ;;  %v9141_v38 = vld [vmem:[%s10351_s29 + $0x748] sm:$0xff]  ;;  %v9140_v54 = vld [vmem:[%s10351_s29 + $0x740] sm:$0xff] }
 0x2f6   : > { %7233 = vmatpush.bf16.msra.mxu0 %v9101_v25  ;;  %v9134_v25 = vld [vmem:[%s10351_s29 + $0x710] sm:$0xff] }
 0x2f7   : > { %7252 = vmatpush.bf16.msra.mxu1 %v9109_v15 }
 0x2f8   : > { %7271 = vmatpush.bf16.msra.mxu2 %v9117_v12  ;;  %v9160_v12 = vld [vmem:[%s10351_s29 + $0x7e0] sm:$0xff] }
 0x2f9   : > { %7290 = vmatpush.bf16.msra.mxu3 %v9125_v27  ;;  %v9142_v27 = vld [vmem:[%s10351_s29 + $0x750] sm:$0xff] }
 0x2fa   : > { %7234 = vmatpush.bf16.msra.mxu0 %v9100_v32  ;;  %v6901_v59 = vpop.f32.mrf.mxu2  ;;  %v6932_v1 = vpop.f32.mrf.mxu0  ;;  %v7794_v32 = vld [vmem:[%s11043_s0 + $0x168] sm:$0xf] }
 0x2fb   : > { %7253 = vmatpush.bf16.msra.mxu1 %v9108_v30  ;;  %v6902_v63 = vadd.f32 %v6901_v59, %v6883_v48  ;;  %v6920_v0 = vpop.f32.mrf.mxu3  ;;  %v6933_v4 = vadd.f32 %v6932_v1, %v10838_v61  ;;  %v6951_v5 = vpop.f32.mrf.mxu1  ;;  %v9151_v61 = vld [vmem:[%s10351_s29 + $0x798] sm:$0xff]  ;;  %v9158_v30 = vld [vmem:[%s10351_s29 + $0x7d0] sm:$0xff] }
 0x2fc   : > { %7272 = vmatpush.bf16.msra.mxu2 %v9116_v28  ;;  %v7674_v1 = vld [vmem:[%s11043_s0 + $0x70] sm:$0xf] }
 0x2fd   : > { %7291 = vmatpush.bf16.msra.mxu3 %v9124_v33  ;;  %v10921_v8 = vadd.f32 %v6920_v0, %v6902_v63  ;;  %v6952_v11 = vadd.f32 %v6951_v5, %v6933_v4  ;;  %7235 = vmatmul.bf16.vlgmr.msra.gmra.mxu0 %v7659_v60  ;;  %v8905_v33 = vld [vmem:[%s11043_s0 + $0x1e4] sm:$0xf0]  ;;  %v7676_v4 = vld [vmem:[%s11043_s0 + $0xf0] sm:$0xf0]  ;;  %v7682_v5 = vld [vmem:[%s11043_s0 + $0x78] sm:$0xf] }
 0x2fe   : > { %7303 = vmatpush.bf16.msrb.mxu0 %v9139_v34  ;;  %7254 = vmatmul.bf16.vlgmr.msra.gmra.mxu1 %v7663_v2  ;;  %v8889_v34 = vld [vmem:[%s11043_s0 + $0x16c] sm:$0xf]  ;;  %v7795_v49 = vor.u32 %v8905_v33, %v7794_v32  ;;  %v8874_v2 = vld [vmem:[%s11043_s0 + $0xec] sm:$0xf0]  ;;  %v7810_v32 = vld [vmem:[%s11043_s0 + $0x178] sm:$0xf] }
 0x2ff   : > { %7322 = vmatpush.bf16.msrb.mxu1 %v9147_v31  ;;  %7273 = vmatmul.bf16.vlgmr.msra.gmra.mxu2 %v7667_v3  ;;  %v7788_v31 = vld [vmem:[%s11043_s0 + $0x1e0] sm:$0xf0]  ;;  %v8858_v3 = vld [vmem:[%s11043_s0 + $0x74] sm:$0xf]  ;;  %v8907_v33 = vld [vmem:[%s11043_s0 + $0x1f4] sm:$0xf0] }
 0x300   : > { %7341 = vmatpush.bf16.msrb.mxu2 %v9155_v20  ;;  %7292 = vmatmul.bf16.vlgmr.msra.gmra.mxu3 %v7671_v6  ;;  %v8888_v20 = vld [vmem:[%s11043_s0 + $0x164] sm:$0xf]  ;;  %v8875_v6 = vld [vmem:[%s11043_s0 + $0xf4] sm:$0xf0] }
 0x301   : > { %7360 = vmatpush.bf16.msrb.mxu3 %v9163_v36  ;;  %v7796_v36 = vld [vmem:[%s11043_s0 + $0x1e8] sm:$0xf0]  ;;  %v7791_v48 = vor.u32 %v8888_v20, %v7788_v31  ;;  %v8890_v20 = vld [vmem:[%s11043_s0 + $0x174] sm:$0xf] }
 0x302   : > { %7304 = vmatpush.bf16.msrb.mxu0 %v9138_v47  ;;  %v6970_v15 = vpop.f32.mrf.mxu2  ;;  %v6934_v19 = vpop.f32.mrf.mxu0  ;;  %v7799_v46 = vor.u32 %v8889_v34, %v7796_v36  ;;  %v7804_v31 = vld [vmem:[%s11043_s0 + $0x1f0] sm:$0xf0]  ;;  %v8891_v34 = vld [vmem:[%s11043_s0 + $0x17c] sm:$0xf] }
 0x303   : > { %7323 = vmatpush.bf16.msrb.mxu1 %v9146_v42  ;;  %v6971_v17 = vadd.f32 %v6970_v15, %v6952_v11  ;;  %v6989_v18 = vpop.f32.mrf.mxu3  ;;  %v6935_v21 = vadd.f32 %v6934_v19, %v10873_v26  ;;  %v6953_v22 = vpop.f32.mrf.mxu1  ;;  %v8904_v26 = vld [vmem:[%s11043_s0 + $0x1dc] sm:$0xf0]  ;;  %v9157_v42 = vld [vmem:[%s10351_s29 + $0x7c8] sm:$0xff] }
 0x304   : > { %7342 = vmatpush.bf16.msrb.mxu2 %v9154_v37  ;;  %v9133_v37 = vld [vmem:[%s10351_s29 + $0x708] sm:$0xff]  ;;  %v7787_v41 = vor.u32 %v8904_v26, %v7786_v29 }
 0x305   : > { %7361 = vmatpush.bf16.msrb.mxu3 %v9162_v50  ;;  %v10932_v24 = vadd.f32 %v6989_v18, %v6971_v17  ;;  %v6954_v28 = vadd.f32 %v6953_v22, %v6935_v21 }
 0x306   : > { %7305 = vmatpush.bf16.msrb.mxu0 %v9137_v58 }
 0x307   : > { %7324 = vmatpush.bf16.msrb.mxu1 %v9145_v52 }
 0x308   : > { %7343 = vmatpush.bf16.msrb.mxu2 %v9153_v39 }
 0x309   : > { %7362 = vmatpush.bf16.msrb.mxu3 %v9161_v62 }
 0x30a   : > { %7306 = vmatpush.bf16.msrb.mxu0 %v9136_v9  ;;  %v6972_v40 = vpop.f32.mrf.mxu2  ;;  %v6937_v47 = vpop.f32.mrf.mxu0 }
 0x30b   : > { %7325 = vmatpush.bf16.msrb.mxu1 %v9144_v10  ;;  %v6973_v43 = vadd.f32 %v6972_v40, %v6954_v28  ;;  %v6991_v44 = vpop.f32.mrf.mxu3  ;;  %v6938_v50 = vadd.f32 %v6937_v47, %v10887_v45  ;;  %v6956_v39 = vpop.f32.mrf.mxu1  ;;  %v7675_v10 = vor.u32 %v8874_v2, %v7674_v1 }
 0x30c   : > { %7344 = vmatpush.bf16.msrb.mxu2 %v9152_v7  ;;  %v8859_v7 = vld [vmem:[%s11043_s0 + $0x7c] sm:$0xf] }
 0x30d   : > { %7363 = vmatpush.bf16.msrb.mxu3 %v9160_v12  ;;  %v6992_v52 = vadd.f32 %v6991_v44, %v6973_v43  ;;  %v6957_v55 = vadd.f32 %v6956_v39, %v6938_v50  ;;  %7240 = vmatmul.bf16.gmra.mxu0 %v7787_v41  ;;  %v7811_v43 = vor.u32 %v8907_v33, %v7810_v32 }
 0x30e   : > { %7307 = vmatpush.bf16.msrb.mxu0 %v9135_v13  ;;  %7259 = vmatmul.bf16.gmra.mxu1 %v7791_v48  ;;  %v7679_v13 = vor.u32 %v8858_v3, %v7676_v4 }
 0x30f   : > { %7326 = vmatpush.bf16.msrb.mxu1 %v9143_v14  ;;  %7278 = vmatmul.bf16.gmra.mxu2 %v7795_v49  ;;  %v7683_v14 = vor.u32 %v8875_v6, %v7682_v5 }
 0x310   : > { %7345 = vmatpush.bf16.msrb.mxu2 %v9151_v61  ;;  %7297 = vmatmul.bf16.gmra.mxu3 %v7799_v46 }
 0x311   : > { %7364 = vmatpush.bf16.msrb.mxu3 %v9159_v16 }
 0x312   : > { %7308 = vmatpush.bf16.msrb.mxu0 %v9134_v25  ;;  %v6975_v45 = vpop.f32.mrf.mxu2  ;;  %v6939_v59 = vpop.f32.mrf.mxu0 }
 0x313   : > { %7327 = vmatpush.bf16.msrb.mxu1 %v9142_v27  ;;  %v6976_v57 = vadd.f32 %v6975_v45, %v6957_v55  ;;  %v6994_v58 = vpop.f32.mrf.mxu3  ;;  %v6940_v60 = vadd.f32 %v6939_v59, %v10921_v8  ;;  %v6958_v62 = vpop.f32.mrf.mxu1  ;;  %v7684_v8 = vld [vmem:[%s11043_s0 + $0xf8] sm:$0xf0] }
 0x314   : > { %7346 = vmatpush.bf16.msrb.mxu2 %v9150_v23  ;;  %v7687_v17 = vor.u32 %v8859_v7, %v7684_v8 }
 0x315   : > { %7365 = vmatpush.bf16.msrb.mxu3 %v9158_v30  ;;  %v6995_v63 = vadd.f32 %v6994_v58, %v6976_v57  ;;  %v6959_v0 = vadd.f32 %v6958_v62, %v6940_v60  ;;  %v8906_v30 = vld [vmem:[%s11043_s0 + $0x1ec] sm:$0xf0] }
 0x316   : > { %7309 = vmatpush.bf16.msrb.mxu0 %v9133_v37 }
 0x317   : > { %7328 = vmatpush.bf16.msrb.mxu1 %v9141_v38 }
 0x318   : > { %7347 = vmatpush.bf16.msrb.mxu2 %v9149_v35  ;;  %v7812_v35 = vld [vmem:[%s11043_s0 + $0x1f8] sm:$0xf0] }
 0x319   : > { %7366 = vmatpush.bf16.msrb.mxu3 %v9157_v42  ;;  %v7807_v42 = vor.u32 %v8890_v20, %v7804_v31  ;;  %v7815_v48 = vor.u32 %v8891_v34, %v7812_v35 }
 0x31a   : > { %7310 = vmatpush.bf16.msrb.mxu0 %v9132_v53  ;;  %v6977_v9 = vpop.f32.mrf.mxu2  ;;  %v7008_v61 = vpop.f32.mrf.mxu0 }
 0x31b   : > { %7329 = vmatpush.bf16.msrb.mxu1 %v9140_v54  ;;  %v6978_v11 = vadd.f32 %v6977_v9, %v6959_v0  ;;  %v6996_v12 = vpop.f32.mrf.mxu3  ;;  %v7009_v15 = vadd.f32 %v7008_v61, %v10932_v24  ;;  %v7027_v16 = vpop.f32.mrf.mxu1  ;;  %v7802_v24 = vld [vmem:[%s11043_s0 + $0x170] sm:$0xf] }
 0x31c   : > { %7348 = vmatpush.bf16.msrb.mxu2 %v9148_v51  ;;  %v7803_v37 = vor.u32 %v8906_v30, %v7802_v24 }
 0x31d   : > { %7367 = vmatpush.bf16.msrb.mxu3 %v9156_v56  ;;  %v6997_v18 = vadd.f32 %v6996_v12, %v6978_v11  ;;  %v7028_v19 = vadd.f32 %v7027_v16, %v7009_v15  ;;  %7311 = vmatmul.bf16.vlgmr.msrb.gmra.mxu0 %v7675_v10 }
 0x31e   : > { %7330 = vmatmul.bf16.vlgmr.msrb.gmra.mxu1 %v7679_v13 }
 0x31f   : > { %7349 = vmatmul.bf16.vlgmr.msrb.gmra.mxu2 %v7683_v14 }
 0x320   : > { %7368 = vmatmul.bf16.vlgmr.msrb.gmra.mxu3 %v7687_v17 }
 0x322   : > { %v7046_v21 = vpop.f32.mrf.mxu2  ;;  %v7010_v25 = vpop.f32.mrf.mxu0 }
 0x323   : > { %v7047_v22 = vadd.f32 %v7046_v21, %v7028_v19  ;;  %v7065_v23 = vpop.f32.mrf.mxu3  ;;  %v7011_v27 = vadd.f32 %v7010_v25, %v6992_v52  ;;  %v7029_v28 = vpop.f32.mrf.mxu1 }
 0x325   : > { %v7066_v29 = vadd.f32 %v7065_v23, %v7047_v22  ;;  %v7030_v26 = vadd.f32 %v7029_v28, %v7011_v27 }
 0x32a   : > { %v7048_v36 = vpop.f32.mrf.mxu2  ;;  %v7013_v41 = vpop.f32.mrf.mxu0 }
 0x32b   : > { %v7049_v38 = vadd.f32 %v7048_v36, %v7030_v26  ;;  %v7067_v40 = vpop.f32.mrf.mxu3  ;;  %v7014_v44 = vadd.f32 %v7013_v41, %v6995_v63  ;;  %v7032_v47 = vpop.f32.mrf.mxu1 }
 0x32d   : > { %v7068_v49 = vadd.f32 %v7067_v40, %v7049_v38  ;;  %v7033_v50 = vadd.f32 %v7032_v47, %v7014_v44  ;;  %7316 = vmatmul.bf16.gmra.mxu0 %v7803_v37 }
 0x32e   : > { %7335 = vmatmul.bf16.gmra.mxu1 %v7807_v42 }
 0x32f   : > { %7354 = vmatmul.bf16.gmra.mxu2 %v7811_v43 }
 0x330   : > { %7373 = vmatmul.bf16.gmra.mxu3 %v7815_v48 }
 0x332   : > { %v7051_v39 = vpop.f32.mrf.mxu2  ;;  %v7015_v52 = vpop.f32.mrf.mxu0 }
 0x333   : > { %v7052_v46 = vadd.f32 %v7051_v39, %v7033_v50  ;;  %v7070_v51 = vpop.f32.mrf.mxu3  ;;  %v7016_v53 = vadd.f32 %v7015_v52, %v6997_v18  ;;  %v7034_v54 = vpop.f32.mrf.mxu1 }
 0x335   : > { %v7071_v55 = vadd.f32 %v7070_v51, %v7052_v46  ;;  %v7035_v56 = vadd.f32 %v7034_v54, %v7016_v53 }
 0x33a   : > { %v7053_v45 = vpop.f32.mrf.mxu2  ;;  %v7084_v59 = vpop.f32.mrf.mxu0 }
 0x33b   : > { %v7054_v57 = vadd.f32 %v7053_v45, %v7035_v56  ;;  %v7072_v58 = vpop.f32.mrf.mxu3  ;;  %v7085_v60 = vadd.f32 %v7084_v59, %v7066_v29  ;;  %v7103_v62 = vpop.f32.mrf.mxu1 }
 0x33d   : > { %v7073_v63 = vadd.f32 %v7072_v58, %v7054_v57  ;;  %v7104_v0 = vadd.f32 %v7103_v62, %v7085_v60 }
 0x342   : > { %v7122_v1 = vpop.f32.mrf.mxu2  ;;  %v7086_v4 = vpop.f32.mrf.mxu0 }
 0x343   : > { %v7123_v2 = vadd.f32 %v7122_v1, %v7104_v0  ;;  %v7141_v3 = vpop.f32.mrf.mxu3  ;;  %v7087_v5 = vadd.f32 %v7086_v4, %v7068_v49  ;;  %v7105_v6 = vpop.f32.mrf.mxu1 }
 0x345   : > { %v7142_v7 = vadd.f32 %v7141_v3, %v7123_v2  ;;  %v7106_v8 = vadd.f32 %v7105_v6, %v7087_v5 }
 0x34a   : > { %v7124_v9 = vpop.f32.mrf.mxu2  ;;  %v7089_v12 = vpop.f32.mrf.mxu0 }
 0x34b   : > { %v7125_v10 = vadd.f32 %v7124_v9, %v7106_v8  ;;  %v7143_v11 = vpop.f32.mrf.mxu3  ;;  %v7090_v61 = vadd.f32 %v7089_v12, %v7071_v55  ;;  %v7108_v13 = vpop.f32.mrf.mxu1 }
 0x34d   : > { %v7144_v14 = vadd.f32 %v7143_v11, %v7125_v10  ;;  %v7109_v15 = vadd.f32 %v7108_v13, %v7090_v61 }
 0x352   : > { %v7127_v16 = vpop.f32.mrf.mxu2  ;;  %v7091_v19 = vpop.f32.mrf.mxu0 }
 0x353   : > { %v7128_v17 = vadd.f32 %v7127_v16, %v7109_v15  ;;  %v7146_v18 = vpop.f32.mrf.mxu3  ;;  %v7092_v21 = vadd.f32 %v7091_v19, %v7073_v63  ;;  %v7110_v22 = vpop.f32.mrf.mxu1 }
 0x355   : > { %v7147_v23 = vadd.f32 %v7146_v18, %v7128_v17  ;;  %v7111_v25 = vadd.f32 %v7110_v22, %v7092_v21 }
 0x35a   : > { %v7129_v27 = vpop.f32.mrf.mxu2  ;;  %v7160_v26 = vpop.f32.mrf.mxu0 }
 0x35b   : > { %v7130_v28 = vadd.f32 %v7129_v27, %v7111_v25  ;;  %v7148_v29 = vpop.f32.mrf.mxu3  ;;  %v7179_v24 = vpop.f32.mrf.mxu1  ;;  %v7161_v51 = vadd.f32 %v7160_v26, %v7142_v7 }
 0x35d   : > { %v7149_v30 = vadd.f32 %v7148_v29, %v7130_v28  ;;  %v7180_v53 = vadd.f32 %v7179_v24, %v7161_v51 }
 0x362   : > { %v7198_v20 = vpop.f32.mrf.mxu2  ;;  %v7162_v32 = vpop.f32.mrf.mxu0 }
 0x363   : > { %v7217_v31 = vpop.f32.mrf.mxu3  ;;  %v7181_v33 = vpop.f32.mrf.mxu1  ;;  %v7199_v45 = vadd.f32 %v7198_v20, %v7180_v53  ;;  %v7163_v57 = vadd.f32 %v7162_v32, %v7144_v14 }
 0x365   : > { %v7218_v58 = vadd.f32 %v7217_v31, %v7199_v45  ;;  %v7182_v59 = vadd.f32 %v7181_v33, %v7163_v57 }
 0x36a   : > { %v7200_v34 = vpop.f32.mrf.mxu2  ;;  %v7165_v36 = vpop.f32.mrf.mxu0 }
 0x36b   : > { %v7219_v35 = vpop.f32.mrf.mxu3  ;;  %v7184_v37 = vpop.f32.mrf.mxu1  ;;  %v7201_v62 = vadd.f32 %v7200_v34, %v7182_v59  ;;  %v7166_v4 = vadd.f32 %v7165_v36, %v7147_v23 }
 0x36d   : > { %v7220_v3 = vadd.f32 %v7219_v35, %v7201_v62  ;;  %v7185_v9 = vadd.f32 %v7184_v37, %v7166_v4 }
 0x372   : > { %v7203_v38 = vpop.f32.mrf.mxu2  ;;  %v7167_v41 = vpop.f32.mrf.mxu0 }
 0x373   : > { %v7222_v40 = vpop.f32.mrf.mxu3  ;;  %v7186_v42 = vpop.f32.mrf.mxu1  ;;  %v7204_v61 = vadd.f32 %v7203_v38, %v7185_v9  ;;  %v7168_v13 = vadd.f32 %v7167_v41, %v7149_v30 }
 0x375   : > { %v7223_v18 = vadd.f32 %v7222_v40, %v7204_v61  ;;  %v7187_v19 = vadd.f32 %v7186_v42, %v7168_v13 }
 0x37a   : > { %v7205_v43 = vpop.f32.mrf.mxu2  ;;  %v7236_v47 = vpop.f32.mrf.mxu0 }
 0x37b   : > { %v7224_v44 = vpop.f32.mrf.mxu3  ;;  %v7255_v48 = vpop.f32.mrf.mxu1  ;;  %v7237_v63 = vadd.f32 %v7236_v47, %v7218_v58  ;;  %v7206_v22 = vadd.f32 %v7205_v43, %v7187_v19 }
 0x37d   : > { %v7256_v5 = vadd.f32 %v7255_v48, %v7237_v63  ;;  %v7225_v31 = vadd.f32 %v7224_v44, %v7206_v22 }
 0x382   : > { %v7274_v49 = vpop.f32.mrf.mxu2  ;;  %v7238_v39 = vpop.f32.mrf.mxu0 }
 0x383   : > { %v7293_v50 = vpop.f32.mrf.mxu3  ;;  %v7257_v46 = vpop.f32.mrf.mxu1  ;;  %v7275_v6 = vadd.f32 %v7274_v49, %v7256_v5  ;;  %v7239_v7 = vadd.f32 %v7238_v39, %v7220_v3 }
 0x385   : > { %v7294_v14 = vadd.f32 %v7293_v50, %v7275_v6  ;;  %v7258_v15 = vadd.f32 %v7257_v46, %v7239_v7 }
 0x38a   : > { %v7276_v52 = vpop.f32.mrf.mxu2  ;;  %v7241_v55 = vpop.f32.mrf.mxu0 }
 0x38b   : > { %v7295_v54 = vpop.f32.mrf.mxu3  ;;  %v7260_v56 = vpop.f32.mrf.mxu1  ;;  %v7277_v16 = vadd.f32 %v7276_v52, %v7258_v15  ;;  %v7242_v23 = vadd.f32 %v7241_v55, %v7223_v18 }
 0x38d   : > { %v7296_v25 = vadd.f32 %v7295_v54, %v7277_v16  ;;  %v7261_v32 = vadd.f32 %v7260_v56, %v7242_v23 }
 0x392   : > { %v7279_v60 = vpop.f32.mrf.mxu2  ;;  %v7243_v1 = vpop.f32.mrf.mxu0 }
 0x393   : > { %v7298_v0 = vpop.f32.mrf.mxu3  ;;  %v7262_v2 = vpop.f32.mrf.mxu1  ;;  %v7280_v30 = vadd.f32 %v7279_v60, %v7261_v32  ;;  %v7244_v33 = vadd.f32 %v7243_v1, %v7225_v31 }
 0x395   : > { %v7299_v41 = vadd.f32 %v7298_v0, %v7280_v30  ;;  %v7263_v42 = vadd.f32 %v7262_v2, %v7244_v33 }
 0x39a   : > { %v7281_v8 = vpop.f32.mrf.mxu2  ;;  %v7312_v11 = vpop.f32.mrf.mxu0 }
 0x39b   : > { %v7300_v10 = vpop.f32.mrf.mxu3  ;;  %v7331_v12 = vpop.f32.mrf.mxu1  ;;  %v7313_v17 = vadd.f32 %v7312_v11, %v7294_v14  ;;  %v7282_v49 = vadd.f32 %v7281_v8, %v7263_v42 }
 0x39d   : > { %v7332_v27 = vadd.f32 %v7331_v12, %v7313_v17  ;;  %v7301_v52 = vadd.f32 %v7300_v10, %v7282_v49 }
 0x3a2   : > { %v7350_v21 = vpop.f32.mrf.mxu2  ;;  %v7314_v29 = vpop.f32.mrf.mxu0 }
 0x3a3   : > { %v7369_v28 = vpop.f32.mrf.mxu3  ;;  %v7333_v26 = vpop.f32.mrf.mxu1  ;;  %v7351_v24 = vadd.f32 %v7350_v21, %v7332_v27  ;;  %v7315_v20 = vadd.f32 %v7314_v29, %v7296_v25 }
 0x3a5   : > { %v7370_v34 = vadd.f32 %v7369_v28, %v7351_v24  ;;  %v7334_v35 = vadd.f32 %v7333_v26, %v7315_v20 }
 0x3a7   : > { %v7379_v43 = vmul.f32 0.2, %v7370_v34 }
 0x3a9   : > { %v7383_v39 = vmax.f32 %v7370_v34, %v7379_v43 }
 0x3aa   : > { %v7352_v36 = vpop.f32.mrf.mxu2  ;;  %v7317_v40 = vpop.f32.mrf.mxu0 }
 0x3ab   : > { %v7353_v37 = vadd.f32 %v7352_v36, %v7334_v35  ;;  %v7371_v38 = vpop.f32.mrf.mxu3  ;;  %v7336_v48 = vpop.f32.mrf.mxu1  ;;  %v7318_v44 = vadd.f32 %v7317_v40, %v7299_v41 }
 0x3ad   : > { %v7372_v47 = vadd.f32 %v7371_v38, %v7353_v37  ;;  %v7337_v54 = vadd.f32 %v7336_v48, %v7318_v44 }
 0x3af   : > { %v7380_v50 = vmul.f32 0.2, %v7372_v47 }
 0x3b1   : > { %v7384_v46 = vmax.f32 %v7372_v47, %v7380_v50 }
 0x3b2   : > { %v7355_v51 = vpop.f32.mrf.mxu2  ;;  %v7319_v56 = vpop.f32.mrf.mxu0 }
 0x3b3   : > { %v9167_v53 = vpack.c.bf16 %v7384_v46, %v7383_v39  ;;  %v7374_v55 = vpop.f32.mrf.mxu3  ;;  %v7356_v45 = vadd.f32 %v7355_v51, %v7337_v54  ;;  %v7320_v57 = vadd.f32 %v7319_v56, %v7301_v52  ;;  %v7338_v58 = vpop.f32.mrf.mxu1 }
 0x3b5   : > { %9168 = vst [vmem:[%s4330_s5] sm:$0xff] %v9167_v53   ;;  %v7375_v59 = vadd.f32 %v7374_v55, %v7356_v45  ;;  %v7339_v60 = vadd.f32 %v7338_v58, %v7320_v57 }
 0x3b7   : > { %v7381_v1 = vmul.f32 0.2, %v7375_v59 }
 0x3b9   : > { %v7385_v4 = vmax.f32 %v7375_v59, %v7381_v1 }
 0x3ba   : > { %v7357_v62 = vpop.f32.mrf.mxu2 }
 0x3bb   : > { %v7358_v63 = vadd.f32 %v7357_v62, %v7339_v60  ;;  %v7376_v0 = vpop.f32.mrf.mxu3 }
 0x3bc   : > { %v7423_v7 = vld [vmem:[%s4330_s5] sm:$0xf] (%p9305_p6)  ;;  %v7425_v8 = vld [vmem:[%s4330_s5 + $0x4] sm:$0xf] (%p9305_p6) }
 0x3bd   : > { %v7377_v2 = vadd.f32 %v7376_v0, %v7358_v63  ;;  %7424 = vst [vmem:[%s7406_s7] sm:$0xf] (%p9305_p6), %v7423_v7 }
 0x3be   : > { %7426 = vst [vmem:[%s7406_s7 + $0x8] sm:$0xf] (%p9305_p6), %v7425_v8 }
 0x3bf   : > { %v7382_v3 = vmul.f32 0.2, %v7377_v2 }
 0x3c1   : > { %v7386_v5 = vmax.f32 %v7377_v2, %v7382_v3  ;;  %7401 = sbr.rel (!%p9305_p6) target bundleno = 975 (0x3cf), region = 84 }
 0x3c3   : > { %v9172_v6 = vpack.c.bf16 %v7386_v5, %v7385_v4 }
 0x3c5   : > { %9174 = vst [vmem:[%s4330_s5 + $0x8] sm:$0xff] %v9172_v6  }
 0x3cc   : > { %v7427_v9 = vld [vmem:[%s4330_s5 + $0x8] sm:$0xf]  ;;  %v7429_v10 = vld [vmem:[%s4330_s5 + $0xc] sm:$0xf] }
 0x3cd   : > { %7428 = vst [vmem:[%s7406_s7 + $0x10] sm:$0xf] %v7427_v9 }
 0x3ce   : > { %7430 = vst [vmem:[%s7406_s7 + $0x18] sm:$0xf] %v7429_v10 }
 0x3cf PF: > { %s12_s13 = sadd.s32 1, %s9253_s13   ;;  %s11047_s9 = smov %s9241_s10 }
 0x3d0   : > { %p9_p11 = scmp.ge.s32.totalorder %s12_s13, 4   ;;  %s11048_s10 = smov %s9310_s19 }
 0x3d1   : > { %s11049_s11 = smov %s9249_s12  ;;  %s11050_s12 = smov %s11052_s14 }
 0x3d2   :  { %11 = sbr.rel (!%p9_p11) target bundleno = 3 (0x3), region = 163 }

</bundles_post_ra>
